<compile_context>
chip_gen: v7x
topology: tpu7x:2x2x1
jax: 0.10.0
libtpu: 0.0.40
codegen_flags: <defaults>
</compile_context>

<pallas_src>
import math

import numpy as np

import jax
import jax.numpy as jnp
from jax.experimental import pallas as pl
from jax.experimental.pallas import tpu as pltpu


# (cin, cout, h_in, stride, pad_top/left, pad_bottom/right, instance_norm)
_LAYER_CFG = (
    (3,   24,  32, 2, 1, 1, False),
    (24,  48,  16, 2, 1, 1, True),
    (48,  96,   8, 2, 1, 1, True),
    (96,  192,  4, 2, 1, 1, True),
    (192, 1,    2, 1, 2, 1, False),   # ZeroPad2d((1,0,1,0)) + Conv(k4,p1) == pad (2,1)
)


def _hp_ho(cfg):
    cin, cout, hin, s, pt, pb, norm = cfg
    hp = hin + pt + pb
    ho = (hp - 4) // s + 1
    return hp, ho


# ------------------------------- kernel -------------------------------------

def _disc_kernel(*refs):
    """Whole Discriminator forward for ONE image (grid step = batch index)."""
    f32 = jnp.float32
    bf16 = jnp.bfloat16

    # ---- unpack positional refs: x, per-layer (S, W, bias[, G, G^T]), out,
    # ---- then one VMEM scratch per intermediate padded activation.
    x_ref = refs[0]
    idx = 1
    layer_refs = []
    for cfg in _LAYER_CFG:
        n = 5 if cfg[6] else 3
        layer_refs.append(refs[idx:idx + n])
        idx += n
    o_ref = refs[idx]
    scratch = refs[idx + 1:]

    # Zero the scratch activations so their padding ring is 0 (scratch
    # persists across grid steps, so re-init every step).
    for a in scratch:
        a[...] = jnp.zeros_like(a)

    cur = x_ref[0]                       # [Hp1, Wp1*Cin1] padded input image

    for li, cfg in enumerate(_LAYER_CFG):
        cin, cout, hin, s, pt, pb, norm = cfg
        hp, ho = _hp_ho(cfg)
        r = layer_refs[li]
        s_ref, w_ref, b_ref = r[0], r[1], r[2]

        # One cast per layer; both matmuls below are native bf16 on the MXU.
        cur_bf = cur.astype(bf16)

        # Direct conv: 4 H-taps.  S[di] (0/1, bf16 -> exact selection) picks
        # the strided input rows as a safe 2-D matmul; the repacked bf16
        # weight folds the W-taps and the Cin contraction.  f32 accumulation.
        acc = jnp.zeros((ho, ho * cout), f32)
        for di in range(4):                                   # unrolled taps
            rows = jnp.dot(s_ref[di], cur_bf,
                           preferred_element_type=f32).astype(bf16)
            acc = acc + jnp.dot(rows, w_ref[di], preferred_element_type=f32)
        acc = acc + b_ref[...]

        if norm:
            # InstanceNorm2d defaults: biased variance, eps=1e-5, affine=False.
            # Row-sum first (XLU reduce), then group lanes by channel with a
            # tiny 0/1 matrix G [Wo*C, C]; broadcast back with G^T.  All four
            # matmuls here are single-row, so the f32 path stays cheap.
            g_ref, gt_ref = r[3], r[4]
            hw = float(ho * ho)
            col_sum = jnp.sum(acc, axis=0, keepdims=True)            # [1, Wo*C]
            mean_c = jnp.dot(col_sum, g_ref[...],
                             preferred_element_type=f32) / hw        # [1, C]
            mean_b = jnp.dot(mean_c, gt_ref[...],
                             preferred_element_type=f32)             # [1, Wo*C]
            ctr = acc - mean_b
            sq_sum = jnp.sum(ctr * ctr, axis=0, keepdims=True)       # [1, Wo*C]
            var_c = jnp.dot(sq_sum, g_ref[...],
                            preferred_element_type=f32) / hw         # [1, C]
            inv_b = jnp.dot(jax.lax.rsqrt(var_c + 1e-5), gt_ref[...],
                            preferred_element_type=f32)              # [1, Wo*C]
            acc = ctr * inv_b

        if li < len(_LAYER_CFG) - 1:
            # LeakyReLU(0.2) on blocks 1-4, then write into the interior of
            # the next layer's zero-padded VMEM activation.
            acc = jnp.where(acc >= 0, acc, 0.2 * acc)
            npt = _LAYER_CFG[li + 1][4]          # next layer's pad_top/left
            nxt = scratch[li]
            nxt[pl.ds(npt, ho), pl.ds(npt * cout, ho * cout)] = acc
            cur = nxt[...]
        else:
            o_ref[0, :, :] = acc                  # final 2x2 map, no activation


# ------------------------------ host glue -----------------------------------

def make_params(key):
    """Deterministic synthetic params (PyTorch-default-style uniform init)."""
    params = {}
    keys = jax.random.split(key, len(_LAYER_CFG))
    for li, cfg in enumerate(_LAYER_CFG):
        cin, cout = cfg[0], cfg[1]
        kw, kb = jax.random.split(keys[li])
        bound = 1.0 / math.sqrt(cin * 4 * 4)
        params[f"w{li + 1}"] = jax.random.uniform(
            kw, (4, 4, cin, cout), jnp.float32, -bound, bound)   # [kh,kw,Cin,Cout]
        params[f"b{li + 1}"] = jax.random.uniform(
            kb, (cout,), jnp.float32, -bound, bound)
    return params


def pack_params(params):
    """One-time host-side repack of conv weights into kernel operands."""
    packed = []
    for li, cfg in enumerate(_LAYER_CFG):
        cin, cout, hin, s, pt, pb, norm = cfg
        hp, ho = _hp_ho(cfg)
        w = np.asarray(params[f"w{li + 1}"], np.float32)      # [4,4,cin,cout]
        b = np.asarray(params[f"b{li + 1}"], np.float32)      # [cout]

        # Row-tap selectors: S[di] @ padded_act picks rows (s*ho + di).
        # 0/1 values -> exact in bf16, so the selection matmul runs bf16.
        sel = np.zeros((4, ho, hp), np.float32)
        for di in range(4):
            sel[di, np.arange(ho), s * np.arange(ho) + di] = 1.0

        # Fold W-taps + Cin contraction into one [Wp*Cin, Wo*Cout] matrix per
        # H-tap: big[di, j, ci, wo, co] = w[di, j - s*wo, ci, co].
        big = np.zeros((4, hp, cin, ho, cout), np.float32)
        for di in range(4):
            for dj in range(4):
                for wo in range(ho):
                    big[di, s * wo + dj, :, wo, :] = w[di, dj]
        big = big.reshape(4, hp * cin, ho * cout)

        bias = np.tile(b, ho).reshape(1, ho * cout)           # (wo, co) order

        packed += [jnp.asarray(sel, dtype=jnp.bfloat16),
                   jnp.asarray(big, dtype=jnp.bfloat16),
                   jnp.asarray(bias, dtype=jnp.float32)]
        if norm:
            g = np.tile(np.eye(cout, dtype=np.float32), (ho, 1))  # [Wo*C, C]
            packed += [jnp.asarray(g), jnp.asarray(np.ascontiguousarray(g.T))]
    return packed


def discriminator_forward(x_nchw, packed):
    n = x_nchw.shape[0]
    hp1, _ = _hp_ho(_LAYER_CFG[0])
    cin1 = _LAYER_CFG[0][0]

    # NCHW -> NHWC, pad by 1, fold W into the lane dim: [N, Hp, Wp*Cin].
    x = jnp.transpose(x_nchw, (0, 2, 3, 1)).astype(jnp.float32)
    x = jnp.pad(x, ((0, 0), (1, 1), (1, 1), (0, 0)))
    x = x.reshape(n, hp1, hp1 * cin1)

    in_specs = [pl.BlockSpec((1, hp1, hp1 * cin1), lambda i: (i, 0, 0))]
    for a in packed:
        in_specs.append(pl.BlockSpec(a.shape, lambda i, nd=a.ndim: (0,) * nd))

    scratch_shapes = []
    for li in range(len(_LAYER_CFG) - 1):
        cout = _LAYER_CFG[li][1]
        hp_next, _ = _hp_ho(_LAYER_CFG[li + 1])
        scratch_shapes.append(pltpu.VMEM((hp_next, hp_next * cout), jnp.float32))

    _, ho_last = _hp_ho(_LAYER_CFG[-1])
    out = pl.pallas_call(
        _disc_kernel,
        out_shape=jax.ShapeDtypeStruct((n, ho_last, ho_last), jnp.float32),
        grid=(n,),
        in_specs=in_specs,
        out_specs=pl.BlockSpec((1, ho_last, ho_last), lambda i: (i, 0, 0)),
        scratch_shapes=scratch_shapes,
        compiler_params=pltpu.CompilerParams(
            dimension_semantics=("parallel",),           # v7x: one image per TC
            vmem_limit_bytes=32 * 1024 * 1024),
    )(x, *packed)
    return out[:, None, :, :]                            # [N, 1, 2, 2]


def _reference_forward(x_nchw, params):
    """Pure-JAX reference (matches the PyTorch module semantics)."""
    x = jnp.transpose(x_nchw, (0, 2, 3, 1)).astype(jnp.float32)
    for li, cfg in enumerate(_LAYER_CFG):
        cin, cout, hin, s, pt, pb, norm = cfg
        w = params[f"w{li + 1}"]
        b = params[f"b{li + 1}"]
        x = jax.lax.conv_general_dilated(
            x, w, window_strides=(s, s), padding=((pt, pb), (pt, pb)),
            dimension_numbers=("NHWC", "HWIO", "NHWC"))
        x = x + b[None, None, None, :]
        if norm:
            mean = jnp.mean(x, axis=(1, 2), keepdims=True)
            var = jnp.mean((x - mean) ** 2, axis=(1, 2), keepdims=True)
            x = (x - mean) * jax.lax.rsqrt(var + 1e-5)
        if li < len(_LAYER_CFG) - 1:
            x = jnp.where(x >= 0, x, 0.2 * x)
    return jnp.transpose(x, (0, 3, 1, 2))


if __name__ == "__main__":
    key = jax.random.PRNGKey(0)
    pkey, xkey = jax.random.split(key)
    params = make_params(pkey)
    packed = pack_params(params)

    # Small input consistent with the module: N=2, C=3, 32x32 image.
    x = jax.random.normal(xkey, (2, 3, 32, 32), dtype=jnp.float32)

    fwd = jax.jit(discriminator_forward)
    out = fwd(x, packed)
    jax.block_until_ready(out)

    assert out.shape == (2, 1, 2, 2), out.shape
    assert bool(jnp.all(jnp.isfinite(out)))

    # Numerical cross-check against a pure-JAX reference (bf16 matmul operands
    # -> loose-ish tolerance).
    ref = _reference_forward(x, params)
    err = float(jnp.max(jnp.abs(out - ref)))
    scale = float(jnp.max(jnp.abs(ref))) + 1e-6
    assert err <= 5e-2 + 5e-2 * scale, (err, scale)

    print("KERNEL_OK")
</pallas_src>

<mosaic_0001>
module attributes {stable_mosaic.version = 11 : i64} {
  func.func @_disc_kernel(%arg0: i32, %arg1: memref<1x34x102xf32, #tpu.memory_space<vmem>>, %arg2: memref<4x16x34xbf16, #tpu.memory_space<vmem>>, %arg3: memref<4x102x384xbf16, #tpu.memory_space<vmem>>, %arg4: memref<1x384xf32, #tpu.memory_space<vmem>>, %arg5: memref<4x8x18xbf16, #tpu.memory_space<vmem>>, %arg6: memref<4x432x384xbf16, #tpu.memory_space<vmem>>, %arg7: memref<1x384xf32, #tpu.memory_space<vmem>>, %arg8: memref<384x48xf32, #tpu.memory_space<vmem>>, %arg9: memref<48x384xf32, #tpu.memory_space<vmem>>, %arg10: memref<4x4x10xbf16, #tpu.memory_space<vmem>>, %arg11: memref<4x480x384xbf16, #tpu.memory_space<vmem>>, %arg12: memref<1x384xf32, #tpu.memory_space<vmem>>, %arg13: memref<384x96xf32, #tpu.memory_space<vmem>>, %arg14: memref<96x384xf32, #tpu.memory_space<vmem>>, %arg15: memref<4x2x6xbf16, #tpu.memory_space<vmem>>, %arg16: memref<4x576x384xbf16, #tpu.memory_space<vmem>>, %arg17: memref<1x384xf32, #tpu.memory_space<vmem>>, %arg18: memref<384x192xf32, #tpu.memory_space<vmem>>, %arg19: memref<192x384xf32, #tpu.memory_space<vmem>>, %arg20: memref<4x2x5xbf16, #tpu.memory_space<vmem>>, %arg21: memref<4x960x2xbf16, #tpu.memory_space<vmem>>, %arg22: memref<1x2xf32, #tpu.memory_space<vmem>>, %arg23: memref<1x2x2xf32, #tpu.memory_space<vmem>>, %arg24: memref<18x432xf32, #tpu.memory_space<vmem>>, %arg25: memref<10x480xf32, #tpu.memory_space<vmem>>, %arg26: memref<6x576xf32, #tpu.memory_space<vmem>>, %arg27: memref<5x960xf32, #tpu.memory_space<vmem>>) attributes {dimension_semantics = [#tpu.dimension_semantics<parallel>], iteration_bounds = array<i64: 2>, scalar_prefetch = 0 : i64, scratch_operands = 4 : i64, tpu.core_type = #tpu.core_type<tc>, window_params = [{transform_indices = @transform_0, window_bounds = array<i64: 1, 34, 102>}, {pipeline_mode = #tpu.pipeline_mode<synchronous>, transform_indices = @transform_1, window_bounds = array<i64: 4, 16, 34>}, {pipeline_mode = #tpu.pipeline_mode<synchronous>, transform_indices = @transform_2, window_bounds = array<i64: 4, 102, 384>}, {pipeline_mode = #tpu.pipeline_mode<synchronous>, transform_indices = @transform_3, window_bounds = array<i64: 1, 384>}, {pipeline_mode = #tpu.pipeline_mode<synchronous>, transform_indices = @transform_4, window_bounds = array<i64: 4, 8, 18>}, {pipeline_mode = #tpu.pipeline_mode<synchronous>, transform_indices = @transform_5, window_bounds = array<i64: 4, 432, 384>}, {pipeline_mode = #tpu.pipeline_mode<synchronous>, transform_indices = @transform_6, window_bounds = array<i64: 1, 384>}, {pipeline_mode = #tpu.pipeline_mode<synchronous>, transform_indices = @transform_7, window_bounds = array<i64: 384, 48>}, {pipeline_mode = #tpu.pipeline_mode<synchronous>, transform_indices = @transform_8, window_bounds = array<i64: 48, 384>}, {pipeline_mode = #tpu.pipeline_mode<synchronous>, transform_indices = @transform_9, window_bounds = array<i64: 4, 4, 10>}, {pipeline_mode = #tpu.pipeline_mode<synchronous>, transform_indices = @transform_10, window_bounds = array<i64: 4, 480, 384>}, {pipeline_mode = #tpu.pipeline_mode<synchronous>, transform_indices = @transform_11, window_bounds = array<i64: 1, 384>}, {pipeline_mode = #tpu.pipeline_mode<synchronous>, transform_indices = @transform_12, window_bounds = array<i64: 384, 96>}, {pipeline_mode = #tpu.pipeline_mode<synchronous>, transform_indices = @transform_13, window_bounds = array<i64: 96, 384>}, {pipeline_mode = #tpu.pipeline_mode<synchronous>, transform_indices = @transform_14, window_bounds = array<i64: 4, 2, 6>}, {pipeline_mode = #tpu.pipeline_mode<synchronous>, transform_indices = @transform_15, window_bounds = array<i64: 4, 576, 384>}, {pipeline_mode = #tpu.pipeline_mode<synchronous>, transform_indices = @transform_16, window_bounds = array<i64: 1, 384>}, {pipeline_mode = #tpu.pipeline_mode<synchronous>, transform_indices = @transform_17, window_bounds = array<i64: 384, 192>}, {pipeline_mode = #tpu.pipeline_mode<synchronous>, transform_indices = @transform_18, window_bounds = array<i64: 192, 384>}, {pipeline_mode = #tpu.pipeline_mode<synchronous>, transform_indices = @transform_19, window_bounds = array<i64: 4, 2, 5>}, {pipeline_mode = #tpu.pipeline_mode<synchronous>, transform_indices = @transform_20, window_bounds = array<i64: 4, 960, 2>}, {pipeline_mode = #tpu.pipeline_mode<synchronous>, transform_indices = @transform_21, window_bounds = array<i64: 1, 2>}, {transform_indices = @transform_22, window_bounds = array<i64: 1, 2, 2>}]} {
    %cst = arith.constant 0.000000e+00 : f32
    %0 = vector.broadcast %cst : f32 to vector<18x432xf32>
    %c0 = arith.constant 0 : index
    %c0_0 = arith.constant 0 : index
    %1 = vector.load %arg24[%c0, %c0_0] : memref<18x432xf32, #tpu.memory_space<vmem>>, vector<18x432xf32>
    tpu.vector_store %arg24[%c0, %c0_0], %0 {strides = array<i32>} : memref<18x432xf32, #tpu.memory_space<vmem>>, vector<18x432xf32>,
    %cst_1 = arith.constant 0.000000e+00 : f32
    %2 = vector.broadcast %cst_1 : f32 to vector<10x480xf32>
    %c0_2 = arith.constant 0 : index
    %c0_3 = arith.constant 0 : index
    %3 = vector.load %arg25[%c0_2, %c0_3] : memref<10x480xf32, #tpu.memory_space<vmem>>, vector<10x480xf32>
    tpu.vector_store %arg25[%c0_2, %c0_3], %2 {strides = array<i32>} : memref<10x480xf32, #tpu.memory_space<vmem>>, vector<10x480xf32>,
    %cst_4 = arith.constant 0.000000e+00 : f32
    %4 = vector.broadcast %cst_4 : f32 to vector<6x576xf32>
    %c0_5 = arith.constant 0 : index
    %c0_6 = arith.constant 0 : index
    %5 = vector.load %arg26[%c0_5, %c0_6] : memref<6x576xf32, #tpu.memory_space<vmem>>, vector<6x576xf32>
    tpu.vector_store %arg26[%c0_5, %c0_6], %4 {strides = array<i32>} : memref<6x576xf32, #tpu.memory_space<vmem>>, vector<6x576xf32>,
    %cst_7 = arith.constant 0.000000e+00 : f32
    %6 = vector.broadcast %cst_7 : f32 to vector<5x960xf32>
    %c0_8 = arith.constant 0 : index
    %c0_9 = arith.constant 0 : index
    %7 = vector.load %arg27[%c0_8, %c0_9] : memref<5x960xf32, #tpu.memory_space<vmem>>, vector<5x960xf32>
    tpu.vector_store %arg27[%c0_8, %c0_9], %6 {strides = array<i32>} : memref<5x960xf32, #tpu.memory_space<vmem>>, vector<5x960xf32>,
    %c0_10 = arith.constant 0 : index
    %c0_11 = arith.constant 0 : index
    %c0_12 = arith.constant 0 : index
    %8 = vector.load %arg1[%c0_10, %c0_11, %c0_12] : memref<1x34x102xf32, #tpu.memory_space<vmem>>, vector<1x34x102xf32>
    %9 = vector.shape_cast %8 : vector<1x34x102xf32> to vector<34x102xf32>
    %10 = arith.truncf %9 : vector<34x102xf32> to vector<34x102xbf16>
    %cst_13 = arith.constant 0.000000e+00 : f32
    %11 = vector.broadcast %cst_13 : f32 to vector<16x384xf32>
    %c0_14 = arith.constant 0 : index
    %c0_15 = arith.constant 0 : index
    %c0_16 = arith.constant 0 : index
    %12 = vector.load %arg2[%c0_14, %c0_15, %c0_16] : memref<4x16x34xbf16, #tpu.memory_space<vmem>>, vector<1x16x34xbf16>
    %13 = vector.shape_cast %12 : vector<1x16x34xbf16> to vector<16x34xbf16>
    %cst_17 = arith.constant dense<0.000000e+00> : vector<16x102xf32>
    %14 = tpu.matmul %13, %10, %cst_17 {dimension_numbers = #tpu.dot_dimension_numbers<[1], [0], [0], [1], [0, 0, 1, 1], [], []>} : vector<16x34xbf16>, vector<34x102xbf16>, vector<16x102xf32> -> vector<16x102xf32>
    %15 = arith.truncf %14 : vector<16x102xf32> to vector<16x102xbf16>
    %c0_18 = arith.constant 0 : index
    %c0_19 = arith.constant 0 : index
    %c0_20 = arith.constant 0 : index
    %16 = vector.load %arg3[%c0_18, %c0_19, %c0_20] : memref<4x102x384xbf16, #tpu.memory_space<vmem>>, vector<1x102x384xbf16>
    %17 = vector.shape_cast %16 : vector<1x102x384xbf16> to vector<102x384xbf16>
    %cst_21 = arith.constant dense<0.000000e+00> : vector<16x384xf32>
    %18 = tpu.matmul %15, %17, %cst_21 {dimension_numbers = #tpu.dot_dimension_numbers<[1], [0], [0], [1], [0, 0, 1, 1], [], []>} : vector<16x102xbf16>, vector<102x384xbf16>, vector<16x384xf32> -> vector<16x384xf32>
    %19 = arith.addf %11, %18 : vector<16x384xf32>
    %c1 = arith.constant 1 : index
    %c0_22 = arith.constant 0 : index
    %c0_23 = arith.constant 0 : index
    %20 = vector.load %arg2[%c1, %c0_22, %c0_23] : memref<4x16x34xbf16, #tpu.memory_space<vmem>>, vector<1x16x34xbf16>
    %21 = vector.shape_cast %20 : vector<1x16x34xbf16> to vector<16x34xbf16>
    %cst_24 = arith.constant dense<0.000000e+00> : vector<16x102xf32>
    %22 = tpu.matmul %21, %10, %cst_24 {dimension_numbers = #tpu.dot_dimension_numbers<[1], [0], [0], [1], [0, 0, 1, 1], [], []>} : vector<16x34xbf16>, vector<34x102xbf16>, vector<16x102xf32> -> vector<16x102xf32>
    %23 = arith.truncf %22 : vector<16x102xf32> to vector<16x102xbf16>
    %c1_25 = arith.constant 1 : index
    %c0_26 = arith.constant 0 : index
    %c0_27 = arith.constant 0 : index
    %24 = vector.load %arg3[%c1_25, %c0_26, %c0_27] : memref<4x102x384xbf16, #tpu.memory_space<vmem>>, vector<1x102x384xbf16>
    %25 = vector.shape_cast %24 : vector<1x102x384xbf16> to vector<102x384xbf16>
    %cst_28 = arith.constant dense<0.000000e+00> : vector<16x384xf32>
    %26 = tpu.matmul %23, %25, %cst_28 {dimension_numbers = #tpu.dot_dimension_numbers<[1], [0], [0], [1], [0, 0, 1, 1], [], []>} : vector<16x102xbf16>, vector<102x384xbf16>, vector<16x384xf32> -> vector<16x384xf32>
    %27 = arith.addf %19, %26 : vector<16x384xf32>
    %c2 = arith.constant 2 : index
    %c0_29 = arith.constant 0 : index
    %c0_30 = arith.constant 0 : index
    %28 = vector.load %arg2[%c2, %c0_29, %c0_30] : memref<4x16x34xbf16, #tpu.memory_space<vmem>>, vector<1x16x34xbf16>
    %29 = vector.shape_cast %28 : vector<1x16x34xbf16> to vector<16x34xbf16>
    %cst_31 = arith.constant dense<0.000000e+00> : vector<16x102xf32>
    %30 = tpu.matmul %29, %10, %cst_31 {dimension_numbers = #tpu.dot_dimension_numbers<[1], [0], [0], [1], [0, 0, 1, 1], [], []>} : vector<16x34xbf16>, vector<34x102xbf16>, vector<16x102xf32> -> vector<16x102xf32>
    %31 = arith.truncf %30 : vector<16x102xf32> to vector<16x102xbf16>
    %c2_32 = arith.constant 2 : index
    %c0_33 = arith.constant 0 : index
    %c0_34 = arith.constant 0 : index
    %32 = vector.load %arg3[%c2_32, %c0_33, %c0_34] : memref<4x102x384xbf16, #tpu.memory_space<vmem>>, vector<1x102x384xbf16>
    %33 = vector.shape_cast %32 : vector<1x102x384xbf16> to vector<102x384xbf16>
    %cst_35 = arith.constant dense<0.000000e+00> : vector<16x384xf32>
    %34 = tpu.matmul %31, %33, %cst_35 {dimension_numbers = #tpu.dot_dimension_numbers<[1], [0], [0], [1], [0, 0, 1, 1], [], []>} : vector<16x102xbf16>, vector<102x384xbf16>, vector<16x384xf32> -> vector<16x384xf32>
    %35 = arith.addf %27, %34 : vector<16x384xf32>
    %c3 = arith.constant 3 : index
    %c0_36 = arith.constant 0 : index
    %c0_37 = arith.constant 0 : index
    %36 = vector.load %arg2[%c3, %c0_36, %c0_37] : memref<4x16x34xbf16, #tpu.memory_space<vmem>>, vector<1x16x34xbf16>
    %37 = vector.shape_cast %36 : vector<1x16x34xbf16> to vector<16x34xbf16>
    %cst_38 = arith.constant dense<0.000000e+00> : vector<16x102xf32>
    %38 = tpu.matmul %37, %10, %cst_38 {dimension_numbers = #tpu.dot_dimension_numbers<[1], [0], [0], [1], [0, 0, 1, 1], [], []>} : vector<16x34xbf16>, vector<34x102xbf16>, vector<16x102xf32> -> vector<16x102xf32>
    %39 = arith.truncf %38 : vector<16x102xf32> to vector<16x102xbf16>
    %c3_39 = arith.constant 3 : index
    %c0_40 = arith.constant 0 : index
    %c0_41 = arith.constant 0 : index
    %40 = vector.load %arg3[%c3_39, %c0_40, %c0_41] : memref<4x102x384xbf16, #tpu.memory_space<vmem>>, vector<1x102x384xbf16>
    %41 = vector.shape_cast %40 : vector<1x102x384xbf16> to vector<102x384xbf16>
    %cst_42 = arith.constant dense<0.000000e+00> : vector<16x384xf32>
    %42 = tpu.matmul %39, %41, %cst_42 {dimension_numbers = #tpu.dot_dimension_numbers<[1], [0], [0], [1], [0, 0, 1, 1], [], []>} : vector<16x102xbf16>, vector<102x384xbf16>, vector<16x384xf32> -> vector<16x384xf32>
    %43 = arith.addf %35, %42 : vector<16x384xf32>
    %c0_43 = arith.constant 0 : index
    %c0_44 = arith.constant 0 : index
    %44 = vector.load %arg4[%c0_43, %c0_44] : memref<1x384xf32, #tpu.memory_space<vmem>>, vector<1x384xf32>
    %45 = vector.broadcast %44 : vector<1x384xf32> to vector<16x384xf32>
    %46 = arith.addf %43, %45 : vector<16x384xf32>
    %cst_45 = arith.constant 0.000000e+00 : f32
    %47 = vector.broadcast %cst_45 : f32 to vector<16x384xf32>
    %48 = arith.cmpf oge, %46, %47 : vector<16x384xf32>
    %cst_46 = arith.constant 2.000000e-01 : f32
    %49 = vector.broadcast %cst_46 : f32 to vector<16x384xf32>
    %50 = arith.mulf %49, %46 : vector<16x384xf32>
    %51 = arith.select %48, %46, %50 : vector<16x384xi1>, vector<16x384xf32>
    %c1_47 = arith.constant 1 : index
    %c24 = arith.constant 24 : index
    %52 = vector.load %arg24[%c1_47, %c24] : memref<18x432xf32, #tpu.memory_space<vmem>>, vector<16x384xf32>
    tpu.vector_store %arg24[%c1_47, %c24], %51 {strides = array<i32>} : memref<18x432xf32, #tpu.memory_space<vmem>>, vector<16x384xf32>,
    %c0_48 = arith.constant 0 : index
    %c0_49 = arith.constant 0 : index
    %53 = vector.load %arg24[%c0_48, %c0_49] : memref<18x432xf32, #tpu.memory_space<vmem>>, vector<18x432xf32>
    %54 = arith.truncf %53 : vector<18x432xf32> to vector<18x432xbf16>
    %cst_50 = arith.constant 0.000000e+00 : f32
    %55 = vector.broadcast %cst_50 : f32 to vector<8x384xf32>
    %c0_51 = arith.constant 0 : index
    %c0_52 = arith.constant 0 : index
    %c0_53 = arith.constant 0 : index
    %56 = vector.load %arg5[%c0_51, %c0_52, %c0_53] : memref<4x8x18xbf16, #tpu.memory_space<vmem>>, vector<1x8x18xbf16>
    %57 = vector.shape_cast %56 : vector<1x8x18xbf16> to vector<8x18xbf16>
    %cst_54 = arith.constant dense<0.000000e+00> : vector<8x432xf32>
    %58 = tpu.matmul %57, %54, %cst_54 {dimension_numbers = #tpu.dot_dimension_numbers<[1], [0], [0], [1], [0, 0, 1, 1], [], []>} : vector<8x18xbf16>, vector<18x432xbf16>, vector<8x432xf32> -> vector<8x432xf32>
    %59 = arith.truncf %58 : vector<8x432xf32> to vector<8x432xbf16>
    %c0_55 = arith.constant 0 : index
    %c0_56 = arith.constant 0 : index
    %c0_57 = arith.constant 0 : index
    %60 = vector.load %arg6[%c0_55, %c0_56, %c0_57] : memref<4x432x384xbf16, #tpu.memory_space<vmem>>, vector<1x432x384xbf16>
    %61 = vector.shape_cast %60 : vector<1x432x384xbf16> to vector<432x384xbf16>
    %cst_58 = arith.constant dense<0.000000e+00> : vector<8x384xf32>
    %62 = tpu.matmul %59, %61, %cst_58 {dimension_numbers = #tpu.dot_dimension_numbers<[1], [0], [0], [1], [0, 0, 1, 1], [], []>} : vector<8x432xbf16>, vector<432x384xbf16>, vector<8x384xf32> -> vector<8x384xf32>
    %63 = arith.addf %55, %62 : vector<8x384xf32>
    %c1_59 = arith.constant 1 : index
    %c0_60 = arith.constant 0 : index
    %c0_61 = arith.constant 0 : index
    %64 = vector.load %arg5[%c1_59, %c0_60, %c0_61] : memref<4x8x18xbf16, #tpu.memory_space<vmem>>, vector<1x8x18xbf16>
    %65 = vector.shape_cast %64 : vector<1x8x18xbf16> to vector<8x18xbf16>
    %cst_62 = arith.constant dense<0.000000e+00> : vector<8x432xf32>
    %66 = tpu.matmul %65, %54, %cst_62 {dimension_numbers = #tpu.dot_dimension_numbers<[1], [0], [0], [1], [0, 0, 1, 1], [], []>} : vector<8x18xbf16>, vector<18x432xbf16>, vector<8x432xf32> -> vector<8x432xf32>
    %67 = arith.truncf %66 : vector<8x432xf32> to vector<8x432xbf16>
    %c1_63 = arith.constant 1 : index
    %c0_64 = arith.constant 0 : index
    %c0_65 = arith.constant 0 : index
    %68 = vector.load %arg6[%c1_63, %c0_64, %c0_65] : memref<4x432x384xbf16, #tpu.memory_space<vmem>>, vector<1x432x384xbf16>
    %69 = vector.shape_cast %68 : vector<1x432x384xbf16> to vector<432x384xbf16>
    %cst_66 = arith.constant dense<0.000000e+00> : vector<8x384xf32>
    %70 = tpu.matmul %67, %69, %cst_66 {dimension_numbers = #tpu.dot_dimension_numbers<[1], [0], [0], [1], [0, 0, 1, 1], [], []>} : vector<8x432xbf16>, vector<432x384xbf16>, vector<8x384xf32> -> vector<8x384xf32>
    %71 = arith.addf %63, %70 : vector<8x384xf32>
    %c2_67 = arith.constant 2 : index
    %c0_68 = arith.constant 0 : index
    %c0_69 = arith.constant 0 : index
    %72 = vector.load %arg5[%c2_67, %c0_68, %c0_69] : memref<4x8x18xbf16, #tpu.memory_space<vmem>>, vector<1x8x18xbf16>
    %73 = vector.shape_cast %72 : vector<1x8x18xbf16> to vector<8x18xbf16>
    %cst_70 = arith.constant dense<0.000000e+00> : vector<8x432xf32>
    %74 = tpu.matmul %73, %54, %cst_70 {dimension_numbers = #tpu.dot_dimension_numbers<[1], [0], [0], [1], [0, 0, 1, 1], [], []>} : vector<8x18xbf16>, vector<18x432xbf16>, vector<8x432xf32> -> vector<8x432xf32>
    %75 = arith.truncf %74 : vector<8x432xf32> to vector<8x432xbf16>
    %c2_71 = arith.constant 2 : index
    %c0_72 = arith.constant 0 : index
    %c0_73 = arith.constant 0 : index
    %76 = vector.load %arg6[%c2_71, %c0_72, %c0_73] : memref<4x432x384xbf16, #tpu.memory_space<vmem>>, vector<1x432x384xbf16>
    %77 = vector.shape_cast %76 : vector<1x432x384xbf16> to vector<432x384xbf16>
    %cst_74 = arith.constant dense<0.000000e+00> : vector<8x384xf32>
    %78 = tpu.matmul %75, %77, %cst_74 {dimension_numbers = #tpu.dot_dimension_numbers<[1], [0], [0], [1], [0, 0, 1, 1], [], []>} : vector<8x432xbf16>, vector<432x384xbf16>, vector<8x384xf32> -> vector<8x384xf32>
    %79 = arith.addf %71, %78 : vector<8x384xf32>
    %c3_75 = arith.constant 3 : index
    %c0_76 = arith.constant 0 : index
    %c0_77 = arith.constant 0 : index
    %80 = vector.load %arg5[%c3_75, %c0_76, %c0_77] : memref<4x8x18xbf16, #tpu.memory_space<vmem>>, vector<1x8x18xbf16>
    %81 = vector.shape_cast %80 : vector<1x8x18xbf16> to vector<8x18xbf16>
    %cst_78 = arith.constant dense<0.000000e+00> : vector<8x432xf32>
    %82 = tpu.matmul %81, %54, %cst_78 {dimension_numbers = #tpu.dot_dimension_numbers<[1], [0], [0], [1], [0, 0, 1, 1], [], []>} : vector<8x18xbf16>, vector<18x432xbf16>, vector<8x432xf32> -> vector<8x432xf32>
    %83 = arith.truncf %82 : vector<8x432xf32> to vector<8x432xbf16>
    %c3_79 = arith.constant 3 : index
    %c0_80 = arith.constant 0 : index
    %c0_81 = arith.constant 0 : index
    %84 = vector.load %arg6[%c3_79, %c0_80, %c0_81] : memref<4x432x384xbf16, #tpu.memory_space<vmem>>, vector<1x432x384xbf16>
    %85 = vector.shape_cast %84 : vector<1x432x384xbf16> to vector<432x384xbf16>
    %cst_82 = arith.constant dense<0.000000e+00> : vector<8x384xf32>
    %86 = tpu.matmul %83, %85, %cst_82 {dimension_numbers = #tpu.dot_dimension_numbers<[1], [0], [0], [1], [0, 0, 1, 1], [], []>} : vector<8x432xbf16>, vector<432x384xbf16>, vector<8x384xf32> -> vector<8x384xf32>
    %87 = arith.addf %79, %86 : vector<8x384xf32>
    %c0_83 = arith.constant 0 : index
    %c0_84 = arith.constant 0 : index
    %88 = vector.load %arg7[%c0_83, %c0_84] : memref<1x384xf32, #tpu.memory_space<vmem>>, vector<1x384xf32>
    %89 = vector.broadcast %88 : vector<1x384xf32> to vector<8x384xf32>
    %90 = arith.addf %87, %89 : vector<8x384xf32>
    %cst_85 = arith.constant dense<0.000000e+00> : vector<384xf32>
    %91 = vector.multi_reduction <add>, %90, %cst_85 [0] : vector<8x384xf32> to vector<384xf32>
    %92 = vector.shape_cast %91 : vector<384xf32> to vector<1x384xf32>
    %c0_86 = arith.constant 0 : index
    %c0_87 = arith.constant 0 : index
    %93 = vector.load %arg8[%c0_86, %c0_87] : memref<384x48xf32, #tpu.memory_space<vmem>>, vector<384x48xf32>
    %cst_88 = arith.constant dense<0.000000e+00> : vector<1x48xf32>
    %94 = tpu.matmul %92, %93, %cst_88 {dimension_numbers = #tpu.dot_dimension_numbers<[1], [0], [0], [1], [0, 0, 1, 1], [], []>} : vector<1x384xf32>, vector<384x48xf32>, vector<1x48xf32> -> vector<1x48xf32>
    %cst_89 = arith.constant 6.400000e+01 : f32
    %95 = vector.broadcast %cst_89 : f32 to vector<1x48xf32>
    %96 = arith.divf %94, %95 : vector<1x48xf32>
    %c0_90 = arith.constant 0 : index
    %c0_91 = arith.constant 0 : index
    %97 = vector.load %arg9[%c0_90, %c0_91] : memref<48x384xf32, #tpu.memory_space<vmem>>, vector<48x384xf32>
    %cst_92 = arith.constant dense<0.000000e+00> : vector<1x384xf32>
    %98 = tpu.matmul %96, %97, %cst_92 {dimension_numbers = #tpu.dot_dimension_numbers<[1], [0], [0], [1], [0, 0, 1, 1], [], []>} : vector<1x48xf32>, vector<48x384xf32>, vector<1x384xf32> -> vector<1x384xf32>
    %99 = vector.broadcast %98 : vector<1x384xf32> to vector<8x384xf32>
    %100 = arith.subf %90, %99 : vector<8x384xf32>
    %101 = arith.mulf %100, %100 : vector<8x384xf32>
    %cst_93 = arith.constant dense<0.000000e+00> : vector<384xf32>
    %102 = vector.multi_reduction <add>, %101, %cst_93 [0] : vector<8x384xf32> to vector<384xf32>
    %103 = vector.shape_cast %102 : vector<384xf32> to vector<1x384xf32>
    %c0_94 = arith.constant 0 : index
    %c0_95 = arith.constant 0 : index
    %104 = vector.load %arg8[%c0_94, %c0_95] : memref<384x48xf32, #tpu.memory_space<vmem>>, vector<384x48xf32>
    %cst_96 = arith.constant dense<0.000000e+00> : vector<1x48xf32>
    %105 = tpu.matmul %103, %104, %cst_96 {dimension_numbers = #tpu.dot_dimension_numbers<[1], [0], [0], [1], [0, 0, 1, 1], [], []>} : vector<1x384xf32>, vector<384x48xf32>, vector<1x48xf32> -> vector<1x48xf32>
    %cst_97 = arith.constant 6.400000e+01 : f32
    %106 = vector.broadcast %cst_97 : f32 to vector<1x48xf32>
    %107 = arith.divf %105, %106 : vector<1x48xf32>
    %cst_98 = arith.constant 9.99999974E-6 : f32
    %108 = vector.broadcast %cst_98 : f32 to vector<1x48xf32>
    %109 = arith.addf %107, %108 : vector<1x48xf32>
    %110 = math.rsqrt %109 : vector<1x48xf32>
    %c0_99 = arith.constant 0 : index
    %c0_100 = arith.constant 0 : index
    %111 = vector.load %arg9[%c0_99, %c0_100] : memref<48x384xf32, #tpu.memory_space<vmem>>, vector<48x384xf32>
    %cst_101 = arith.constant dense<0.000000e+00> : vector<1x384xf32>
    %112 = tpu.matmul %110, %111, %cst_101 {dimension_numbers = #tpu.dot_dimension_numbers<[1], [0], [0], [1], [0, 0, 1, 1], [], []>} : vector<1x48xf32>, vector<48x384xf32>, vector<1x384xf32> -> vector<1x384xf32>
    %113 = vector.broadcast %112 : vector<1x384xf32> to vector<8x384xf32>
    %114 = arith.mulf %100, %113 : vector<8x384xf32>
    %cst_102 = arith.constant 0.000000e+00 : f32
    %115 = vector.broadcast %cst_102 : f32 to vector<8x384xf32>
    %116 = arith.cmpf oge, %114, %115 : vector<8x384xf32>
    %cst_103 = arith.constant 2.000000e-01 : f32
    %117 = vector.broadcast %cst_103 : f32 to vector<8x384xf32>
    %118 = arith.mulf %117, %114 : vector<8x384xf32>
    %119 = arith.select %116, %114, %118 : vector<8x384xi1>, vector<8x384xf32>
    %c1_104 = arith.constant 1 : index
    %c48 = arith.constant 48 : index
    %120 = vector.load %arg25[%c1_104, %c48] : memref<10x480xf32, #tpu.memory_space<vmem>>, vector<8x384xf32>
    tpu.vector_store %arg25[%c1_104, %c48], %119 {strides = array<i32>} : memref<10x480xf32, #tpu.memory_space<vmem>>, vector<8x384xf32>,
    %c0_105 = arith.constant 0 : index
    %c0_106 = arith.constant 0 : index
    %121 = vector.load %arg25[%c0_105, %c0_106] : memref<10x480xf32, #tpu.memory_space<vmem>>, vector<10x480xf32>
    %122 = arith.truncf %121 : vector<10x480xf32> to vector<10x480xbf16>
    %cst_107 = arith.constant 0.000000e+00 : f32
    %123 = vector.broadcast %cst_107 : f32 to vector<4x384xf32>
    %c0_108 = arith.constant 0 : index
    %c0_109 = arith.constant 0 : index
    %c0_110 = arith.constant 0 : index
    %124 = vector.load %arg10[%c0_108, %c0_109, %c0_110] : memref<4x4x10xbf16, #tpu.memory_space<vmem>>, vector<1x4x10xbf16>
    %125 = vector.shape_cast %124 : vector<1x4x10xbf16> to vector<4x10xbf16>
    %cst_111 = arith.constant dense<0.000000e+00> : vector<4x480xf32>
    %126 = tpu.matmul %125, %122, %cst_111 {dimension_numbers = #tpu.dot_dimension_numbers<[1], [0], [0], [1], [0, 0, 1, 1], [], []>} : vector<4x10xbf16>, vector<10x480xbf16>, vector<4x480xf32> -> vector<4x480xf32>
    %127 = arith.truncf %126 : vector<4x480xf32> to vector<4x480xbf16>
    %c0_112 = arith.constant 0 : index
    %c0_113 = arith.constant 0 : index
    %c0_114 = arith.constant 0 : index
    %128 = vector.load %arg11[%c0_112, %c0_113, %c0_114] : memref<4x480x384xbf16, #tpu.memory_space<vmem>>, vector<1x480x384xbf16>
    %129 = vector.shape_cast %128 : vector<1x480x384xbf16> to vector<480x384xbf16>
    %cst_115 = arith.constant dense<0.000000e+00> : vector<4x384xf32>
    %130 = tpu.matmul %127, %129, %cst_115 {dimension_numbers = #tpu.dot_dimension_numbers<[1], [0], [0], [1], [0, 0, 1, 1], [], []>} : vector<4x480xbf16>, vector<480x384xbf16>, vector<4x384xf32> -> vector<4x384xf32>
    %131 = arith.addf %123, %130 : vector<4x384xf32>
    %c1_116 = arith.constant 1 : index
    %c0_117 = arith.constant 0 : index
    %c0_118 = arith.constant 0 : index
    %132 = vector.load %arg10[%c1_116, %c0_117, %c0_118] : memref<4x4x10xbf16, #tpu.memory_space<vmem>>, vector<1x4x10xbf16>
    %133 = vector.shape_cast %132 : vector<1x4x10xbf16> to vector<4x10xbf16>
    %cst_119 = arith.constant dense<0.000000e+00> : vector<4x480xf32>
    %134 = tpu.matmul %133, %122, %cst_119 {dimension_numbers = #tpu.dot_dimension_numbers<[1], [0], [0], [1], [0, 0, 1, 1], [], []>} : vector<4x10xbf16>, vector<10x480xbf16>, vector<4x480xf32> -> vector<4x480xf32>
    %135 = arith.truncf %134 : vector<4x480xf32> to vector<4x480xbf16>
    %c1_120 = arith.constant 1 : index
    %c0_121 = arith.constant 0 : index
    %c0_122 = arith.constant 0 : index
    %136 = vector.load %arg11[%c1_120, %c0_121, %c0_122] : memref<4x480x384xbf16, #tpu.memory_space<vmem>>, vector<1x480x384xbf16>
    %137 = vector.shape_cast %136 : vector<1x480x384xbf16> to vector<480x384xbf16>
    %cst_123 = arith.constant dense<0.000000e+00> : vector<4x384xf32>
    %138 = tpu.matmul %135, %137, %cst_123 {dimension_numbers = #tpu.dot_dimension_numbers<[1], [0], [0], [1], [0, 0, 1, 1], [], []>} : vector<4x480xbf16>, vector<480x384xbf16>, vector<4x384xf32> -> vector<4x384xf32>
    %139 = arith.addf %131, %138 : vector<4x384xf32>
    %c2_124 = arith.constant 2 : index
    %c0_125 = arith.constant 0 : index
    %c0_126 = arith.constant 0 : index
    %140 = vector.load %arg10[%c2_124, %c0_125, %c0_126] : memref<4x4x10xbf16, #tpu.memory_space<vmem>>, vector<1x4x10xbf16>
    %141 = vector.shape_cast %140 : vector<1x4x10xbf16> to vector<4x10xbf16>
    %cst_127 = arith.constant dense<0.000000e+00> : vector<4x480xf32>
    %142 = tpu.matmul %141, %122, %cst_127 {dimension_numbers = #tpu.dot_dimension_numbers<[1], [0], [0], [1], [0, 0, 1, 1], [], []>} : vector<4x10xbf16>, vector<10x480xbf16>, vector<4x480xf32> -> vector<4x480xf32>
    %143 = arith.truncf %142 : vector<4x480xf32> to vector<4x480xbf16>
    %c2_128 = arith.constant 2 : index
    %c0_129 = arith.constant 0 : index
    %c0_130 = arith.constant 0 : index
    %144 = vector.load %arg11[%c2_128, %c0_129, %c0_130] : memref<4x480x384xbf16, #tpu.memory_space<vmem>>, vector<1x480x384xbf16>
    %145 = vector.shape_cast %144 : vector<1x480x384xbf16> to vector<480x384xbf16>
    %cst_131 = arith.constant dense<0.000000e+00> : vector<4x384xf32>
    %146 = tpu.matmul %143, %145, %cst_131 {dimension_numbers = #tpu.dot_dimension_numbers<[1], [0], [0], [1], [0, 0, 1, 1], [], []>} : vector<4x480xbf16>, vector<480x384xbf16>, vector<4x384xf32> -> vector<4x384xf32>
    %147 = arith.addf %139, %146 : vector<4x384xf32>
    %c3_132 = arith.constant 3 : index
    %c0_133 = arith.constant 0 : index
    %c0_134 = arith.constant 0 : index
    %148 = vector.load %arg10[%c3_132, %c0_133, %c0_134] : memref<4x4x10xbf16, #tpu.memory_space<vmem>>, vector<1x4x10xbf16>
    %149 = vector.shape_cast %148 : vector<1x4x10xbf16> to vector<4x10xbf16>
    %cst_135 = arith.constant dense<0.000000e+00> : vector<4x480xf32>
    %150 = tpu.matmul %149, %122, %cst_135 {dimension_numbers = #tpu.dot_dimension_numbers<[1], [0], [0], [1], [0, 0, 1, 1], [], []>} : vector<4x10xbf16>, vector<10x480xbf16>, vector<4x480xf32> -> vector<4x480xf32>
    %151 = arith.truncf %150 : vector<4x480xf32> to vector<4x480xbf16>
    %c3_136 = arith.constant 3 : index
    %c0_137 = arith.constant 0 : index
    %c0_138 = arith.constant 0 : index
    %152 = vector.load %arg11[%c3_136, %c0_137, %c0_138] : memref<4x480x384xbf16, #tpu.memory_space<vmem>>, vector<1x480x384xbf16>
    %153 = vector.shape_cast %152 : vector<1x480x384xbf16> to vector<480x384xbf16>
    %cst_139 = arith.constant dense<0.000000e+00> : vector<4x384xf32>
    %154 = tpu.matmul %151, %153, %cst_139 {dimension_numbers = #tpu.dot_dimension_numbers<[1], [0], [0], [1], [0, 0, 1, 1], [], []>} : vector<4x480xbf16>, vector<480x384xbf16>, vector<4x384xf32> -> vector<4x384xf32>
    %155 = arith.addf %147, %154 : vector<4x384xf32>
    %c0_140 = arith.constant 0 : index
    %c0_141 = arith.constant 0 : index
    %156 = vector.load %arg12[%c0_140, %c0_141] : memref<1x384xf32, #tpu.memory_space<vmem>>, vector<1x384xf32>
    %157 = vector.broadcast %156 : vector<1x384xf32> to vector<4x384xf32>
    %158 = arith.addf %155, %157 : vector<4x384xf32>
    %cst_142 = arith.constant dense<0.000000e+00> : vector<384xf32>
    %159 = vector.multi_reduction <add>, %158, %cst_142 [0] : vector<4x384xf32> to vector<384xf32>
    %160 = vector.shape_cast %159 : vector<384xf32> to vector<1x384xf32>
    %c0_143 = arith.constant 0 : index
    %c0_144 = arith.constant 0 : index
    %161 = vector.load %arg13[%c0_143, %c0_144] : memref<384x96xf32, #tpu.memory_space<vmem>>, vector<384x96xf32>
    %cst_145 = arith.constant dense<0.000000e+00> : vector<1x96xf32>
    %162 = tpu.matmul %160, %161, %cst_145 {dimension_numbers = #tpu.dot_dimension_numbers<[1], [0], [0], [1], [0, 0, 1, 1], [], []>} : vector<1x384xf32>, vector<384x96xf32>, vector<1x96xf32> -> vector<1x96xf32>
    %cst_146 = arith.constant 1.600000e+01 : f32
    %163 = vector.broadcast %cst_146 : f32 to vector<1x96xf32>
    %164 = arith.divf %162, %163 : vector<1x96xf32>
    %c0_147 = arith.constant 0 : index
    %c0_148 = arith.constant 0 : index
    %165 = vector.load %arg14[%c0_147, %c0_148] : memref<96x384xf32, #tpu.memory_space<vmem>>, vector<96x384xf32>
    %cst_149 = arith.constant dense<0.000000e+00> : vector<1x384xf32>
    %166 = tpu.matmul %164, %165, %cst_149 {dimension_numbers = #tpu.dot_dimension_numbers<[1], [0], [0], [1], [0, 0, 1, 1], [], []>} : vector<1x96xf32>, vector<96x384xf32>, vector<1x384xf32> -> vector<1x384xf32>
    %167 = vector.broadcast %166 : vector<1x384xf32> to vector<4x384xf32>
    %168 = arith.subf %158, %167 : vector<4x384xf32>
    %169 = arith.mulf %168, %168 : vector<4x384xf32>
    %cst_150 = arith.constant dense<0.000000e+00> : vector<384xf32>
    %170 = vector.multi_reduction <add>, %169, %cst_150 [0] : vector<4x384xf32> to vector<384xf32>
    %171 = vector.shape_cast %170 : vector<384xf32> to vector<1x384xf32>
    %c0_151 = arith.constant 0 : index
    %c0_152 = arith.constant 0 : index
    %172 = vector.load %arg13[%c0_151, %c0_152] : memref<384x96xf32, #tpu.memory_space<vmem>>, vector<384x96xf32>
    %cst_153 = arith.constant dense<0.000000e+00> : vector<1x96xf32>
    %173 = tpu.matmul %171, %172, %cst_153 {dimension_numbers = #tpu.dot_dimension_numbers<[1], [0], [0], [1], [0, 0, 1, 1], [], []>} : vector<1x384xf32>, vector<384x96xf32>, vector<1x96xf32> -> vector<1x96xf32>
    %cst_154 = arith.constant 1.600000e+01 : f32
    %174 = vector.broadcast %cst_154 : f32 to vector<1x96xf32>
    %175 = arith.divf %173, %174 : vector<1x96xf32>
    %cst_155 = arith.constant 9.99999974E-6 : f32
    %176 = vector.broadcast %cst_155 : f32 to vector<1x96xf32>
    %177 = arith.addf %175, %176 : vector<1x96xf32>
    %178 = math.rsqrt %177 : vector<1x96xf32>
    %c0_156 = arith.constant 0 : index
    %c0_157 = arith.constant 0 : index
    %179 = vector.load %arg14[%c0_156, %c0_157] : memref<96x384xf32, #tpu.memory_space<vmem>>, vector<96x384xf32>
    %cst_158 = arith.constant dense<0.000000e+00> : vector<1x384xf32>
    %180 = tpu.matmul %178, %179, %cst_158 {dimension_numbers = #tpu.dot_dimension_numbers<[1], [0], [0], [1], [0, 0, 1, 1], [], []>} : vector<1x96xf32>, vector<96x384xf32>, vector<1x384xf32> -> vector<1x384xf32>
    %181 = vector.broadcast %180 : vector<1x384xf32> to vector<4x384xf32>
    %182 = arith.mulf %168, %181 : vector<4x384xf32>
    %cst_159 = arith.constant 0.000000e+00 : f32
    %183 = vector.broadcast %cst_159 : f32 to vector<4x384xf32>
    %184 = arith.cmpf oge, %182, %183 : vector<4x384xf32>
    %cst_160 = arith.constant 2.000000e-01 : f32
    %185 = vector.broadcast %cst_160 : f32 to vector<4x384xf32>
    %186 = arith.mulf %185, %182 : vector<4x384xf32>
    %187 = arith.select %184, %182, %186 : vector<4x384xi1>, vector<4x384xf32>
    %c1_161 = arith.constant 1 : index
    %c96 = arith.constant 96 : index
    %188 = vector.load %arg26[%c1_161, %c96] : memref<6x576xf32, #tpu.memory_space<vmem>>, vector<4x384xf32>
    tpu.vector_store %arg26[%c1_161, %c96], %187 {strides = array<i32>} : memref<6x576xf32, #tpu.memory_space<vmem>>, vector<4x384xf32>,
    %c0_162 = arith.constant 0 : index
    %c0_163 = arith.constant 0 : index
    %189 = vector.load %arg26[%c0_162, %c0_163] : memref<6x576xf32, #tpu.memory_space<vmem>>, vector<6x576xf32>
    %190 = arith.truncf %189 : vector<6x576xf32> to vector<6x576xbf16>
    %cst_164 = arith.constant 0.000000e+00 : f32
    %191 = vector.broadcast %cst_164 : f32 to vector<2x384xf32>
    %c0_165 = arith.constant 0 : index
    %c0_166 = arith.constant 0 : index
    %c0_167 = arith.constant 0 : index
    %192 = vector.load %arg15[%c0_165, %c0_166, %c0_167] : memref<4x2x6xbf16, #tpu.memory_space<vmem>>, vector<1x2x6xbf16>
    %193 = vector.shape_cast %192 : vector<1x2x6xbf16> to vector<2x6xbf16>
    %cst_168 = arith.constant dense<0.000000e+00> : vector<2x576xf32>
    %194 = tpu.matmul %193, %190, %cst_168 {dimension_numbers = #tpu.dot_dimension_numbers<[1], [0], [0], [1], [0, 0, 1, 1], [], []>} : vector<2x6xbf16>, vector<6x576xbf16>, vector<2x576xf32> -> vector<2x576xf32>
    %195 = arith.truncf %194 : vector<2x576xf32> to vector<2x576xbf16>
    %c0_169 = arith.constant 0 : index
    %c0_170 = arith.constant 0 : index
    %c0_171 = arith.constant 0 : index
    %196 = vector.load %arg16[%c0_169, %c0_170, %c0_171] : memref<4x576x384xbf16, #tpu.memory_space<vmem>>, vector<1x576x384xbf16>
    %197 = vector.shape_cast %196 : vector<1x576x384xbf16> to vector<576x384xbf16>
    %cst_172 = arith.constant dense<0.000000e+00> : vector<2x384xf32>
    %198 = tpu.matmul %195, %197, %cst_172 {dimension_numbers = #tpu.dot_dimension_numbers<[1], [0], [0], [1], [0, 0, 1, 1], [], []>} : vector<2x576xbf16>, vector<576x384xbf16>, vector<2x384xf32> -> vector<2x384xf32>
    %199 = arith.addf %191, %198 : vector<2x384xf32>
    %c1_173 = arith.constant 1 : index
    %c0_174 = arith.constant 0 : index
    %c0_175 = arith.constant 0 : index
    %200 = vector.load %arg15[%c1_173, %c0_174, %c0_175] : memref<4x2x6xbf16, #tpu.memory_space<vmem>>, vector<1x2x6xbf16>
    %201 = vector.shape_cast %200 : vector<1x2x6xbf16> to vector<2x6xbf16>
    %cst_176 = arith.constant dense<0.000000e+00> : vector<2x576xf32>
    %202 = tpu.matmul %201, %190, %cst_176 {dimension_numbers = #tpu.dot_dimension_numbers<[1], [0], [0], [1], [0, 0, 1, 1], [], []>} : vector<2x6xbf16>, vector<6x576xbf16>, vector<2x576xf32> -> vector<2x576xf32>
    %203 = arith.truncf %202 : vector<2x576xf32> to vector<2x576xbf16>
    %c1_177 = arith.constant 1 : index
    %c0_178 = arith.constant 0 : index
    %c0_179 = arith.constant 0 : index
    %204 = vector.load %arg16[%c1_177, %c0_178, %c0_179] : memref<4x576x384xbf16, #tpu.memory_space<vmem>>, vector<1x576x384xbf16>
    %205 = vector.shape_cast %204 : vector<1x576x384xbf16> to vector<576x384xbf16>
    %cst_180 = arith.constant dense<0.000000e+00> : vector<2x384xf32>
    %206 = tpu.matmul %203, %205, %cst_180 {dimension_numbers = #tpu.dot_dimension_numbers<[1], [0], [0], [1], [0, 0, 1, 1], [], []>} : vector<2x576xbf16>, vector<576x384xbf16>, vector<2x384xf32> -> vector<2x384xf32>
    %207 = arith.addf %199, %206 : vector<2x384xf32>
    %c2_181 = arith.constant 2 : index
    %c0_182 = arith.constant 0 : index
    %c0_183 = arith.constant 0 : index
    %208 = vector.load %arg15[%c2_181, %c0_182, %c0_183] : memref<4x2x6xbf16, #tpu.memory_space<vmem>>, vector<1x2x6xbf16>
    %209 = vector.shape_cast %208 : vector<1x2x6xbf16> to vector<2x6xbf16>
    %cst_184 = arith.constant dense<0.000000e+00> : vector<2x576xf32>
    %210 = tpu.matmul %209, %190, %cst_184 {dimension_numbers = #tpu.dot_dimension_numbers<[1], [0], [0], [1], [0, 0, 1, 1], [], []>} : vector<2x6xbf16>, vector<6x576xbf16>, vector<2x576xf32> -> vector<2x576xf32>
    %211 = arith.truncf %210 : vector<2x576xf32> to vector<2x576xbf16>
    %c2_185 = arith.constant 2 : index
    %c0_186 = arith.constant 0 : index
    %c0_187 = arith.constant 0 : index
    %212 = vector.load %arg16[%c2_185, %c0_186, %c0_187] : memref<4x576x384xbf16, #tpu.memory_space<vmem>>, vector<1x576x384xbf16>
    %213 = vector.shape_cast %212 : vector<1x576x384xbf16> to vector<576x384xbf16>
    %cst_188 = arith.constant dense<0.000000e+00> : vector<2x384xf32>
    %214 = tpu.matmul %211, %213, %cst_188 {dimension_numbers = #tpu.dot_dimension_numbers<[1], [0], [0], [1], [0, 0, 1, 1], [], []>} : vector<2x576xbf16>, vector<576x384xbf16>, vector<2x384xf32> -> vector<2x384xf32>
    %215 = arith.addf %207, %214 : vector<2x384xf32>
    %c3_189 = arith.constant 3 : index
    %c0_190 = arith.constant 0 : index
    %c0_191 = arith.constant 0 : index
    %216 = vector.load %arg15[%c3_189, %c0_190, %c0_191] : memref<4x2x6xbf16, #tpu.memory_space<vmem>>, vector<1x2x6xbf16>
    %217 = vector.shape_cast %216 : vector<1x2x6xbf16> to vector<2x6xbf16>
    %cst_192 = arith.constant dense<0.000000e+00> : vector<2x576xf32>
    %218 = tpu.matmul %217, %190, %cst_192 {dimension_numbers = #tpu.dot_dimension_numbers<[1], [0], [0], [1], [0, 0, 1, 1], [], []>} : vector<2x6xbf16>, vector<6x576xbf16>, vector<2x576xf32> -> vector<2x576xf32>
    %219 = arith.truncf %218 : vector<2x576xf32> to vector<2x576xbf16>
    %c3_193 = arith.constant 3 : index
    %c0_194 = arith.constant 0 : index
    %c0_195 = arith.constant 0 : index
    %220 = vector.load %arg16[%c3_193, %c0_194, %c0_195] : memref<4x576x384xbf16, #tpu.memory_space<vmem>>, vector<1x576x384xbf16>
    %221 = vector.shape_cast %220 : vector<1x576x384xbf16> to vector<576x384xbf16>
    %cst_196 = arith.constant dense<0.000000e+00> : vector<2x384xf32>
    %222 = tpu.matmul %219, %221, %cst_196 {dimension_numbers = #tpu.dot_dimension_numbers<[1], [0], [0], [1], [0, 0, 1, 1], [], []>} : vector<2x576xbf16>, vector<576x384xbf16>, vector<2x384xf32> -> vector<2x384xf32>
    %223 = arith.addf %215, %222 : vector<2x384xf32>
    %c0_197 = arith.constant 0 : index
    %c0_198 = arith.constant 0 : index
    %224 = vector.load %arg17[%c0_197, %c0_198] : memref<1x384xf32, #tpu.memory_space<vmem>>, vector<1x384xf32>
    %225 = vector.broadcast %224 : vector<1x384xf32> to vector<2x384xf32>
    %226 = arith.addf %223, %225 : vector<2x384xf32>
    %cst_199 = arith.constant dense<0.000000e+00> : vector<384xf32>
    %227 = vector.multi_reduction <add>, %226, %cst_199 [0] : vector<2x384xf32> to vector<384xf32>
    %228 = vector.shape_cast %227 : vector<384xf32> to vector<1x384xf32>
    %c0_200 = arith.constant 0 : index
    %c0_201 = arith.constant 0 : index
    %229 = vector.load %arg18[%c0_200, %c0_201] : memref<384x192xf32, #tpu.memory_space<vmem>>, vector<384x192xf32>
    %cst_202 = arith.constant dense<0.000000e+00> : vector<1x192xf32>
    %230 = tpu.matmul %228, %229, %cst_202 {dimension_numbers = #tpu.dot_dimension_numbers<[1], [0], [0], [1], [0, 0, 1, 1], [], []>} : vector<1x384xf32>, vector<384x192xf32>, vector<1x192xf32> -> vector<1x192xf32>
    %cst_203 = arith.constant 4.000000e+00 : f32
    %231 = vector.broadcast %cst_203 : f32 to vector<1x192xf32>
    %232 = arith.divf %230, %231 : vector<1x192xf32>
    %c0_204 = arith.constant 0 : index
    %c0_205 = arith.constant 0 : index
    %233 = vector.load %arg19[%c0_204, %c0_205] : memref<192x384xf32, #tpu.memory_space<vmem>>, vector<192x384xf32>
    %cst_206 = arith.constant dense<0.000000e+00> : vector<1x384xf32>
    %234 = tpu.matmul %232, %233, %cst_206 {dimension_numbers = #tpu.dot_dimension_numbers<[1], [0], [0], [1], [0, 0, 1, 1], [], []>} : vector<1x192xf32>, vector<192x384xf32>, vector<1x384xf32> -> vector<1x384xf32>
    %235 = vector.broadcast %234 : vector<1x384xf32> to vector<2x384xf32>
    %236 = arith.subf %226, %235 : vector<2x384xf32>
    %237 = arith.mulf %236, %236 : vector<2x384xf32>
    %cst_207 = arith.constant dense<0.000000e+00> : vector<384xf32>
    %238 = vector.multi_reduction <add>, %237, %cst_207 [0] : vector<2x384xf32> to vector<384xf32>
    %239 = vector.shape_cast %238 : vector<384xf32> to vector<1x384xf32>
    %c0_208 = arith.constant 0 : index
    %c0_209 = arith.constant 0 : index
    %240 = vector.load %arg18[%c0_208, %c0_209] : memref<384x192xf32, #tpu.memory_space<vmem>>, vector<384x192xf32>
    %cst_210 = arith.constant dense<0.000000e+00> : vector<1x192xf32>
    %241 = tpu.matmul %239, %240, %cst_210 {dimension_numbers = #tpu.dot_dimension_numbers<[1], [0], [0], [1], [0, 0, 1, 1], [], []>} : vector<1x384xf32>, vector<384x192xf32>, vector<1x192xf32> -> vector<1x192xf32>
    %cst_211 = arith.constant 4.000000e+00 : f32
    %242 = vector.broadcast %cst_211 : f32 to vector<1x192xf32>
    %243 = arith.divf %241, %242 : vector<1x192xf32>
    %cst_212 = arith.constant 9.99999974E-6 : f32
    %244 = vector.broadcast %cst_212 : f32 to vector<1x192xf32>
    %245 = arith.addf %243, %244 : vector<1x192xf32>
    %246 = math.rsqrt %245 : vector<1x192xf32>
    %c0_213 = arith.constant 0 : index
    %c0_214 = arith.constant 0 : index
    %247 = vector.load %arg19[%c0_213, %c0_214] : memref<192x384xf32, #tpu.memory_space<vmem>>, vector<192x384xf32>
    %cst_215 = arith.constant dense<0.000000e+00> : vector<1x384xf32>
    %248 = tpu.matmul %246, %247, %cst_215 {dimension_numbers = #tpu.dot_dimension_numbers<[1], [0], [0], [1], [0, 0, 1, 1], [], []>} : vector<1x192xf32>, vector<192x384xf32>, vector<1x384xf32> -> vector<1x384xf32>
    %249 = vector.broadcast %248 : vector<1x384xf32> to vector<2x384xf32>
    %250 = arith.mulf %236, %249 : vector<2x384xf32>
    %cst_216 = arith.constant 0.000000e+00 : f32
    %251 = vector.broadcast %cst_216 : f32 to vector<2x384xf32>
    %252 = arith.cmpf oge, %250, %251 : vector<2x384xf32>
    %cst_217 = arith.constant 2.000000e-01 : f32
    %253 = vector.broadcast %cst_217 : f32 to vector<2x384xf32>
    %254 = arith.mulf %253, %250 : vector<2x384xf32>
    %255 = arith.select %252, %250, %254 : vector<2x384xi1>, vector<2x384xf32>
    %c2_218 = arith.constant 2 : index
    %c384 = arith.constant 384 : index
    %256 = vector.load %arg27[%c2_218, %c384] : memref<5x960xf32, #tpu.memory_space<vmem>>, vector<2x384xf32>
    tpu.vector_store %arg27[%c2_218, %c384], %255 {strides = array<i32>} : memref<5x960xf32, #tpu.memory_space<vmem>>, vector<2x384xf32>,
    %c0_219 = arith.constant 0 : index
    %c0_220 = arith.constant 0 : index
    %257 = vector.load %arg27[%c0_219, %c0_220] : memref<5x960xf32, #tpu.memory_space<vmem>>, vector<5x960xf32>
    %258 = arith.truncf %257 : vector<5x960xf32> to vector<5x960xbf16>
    %cst_221 = arith.constant 0.000000e+00 : f32
    %259 = vector.broadcast %cst_221 : f32 to vector<2x2xf32>
    %c0_222 = arith.constant 0 : index
    %c0_223 = arith.constant 0 : index
    %c0_224 = arith.constant 0 : index
    %260 = vector.load %arg20[%c0_222, %c0_223, %c0_224] : memref<4x2x5xbf16, #tpu.memory_space<vmem>>, vector<1x2x5xbf16>
    %261 = vector.shape_cast %260 : vector<1x2x5xbf16> to vector<2x5xbf16>
    %cst_225 = arith.constant dense<0.000000e+00> : vector<2x960xf32>
    %262 = tpu.matmul %261, %258, %cst_225 {dimension_numbers = #tpu.dot_dimension_numbers<[1], [0], [0], [1], [0, 0, 1, 1], [], []>} : vector<2x5xbf16>, vector<5x960xbf16>, vector<2x960xf32> -> vector<2x960xf32>
    %263 = arith.truncf %262 : vector<2x960xf32> to vector<2x960xbf16>
    %c0_226 = arith.constant 0 : index
    %c0_227 = arith.constant 0 : index
    %c0_228 = arith.constant 0 : index
    %264 = vector.load %arg21[%c0_226, %c0_227, %c0_228] : memref<4x960x2xbf16, #tpu.memory_space<vmem>>, vector<1x960x2xbf16>
    %265 = vector.shape_cast %264 : vector<1x960x2xbf16> to vector<960x2xbf16>
    %cst_229 = arith.constant dense<0.000000e+00> : vector<2x2xf32>
    %266 = tpu.matmul %263, %265, %cst_229 {dimension_numbers = #tpu.dot_dimension_numbers<[1], [0], [0], [1], [0, 0, 1, 1], [], []>} : vector<2x960xbf16>, vector<960x2xbf16>, vector<2x2xf32> -> vector<2x2xf32>
    %267 = arith.addf %259, %266 : vector<2x2xf32>
    %c1_230 = arith.constant 1 : index
    %c0_231 = arith.constant 0 : index
    %c0_232 = arith.constant 0 : index
    %268 = vector.load %arg20[%c1_230, %c0_231, %c0_232] : memref<4x2x5xbf16, #tpu.memory_space<vmem>>, vector<1x2x5xbf16>
    %269 = vector.shape_cast %268 : vector<1x2x5xbf16> to vector<2x5xbf16>
    %cst_233 = arith.constant dense<0.000000e+00> : vector<2x960xf32>
    %270 = tpu.matmul %269, %258, %cst_233 {dimension_numbers = #tpu.dot_dimension_numbers<[1], [0], [0], [1], [0, 0, 1, 1], [], []>} : vector<2x5xbf16>, vector<5x960xbf16>, vector<2x960xf32> -> vector<2x960xf32>
    %271 = arith.truncf %270 : vector<2x960xf32> to vector<2x960xbf16>
    %c1_234 = arith.constant 1 : index
    %c0_235 = arith.constant 0 : index
    %c0_236 = arith.constant 0 : index
    %272 = vector.load %arg21[%c1_234, %c0_235, %c0_236] : memref<4x960x2xbf16, #tpu.memory_space<vmem>>, vector<1x960x2xbf16>
    %273 = vector.shape_cast %272 : vector<1x960x2xbf16> to vector<960x2xbf16>
    %cst_237 = arith.constant dense<0.000000e+00> : vector<2x2xf32>
    %274 = tpu.matmul %271, %273, %cst_237 {dimension_numbers = #tpu.dot_dimension_numbers<[1], [0], [0], [1], [0, 0, 1, 1], [], []>} : vector<2x960xbf16>, vector<960x2xbf16>, vector<2x2xf32> -> vector<2x2xf32>
    %275 = arith.addf %267, %274 : vector<2x2xf32>
    %c2_238 = arith.constant 2 : index
    %c0_239 = arith.constant 0 : index
    %c0_240 = arith.constant 0 : index
    %276 = vector.load %arg20[%c2_238, %c0_239, %c0_240] : memref<4x2x5xbf16, #tpu.memory_space<vmem>>, vector<1x2x5xbf16>
    %277 = vector.shape_cast %276 : vector<1x2x5xbf16> to vector<2x5xbf16>
    %cst_241 = arith.constant dense<0.000000e+00> : vector<2x960xf32>
    %278 = tpu.matmul %277, %258, %cst_241 {dimension_numbers = #tpu.dot_dimension_numbers<[1], [0], [0], [1], [0, 0, 1, 1], [], []>} : vector<2x5xbf16>, vector<5x960xbf16>, vector<2x960xf32> -> vector<2x960xf32>
    %279 = arith.truncf %278 : vector<2x960xf32> to vector<2x960xbf16>
    %c2_242 = arith.constant 2 : index
    %c0_243 = arith.constant 0 : index
    %c0_244 = arith.constant 0 : index
    %280 = vector.load %arg21[%c2_242, %c0_243, %c0_244] : memref<4x960x2xbf16, #tpu.memory_space<vmem>>, vector<1x960x2xbf16>
    %281 = vector.shape_cast %280 : vector<1x960x2xbf16> to vector<960x2xbf16>
    %cst_245 = arith.constant dense<0.000000e+00> : vector<2x2xf32>
    %282 = tpu.matmul %279, %281, %cst_245 {dimension_numbers = #tpu.dot_dimension_numbers<[1], [0], [0], [1], [0, 0, 1, 1], [], []>} : vector<2x960xbf16>, vector<960x2xbf16>, vector<2x2xf32> -> vector<2x2xf32>
    %283 = arith.addf %275, %282 : vector<2x2xf32>
    %c3_246 = arith.constant 3 : index
    %c0_247 = arith.constant 0 : index
    %c0_248 = arith.constant 0 : index
    %284 = vector.load %arg20[%c3_246, %c0_247, %c0_248] : memref<4x2x5xbf16, #tpu.memory_space<vmem>>, vector<1x2x5xbf16>
    %285 = vector.shape_cast %284 : vector<1x2x5xbf16> to vector<2x5xbf16>
    %cst_249 = arith.constant dense<0.000000e+00> : vector<2x960xf32>
    %286 = tpu.matmul %285, %258, %cst_249 {dimension_numbers = #tpu.dot_dimension_numbers<[1], [0], [0], [1], [0, 0, 1, 1], [], []>} : vector<2x5xbf16>, vector<5x960xbf16>, vector<2x960xf32> -> vector<2x960xf32>
    %287 = arith.truncf %286 : vector<2x960xf32> to vector<2x960xbf16>
    %c3_250 = arith.constant 3 : index
    %c0_251 = arith.constant 0 : index
    %c0_252 = arith.constant 0 : index
    %288 = vector.load %arg21[%c3_250, %c0_251, %c0_252] : memref<4x960x2xbf16, #tpu.memory_space<vmem>>, vector<1x960x2xbf16>
    %289 = vector.shape_cast %288 : vector<1x960x2xbf16> to vector<960x2xbf16>
    %cst_253 = arith.constant dense<0.000000e+00> : vector<2x2xf32>
    %290 = tpu.matmul %287, %289, %cst_253 {dimension_numbers = #tpu.dot_dimension_numbers<[1], [0], [0], [1], [0, 0, 1, 1], [], []>} : vector<2x960xbf16>, vector<960x2xbf16>, vector<2x2xf32> -> vector<2x2xf32>
    %291 = arith.addf %283, %290 : vector<2x2xf32>
    %c0_254 = arith.constant 0 : index
    %c0_255 = arith.constant 0 : index
    %292 = vector.load %arg22[%c0_254, %c0_255] : memref<1x2xf32, #tpu.memory_space<vmem>>, vector<1x2xf32>
    %293 = vector.broadcast %292 : vector<1x2xf32> to vector<2x2xf32>
    %294 = arith.addf %291, %293 : vector<2x2xf32>
    %c0_256 = arith.constant 0 : index
    %c0_257 = arith.constant 0 : index
    %c0_258 = arith.constant 0 : index
    %295 = vector.load %arg23[%c0_256, %c0_257, %c0_258] : memref<1x2x2xf32, #tpu.memory_space<vmem>>, vector<1x2x2xf32>
    %296 = vector.shape_cast %295 : vector<1x2x2xf32> to vector<2x2xf32>
    %297 = vector.shape_cast %294 : vector<2x2xf32> to vector<1x2x2xf32>
    tpu.vector_store %arg23[%c0_256, %c0_257, %c0_258], %297 {strides = array<i32>} : memref<1x2x2xf32, #tpu.memory_space<vmem>>, vector<1x2x2xf32>,
    return
  }
  func.func @transform_0(%arg0: i32) -> (i32, i32, i32) {
    %c0_i32 = arith.constant 0 : i32
    %c0_i32_0 = arith.constant 0 : i32
    %c0_i32_1 = arith.constant 0 : i32
    return %arg0, %c0_i32, %c0_i32_0 : i32, i32, i32
  }
  func.func @transform_1(%arg0: i32) -> (i32, i32, i32) {
    %c0_i32 = arith.constant 0 : i32
    %c0_i32_0 = arith.constant 0 : i32
    %c0_i32_1 = arith.constant 0 : i32
    %c0_i32_2 = arith.constant 0 : i32
    return %c0_i32, %c0_i32_0, %c0_i32_1 : i32, i32, i32
  }
  func.func @transform_2(%arg0: i32) -> (i32, i32, i32) {
    %c0_i32 = arith.constant 0 : i32
    %c0_i32_0 = arith.constant 0 : i32
    %c0_i32_1 = arith.constant 0 : i32
    %c0_i32_2 = arith.constant 0 : i32
    return %c0_i32, %c0_i32_0, %c0_i32_1 : i32, i32, i32
  }
  func.func @transform_3(%arg0: i32) -> (i32, i32) {
    %c0_i32 = arith.constant 0 : i32
    %c0_i32_0 = arith.constant 0 : i32
    %c0_i32_1 = arith.constant 0 : i32
    return %c0_i32, %c0_i32_0 : i32, i32
  }
  func.func @transform_4(%arg0: i32) -> (i32, i32, i32) {
    %c0_i32 = arith.constant 0 : i32
    %c0_i32_0 = arith.constant 0 : i32
    %c0_i32_1 = arith.constant 0 : i32
    %c0_i32_2 = arith.constant 0 : i32
    return %c0_i32, %c0_i32_0, %c0_i32_1 : i32, i32, i32
  }
  func.func @transform_5(%arg0: i32) -> (i32, i32, i32) {
    %c0_i32 = arith.constant 0 : i32
    %c0_i32_0 = arith.constant 0 : i32
    %c0_i32_1 = arith.constant 0 : i32
    %c0_i32_2 = arith.constant 0 : i32
    return %c0_i32, %c0_i32_0, %c0_i32_1 : i32, i32, i32
  }
  func.func @transform_6(%arg0: i32) -> (i32, i32) {
    %c0_i32 = arith.constant 0 : i32
    %c0_i32_0 = arith.constant 0 : i32
    %c0_i32_1 = arith.constant 0 : i32
    return %c0_i32, %c0_i32_0 : i32, i32
  }
  func.func @transform_7(%arg0: i32) -> (i32, i32) {
    %c0_i32 = arith.constant 0 : i32
    %c0_i32_0 = arith.constant 0 : i32
    %c0_i32_1 = arith.constant 0 : i32
    return %c0_i32, %c0_i32_0 : i32, i32
  }
  func.func @transform_8(%arg0: i32) -> (i32, i32) {
    %c0_i32 = arith.constant 0 : i32
    %c0_i32_0 = arith.constant 0 : i32
    %c0_i32_1 = arith.constant 0 : i32
    return %c0_i32, %c0_i32_0 : i32, i32
  }
  func.func @transform_9(%arg0: i32) -> (i32, i32, i32) {
    %c0_i32 = arith.constant 0 : i32
    %c0_i32_0 = arith.constant 0 : i32
    %c0_i32_1 = arith.constant 0 : i32
    %c0_i32_2 = arith.constant 0 : i32
    return %c0_i32, %c0_i32_0, %c0_i32_1 : i32, i32, i32
  }
  func.func @transform_10(%arg0: i32) -> (i32, i32, i32) {
    %c0_i32 = arith.constant 0 : i32
    %c0_i32_0 = arith.constant 0 : i32
    %c0_i32_1 = arith.constant 0 : i32
    %c0_i32_2 = arith.constant 0 : i32
    return %c0_i32, %c0_i32_0, %c0_i32_1 : i32, i32, i32
  }
  func.func @transform_11(%arg0: i32) -> (i32, i32) {
    %c0_i32 = arith.constant 0 : i32
    %c0_i32_0 = arith.constant 0 : i32
    %c0_i32_1 = arith.constant 0 : i32
    return %c0_i32, %c0_i32_0 : i32, i32
  }
  func.func @transform_12(%arg0: i32) -> (i32, i32) {
    %c0_i32 = arith.constant 0 : i32
    %c0_i32_0 = arith.constant 0 : i32
    %c0_i32_1 = arith.constant 0 : i32
    return %c0_i32, %c0_i32_0 : i32, i32
  }
  func.func @transform_13(%arg0: i32) -> (i32, i32) {
    %c0_i32 = arith.constant 0 : i32
    %c0_i32_0 = arith.constant 0 : i32
    %c0_i32_1 = arith.constant 0 : i32
    return %c0_i32, %c0_i32_0 : i32, i32
  }
  func.func @transform_14(%arg0: i32) -> (i32, i32, i32) {
    %c0_i32 = arith.constant 0 : i32
    %c0_i32_0 = arith.constant 0 : i32
    %c0_i32_1 = arith.constant 0 : i32
    %c0_i32_2 = arith.constant 0 : i32
    return %c0_i32, %c0_i32_0, %c0_i32_1 : i32, i32, i32
  }
  func.func @transform_15(%arg0: i32) -> (i32, i32, i32) {
    %c0_i32 = arith.constant 0 : i32
    %c0_i32_0 = arith.constant 0 : i32
    %c0_i32_1 = arith.constant 0 : i32
    %c0_i32_2 = arith.constant 0 : i32
    return %c0_i32, %c0_i32_0, %c0_i32_1 : i32, i32, i32
  }
  func.func @transform_16(%arg0: i32) -> (i32, i32) {
    %c0_i32 = arith.constant 0 : i32
    %c0_i32_0 = arith.constant 0 : i32
    %c0_i32_1 = arith.constant 0 : i32
    return %c0_i32, %c0_i32_0 : i32, i32
  }
  func.func @transform_17(%arg0: i32) -> (i32, i32) {
    %c0_i32 = arith.constant 0 : i32
    %c0_i32_0 = arith.constant 0 : i32
    %c0_i32_1 = arith.constant 0 : i32
    return %c0_i32, %c0_i32_0 : i32, i32
  }
  func.func @transform_18(%arg0: i32) -> (i32, i32) {
    %c0_i32 = arith.constant 0 : i32
    %c0_i32_0 = arith.constant 0 : i32
    %c0_i32_1 = arith.constant 0 : i32
    return %c0_i32, %c0_i32_0 : i32, i32
  }
  func.func @transform_19(%arg0: i32) -> (i32, i32, i32) {
    %c0_i32 = arith.constant 0 : i32
    %c0_i32_0 = arith.constant 0 : i32
    %c0_i32_1 = arith.constant 0 : i32
    %c0_i32_2 = arith.constant 0 : i32
    return %c0_i32, %c0_i32_0, %c0_i32_1 : i32, i32, i32
  }
  func.func @transform_20(%arg0: i32) -> (i32, i32, i32) {
    %c0_i32 = arith.constant 0 : i32
    %c0_i32_0 = arith.constant 0 : i32
    %c0_i32_1 = arith.constant 0 : i32
    %c0_i32_2 = arith.constant 0 : i32
    return %c0_i32, %c0_i32_0, %c0_i32_1 : i32, i32, i32
  }
  func.func @transform_21(%arg0: i32) -> (i32, i32) {
    %c0_i32 = arith.constant 0 : i32
    %c0_i32_0 = arith.constant 0 : i32
    %c0_i32_1 = arith.constant 0 : i32
    return %c0_i32, %c0_i32_0 : i32, i32
  }
  func.func @transform_22(%arg0: i32) -> (i32, i32, i32) {
    %c0_i32 = arith.constant 0 : i32
    %c0_i32_0 = arith.constant 0 : i32
    %c0_i32_1 = arith.constant 0 : i32
    return %arg0, %c0_i32, %c0_i32_0 : i32, i32, i32
  }
}

</mosaic_0001>

<bundles_post_ra>
// kernel: discriminator_forward.1
= control target key start
LH: loop header
LB: loop body
LE: loop exit
PB: predicated region body
PF: predicated region fallthrough
CT: control target
= control target key end

     0   :  { %s32745_s0 = inlined_call_operand.vmem [shape: f32[2,34,102], index: 0, kind: input, shape index: {}]   ;;  %s32746_s1 = inlined_call_operand.vmem [shape: bf16[4,16,34], index: 1, kind: input, shape index: {}]   ;;  %s32747_s2 = inlined_call_operand.vmem [shape: bf16[4,102,384], index: 2, kind: input, shape index: {}]   ;;  %s32748_s3 = inlined_call_operand.hbm [shape: f32[1,384], index: 3, kind: input, shape index: {}]   ;;  %s32749_s4 = inlined_call_operand.hbm [shape: bf16[4,8,18], index: 4, kind: input, shape index: {}]   ;;  %s32750_s5 = inlined_call_operand.hbm [shape: bf16[4,432,384], index: 5, kind: input, shape index: {}]   ;;  %s32751_s6 = inlined_call_operand.hbm [shape: f32[1,384], index: 6, kind: input, shape index: {}]   ;;  %s32752_s7 = inlined_call_operand.vmem [shape: f32[384,48], index: 7, kind: input, shape index: {}]   ;;  %s32753_s8 = inlined_call_operand.vmem [shape: f32[48,384], index: 8, kind: input, shape index: {}]   ;;  %s32754_s9 = inlined_call_operand.hbm [shape: bf16[4,4,10], index: 9, kind: input, shape index: {}]   ;;  %s32755_s10 = inlined_call_operand.vmem [shape: bf16[4,480,384], index: 10, kind: input, shape index: {}]   ;;  %s32756_s11 = inlined_call_operand.hbm [shape: f32[1,384], index: 11, kind: input, shape index: {}]   ;;  %s32757_s12 = inlined_call_operand.vmem [shape: f32[384,96], index: 12, kind: input, shape index: {}]   ;;  %s32758_s13 = inlined_call_operand.vmem [shape: f32[96,384], index: 13, kind: input, shape index: {}]   ;;  %s32759_s14 = inlined_call_operand.hbm [shape: bf16[4,2,6], index: 14, kind: input, shape index: {}]   ;;  %s32760_s15 = inlined_call_operand.vmem [shape: bf16[4,576,384], index: 15, kind: input, shape index: {}]   ;;  %s32761_s16 = inlined_call_operand.hbm [shape: f32[1,384], index: 16, kind: input, shape index: {}]   ;;  %s32762_s17 = inlined_call_operand.vmem [shape: f32[384,192], index: 17, kind: input, shape index: {}]   ;;  %s32763_s18 = inlined_call_operand.hbm [shape: f32[192,384], index: 18, kind: input, shape index: {}]   ;;  %s32764_s19 = inlined_call_operand.vmem [shape: bf16[4,2,5], index: 19, kind: input, shape index: {}]   ;;  %s32765_s20 = inlined_call_operand.vmem [shape: bf16[4,960,2], index: 20, kind: input, shape index: {}]   ;;  %s32766_s21 = inlined_call_operand.vmem [shape: f32[1,2], index: 21, kind: input, shape index: {}]   ;;  %s32767_s22 = inlined_call_operand.hbm [shape: f32[2,2,2], index: 22, kind: output, shape index: {}]  }
   0x1   :  { %32820 = sst [smem:[#allocation60_spill]] %s32745_s0 }
   0x2   :  { %32821 = sst [smem:[#allocation61_spill]] %s32746_s1 }
   0x3   :  { %32822 = sst [smem:[#allocation62_spill]] %s32747_s2 }
   0x4   :  { %32823 = sst [smem:[#allocation63_spill]] %s32748_s3 }
   0x5   :  { %32824 = sst [smem:[#allocation64_spill]] %s32749_s4 }
   0x6   :  { %32825 = sst [smem:[#allocation65_spill]] %s32750_s5 }
   0x7   :  { %32826 = sst [smem:[#allocation66_spill]] %s32751_s6 }
   0x8   :  { %32827 = sst [smem:[#allocation67_spill]] %s32756_s11 }
   0x9   :  { %32828 = sst [smem:[#allocation68_spill]] %s32762_s17 }
   0xa   :  { %32829 = sst [smem:[#allocation69_spill]] %s32764_s19 }
   0xb   :  { %32830 = sst [smem:[#allocation70_spill]] %s32765_s20 }
   0xc   :  { %32831 = sst [smem:[#allocation71_spill]] %s32766_s21 }
   0xd   :  { %32832 = sst [smem:[#allocation72_spill]] %s32767_s22 }
   0xe   :  { %27 = vsyncpa [#allocation7], 0 }
   0xf   :  { %28 = vsyncpa [#allocation10], 0 }
  0x10   :  { %29 = vsyncpa [#allocation13], 0 }
  0x11   :  { %30 = vsyncpa [#allocation16], 0 }
  0x12   :  { %31 = vsyncpa [#allocation19], 0 }
  0x13   :  { %32 = vsyncpa [#allocation8], 0 }
  0x14   :  { %34 = vsyncpa [#allocation8 + $0x1], 0  ;;  %s26517_s3 = smov 0   ;;  %s26519_s28 = smov 0  }
  0x15   :  { %s26521_s29 = smov 0   ;;  %s26523_s30 = smov 0  }
  0x16 LB: > { %32833 = sst [smem:[#allocation28_spill]] %s26360_s3  ;;  %s26538_s4 = sadd.s32 4294967295, %s26372_s30   ;;  %s26372_s30 = sphi %s26523_s30, %s32927_s30   ;;  %s26368_s29 = sphi %s26521_s29, %s32930_s29   ;;  %s26364_s28 = sphi %s26519_s28, %s32929_s28   ;;  %s26360_s3 = sphi %s26517_s3, %s32928_s3  }
  0x17   : > { %32834 = sst [smem:[#allocation29_spill]] %s26364_s28  ;;  %s19127_s0 = sadd.s32 4294967294, %s26372_s30  }
  0x18   : > { %32835 = sst [smem:[#allocation30_spill]] %s26368_s29  ;;  %s26542_s23 = sadd.s32 1, %s26372_s30  }
  0x19   : > { %32836 = sst [smem:[#allocation31_spill]] %s26372_s30  ;;  %s514_s1 = sadd.s32 1, %s26368_s29 }
  0x1a   : > { %32837 = sst [smem:[#allocation32_spill]] %s26542_s23  ;;  %s511_s5 = ssub.s32 %s26372_s30, %s26542_s23 }
  0x1b   : > { %p524_p0 = scmp.ne.s32.totalorder %s26368_s29, %s26364_s28  ;;  %p512_p1 = scmp.eq.s32.totalorder %s511_s5, 0 }
  0x1c   : > { %p525_p2 = scmp.eq.s32.totalorder %s26538_s4, 1  ;;  %p530_p3 = scmp.ne.s32.totalorder %s26364_s28, %s26360_s3 }
  0x1d   : > { %p531_p4 = scmp.eq.s32.totalorder %s19127_s0, 1  ;;  %p19128_p7 = scmp.ge.s32.totalorder %s26372_s30, 1 }
  0x1e   : > { %s26553_s24 = scalar_select %p512_p1, %s26368_s29, %s514_s1  }
  0x1f   : > { %p26555_p5 = por %p525_p2, %p524_p0  ;;  %p26559_p6 = por %p531_p4, %p530_p3 }
  0x20   : > { %32838 = sst [smem:[#allocation33_spill]] %s26553_s24  ;;  %p538_p8 = scmp.lt.s32.totalorder %s26372_s30, 3 }
  0x21   : > { %s32839_s6 = scalar_select %p26555_p5, 1, 0 }
  0x22   : > { %s32841_s25 = scalar_select %p26559_p6, 1, 0 }
  0x23   : > { %32840 = sst [smem:[#allocation34_spill]] %s32839_s6  ;;  %p32783_p9 = scmp.eq.s32.totalorder %s26538_s4, 0 }
  0x24   : > { %32842 = sst [smem:[#allocation35_spill]] %s32841_s25  ;;  %p26566_p10 = pnand %p19128_p7, %p538_p8 }
  0x25   : > { %s26374_s2 = smov [#allocation9]   ;;  %s26375_s1 = smov [#allocation12]  }
  0x26   : > { %s32843_s26 = scalar_select %p26566_p10, 1, 0 }
  0x27   : > { %s567_s27 = sshll.u32 %s26374_s2, 4  ;;  %p24076_p11 = pneg %p26566_p10  ;;  %s26572_s27 = int_to_ptr.vmem [resolvable:$true] %s567_s27 }
  0x28   : > { %s594_s5 = sshll.u32 %s26375_s1, 4  ;;  %s26376_s24 = smov [#allocation15]   ;;  %s26580_s5 = int_to_ptr.vmem [resolvable:$true] %s594_s5 }
  0x29   : > { %p26576_p12 = pnand %p32783_p9, %p24076_p11  ;;  %s26582_s29 = sshll.u32 %s26376_s24, 4  ;;  %s628_s29 = int_to_ptr.vmem [resolvable:$true] %s26582_s29 }
  0x2a   : > { %s32845_s2 = sld [smem:[#allocation64_spill]] }
  0x2b   : > { %p26592_p0 = pneg %p26576_p12 }
  0x30   : > { %s26038_s3 = scalar_lea.hbm %s32845_s2, 256 }
  0x31   : > { %p26039_p13 = scmp.ne.s32.totalorder %s32845_s2, %s26038_s3  ;;  %p26045_p3 = scmp.lt.u32.totalorder %s26038_s3, %s32845_s2 }
  0x33   : > { %p26041_p1 = pnand %p26592_p0, %p26039_p13 }
  0x35   : > { %p26042_p2 = pneg %p26041_p1 }
  0x37   : > { %p26047_p4 = pnand %p26045_p3, %p26042_p2 }
  0x39   : > { %26050 = shalt.err (!%p26047_p4)
}
  0x3a   : > { %s26051_s22 = scalar_lea.vmem %s26572_s27, 256  ;;  %p26059_p9 = scmp.lt.s32.totalorder %s26572_s27, %s26572_s27 }
  0x3b   : > { %p26052_p7 = scmp.ne.s32.totalorder %s26572_s27, %s26051_s22  ;;  %p26060_p6 = scmp.lt.s32.totalorder %s26051_s22, %s26051_s22 }
  0x3d   : > { %p26054_p8 = pnand %p26052_p7, %p26592_p0  ;;  %p26061_p13 = por %p26060_p6, %p26059_p9 }
  0x3f   : > { %p26055_p11 = pneg %p26054_p8 }
  0x41   : > { %p26062_p1 = pnand %p26061_p13, %p26055_p11 }
  0x43   : > { %26065 = shalt.err (!%p26062_p1)
}
  0x44   : > { %s26377_s30 = smov 64   ;;  %s26378_s3 = smov 4  }
  0x45   : > { %24082 = dma.hbm_to_vmem [thread:$0]  (!%p26576_p12), %s32845_s2, 256, %s26572_s27, [#allocation10], %s26377_s30, %s26377_s30, %s26378_s3  }
  0x46   : > { %s32847_s21 = sld [smem:[#allocation66_spill]] }
  0x4c   : > { %s26066_s28 = scalar_lea.hbm %s32847_s21, 48 }
  0x4d   : > { %p26067_p6 = scmp.ne.s32.totalorder %s32847_s21, %s26066_s28  ;;  %p26073_p3 = scmp.lt.u32.totalorder %s26066_s28, %s32847_s21 }
  0x4f   : > { %p26069_p9 = pnand %p26067_p6, %p26592_p0 }
  0x51   : > { %p26070_p2 = pneg %p26069_p9 }
  0x53   : > { %p26075_p4 = pnand %p26073_p3, %p26070_p2 }
  0x55   : > { %26078 = shalt.err (!%p26075_p4)
}
  0x56   : > { %s26079_s27 = scalar_lea.vmem %s26580_s5, 48  ;;  %s26086_s19 = scalar_lea.vmem %s26580_s5, 64 }
  0x57   : > { %p26080_p7 = scmp.ne.s32.totalorder %s26580_s5, %s26079_s27  ;;  %p26087_p13 = scmp.lt.s32.totalorder %s26580_s5, %s26580_s5 }
  0x58   : > { %p26088_p1 = scmp.lt.s32.totalorder %s26086_s19, %s26079_s27 }
  0x59   : > { %p26082_p8 = pnand %p26080_p7, %p26592_p0 }
  0x5a   : > { %p26089_p6 = por %p26088_p1, %p26087_p13 }
  0x5b   : > { %p26083_p11 = pneg %p26082_p8 }
  0x5d   : > { %p26090_p9 = pnand %p26089_p6, %p26083_p11 }
  0x5f   : > { %26093 = shalt.err (!%p26090_p9)
}
  0x60   : > { %24088 = dma.hbm_to_vmem [thread:$0]  (!%p26576_p12), %s32847_s21, 48, %s26580_s5, [#allocation13]  }
  0x61   : > { %s32848_s11 = sld [smem:[#allocation67_spill]] }
  0x67   : > { %s26094_s3 = scalar_lea.hbm %s32848_s11, 48 }
  0x68   : > { %p26095_p2 = scmp.ne.s32.totalorder %s32848_s11, %s26094_s3  ;;  %p26101_p7 = scmp.lt.u32.totalorder %s26094_s3, %s32848_s11 }
  0x6a   : > { %p26097_p3 = pnand %p26095_p2, %p26592_p0 }
  0x6c   : > { %p26098_p4 = pneg %p26097_p3 }
  0x6e   : > { %p26103_p8 = pnand %p26101_p7, %p26098_p4 }
  0x70   : > { %26106 = shalt.err (!%p26103_p8)
}
  0x71   : > { %s26107_s22 = scalar_lea.vmem %s628_s29, 48  ;;  %s26114_s5 = scalar_lea.vmem %s628_s29, 64 }
  0x72   : > { %p26108_p11 = scmp.ne.s32.totalorder %s628_s29, %s26107_s22  ;;  %p26115_p6 = scmp.lt.s32.totalorder %s628_s29, %s628_s29 }
  0x73   : > { %p26116_p9 = scmp.lt.s32.totalorder %s26114_s5, %s26107_s22 }
  0x74   : > { %p26110_p13 = pnand %p26108_p11, %p26592_p0 }
  0x75   : > { %p26117_p5 = por %p26116_p9, %p26115_p6 }
  0x76   : > { %p26111_p1 = pneg %p26110_p13 }
  0x78   : > { %p26118_p10 = pnand %p26117_p5, %p26111_p1 }
  0x7a   : > { %26121 = shalt.err (!%p26118_p10)
}
  0x7b   : > { %24094 = dma.hbm_to_vmem [thread:$0]  (!%p26576_p12), %s32848_s11, 48, %s628_s29, [#allocation16]  }
  0x7c   : > { %s26379_s17 = smov [#allocation18]   ;;  %s26380_s28 = smov [#allocation6]  }
  0x7d   : > { %s660_s20 = sshll.u32 %s26379_s17, 4  ;;  %s557_s30 = sshll.u32 %s26380_s28, 4  ;;  %s661_s20 = int_to_ptr.vmem [resolvable:$true] %s660_s20  ;;  %s558_s30 = int_to_ptr.vmem [resolvable:$true] %s557_s30 }
  0x7e   : > { %s26122_s25 = scalar_lea.hbm %s32761_s16, 48 }
  0x7f   : > { %p26123_p5 = scmp.ne.s32.totalorder %s32761_s16, %s26122_s25  ;;  %p26129_p3 = scmp.lt.u32.totalorder %s26122_s25, %s32761_s16 }
  0x81   : > { %p26125_p10 = pnand %p26123_p5, %p26592_p0 }
  0x83   : > { %p26126_p2 = pneg %p26125_p10 }
  0x85   : > { %p26131_p4 = pnand %p26129_p3, %p26126_p2 }
  0x87   : > { %26134 = shalt.err (!%p26131_p4)
}
  0x88   : > { %s26135_s29 = scalar_lea.vmem %s661_s20, 48  ;;  %s26142_s27 = scalar_lea.vmem %s661_s20, 64 }
  0x89   : > { %p26136_p7 = scmp.ne.s32.totalorder %s661_s20, %s26135_s29  ;;  %p26143_p13 = scmp.lt.s32.totalorder %s661_s20, %s661_s20 }
  0x8a   : > { %p26144_p1 = scmp.lt.s32.totalorder %s26142_s27, %s26135_s29 }
  0x8b   : > { %p26138_p8 = pnand %p26136_p7, %p26592_p0 }
  0x8c   : > { %p26145_p6 = por %p26144_p1, %p26143_p13 }
  0x8d   : > { %p26139_p11 = pneg %p26138_p8 }
  0x8f   : > { %p26146_p9 = pnand %p26145_p6, %p26139_p11 }
  0x91   : > { %26149 = shalt.err (!%p26146_p9)
}
  0x92   : > { %24100 = dma.hbm_to_vmem [thread:$0]  (!%p26576_p12), %s32761_s16, 48, %s661_s20, [#allocation19]  }
  0x93   : > { %s32849_s23 = sld [smem:[#allocation63_spill]] }
  0x99   : > { %s26150_s25 = scalar_lea.hbm %s32849_s23, 48 }
  0x9a   : > { %p26151_p5 = scmp.ne.s32.totalorder %s32849_s23, %s26150_s25  ;;  %p26157_p3 = scmp.lt.u32.totalorder %s26150_s25, %s32849_s23 }
  0x9c   : > { %p26153_p10 = pnand %p26151_p5, %p26592_p0 }
  0x9e   : > { %p26154_p2 = pneg %p26153_p10 }
  0xa0   : > { %p26159_p4 = pnand %p26157_p3, %p26154_p2 }
  0xa2   : > { %26162 = shalt.err (!%p26159_p4)
}
  0xa3   : > { %s26163_s29 = scalar_lea.vmem %s558_s30, 48  ;;  %s26170_s20 = scalar_lea.vmem %s558_s30, 64 }
  0xa4   : > { %p26164_p7 = scmp.ne.s32.totalorder %s558_s30, %s26163_s29  ;;  %p26171_p13 = scmp.lt.s32.totalorder %s558_s30, %s558_s30 }
  0xa5   : > { %p26172_p1 = scmp.lt.s32.totalorder %s26170_s20, %s26163_s29 }
  0xa6   : > { %p26166_p8 = pnand %p26164_p7, %p26592_p0 }
  0xa7   : > { %p26173_p6 = por %p26172_p1, %p26171_p13 }
  0xa8   : > { %p26167_p11 = pneg %p26166_p8 }
  0xaa   : > { %p26174_p9 = pnand %p26173_p6, %p26167_p11 }
  0xac   : > { %26177 = shalt.err (!%p26174_p9)
}
  0xad   : > { %24079 = dma.hbm_to_vmem [thread:$0]  (!%p26576_p12), %s32849_s23, 48, %s558_s30, [#allocation7]  }
  0xae   : > { %s26381_s17 = smov [#allocation11]   ;;  %s32850_s1 = sld [smem:[#allocation65_spill]] }
  0xaf   : > { %s580_s28 = sshll.u32 %s26381_s17, 4  ;;  %s581_s28 = int_to_ptr.vmem [resolvable:$true] %s580_s28 }
  0xb4   : > { %s26178_s24 = scalar_lea.hbm %s32850_s1, 41472 }
  0xb5   : > { %p26179_p5 = scmp.ne.s32.totalorder %s32850_s1, %s26178_s24  ;;  %p26185_p3 = scmp.lt.u32.totalorder %s26178_s24, %s32850_s1 }
  0xb7   : > { %p26181_p10 = pnand %p26179_p5, %p26592_p0 }
  0xb9   : > { %p26182_p2 = pneg %p26181_p10 }
  0xbb   : > { %p26187_p4 = pnand %p26185_p3, %p26182_p2 }
  0xbd   : > { %26190 = shalt.err (!%p26187_p4)
}
  0xbe   : > { %s26191_s30 = scalar_lea.vmem %s581_s28, 41472  ;;  %p26199_p13 = scmp.lt.s32.totalorder %s581_s28, %s581_s28 }
  0xbf   : > { %p26192_p7 = scmp.ne.s32.totalorder %s581_s28, %s26191_s30  ;;  %p26200_p1 = scmp.lt.s32.totalorder %s26191_s30, %s26191_s30 }
  0xc1   : > { %p26194_p8 = pnand %p26192_p7, %p26592_p0  ;;  %p26201_p6 = por %p26200_p1, %p26199_p13 }
  0xc3   : > { %p26195_p11 = pneg %p26194_p8 }
  0xc5   : > { %p26202_p9 = pnand %p26201_p6, %p26195_p11 }
  0xc7   : > { %26205 = shalt.err (!%p26202_p9)
}
  0xc8   : > { %s26382_s27 = smov 192   ;;  %s26383_s19 = smov 12  }
  0xc9   : > { %24085 = dma.hbm_to_vmem [thread:$0]  (!%p26576_p12), %s32850_s1, 41472, %s581_s28, [#allocation10], %s26382_s27, %s26382_s27, %s26383_s19  }
  0xca   : > { %s26384_s25 = smov [#allocation14]   ;;  %s26206_s29 = scalar_lea.hbm %s32754_s9, 128 }
  0xcb   : > { %s610_s24 = sshll.u32 %s26384_s25, 4  ;;  %p26207_p5 = scmp.ne.s32.totalorder %s32754_s9, %s26206_s29  ;;  %s611_s24 = int_to_ptr.vmem [resolvable:$true] %s610_s24 }
  0xcc   : > { %p26213_p3 = scmp.lt.u32.totalorder %s26206_s29, %s32754_s9 }
  0xcd   : > { %p26209_p10 = pnand %p26207_p5, %p26592_p0 }
  0xcf   : > { %p26210_p2 = pneg %p26209_p10 }
  0xd1   : > { %p26215_p4 = pnand %p26213_p3, %p26210_p2 }
  0xd3   : > { %26218 = shalt.err (!%p26215_p4)
}
  0xd4   : > { %s26219_s28 = scalar_lea.vmem %s611_s24, 128  ;;  %p26227_p13 = scmp.lt.s32.totalorder %s611_s24, %s611_s24 }
  0xd5   : > { %p26220_p7 = scmp.ne.s32.totalorder %s611_s24, %s26219_s28  ;;  %p26228_p1 = scmp.lt.s32.totalorder %s26219_s28, %s26219_s28 }
  0xd7   : > { %p26222_p8 = pnand %p26220_p7, %p26592_p0  ;;  %p26229_p6 = por %p26228_p1, %p26227_p13 }
  0xd9   : > { %p26223_p11 = pneg %p26222_p8 }
  0xdb   : > { %p26230_p9 = pnand %p26229_p6, %p26223_p11 }
  0xdd   : > { %26233 = shalt.err (!%p26230_p9)
}
  0xde   : > { %s26385_s27 = smov 32   ;;  %s26386_s19 = smov 2  }
  0xdf   : > { %24091 = dma.hbm_to_vmem [thread:$0]  (!%p26576_p12), %s32754_s9, 128, %s611_s24, [#allocation13], %s26385_s27, %s26385_s27, %s26386_s19  }
  0xe0   : > { %s26387_s17 = smov [#allocation17]   ;;  %s26234_s5 = scalar_lea.hbm %s32759_s14, 64 }
  0xe1   : > { %s643_s3 = sshll.u32 %s26387_s17, 4  ;;  %p26235_p5 = scmp.ne.s32.totalorder %s32759_s14, %s26234_s5  ;;  %s644_s3 = int_to_ptr.vmem [resolvable:$true] %s643_s3 }
  0xe2   : > { %p26241_p3 = scmp.lt.u32.totalorder %s26234_s5, %s32759_s14 }
  0xe3   : > { %p26237_p10 = pnand %p26235_p5, %p26592_p0 }
  0xe5   : > { %p26238_p2 = pneg %p26237_p10 }
  0xe7   : > { %p26243_p4 = pnand %p26241_p3, %p26238_p2 }
  0xe9   : > { %26246 = shalt.err (!%p26243_p4)
}
  0xea   : > { %s26247_s24 = scalar_lea.vmem %s644_s3, 64  ;;  %p26255_p13 = scmp.lt.s32.totalorder %s644_s3, %s644_s3 }
  0xeb   : > { %p26248_p7 = scmp.ne.s32.totalorder %s644_s3, %s26247_s24  ;;  %p26256_p1 = scmp.lt.s32.totalorder %s26247_s24, %s26247_s24 }
  0xed   : > { %p26250_p8 = pnand %p26248_p7, %p26592_p0  ;;  %p26257_p6 = por %p26256_p1, %p26255_p13 }
  0xef   : > { %p26251_p11 = pneg %p26250_p8 }
  0xf1   : > { %p26258_p9 = pnand %p26257_p6, %p26251_p11 }
  0xf3   : > { %26261 = shalt.err (!%p26258_p9)
}
  0xf4   : > { %s26388_s27 = smov 16   ;;  %s26389_s19 = smov 1  }
  0xf5   : > { %24097 = dma.hbm_to_vmem [thread:$0]  (!%p26576_p12), %s32759_s14, 64, %s644_s3, [#allocation16], %s26388_s27, %s26388_s27, %s26389_s19  }
  0xf6   : > { %s26390_s17 = smov [#allocation20]   ;;  %s26262_s29 = scalar_lea.hbm %s32763_s18, 9216 }
  0xf7   : > { %s673_s25 = sshll.u32 %s26390_s17, 4  ;;  %p26263_p5 = scmp.ne.s32.totalorder %s32763_s18, %s26262_s29  ;;  %s674_s25 = int_to_ptr.vmem [resolvable:$true] %s673_s25 }
  0xf8   : > { %p26269_p3 = scmp.lt.u32.totalorder %s26262_s29, %s32763_s18 }
  0xf9   : > { %p26265_p10 = pnand %p26263_p5, %p26592_p0 }
  0xfb   : > { %p26266_p2 = pneg %p26265_p10 }
  0xfd   : > { %p26271_p4 = pnand %p26269_p3, %p26266_p2 }
  0xff   : > { %26274 = shalt.err (!%p26271_p4)
}
 0x100   : > { %s26275_s3 = scalar_lea.vmem %s674_s25, 9216  ;;  %p26283_p13 = scmp.lt.s32.totalorder %s674_s25, %s674_s25 }
 0x101   : > { %p26276_p7 = scmp.ne.s32.totalorder %s674_s25, %s26275_s3  ;;  %p26284_p1 = scmp.lt.s32.totalorder %s26275_s3, %s26275_s3 }
 0x103   : > { %p26278_p8 = pnand %p26276_p7, %p26592_p0  ;;  %p26285_p6 = por %p26284_p1, %p26283_p13 }
 0x105   : > { %p26279_p11 = pneg %p26278_p8 }
 0x107   : > { %p26286_p9 = pnand %p26285_p6, %p26279_p11 }
 0x109   : > { %26289 = shalt.err (!%p26286_p9)
}
 0x10a   : > { %s26391_s27 = smov 384   ;;  %s26392_s19 = smov 24  }
 0x10b   : > { %24103 = dma.hbm_to_vmem [thread:$0]  (!%p26576_p12), %s32763_s18, 9216, %s674_s25, [#allocation19], %s26391_s27, %s26391_s27, %s26392_s19  }
 0x10c   : > { %p32851_p5 = scmp.ne.s32.totalorder %s32843_s26, 0 }
 0x10e   : > { %706 = sbr.rel (%p32851_p5) target bundleno = 8953 (0x22f9), region = 108 }
 0x115   : > { %p32852_p10 = scmp.eq.s32.totalorder %s26538_s4, 0 }
 0x117   : > { %26335 = dma.done.wait (%p32852_p10), [#allocation7], 48   ;;  %p32853_p0 = pmov %p32852_p10 }
 0x119   : > { %26337 = vsyncadd (%p32853_p0), [#allocation7], 4294967248  ;;  %p32854_p2 = pmov %p32853_p0 }
 0x11a   : > { %p32855_p3 = pmov %p32853_p0 }
 0x11b   : > { %26339 = dma.done.wait (%p32854_p2), [#allocation10], 41728  }
 0x11c   : > { %26341 = vsyncadd (%p32855_p3), [#allocation10], 4294925568  ;;  %p32856_p4 = pmov %p32853_p0 }
 0x11d   : > { %p32857_p12 = pmov %p32853_p0 }
 0x11e   : > { %26343 = dma.done.wait (%p32856_p4), [#allocation13], 176  }
 0x11f   : > { %26345 = vsyncadd (%p32857_p12), [#allocation13], 4294967120  ;;  %p32858_p7 = pmov %p32853_p0 }
 0x120   : > { %p32859_p8 = pmov %p32853_p0 }
 0x121   : > { %26347 = dma.done.wait (%p32858_p7), [#allocation16], 112  }
 0x122   : > { %26349 = vsyncadd (%p32859_p8), [#allocation16], 4294967184  ;;  %p32860_p11 = pmov %p32853_p0 }
 0x123   : > { %p32861_p13 = pmov %p32853_p0 }
 0x124   : > { %26351 = dma.done.wait (%p32860_p11), [#allocation19], 9264  }
 0x125   : > { %26353 = vsyncadd (%p32861_p13), [#allocation19], 4294958032  ;;  %p800_p1 = scmp.lt.s32.totalorder %s26538_s4, 1  ;;  %v26393_v0 = vmov 0.0   ;;  %vm26394_vm0 = vmmov 0   ;;  %s32862_s25 = sld [smem:[#allocation60_spill]] }
 0x126   : > { %22913 = vmatprep.subr.bf16.mxu1 %v26393_v0  ;;  %806 = vst [vmem:[#allocation2] sm:$0xff] %v26393_v0  ;;  %807 = vst [vmem:[#allocation2 + $0x8] sm:$0xff] %v26393_v0  ;;  %22919 = vmatprep.mubr.msk.bf16.mxu1 %vm26394_vm0, %v26393_v0  ;;  %vm864_vm1 = vcmask 1040384   ;;  %s32863_s20 = sld [smem:[#allocation62_spill]]  ;;  %s32864_s24 = sld [smem:[#allocation61_spill]]  ;;  %vm860_vm2 = vcmask 277504  }
 0x127   : > { %808 = vst [vmem:[#allocation2 + $0x10] sm:$0xff] %v26393_v0  ;;  %811 = vst [vmem:[#allocation2 + $0x20] sm:$0xff] %v26393_v0  ;;  %s801_s6 = scalar_select %p800_p1, %s26538_s4, 1  ;;  %22903 = vmatprep.subr.bf16.mxu0 %v26393_v0  ;;  %22909 = vmatprep.mubr.msk.bf16.mxu0 %vm26394_vm0, %v26393_v0  ;;  %vm1124_vm3 = vcmask 1042432   ;;  %v32791_v37 = vmov 0   ;;  %vm1120_vm4 = vcmask 834560  }
 0x128   : > { %815 = vst [vmem:[#allocation2 + $0x40] sm:$0x3] %v26393_v0  ;;  %816 = vst [vmem:[#allocation2 + $0x48] sm:$0x3] %v26393_v0  ;;  %vm809_vm5 = vcmask 392192   ;;  %s26396_s28 = smov 24  }
 0x129   : > { %817 = vst [vmem:[#allocation2 + $0x50] sm:$0x3] %v26393_v0  ;;  %820 = vst [vmem:[#allocation3] sm:$0xff] %v26393_v0  ;;  %s24037_s26 = smul.u32 40, %s801_s6  ;;  %vm818_vm12 = vcmask 386048   ;;  %vm2064_vm13 = vcmask 195584  }
 0x12a   : > { %821 = vst [vmem:[#allocation3 + $0x8] sm:$0xff] %v26393_v0  ;;  %822 = vst [vmem:[#allocation3 + $0x10] sm:$0xff] %v26393_v0  ;;  %vm2087_vm14 = vcmask 195585   ;;  %vm2098_vm15 = vcmask 188416   ;;  %s26398_s29 = smov 48   ;;  %s26399_s27 = smov 96  }
 0x12b   : > { %825 = vst [vmem:[#allocation3 + $0x20] sm:$0x3] %v26393_v0  ;;  %826 = vst [vmem:[#allocation3 + $0x28] sm:$0x3] %v26393_v0  ;;  %s804_s22 = scalar_lea.vmem %s32862_s25, %s24037_s26  ;;  %s32865_s17 = sld [smem:[#allocation68_spill]] }
 0x12c   : > { %827 = vst [vmem:[#allocation3 + $0x30] sm:$0x3] %v26393_v0  ;;  %830 = vst [vmem:[#allocation4] sm:$0x3f] %v26393_v0  ;;  %v845_v1 = vld [vmem:[%s804_s22] sm:$0xff]  ;;  %v846_v2 = vld [vmem:[%s804_s22 + $0x8] sm:$0xff] }
 0x12d   : > { %831 = vst [vmem:[#allocation4 + $0x8] sm:$0x3f] %v26393_v0  ;;  %832 = vst [vmem:[#allocation4 + $0x10] sm:$0x3f] %v26393_v0  ;;  %v847_v3 = vld [vmem:[%s804_s22 + $0x10] sm:$0xff]  ;;  %v26823_v4 = vpack.c.bf16 %v846_v2, %v845_v1  ;;  %v848_v5 = vld [vmem:[%s804_s22 + $0x18] sm:$0xff] }
 0x12e   : > { %833 = vst [vmem:[#allocation4 + $0x18] sm:$0x3f] %v26393_v0  ;;  %836 = vst [vmem:[#allocation5] sm:$0x1f] %v26393_v0  ;;  %v849_v6 = vld [vmem:[%s804_s22 + $0x20] sm:$0x3]  ;;  %v26826_v7 = vpack.c.bf16 %v848_v5, %v847_v3 }
 0x12f   : > { %837 = vst [vmem:[#allocation5 + $0x8] sm:$0x1f] %v26393_v0  ;;  %838 = vst [vmem:[#allocation5 + $0x10] sm:$0x1f] %v26393_v0  ;;  %22914 = vmatpush3.bf16.msra.mxu1 %v26823_v4  ;;  %22904 = vmatpush3.bf16.msra.mxu0 %v26823_v4  ;;  %v852_v8 = vpack.c.bf16 %v849_v6, %v849_v6  ;;  %v24190_v10 = vld [vmem:[%s32863_s20 + $0xa0] ss:$12 sps:$4 sm:$0xff]  }
 0x130   : > { %839 = vst [vmem:[#allocation5 + $0x18] sm:$0x1f] %v26393_v0  ;;  %840 = vst [vmem:[#allocation5 + $0x20] sm:$0x1f] %v26393_v0  ;;  %22915 = vmatprep.subr.bf16.mxu1 %v26393_v0  ;;  %22905 = vmatprep.subr.bf16.mxu0 %v26393_v0  ;;  %v24186_v11 = vld [vmem:[%s32864_s24 + $0x8] sm:$0xff]   ;;  %v24187_v12 = vld [vmem:[%s32864_s24] sm:$0xff]  }
 0x131   : > { %841 = vst [vmem:[#allocation5 + $0x28] sm:$0x1f] %v26393_v0  ;;  %842 = vst [vmem:[#allocation5 + $0x30] sm:$0x1f] %v26393_v0  ;;  %v26835_v9 = vsel %vm864_vm1, %v852_v8, 0  ;;  %v26945_v54 = vld [vmem:[#allocation2] sm:$0xff] }
 0x132   : > { %v24188_v13 = vld [vmem:[%s32863_s20 + $0x9c] ss:$12 sps:$4 sm:$0xff]   ;;  %v24191_v14 = vld [vmem:[%s32863_s20 + $0xa4] ss:$12 sps:$4 sm:$0xff]   ;;  %v24192_v16 = vld [vmem:[%s32863_s20 + $0xb4] ss:$12 sps:$4 sm:$0xff]  }
 0x133   : > { %22916 = vmatpush3.bf16.msra.mxu1 %v26826_v7  ;;  %22906 = vmatpush3.bf16.msra.mxu0 %v26826_v7  ;;  %v24194_v15 = vld [vmem:[%s32863_s20 + $0xb8] ss:$12 sps:$4 sm:$0xff]   ;;  %v24195_v17 = vld [vmem:[%s32863_s20 + $0xbc] ss:$12 sps:$4 sm:$0xff]   ;;  %v24199_v20 = vld [vmem:[%s32863_s20 + $0xd4] ss:$12 sps:$4 sm:$0xff]  }
 0x134   : > { %22917 = vmatprep.subr.bf16.mxu1 %v26393_v0  ;;  %22907 = vmatprep.subr.bf16.mxu0 %v26393_v0  ;;  %v24198_v18 = vld [vmem:[%s32863_s20 + $0xd0] ss:$12 sps:$4 sm:$0xff]   ;;  %v24196_v19 = vld [vmem:[%s32863_s20 + $0xcc] ss:$12 sps:$4 sm:$0xff]   ;;  %v24202_v21 = vld [vmem:[%s32863_s20 + $0xe8] ss:$12 sps:$4 sm:$0xff]  }
 0x135   : > { %v24200_v22 = vld [vmem:[%s32863_s20 + $0xe4] ss:$12 sps:$4 sm:$0xff]   ;;  %v24203_v23 = vld [vmem:[%s32863_s20 + $0xec] ss:$12 sps:$4 sm:$0xff]   ;;  %v24204_v25 = vld [vmem:[%s32863_s20 + $0xfc] ss:$12 sps:$4 sm:$0xff]  }
 0x136   : > { %v24206_v24 = vld [vmem:[%s32863_s20 + $0x100] ss:$12 sps:$4 sm:$0xff]   ;;  %v24207_v26 = vld [vmem:[%s32863_s20 + $0x104] ss:$12 sps:$4 sm:$0xff]   ;;  %v24211_v29 = vld [vmem:[%s32863_s20 + $0x11c] ss:$12 sps:$4 sm:$0xff]  }
 0x137   : > { %22918 = vmatpush3.bf16.msra.mxu1 %v26835_v9  ;;  %22908 = vmatpush3.bf16.msra.mxu0 %v26835_v9  ;;  %v24210_v27 = vld [vmem:[%s32863_s20 + $0x118] ss:$12 sps:$4 sm:$0xff]   ;;  %v24208_v28 = vld [vmem:[%s32863_s20 + $0x114] ss:$12 sps:$4 sm:$0xff]   ;;  %v19181_v30 = vld [vmem:[%s32863_s20 + $0x12c] sm:$0x77] }
 0x138   : > { %1134 = vmatprep.subr.bf16.mxu0 %v24190_v10  ;;  %22923 = vmatprep.subr.bf16.mxu1 %v26393_v0  ;;  %v19202_v31 = vcombine.high %v19181_v30, %v19181_v30  ;;  %v19201_v32 = vcombine.low %v19181_v30, %v19181_v30  ;;  %v24214_v33 = vld [vmem:[%s32863_s20 + $0x134] ss:$0 sps:$4 sm:$0x77]   ;;  %v24217_v36 = vld [vmem:[%s32863_s20 + $0x4] ss:$12 sps:$4 sm:$0xff]   ;;  %s32916_s5 = sld [smem:[#allocation69_spill]] }
 0x139   : > { %v1132_v35 = vsel %vm1124_vm3, %v24214_v33, 0  ;;  %v24215_v39 = vld [vmem:[%s32863_s20] ss:$12 sps:$4 sm:$0xff]   ;;  %v24218_v40 = vld [vmem:[%s32863_s20 + $0x8] ss:$12 sps:$4 sm:$0xff]   ;;  %s32918_s2 = sld [smem:[#allocation29_spill]] }
 0x13a   : > { %22920 = vmatmul.mubr.msk.bf16.vlgmr.msra.gmra.mrb[0].mxu1 %vm860_vm2, %v24186_v11  ;;  %22910 = vmatmul.mubr.msk.bf16.vlgmr.msra.gmra.mrb[0].mxu0 %vm860_vm2, %v24187_v12  ;;  %v1126_v34 = vsel %vm1124_vm3, %v19201_v32, 0  ;;  %v24221_v43 = vld [vmem:[%s32863_s20 + $0x1c] ss:$12 sps:$4 sm:$0xff]   ;;  %v24219_v51 = vld [vmem:[%s32863_s20 + $0x18] ss:$12 sps:$4 sm:$0xff]   ;;  %v24242_v11 = vld [vmem:[%s32864_s24 + $0x10] sm:$0xff]  }
 0x13b   : > { %1135 = vmatpush1.bf16.msra.mxu0 %v24188_v13  ;;  %22924 = vmatpush3.bf16.msra.mxu1 %v24191_v14  ;;  %v24222_v52 = vld [vmem:[%s32863_s20 + $0x20] ss:$12 sps:$4 sm:$0xff]   ;;  %v24223_v55 = vld [vmem:[%s32863_s20 + $0x30] ss:$12 sps:$4 sm:$0xff]   ;;  %v24226_v56 = vld [vmem:[%s32863_s20 + $0x38] ss:$12 sps:$4 sm:$0xff]  }
 0x13c   : > { %1136 = vmatprep.subr.bf16.mxu0 %v24194_v15  ;;  %22925 = vmatprep.subr.bf16.mxu1 %v26393_v0  ;;  %v24225_v53 = vld [vmem:[%s32863_s20 + $0x34] ss:$12 sps:$4 sm:$0xff]   ;;  %v24229_v57 = vld [vmem:[%s32863_s20 + $0x4c] ss:$12 sps:$4 sm:$0xff]   ;;  %v24230_v59 = vld [vmem:[%s32863_s20 + $0x50] ss:$12 sps:$4 sm:$0xff]  }
 0x13d   : > { %22937 = vmatprep.mubr.msk.bf16.mxu1 %vm26394_vm0, %v26393_v0  ;;  %1166 = vmatprep.mubr.bf16.mxu0 %v32791_v37  ;;  %v24227_v58 = vld [vmem:[%s32863_s20 + $0x48] ss:$12 sps:$4 sm:$0xff]   ;;  %v24233_v60 = vld [vmem:[%s32863_s20 + $0x64] ss:$12 sps:$4 sm:$0xff]   ;;  %v24231_v61 = vld [vmem:[%s32863_s20 + $0x60] ss:$12 sps:$4 sm:$0xff]  }
 0x13e   : > { %v24234_v62 = vld [vmem:[%s32863_s20 + $0x68] ss:$12 sps:$4 sm:$0xff]   ;;  %v24235_v1 = vld [vmem:[%s32863_s20 + $0x78] ss:$12 sps:$4 sm:$0xff]   ;;  %v24238_v2 = vld [vmem:[%s32863_s20 + $0x80] ss:$12 sps:$4 sm:$0xff]  }
 0x13f   : > { %1137 = vmatpush1.bf16.msra.mxu0 %v24192_v16  ;;  %22926 = vmatpush3.bf16.msra.mxu1 %v24195_v17  ;;  %v24237_v63 = vld [vmem:[%s32863_s20 + $0x7c] ss:$12 sps:$4 sm:$0xff]   ;;  %v24241_v3 = vld [vmem:[%s32863_s20 + $0x98] ss:$0 sps:$4 sm:$0x77]   ;;  %s797_s6 = sand.u32 1, %s32918_s2  }
 0x140   : > { %1138 = vmatprep.subr.bf16.mxu0 %v24198_v18  ;;  %22927 = vmatprep.subr.bf16.mxu1 %v26393_v0  ;;  %v1332_v10 = vsel %vm1124_vm3, %v24241_v3, 0  ;;  %v24243_v12 = vld [vmem:[%s32863_s20 + $0x138] ss:$12 sps:$4 sm:$0xff]   ;;  %v24245_v13 = vld [vmem:[%s32863_s20 + $0x13c] ss:$12 sps:$4 sm:$0xff]   ;;  %s19149_s26 = sshll.u32 %s797_s6, 1 }
 0x141   : > { %v24246_v14 = vld [vmem:[%s32863_s20 + $0x140] ss:$12 sps:$4 sm:$0xff]   ;;  %v24247_v16 = vld [vmem:[%s32863_s20 + $0x150] ss:$12 sps:$4 sm:$0xff]   ;;  %v24250_v17 = vld [vmem:[%s32863_s20 + $0x158] ss:$12 sps:$4 sm:$0xff]  }
 0x142   : > { %v24249_v15 = vld [vmem:[%s32863_s20 + $0x154] ss:$12 sps:$4 sm:$0xff]   ;;  %v24253_v18 = vld [vmem:[%s32863_s20 + $0x16c] ss:$12 sps:$4 sm:$0xff]   ;;  %v24293_v3 = vld [vmem:[%s32863_s20 + $0x250] ss:$12 sps:$4 sm:$0xff]  }
 0x143   : > { %1139 = vmatpush1.bf16.msra.mxu0 %v24196_v19  ;;  %22928 = vmatpush3.bf16.msra.mxu1 %v24199_v20  ;;  %v24254_v19 = vld [vmem:[%s32863_s20 + $0x170] ss:$12 sps:$4 sm:$0xff]   ;;  %v24251_v20 = vld [vmem:[%s32863_s20 + $0x168] ss:$12 sps:$4 sm:$0xff]   ;;  %s32919_s22 = sld [smem:[#allocation71_spill]]  ;;  %s21960_s30 = sshll.u32 %s26538_s4, 5 }
 0x144   : > { %1140 = vmatprep.subr.bf16.mxu0 %v24202_v21  ;;  %22929 = vmatprep.subr.bf16.mxu1 %v26393_v0  ;;  %v24257_v21 = vld [vmem:[%s32863_s20 + $0x184] ss:$12 sps:$4 sm:$0xff]   ;;  %v19259_v30 = vld [vmem:[%s32863_s20 + $0x1c8] sm:$0x77]  ;;  %s32921_s2 = sld [smem:[#allocation72_spill]]  ;;  %s18967_s0 = scalar_lea.sflag [#allocation8], %s797_s6 }
 0x145   : > { %v19280_v32 = vcombine.high %v19259_v30, %v19259_v30  ;;  %v19279_v33 = vcombine.low %v19259_v30, %v19259_v30 }
 0x147   : > { %1141 = vmatpush1.bf16.msra.mxu0 %v24200_v22  ;;  %22930 = vmatpush3.bf16.msra.mxu1 %v24203_v23  ;;  %v24258_v22 = vld [vmem:[%s32863_s20 + $0x188] ss:$12 sps:$4 sm:$0xff]   ;;  %v24255_v23 = vld [vmem:[%s32863_s20 + $0x180] ss:$12 sps:$4 sm:$0xff]  }
 0x148   : > { %1142 = vmatprep.subr.bf16.mxu0 %v24206_v24  ;;  %22931 = vmatprep.subr.bf16.mxu1 %v26393_v0  ;;  %v24259_v24 = vld [vmem:[%s32863_s20 + $0x198] ss:$12 sps:$4 sm:$0xff]  }
 0x14a   : > { %s32703_s1 = scalar_lea.hbm %s32921_s2, %s21960_s30 }
 0x14b   : > { %1143 = vmatpush1.bf16.msra.mxu0 %v24204_v25  ;;  %22932 = vmatpush3.bf16.msra.mxu1 %v24207_v26  ;;  %v24261_v25 = vld [vmem:[%s32863_s20 + $0x19c] ss:$12 sps:$4 sm:$0xff]   ;;  %v24262_v26 = vld [vmem:[%s32863_s20 + $0x1a0] ss:$12 sps:$4 sm:$0xff]  }
 0x14c   : > { %1144 = vmatprep.subr.bf16.mxu0 %v24210_v27  ;;  %22933 = vmatprep.subr.bf16.mxu1 %v26393_v0  ;;  %v24263_v27 = vld [vmem:[%s32863_s20 + $0x1b0] ss:$12 sps:$4 sm:$0xff]  }
 0x14f   : > { %1145 = vmatpush1.bf16.msra.mxu0 %v24208_v28  ;;  %22934 = vmatpush3.bf16.msra.mxu1 %v24211_v29  ;;  %v24265_v28 = vld [vmem:[%s32863_s20 + $0x1b4] ss:$12 sps:$4 sm:$0xff]   ;;  %v24266_v29 = vld [vmem:[%s32863_s20 + $0x1b8] ss:$12 sps:$4 sm:$0xff]  }
 0x150   : > { %22935 = vmatprep.subr.bf16.mxu1 %v26393_v0  ;;  %19204 = vmatprep.subr.msk.bf16.mxu0 %vm1124_vm3, %v19202_v31  ;;  %v24268_v31 = vld [vmem:[%s32863_s20 + $0x1d0] ss:$0 sps:$4 sm:$0x77]  }
 0x153   : > { %1147 = vmatpush1.bf16.msra.mxu0 %v1126_v34  ;;  %22936 = vmatpush3.bf16.msra.mxu1 %v1132_v35  ;;  %v1612_v34 = vsel %vm1124_vm3, %v24268_v31, 0  ;;  %v1606_v35 = vsel %vm1124_vm3, %v19279_v33, 0 }
 0x154   : > { %22941 = vmatprep.subr.bf16.mxu1 %v26393_v0  ;;  %1334 = vmatprep.subr.bf16.mxu0 %v24217_v36  ;;  %v934_v0 = vld [vmem:[%s32863_s20 + $0x90] sm:$0x77]  ;;  %v24273_v36 = vld [vmem:[%s32863_s20 + $0x1d8] ss:$12 sps:$4 sm:$0xff]  }
 0x155   : > { %v19226_v5 = vcombine.high %v934_v0, %v934_v0  ;;  %v19225_v6 = vcombine.low %v934_v0, %v934_v0  ;;  %v24289_v0 = vld [vmem:[%s32863_s20 + $0x238] ss:$12 sps:$4 sm:$0xff]  }
 0x157   : > { %v1326_v8 = vsel %vm1124_vm3, %v19225_v6, 0  ;;  %v19313_v6 = vld [vmem:[%s32863_s20 + $0x264] sm:$0x77] }
 0x20d   : > { %v981_v38 = vpop.f32.mrb[0].mxu1  ;;  %v902_v41 = vpop.f32.mrb[0].mxu0 }
 0x20e   : > { %v22921_v42 = vpop.f32.mrb[1].mxu1  ;;  %v22911_v44 = vpop.f32.mrb[1].mxu0 }
 0x20f   : > { %v984_v45 = vpop.f32.mrb[2].mxu1  ;;  %v905_v46 = vpop.f32.mrb[2].mxu0 }
 0x210   : > { %v988_v47 = vpack.c.bf16 %v984_v45, %v981_v38  ;;  %v22922_v48 = vpop.f32.mrb[3].mxu1  ;;  %v909_v49 = vpack.c.bf16 %v905_v46, %v902_v41  ;;  %v22912_v50 = vpop.f32.mrb[3].mxu0 }
 0x211   : > { %v24271_v50 = vld [vmem:[%s32863_s20 + $0x1d4] ss:$12 sps:$4 sm:$0xff]  }
 0x212   : > { %19205 = vmatmul.mubr.msk.bf16.vlgmr.msra.gmra.mrb[4].mxu0 %vm1120_vm4, %v988_v47  ;;  %22938 = vmatmul.mubr.msk.bf16.vlgmr.msra.gmra.mrb[4].mxu1 %vm1120_vm4, %v988_v47 }
 0x213   : > { %1335 = vmatpush1.bf16.msra.mxu0 %v24215_v39  ;;  %22942 = vmatpush3.bf16.msra.mxu1 %v24218_v40 }
 0x214   : > { %1336 = vmatprep.subr.bf16.mxu0 %v24221_v43  ;;  %22943 = vmatprep.subr.bf16.mxu1 %v26945_v54 }
 0x215   : > { %1366 = vmatprep.mubr.bf16.mxu0 %v32791_v37  ;;  %22955 = vmatprep.mubr.msk.bf16.mxu1 %vm26394_vm0, %v26945_v54 }
 0x217   : > { %1337 = vmatpush1.bf16.msra.mxu0 %v24219_v51  ;;  %22944 = vmatpush3.bf16.msra.mxu1 %v24222_v52  ;;  %v24277_v52 = vld [vmem:[%s32863_s20 + $0x1f0] ss:$12 sps:$4 sm:$0xff]  }
 0x218   : > { %1338 = vmatprep.subr.bf16.mxu0 %v24225_v53  ;;  %22945 = vmatprep.subr.bf16.mxu1 %v26945_v54 }
 0x21b   : > { %1339 = vmatpush1.bf16.msra.mxu0 %v24223_v55  ;;  %22946 = vmatpush3.bf16.msra.mxu1 %v24226_v56  ;;  %v24275_v55 = vld [vmem:[%s32863_s20 + $0x1ec] ss:$12 sps:$4 sm:$0xff]   ;;  %v26035_v56 = vld [vmem:[#allocation2] sm:$0xff] }
 0x21c   : > { %1340 = vmatprep.subr.bf16.mxu0 %v24229_v57  ;;  %22947 = vmatprep.subr.bf16.mxu1 %v26945_v54  ;;  %v24281_v57 = vld [vmem:[%s32863_s20 + $0x208] ss:$12 sps:$4 sm:$0xff]  }
 0x21f   : > { %1341 = vmatpush1.bf16.msra.mxu0 %v24227_v58  ;;  %22948 = vmatpush3.bf16.msra.mxu1 %v24230_v59  ;;  %v24279_v58 = vld [vmem:[%s32863_s20 + $0x204] ss:$12 sps:$4 sm:$0xff]   ;;  %v24274_v59 = vld [vmem:[%s32863_s20 + $0x1dc] ss:$12 sps:$4 sm:$0xff]  }
 0x220   : > { %1342 = vmatprep.subr.bf16.mxu0 %v24233_v60  ;;  %22949 = vmatprep.subr.bf16.mxu1 %v26945_v54  ;;  %v24278_v60 = vld [vmem:[%s32863_s20 + $0x1f4] ss:$12 sps:$4 sm:$0xff]  }
 0x223   : > { %1343 = vmatpush1.bf16.msra.mxu0 %v24231_v61  ;;  %22950 = vmatpush3.bf16.msra.mxu1 %v24234_v62  ;;  %v24283_v61 = vld [vmem:[%s32863_s20 + $0x21c] ss:$12 sps:$4 sm:$0xff]   ;;  %v24286_v62 = vld [vmem:[%s32863_s20 + $0x224] ss:$12 sps:$4 sm:$0xff]  }
 0x224   : > { %1344 = vmatprep.subr.bf16.mxu0 %v24237_v63  ;;  %22951 = vmatprep.subr.bf16.mxu1 %v26945_v54  ;;  %v24287_v63 = vld [vmem:[%s32863_s20 + $0x234] ss:$12 sps:$4 sm:$0xff]  }
 0x227   : > { %1345 = vmatpush1.bf16.msra.mxu0 %v24235_v1  ;;  %22952 = vmatpush3.bf16.msra.mxu1 %v24238_v2  ;;  %v24290_v1 = vld [vmem:[%s32863_s20 + $0x23c] ss:$12 sps:$4 sm:$0xff]   ;;  %v24291_v2 = vld [vmem:[%s32863_s20 + $0x24c] ss:$12 sps:$4 sm:$0xff]  }
 0x228   : > { %19228 = vmatprep.subr.msk.bf16.mxu0 %vm1124_vm3, %v19226_v5  ;;  %22953 = vmatprep.subr.bf16.mxu1 %v26945_v54  ;;  %v24294_v5 = vld [vmem:[%s32863_s20 + $0x254] ss:$12 sps:$4 sm:$0xff]  }
 0x22b   : > { %1347 = vmatpush1.bf16.msra.mxu0 %v1326_v8  ;;  %22954 = vmatpush3.bf16.msra.mxu1 %v1332_v10  ;;  %v19334_v8 = vcombine.high %v19313_v6, %v19313_v6  ;;  %v19333_v10 = vcombine.low %v19313_v6, %v19313_v6 }
 0x22c   : > { %22959 = vmatprep.subr.bf16.mxu0 %v26945_v54  ;;  %22969 = vmatprep.subr.bf16.mxu1 %v26945_v54 }
 0x22e   : > { %19229 = vmatmul.mubr.msk.bf16.vlgmr.msra.gmra.mrb[4].mxu0 %vm1120_vm4, %v909_v49  ;;  %22956 = vmatmul.mubr.msk.bf16.vlgmr.msra.gmra.mrb[8].mxu1 %vm1120_vm4, %v909_v49 }
 0x22f   : > { %22960 = vmatpush3.bf16.msra.mxu0 %v26823_v4  ;;  %22965 = vmatprep.mubr.msk.bf16.mxu0 %vm26394_vm0, %v26945_v54 }
 0x230   : > { %22961 = vmatprep.subr.bf16.mxu0 %v26945_v54  ;;  %22983 = vmatprep.mubr.msk.bf16.mxu1 %vm26394_vm0, %v26945_v54 }
 0x231   : > { %22970 = vmatpush3.bf16.msra.mxu1 %v24246_v14 }
 0x232   : > { %22971 = vmatprep.subr.bf16.mxu1 %v26945_v54 }
 0x233   : > { %22962 = vmatpush3.bf16.msra.mxu0 %v26826_v7 }
 0x234   : > { %22963 = vmatprep.subr.bf16.mxu0 %v26945_v54 }
 0x235   : > { %22972 = vmatpush3.bf16.msra.mxu1 %v24250_v17 }
 0x236   : > { %22973 = vmatprep.subr.bf16.mxu1 %v26945_v54 }
 0x237   : > { %22964 = vmatpush3.bf16.msra.mxu0 %v26835_v9 }
 0x238   : > { %1614 = vmatprep.subr.bf16.mxu0 %v24245_v13 }
 0x239   : > { %22974 = vmatpush3.bf16.msra.mxu1 %v24254_v19 }
 0x23a   : > { %22966 = vmatmul.mubr.msk.bf16.vlgmr.msra.gmra.mrb[8].mxu0 %vm860_vm2, %v24242_v11  ;;  %22975 = vmatprep.subr.bf16.mxu1 %v26945_v54  ;;  %v24297_v11 = vld [vmem:[%s32863_s20 + $0x26c] ss:$0 sps:$4 sm:$0x77]  }
 0x23b   : > { %1646 = vmatprep.mubr.bf16.mxu0 %v32791_v37  ;;  %1615 = vmatpush1.bf16.msra.mxu0 %v24243_v12  ;;  %v1892_v12 = vsel %vm1124_vm3, %v19333_v10, 0  ;;  %v1898_v13 = vsel %vm1124_vm3, %v24297_v11, 0 }
 0x23c   : > { %1616 = vmatprep.subr.bf16.mxu0 %v24249_v15 }
 0x23d   : > { %22976 = vmatpush3.bf16.msra.mxu1 %v24258_v22 }
 0x23e   : > { %22977 = vmatprep.subr.bf16.mxu1 %v26945_v54 }
 0x23f   : > { %1617 = vmatpush1.bf16.msra.mxu0 %v24247_v16 }
 0x240   : > { %1618 = vmatprep.subr.bf16.mxu0 %v24253_v18 }
 0x241   : > { %22978 = vmatpush3.bf16.msra.mxu1 %v24262_v26 }
 0x242   : > { %22979 = vmatprep.subr.bf16.mxu1 %v26945_v54 }
 0x243   : > { %1619 = vmatpush1.bf16.msra.mxu0 %v24251_v20 }
 0x244   : > { %1620 = vmatprep.subr.bf16.mxu0 %v24257_v21 }
 0x245   : > { %22980 = vmatpush3.bf16.msra.mxu1 %v24266_v29 }
 0x246   : > { %22981 = vmatprep.subr.bf16.mxu1 %v26945_v54 }
 0x247   : > { %1621 = vmatpush1.bf16.msra.mxu0 %v24255_v23 }
 0x248   : > { %1622 = vmatprep.subr.bf16.mxu0 %v24261_v25  ;;  %v1992_v25 = vlaneseq }
 0x249   : > { %22982 = vmatpush3.bf16.msra.mxu1 %v1612_v34  ;;  %v26036_v34 = vld [vmem:[#allocation2] sm:$0xff] }
 0x24a   : > { %22987 = vmatprep.subr.bf16.mxu1 %v26945_v54  ;;  %v1993_v26 = vshrl.u32 %v1992_v25, 7  ;;  %810 = vst.msk [vmem:[#allocation2 + $0x18] sm:$0xff] %vm809_vm5, %v26036_v34  ;;  %814 = vst.msk [vmem:[#allocation2 + $0x38] sm:$0xff] %vm809_vm5, %v26036_v34 }
 0x24b   : > { %1623 = vmatpush1.bf16.msra.mxu0 %v24259_v24  ;;  %819 = vst.msk [vmem:[#allocation2 + $0x58] sm:$0x3] %vm818_vm12, %v26036_v34  ;;  %vm6084_vm12 = vcmask 392193  }
 0x24c   : > { %1624 = vmatprep.subr.bf16.mxu0 %v24265_v28  ;;  %v1990_v28 = vld [vmem:[#allocation6] sm:$0x7]  ;;  %v27173_v29 = vsub.s32 1, %v1993_v26  ;;  %v27175_v30 = vsub.s32 2, %v1993_v26 }
 0x24e   : > { %v2003_v33 = vrot.slane %v1990_v28, %v27175_v30 }
 0x24f   : > { %1625 = vmatpush1.bf16.msra.mxu0 %v24263_v27  ;;  %v27171_v27 = vsub.s32 0, %v1993_v26 }
 0x250   : > { %19282 = vmatprep.subr.msk.bf16.mxu0 %vm1124_vm3, %v19280_v32  ;;  %v1999_v32 = vrot.slane %v1990_v28, %v27173_v29 }
 0x251   : > { %v1995_v31 = vrot.slane %v1990_v28, %v27171_v27 }
 0x253   : > { %1627 = vmatpush1.bf16.msra.mxu0 %v1606_v35 }
 0x254   : > { %1900 = vmatprep.subr.bf16.mxu0 %v24273_v36 }
 0x2e5   : > { %v1211_v38 = vpop.f32.mrb[4].mxu1 }
 0x2e6   : > { %v22939_v39 = vpop.f32.mrb[5].mxu1 }
 0x2e7   : > { %v1214_v40 = vpop.f32.mrb[6].mxu1 }
 0x2e8   : > { %v22940_v41 = vpop.f32.mrb[7].mxu1 }
 0x301   : > { %v1411_v42 = vpop.f32.mrb[8].mxu1 }
 0x302   : > { %v27089_v43 = vadd.f32 %v1411_v42, %v1211_v38  ;;  %v22957_v44 = vpop.f32.mrb[9].mxu1 }
 0x303   : > { %v1414_v45 = vpop.f32.mrb[10].mxu1 }
 0x304   : > { %v27091_v46 = vadd.f32 %v1414_v45, %v1214_v40  ;;  %v22958_v47 = vpop.f32.mrb[11].mxu1 }
 0x30d   : > { %v1463_v48 = vpop.f32.mrb[8].mxu0 }
 0x30e   : > { %v22967_v49 = vpop.f32.mrb[9].mxu0 }
 0x30f   : > { %v1466_v51 = vpop.f32.mrb[10].mxu0 }
 0x310   : > { %v1470_v53 = vpack.c.bf16 %v1466_v51, %v1463_v48  ;;  %v22968_v54 = vpop.f32.mrb[11].mxu0 }
 0x312   : > { %19283 = vmatmul.mubr.msk.bf16.vlgmr.msra.gmra.mrb[4].mxu0 %vm1120_vm4, %v1470_v53  ;;  %22984 = vmatmul.mubr.msk.bf16.vlgmr.msra.gmra.mrb[12].mxu1 %vm1120_vm4, %v1470_v53 }
 0x313   : > { %22988 = vmatpush3.bf16.msra.mxu1 %v26823_v4  ;;  %22993 = vmatprep.mubr.msk.bf16.mxu1 %vm26394_vm0, %v26035_v56  ;;  %v24270_v4 = vld [vmem:[%s32864_s24 + $0x18] sm:$0xff]  }
 0x314   : > { %22989 = vmatprep.subr.bf16.mxu1 %v26035_v56  ;;  %1901 = vmatpush1.bf16.msra.mxu0 %v24271_v50 }
 0x315   : > { %1902 = vmatprep.subr.bf16.mxu0 %v24277_v52  ;;  %1932 = vmatprep.mubr.bf16.mxu0 %v32791_v37 }
 0x317   : > { %22990 = vmatpush3.bf16.msra.mxu1 %v26826_v7  ;;  %v24282_v7 = vld [vmem:[%s32863_s20 + $0x20c] ss:$12 sps:$4 sm:$0xff]  }
 0x318   : > { %22991 = vmatprep.subr.bf16.mxu1 %v26035_v56  ;;  %1903 = vmatpush1.bf16.msra.mxu0 %v24275_v55 }
 0x319   : > { %1904 = vmatprep.subr.bf16.mxu0 %v24281_v57 }
 0x31b   : > { %22992 = vmatpush3.bf16.msra.mxu1 %v26835_v9  ;;  %v24285_v9 = vld [vmem:[%s32863_s20 + $0x220] ss:$12 sps:$4 sm:$0xff]  }
 0x31c   : > { %22997 = vmatprep.subr.bf16.mxu1 %v26035_v56  ;;  %1905 = vmatpush1.bf16.msra.mxu0 %v24279_v58 }
 0x31d   : > { %1906 = vmatprep.subr.bf16.mxu0 %v24285_v9 }
 0x31e   : > { %22994 = vmatmul.mubr.msk.bf16.vlgmr.msra.gmra.mrb[16].mxu1 %vm860_vm2, %v24270_v4  ;;  %vm2083_vm2 = vcmask 1047745  }
 0x31f   : > { %22998 = vmatpush3.bf16.msra.mxu1 %v24274_v59  ;;  %23011 = vmatprep.mubr.msk.bf16.mxu1 %vm26394_vm0, %v26035_v56 }
 0x320   : > { %22999 = vmatprep.subr.bf16.mxu1 %v26035_v56  ;;  %1907 = vmatpush1.bf16.msra.mxu0 %v24283_v61 }
 0x321   : > { %1908 = vmatprep.subr.bf16.mxu0 %v24289_v0 }
 0x323   : > { %23000 = vmatpush3.bf16.msra.mxu1 %v24278_v60 }
 0x324   : > { %23001 = vmatprep.subr.bf16.mxu1 %v26035_v56  ;;  %1909 = vmatpush1.bf16.msra.mxu0 %v24287_v63 }
 0x325   : > { %1910 = vmatprep.subr.bf16.mxu0 %v24293_v3 }
 0x327   : > { %23002 = vmatpush3.bf16.msra.mxu1 %v24282_v7 }
 0x328   : > { %23003 = vmatprep.subr.bf16.mxu1 %v26035_v56  ;;  %1911 = vmatpush1.bf16.msra.mxu0 %v24291_v2 }
 0x329   : > { %19336 = vmatprep.subr.msk.bf16.mxu0 %vm1124_vm3, %v19334_v8 }
 0x32b   : > { %23004 = vmatpush3.bf16.msra.mxu1 %v24286_v62 }
 0x32c   : > { %23005 = vmatprep.subr.bf16.mxu1 %v26035_v56  ;;  %1913 = vmatpush1.bf16.msra.mxu0 %v1892_v12 }
 0x32f   : > { %23006 = vmatpush3.bf16.msra.mxu1 %v24290_v1 }
 0x330   : > { %23007 = vmatprep.subr.bf16.mxu1 %v26035_v56 }
 0x333   : > { %23008 = vmatpush3.bf16.msra.mxu1 %v24294_v5 }
 0x334   : > { %23009 = vmatprep.subr.bf16.mxu1 %v26035_v56 }
 0x337   : > { %23010 = vmatpush3.bf16.msra.mxu1 %v1898_v13 }
 0x3e5   : > { %v1691_v14 = vpop.f32.mrb[12].mxu1 }
 0x3e6   : > { %v22985_v15 = vpop.f32.mrb[13].mxu1  ;;  %v1700_v16 = vadd.f32 %v1691_v14, %v27089_v43 }
 0x3e7   : > { %v1694_v17 = vpop.f32.mrb[14].mxu1 }
 0x3e8   : > { %v22986_v18 = vpop.f32.mrb[15].mxu1  ;;  %v1703_v19 = vadd.f32 %v1694_v17, %v27091_v46 }
 0x3f1   : > { %v1749_v20 = vpop.f32.mrb[16].mxu1 }
 0x3f2   : > { %v22995_v21 = vpop.f32.mrb[17].mxu1 }
 0x3f3   : > { %v1752_v22 = vpop.f32.mrb[18].mxu1 }
 0x3f4   : > { %v1756_v23 = vpack.c.bf16 %v1752_v22, %v1749_v20  ;;  %v22996_v24 = vpop.f32.mrb[19].mxu1 }
 0x3f6   : > { %19337 = vmatmul.mubr.msk.bf16.vlgmr.msra.gmra.mrb[4].mxu0 %vm1120_vm4, %v1756_v23  ;;  %23012 = vmatmul.mubr.msk.bf16.vlgmr.msra.gmra.mrb[20].mxu1 %vm1120_vm4, %v1756_v23  ;;  %vm2089_vm4 = vcmask 1047744  }
 0x3f7   : > { %2409 = vmatprep.mubr.bf16.mxu1 %v32791_v37  ;;  %2169 = vmatprep.mubr.bf16.mxu0 %v32791_v37 }
 0x4c9   : > { %v1934_v35 = vpop.f32.mrb[4].mxu0  ;;  %v1977_v36 = vpop.f32.mrb[20].mxu1 }
 0x4ca   : > { %v2007_v38 = vadd.f32 %v1995_v31, %v1934_v35  ;;  %v1986_v39 = vadd.f32 %v1977_v36, %v1700_v16  ;;  %v1936_v40 = vpop.f32.mrb[5].mxu0  ;;  %v23013_v41 = vpop.f32.mrb[21].mxu1 }
 0x4cb   : > { %v2008_v42 = vadd.f32 %v1999_v32, %v1936_v40  ;;  %v1938_v43 = vpop.f32.mrb[6].mxu0  ;;  %v1980_v44 = vpop.f32.mrb[22].mxu1 }
 0x4cc   : > { %v2019_v45 = vmul.f32 0.2, %v2007_v38  ;;  %v2009_v46 = vadd.f32 %v2003_v33, %v1986_v39  ;;  %v2010_v47 = vadd.f32 %v1995_v31, %v1938_v43  ;;  %v1989_v48 = vadd.f32 %v1980_v44, %v1703_v19  ;;  %v1940_v49 = vpop.f32.mrb[7].mxu0  ;;  %v23014_v50 = vpop.f32.mrb[23].mxu1  ;;  %v2332_v43 = vld [vmem:[#allocation9 + $0x4] sm:$0xf] }
 0x4cd   : > { %v2011_v51 = vadd.f32 %v1999_v32, %v1940_v49  ;;  %vm2014_vm6 = vcmp.ge.f32.partialorder %v2008_v42, 0.0  ;;  %v2020_v52 = vmul.f32 0.2, %v2008_v42  ;;  %vm2013_vm7 = vcmp.ge.f32.partialorder %v2007_v38, 0.0  ;;  %v24306_v49 = vld [vmem:[#allocation11 + $0x424] ss:$12 sps:$4 sm:$0xff]  }
 0x4ce   : > { %v2021_v53 = vmul.f32 0.2, %v2009_v46  ;;  %vm2016_vm8 = vcmp.ge.f32.partialorder %v2010_v47, 0.0  ;;  %v2022_v54 = vmul.f32 0.2, %v2010_v47  ;;  %v2012_v55 = vadd.f32 %v2003_v33, %v1989_v48 }
 0x4cf   : > { %v2023_v56 = vmul.f32 0.2, %v2011_v51  ;;  %v2026_v57 = vsel %vm2014_vm6, %v2008_v42, %v2020_v52  ;;  %vm2017_vm9 = vcmp.ge.f32.partialorder %v2011_v51, 0.0  ;;  %vm2015_vm10 = vcmp.ge.f32.partialorder %v2009_v46, 0.0 }
 0x4d0   : > { %vm2018_vm11 = vcmp.ge.f32.partialorder %v2012_v55, 0.0  ;;  %v2024_v58 = vmul.f32 0.2, %v2012_v55  ;;  %v2038_v4 = vrot.slane %v2026_v57, 7  ;;  %v2027_v59 = vsel %vm2015_vm10, %v2009_v46, %v2021_v53  ;;  %v24298_v46 = vld [vmem:[#allocation11 + $0x408] ss:$12 sps:$4 sm:$0xff]  }
 0x4d1   : > { %v2029_v60 = vsel %vm2017_vm9, %v2011_v51, %v2023_v56  ;;  %v2025_v7 = vsel %vm2013_vm7, %v2007_v38, %v2019_v45  ;;  %v2028_v9 = vsel %vm2016_vm8, %v2010_v47, %v2022_v54  ;;  %v2039_v1 = vrot.slane %v2027_v59, 7  ;;  %v24300_v38 = vld [vmem:[#allocation11 + $0x40c] ss:$12 sps:$4 sm:$0xff]   ;;  %v24312_v53 = vld [vmem:[#allocation11 + $0x43c] ss:$12 sps:$4 sm:$0xff]  }
 0x4d2   : > { %2048 = vrot.lane.b32.xlu0 %v2038_v4, %s26396_s28  ;;  %v2042_v61 = vrot.slane %v2029_v60, 7  ;;  %v2030_v62 = vsel %vm2018_vm11, %v2012_v55, %v2024_v58  ;;  %v2037_v63 = vrot.slane %v2025_v7, 7  ;;  %v2040_v0 = vrot.slane %v2028_v9, 7  ;;  %v24304_v51 = vld [vmem:[#allocation11 + $0x420] ss:$12 sps:$4 sm:$0xff]  }
 0x4d3   : > { %v2044_v2 = vrot.slane %v2030_v62, 7  ;;  %vm2094_vm6 = vcmask 1040576   ;;  %vm2121_vm7 = vcmask 146432   ;;  %v2120_v54 = vld [vmem:[#allocation9] sm:$0xf]  ;;  %vm828_vm8 = vcmask 779264  }
 0x4d4   : > { %v2043_v3 = vsel %vm864_vm1, %v2038_v4, %v2042_v61  ;;  %v2041_v5 = vsel %vm864_vm1, %v2037_v63, %v2040_v0  ;;  %v24310_v55 = vld [vmem:[#allocation11 + $0x438] ss:$12 sps:$4 sm:$0xff]   ;;  %v24318_v56 = vld [vmem:[#allocation11 + $0x454] ss:$12 sps:$4 sm:$0xff]   ;;  %v24316_v57 = vld [vmem:[#allocation11 + $0x450] ss:$12 sps:$4 sm:$0xff]  }
 0x4d5   : > { %2054 = vrot.lane.b32.xlu1 %v2043_v3, %s26396_s28  ;;  %v2045_v6 = vsel %vm864_vm1, %v2039_v1, %v2044_v2  ;;  %v24324_v58 = vld [vmem:[#allocation11 + $0x46c] ss:$12 sps:$4 sm:$0xff]   ;;  %v24322_v4 = vld [vmem:[#allocation11 + $0x468] ss:$12 sps:$4 sm:$0xff]   ;;  %v24330_v59 = vld [vmem:[#allocation11 + $0x484] ss:$12 sps:$4 sm:$0xff]  }
 0x4d6   : > { %2050 = vrot.lane.b32.xlu0 %v2039_v1, %s26396_s28  ;;  %v24303_v60 = vld [vmem:[#allocation11 + $0x28c] ss:$12 sps:$4 sm:$0xff]   ;;  %v24336_v9 = vld [vmem:[#allocation11 + $0x49c] ss:$12 sps:$4 sm:$0xff]   ;;  %v24309_v62 = vld [vmem:[#allocation11 + $0x2a4] ss:$12 sps:$4 sm:$0xff]  }
 0x4d7   : > { %v24328_v7 = vld [vmem:[#allocation11 + $0x480] ss:$12 sps:$4 sm:$0xff]   ;;  %v24340_v3 = vld [vmem:[#allocation11 + $0x4b0] ss:$12 sps:$4 sm:$0xff]  }
 0x4d8   : > { %v24307_v1 = vld [vmem:[#allocation11 + $0x2a0] ss:$12 sps:$4 sm:$0xff]  }
 0x4d9   : > { %2056 = vrot.lane.b32.xlu1 %v2045_v6, %s26396_s28  ;;  %v24313_v6 = vld [vmem:[#allocation11 + $0x2b8] ss:$12 sps:$4 sm:$0xff]  }
 0x4da   : > { %2060 = vrot.lane.b32.xlu0 %v2042_v61, %s26396_s28  ;;  %v24301_v61 = vld [vmem:[#allocation11 + $0x288] ss:$12 sps:$4 sm:$0xff]  }
 0x4dd   : > { %2062 = vrot.lane.b32.xlu1 %v2044_v2, %s26396_s28  ;;  %v24315_v2 = vld [vmem:[#allocation11 + $0x2bc] ss:$12 sps:$4 sm:$0xff]  }
 0x4de   : > { %2046 = vrot.lane.b32.xlu0 %v2037_v63, %s26396_s28  ;;  %v24334_v63 = vld [vmem:[#allocation11 + $0x498] ss:$12 sps:$4 sm:$0xff]  }
 0x4e1   : > { %2052 = vrot.lane.b32.xlu1 %v2041_v5, %s26396_s28  ;;  %v24348_v5 = vld [vmem:[#allocation11 + $0x4cc] ss:$12 sps:$4 sm:$0xff]  }
 0x4e2   : > { %2058 = vrot.lane.b32.xlu0 %v2040_v0, %s26396_s28  ;;  %v24342_v0 = vld [vmem:[#allocation11 + $0x4b4] ss:$12 sps:$4 sm:$0xff]   ;;  %s799_s28 = scalar_lea.vmem [#allocation21], %s19149_s26  ;;  %s26401_s26 = smov [#allocation21]  }
 0x4e3   : > { %s18980_s3 = sshll.u32 %s799_s28, 4  ;;  %s26294_s25 = sshll.u32 %s26401_s26, 4  ;;  %s32705_s3 = int_to_ptr.vmem [resolvable:$true] %s18980_s3  ;;  %s26295_s25 = int_to_ptr.vmem [resolvable:$false] %s26294_s25 }
 0x4e4   : > { %s26290_s4 = scalar_lea.vmem %s32705_s3, 32  ;;  %p26297_p0 = scmp.lt.s32.totalorder %s32705_s3, %s26295_s25 }
 0x4e5   : > { %p26291_p6 = scmp.ne.s32.totalorder %s32705_s3, %s26290_s4 }
 0x544   : > { %v2049_v8 = vpop.permute.xlu0 %2048 }
 0x547   : > { %v2055_v10 = vpop.permute.xlu1 %2054 }
 0x548   : > { %v2051_v11 = vpop.permute.xlu0 %2050 }
 0x549   : > { %v2066_v12 = vsel %vm2064_vm13, %v2049_v8, %v2051_v11  ;;  %2088 = vst.msk [vmem:[#allocation2 + $0x18] sm:$0xfe] %vm2087_vm14, %v2051_v11  ;;  %v24354_v11 = vld [vmem:[#allocation11 + $0x4e4] ss:$12 sps:$4 sm:$0xff]   ;;  %vm6080_vm14 = vcmask 1047937  }
 0x54a   : > { %2086 = vst [vmem:[#allocation2 + $0x10] sm:$0xfe] %v2066_v12  ;;  %v24319_v12 = vld [vmem:[#allocation11 + $0x2d0] ss:$12 sps:$4 sm:$0xff]  }
 0x54b   : > { %v2057_v13 = vpop.permute.xlu1 %2056 }
 0x54c   : > { %v2068_v14 = vsel %vm2064_vm13, %v2055_v10, %v2057_v13  ;;  %2093 = vst.msk [vmem:[#allocation2 + $0x38] sm:$0xff] %vm2064_vm13, %v2057_v13  ;;  %v2061_v15 = vpop.permute.xlu0 %2060  ;;  %v24327_v13 = vld [vmem:[#allocation11 + $0x2ec] ss:$12 sps:$4 sm:$0xff]  }
 0x54f   : > { %v2063_v16 = vpop.permute.xlu1 %2062 }
 0x550   : > { %v2070_v17 = vsel %vm2064_vm13, %v2061_v15, %v2063_v16  ;;  %2099 = vst.msk [vmem:[#allocation2 + $0x58] sm:$0x1] %vm2098_vm15, %v2063_v16  ;;  %v2047_v18 = vpop.permute.xlu0 %2046  ;;  %v2103_v22 = vld [vmem:[#allocation2 + $0x18] sm:$0xff]  ;;  %v24333_v16 = vld [vmem:[#allocation11 + $0x304] ss:$12 sps:$4 sm:$0xff]   ;;  %vm6086_vm15 = vcmask 1040768  }
 0x551   : > { %2097 = vst [vmem:[#allocation2 + $0x50] sm:$0x1] %v2070_v17  ;;  %v2065_v19 = vsel %vm2064_vm13, %v2047_v18, %v2049_v8  ;;  %2084 = vst.msk [vmem:[#allocation2] sm:$0xfe] %vm2083_vm2, %v2047_v18  ;;  %v2102_v20 = vld [vmem:[#allocation2 + $0x10] sm:$0xff]  ;;  %vm6109_vm2 = vcmask 1044480  }
 0x552   : > { %2085 = vst [vmem:[#allocation2 + $0x8] sm:$0xfe] %v2065_v19  ;;  %v27194_v31 = vpack.c.bf16 %v2068_v14, %v2102_v20  ;;  %v24321_v8 = vld [vmem:[#allocation11 + $0x2d4] ss:$12 sps:$4 sm:$0xff]   ;;  %v24339_v18 = vld [vmem:[#allocation11 + $0x31c] ss:$12 sps:$4 sm:$0xff]  }
 0x553   : > { %v2053_v21 = vpop.permute.xlu1 %2052  ;;  %v2107_v23 = vld [vmem:[#allocation2 + $0x38] sm:$0xff]  ;;  %v24337_v19 = vld [vmem:[#allocation11 + $0x318] ss:$12 sps:$4 sm:$0xff]  }
 0x554   : > { %v2067_v24 = vsel %vm2064_vm13, %v2053_v21, %v2055_v10  ;;  %2090 = vst.msk [vmem:[#allocation2 + $0x20] sm:$0xff] %vm2089_vm4, %v2053_v21  ;;  %v2059_v25 = vpop.permute.xlu0 %2058  ;;  %v27191_v26 = vpack.c.bf16 %v2107_v23, %v2103_v22  ;;  %v24346_v10 = vld [vmem:[#allocation11 + $0x4c8] ss:$12 sps:$4 sm:$0xff]   ;;  %v24352_v14 = vld [vmem:[#allocation11 + $0x4e0] ss:$12 sps:$4 sm:$0xff]   ;;  %vm9570_vm4 = vcmask 1043456  }
 0x555   : > { %v2069_v28 = vsel %vm2064_vm13, %v2059_v25, %v2061_v15  ;;  %2095 = vst.msk [vmem:[#allocation2 + $0x40] sm:$0x1] %vm2094_vm6, %v2059_v25  ;;  %v24325_v15 = vld [vmem:[#allocation11 + $0x2e8] ss:$12 sps:$4 sm:$0xff]   ;;  %v24331_v17 = vld [vmem:[#allocation11 + $0x300] ss:$12 sps:$4 sm:$0xff]  }
 0x556   : > { %2096 = vst [vmem:[#allocation2 + $0x48] sm:$0x1] %v2069_v28  ;;  %2377 = vmatprep.subr.bf16.mxu1 %v27191_v26  ;;  %v24345_v20 = vld [vmem:[#allocation11 + $0x334] ss:$12 sps:$4 sm:$0xff]   ;;  %v24343_v21 = vld [vmem:[#allocation11 + $0x330] ss:$12 sps:$4 sm:$0xff]  }
 0x557   : > { %2378 = vmatpush1.bf16.msra.mxu1 %v27194_v31  ;;  %v2111_v32 = vld [vmem:[#allocation2 + $0x58] sm:$0x3]  ;;  %v24351_v22 = vld [vmem:[#allocation11 + $0x34c] ss:$12 sps:$4 sm:$0xff]   ;;  %v24349_v23 = vld [vmem:[#allocation11 + $0x348] ss:$12 sps:$4 sm:$0xff]  }
 0x558   : > { %v27198_v33 = vpack.c.bf16 %v2111_v32, %v2111_v32  ;;  %v2110_v34 = vld [vmem:[#allocation2 + $0x50] sm:$0x3]  ;;  %v2100_v41 = vld [vmem:[#allocation2] sm:$0xff]  ;;  %v24355_v25 = vld [vmem:[#allocation11 + $0x360] ss:$12 sps:$4 sm:$0xff]   ;;  %vm6090_vm13 = vcmask 385024  }
 0x559   : > { %v2118_v35 = vpack.c.bf16 %v2110_v34, %v2110_v34  ;;  %v2101_v36 = vld [vmem:[#allocation2 + $0x8] sm:$0xff]  ;;  %v24358_v28 = vld [vmem:[#allocation11 + $0x4f8] ss:$12 sps:$4 sm:$0xff]   ;;  %v24360_v32 = vld [vmem:[#allocation11 + $0x4fc] ss:$12 sps:$4 sm:$0xff]  }
 0x55a   : > { %19345 = vmatprep.subr.msk.bf16.mxu1 %vm864_vm1, %v27198_v33  ;;  %v27202_v39 = vpack.c.bf16 %v2067_v24, %v2101_v36  ;;  %v24357_v24 = vld [vmem:[#allocation11 + $0x364] ss:$12 sps:$4 sm:$0xff]  }
 0x55b   : > { %v27205_v40 = vsel %vm864_vm1, %v2118_v35, 0  ;;  %v2104_v42 = vld [vmem:[#allocation2 + $0x20] sm:$0xff]  ;;  %v24364_v36 = vld [vmem:[#allocation11 + $0x350] ss:$12 sps:$4 sm:$0xff]  }
 0x55c   : > { %2380 = vmatpush1.bf16.msra.mxu1 %v27205_v40  ;;  %2137 = vmatprep.subr.bf16.mxu0 %v27202_v39  ;;  %v27209_v44 = vpack.c.bf16 %v2104_v42, %v2100_v41  ;;  %v2108_v45 = vld [vmem:[#allocation2 + $0x40] sm:$0x3]  ;;  %v24363_v35 = vld [vmem:[#allocation11 + $0x37c] ss:$12 sps:$4 sm:$0xff]   ;;  %v24368_v41 = vld [vmem:[#allocation11 + $0x394] ss:$12 sps:$4 sm:$0xff]  }
 0x55d   : > { %v2109_v47 = vld [vmem:[#allocation2 + $0x48] sm:$0x3]  ;;  %v2116_v48 = vpack.c.bf16 %v2108_v45, %v2108_v45  ;;  %3007 = vmatprep.subr.bf16.mxu1 %v24300_v38  ;;  %v24361_v34 = vld [vmem:[#allocation11 + $0x378] ss:$12 sps:$4 sm:$0xff]   ;;  %v24366_v38 = vld [vmem:[#allocation11 + $0x390] ss:$12 sps:$4 sm:$0xff]  }
 0x55e   : > { %2138 = vmatpush1.bf16.msra.mxu0 %v27209_v44  ;;  %v27212_v50 = vpack.c.bf16 %v2109_v47, %v2109_v47  ;;  %v24371_v42 = vld [vmem:[#allocation11 + $0x3a8] ss:$12 sps:$4 sm:$0xff]   ;;  %v24376_v45 = vld [vmem:[#allocation11 + $0x3c0] ss:$12 sps:$4 sm:$0xff]   ;;  %v24381_v47 = vld [vmem:[#allocation11 + $0x3d8] ss:$12 sps:$4 sm:$0xff]  }
 0x55f   : > { %19346 = vmatmul.mubr.msk.bf16.vlgmr.msra.gmra.mrb[24].mxu1 %vm2121_vm7, %v2332_v43  ;;  %v27218_v52 = vsel %vm864_vm1, %v2116_v48, 0  ;;  %v24383_v48 = vld [vmem:[#allocation11 + $0x3dc] ss:$12 sps:$4 sm:$0xff]  }
 0x560   : > { %19339 = vmatprep.subr.msk.bf16.mxu0 %vm864_vm1, %v27212_v50  ;;  %3008 = vmatpush1.bf16.msra.mxu1 %v24298_v46  ;;  %v24378_v46 = vld [vmem:[#allocation11 + $0x3c4] ss:$12 sps:$4 sm:$0xff]  }
 0x561   : > { %3009 = vmatprep.subr.bf16.mxu1 %v24306_v49  ;;  %v24386_v49 = vld [vmem:[#allocation11 + $0x3f0] ss:$12 sps:$4 sm:$0xff]  }
 0x562   : > { %2140 = vmatpush1.bf16.msra.mxu0 %v27218_v52 }
 0x563   : > { %2178 = vmatprep.subr.bf16.mxu0 %v27191_v26 }
 0x564   : > { %3010 = vmatpush1.bf16.msra.mxu1 %v24304_v51  ;;  %v24388_v51 = vld [vmem:[#allocation11 + $0x3f4] ss:$12 sps:$4 sm:$0xff]  }
 0x565   : > { %19340 = vmatmul.mubr.msk.bf16.vlgmr.msra.gmra.mrb[12].mxu0 %vm2121_vm7, %v2120_v54  ;;  %3011 = vmatprep.subr.bf16.mxu1 %v24312_v53 }
 0x566   : > { %2179 = vmatpush1.bf16.msra.mxu0 %v27194_v31  ;;  %2210 = vmatprep.mubr.bf16.mxu0 %v32791_v37 }
 0x567   : > { %19341 = vmatprep.subr.msk.bf16.mxu0 %vm864_vm1, %v27198_v33 }
 0x568   : > { %3012 = vmatpush1.bf16.msra.mxu1 %v24310_v55 }
 0x569   : > { %3013 = vmatprep.subr.bf16.mxu1 %v24318_v56 }
 0x56a   : > { %2181 = vmatpush1.bf16.msra.mxu0 %v27205_v40 }
 0x56b   : > { %2336 = vmatprep.subr.bf16.mxu0 %v27202_v39 }
 0x56c   : > { %3014 = vmatpush1.bf16.msra.mxu1 %v24316_v57  ;;  %v24365_v57 = vld [vmem:[#allocation11 + $0x290] ss:$12 sps:$4 sm:$0xff]  }
 0x56d   : > { %19342 = vmatmul.mubr.msk.bf16.vlgmr.msra.gmra.mrb[16].mxu0 %vm2121_vm7, %v2120_v54  ;;  %3015 = vmatprep.subr.bf16.mxu1 %v24324_v58 }
 0x56e   : > { %2337 = vmatpush1.bf16.msra.mxu0 %v27209_v44  ;;  %2368 = vmatprep.mubr.bf16.mxu0 %v32791_v37 }
 0x56f   : > { %19343 = vmatprep.subr.msk.bf16.mxu0 %vm864_vm1, %v27212_v50 }
 0x570   : > { %3016 = vmatpush1.bf16.msra.mxu1 %v24322_v4 }
 0x571   : > { %3017 = vmatprep.subr.bf16.mxu1 %v24330_v59  ;;  %v24369_v59 = vld [vmem:[#allocation11 + $0x368] ss:$12 sps:$4 sm:$0xff]  }
 0x572   : > { %2339 = vmatpush1.bf16.msra.mxu0 %v27218_v52 }
 0x573   : > { %2966 = vmatprep.subr.bf16.mxu0 %v24303_v60  ;;  %v24370_v60 = vld [vmem:[#allocation11 + $0x2a8] ss:$12 sps:$4 sm:$0xff]  }
 0x574   : > { %3018 = vmatpush1.bf16.msra.mxu1 %v24328_v7 }
 0x575   : > { %19344 = vmatmul.mubr.msk.bf16.vlgmr.msra.gmra.mrb[20].mxu0 %vm2121_vm7, %v2332_v43  ;;  %3019 = vmatprep.subr.bf16.mxu1 %v24336_v9  ;;  %v24373_v43 = vld [vmem:[#allocation11 + $0x3ac] ss:$12 sps:$4 sm:$0xff]  }
 0x576   : > { %2967 = vmatpush1.bf16.msra.mxu0 %v24301_v61  ;;  %v24374_v9 = vld [vmem:[#allocation11 + $0x380] ss:$12 sps:$4 sm:$0xff]  }
 0x577   : > { %2968 = vmatprep.subr.bf16.mxu0 %v24309_v62 }
 0x578   : > { %3020 = vmatpush1.bf16.msra.mxu1 %v24334_v63 }
 0x579   : > { %3021 = vmatprep.subr.bf16.mxu1 %v24342_v0  ;;  %v24375_v0 = vld [vmem:[#allocation11 + $0x2c0] ss:$12 sps:$4 sm:$0xff]  }
 0x57a   : > { %2969 = vmatpush1.bf16.msra.mxu0 %v24307_v1  ;;  %v24379_v1 = vld [vmem:[#allocation11 + $0x398] ss:$12 sps:$4 sm:$0xff]  }
 0x57b   : > { %2970 = vmatprep.subr.bf16.mxu0 %v24315_v2  ;;  %v24380_v2 = vld [vmem:[#allocation11 + $0x2d8] ss:$12 sps:$4 sm:$0xff]  }
 0x57c   : > { %3022 = vmatpush1.bf16.msra.mxu1 %v24340_v3 }
 0x57d   : > { %3023 = vmatprep.subr.bf16.mxu1 %v24348_v5  ;;  %v24384_v5 = vld [vmem:[#allocation11 + $0x3b0] ss:$12 sps:$4 sm:$0xff]  }
 0x57e   : > { %2971 = vmatpush1.bf16.msra.mxu0 %v24313_v6 }
 0x57f   : > { %2972 = vmatprep.subr.bf16.mxu0 %v24321_v8 }
 0x580   : > { %3024 = vmatpush1.bf16.msra.mxu1 %v24346_v10 }
 0x581   : > { %3025 = vmatprep.subr.bf16.mxu1 %v24354_v11  ;;  %v24385_v11 = vld [vmem:[#allocation11 + $0x2f0] ss:$12 sps:$4 sm:$0xff]  }
 0x582   : > { %2973 = vmatpush1.bf16.msra.mxu0 %v24319_v12  ;;  %v24389_v12 = vld [vmem:[#allocation11 + $0x3c8] ss:$12 sps:$4 sm:$0xff]  }
 0x583   : > { %2974 = vmatprep.subr.bf16.mxu0 %v24327_v13 }
 0x584   : > { %3026 = vmatpush1.bf16.msra.mxu1 %v24352_v14  ;;  %v24390_v14 = vld [vmem:[#allocation11 + $0x308] ss:$12 sps:$4 sm:$0xff]  }
 0x585   : > { %3027 = vmatprep.subr.bf16.mxu1 %v24360_v32  ;;  %v24400_v32 = vld [vmem:[#allocation11 + $0x440] ss:$12 sps:$4 sm:$0xff]  }
 0x586   : > { %2975 = vmatpush1.bf16.msra.mxu0 %v24325_v15 }
 0x587   : > { %2976 = vmatprep.subr.bf16.mxu0 %v24333_v16 }
 0x588   : > { %3028 = vmatpush1.bf16.msra.mxu1 %v24358_v28  ;;  %v24399_v28 = vld [vmem:[#allocation11 + $0x4] ss:$12 sps:$4 sm:$0xff]  }
 0x589   : > { %22011 = vmatprep.subr.bf16.mxu1 %v24364_v36 }
 0x58a   : > { %2977 = vmatpush1.bf16.msra.mxu0 %v24331_v17  ;;  %v24391_v17 = vld [vmem:[#allocation11 + $0x3e0] ss:$12 sps:$4 sm:$0xff]  }
 0x58b   : > { %2978 = vmatprep.subr.bf16.mxu0 %v24339_v18 }
 0x58e   : > { %2979 = vmatpush1.bf16.msra.mxu0 %v24337_v19  ;;  %v24393_v19 = vld [vmem:[#allocation11 + $0x410] ss:$12 sps:$4 sm:$0xff]  }
 0x58f   : > { %2980 = vmatprep.subr.bf16.mxu0 %v24345_v20 }
 0x592   : > { %2981 = vmatpush1.bf16.msra.mxu0 %v24343_v21 }
 0x593   : > { %2982 = vmatprep.subr.bf16.mxu0 %v24351_v22  ;;  %v24392_v22 = vld [vmem:[#allocation11 + $0x320] ss:$12 sps:$4 sm:$0xff]  }
 0x596   : > { %2983 = vmatpush1.bf16.msra.mxu0 %v24349_v23  ;;  %v24394_v23 = vld [vmem:[#allocation11 + $0x3f8] ss:$12 sps:$4 sm:$0xff]  }
 0x597   : > { %2984 = vmatprep.subr.bf16.mxu0 %v24357_v24  ;;  %v24396_v24 = vld [vmem:[#allocation11 + $0x428] ss:$12 sps:$4 sm:$0xff]  }
 0x59a   : > { %2985 = vmatpush1.bf16.msra.mxu0 %v24355_v25  ;;  %v24395_v25 = vld [vmem:[#allocation11 + $0x338] ss:$12 sps:$4 sm:$0xff]  }
 0x59b   : > { %2986 = vmatprep.subr.bf16.mxu0 %v24363_v35  ;;  %v24403_v35 = vld [vmem:[#allocation11 + $0x1c] ss:$12 sps:$4 sm:$0xff]  }
 0x59e   : > { %2987 = vmatpush1.bf16.msra.mxu0 %v24361_v34  ;;  %v24397_v34 = vld [vmem:[#allocation11] ss:$12 sps:$4 sm:$0xff]  }
 0x59f   : > { %2988 = vmatprep.subr.bf16.mxu0 %v24368_v41  ;;  %v24401_v41 = vld [vmem:[#allocation11 + $0x18] ss:$12 sps:$4 sm:$0xff]  }
 0x5a2   : > { %2989 = vmatpush1.bf16.msra.mxu0 %v24366_v38  ;;  %v24404_v38 = vld [vmem:[#allocation11 + $0x458] ss:$12 sps:$4 sm:$0xff]  }
 0x5a3   : > { %2990 = vmatprep.subr.bf16.mxu0 %v24373_v43  ;;  %v24408_v43 = vld [vmem:[#allocation11 + $0x470] ss:$12 sps:$4 sm:$0xff]  }
 0x5a6   : > { %2991 = vmatpush1.bf16.msra.mxu0 %v24371_v42  ;;  %v24407_v42 = vld [vmem:[#allocation11 + $0x34] ss:$12 sps:$4 sm:$0xff]  }
 0x5a7   : > { %2992 = vmatprep.subr.bf16.mxu0 %v24378_v46  ;;  %v24411_v46 = vld [vmem:[#allocation11 + $0x4c] ss:$12 sps:$4 sm:$0xff]  }
 0x5aa   : > { %2993 = vmatpush1.bf16.msra.mxu0 %v24376_v45  ;;  %v24405_v45 = vld [vmem:[#allocation11 + $0x30] ss:$12 sps:$4 sm:$0xff]  }
 0x5ab   : > { %2994 = vmatprep.subr.bf16.mxu0 %v24383_v48  ;;  %v24409_v48 = vld [vmem:[#allocation11 + $0x48] ss:$12 sps:$4 sm:$0xff]  }
 0x5ae   : > { %2995 = vmatpush1.bf16.msra.mxu0 %v24381_v47  ;;  %v24412_v47 = vld [vmem:[#allocation11 + $0x488] ss:$12 sps:$4 sm:$0xff]  }
 0x5af   : > { %2996 = vmatprep.subr.bf16.mxu0 %v24388_v51  ;;  %v24416_v51 = vld [vmem:[#allocation11 + $0x4a0] ss:$12 sps:$4 sm:$0xff]  }
 0x5b2   : > { %2997 = vmatpush1.bf16.msra.mxu0 %v24386_v49  ;;  %v24415_v49 = vld [vmem:[#allocation11 + $0x64] ss:$12 sps:$4 sm:$0xff]  }
 0x5b3   : > { %3088 = vmatprep.subr.bf16.mxu0 %v32791_v37 }
 0x632   : > { %v2411_v53 = vpop.f32.mrb[24].mxu1 }
 0x633   : > { %v2413_v54 = vpop.f32.mrb[25].mxu1  ;;  %v27237_v58 = vpack.c.bf16 %v2411_v53, %v2411_v53  ;;  %v24413_v53 = vld [vmem:[#allocation11 + $0x60] ss:$12 sps:$4 sm:$0xff]  }
 0x634   : > { %v2421_v55 = vpack.c.bf16 %v2413_v54, %v2413_v54  ;;  %v2415_v56 = vpop.f32.mrb[26].mxu1  ;;  %v24419_v54 = vld [vmem:[#allocation11 + $0x7c] ss:$12 sps:$4 sm:$0xff]  }
 0x635   : > { %v2416_v4 = vpop.f32.mrb[27].mxu1  ;;  %v24417_v56 = vld [vmem:[#allocation11 + $0x78] ss:$12 sps:$4 sm:$0xff]  }
 0x636   : > { %19428 = vmatprep.mubr.msk.bf16.mxu1 %vm809_vm5, %v2421_v55  ;;  %v24424_v4 = vld [vmem:[#allocation11 + $0x4d0] ss:$12 sps:$4 sm:$0xff]  }
 0x637   : > { %3040 = vmatmul.mubr.bf16.vlgmr.msra.gmra.mrb[28].mxu1 %v27237_v58 }
 0x638   : > { %22012 = vmatpush3.bf16.msra.mxu1 %v24365_v57  ;;  %v27241_v7 = vpop.f32.mrb[12].mxu0  ;;  %v24423_v57 = vld [vmem:[#allocation11 + $0x94] ss:$12 sps:$4 sm:$0xff]  }
 0x639   : > { %22013 = vmatprep.subr.bf16.mxu1 %v24369_v59  ;;  %v2173_v61 = vpop.f32.mrb[13].mxu0  ;;  %v24421_v59 = vld [vmem:[#allocation11 + $0x90] ss:$12 sps:$4 sm:$0xff]  }
 0x63a   : > { %v2175_v62 = vpop.f32.mrb[14].mxu0  ;;  %v27250_v36 = vpack.c.bf16 %v2173_v61, %v2173_v61  ;;  %v24425_v61 = vld [vmem:[#allocation11 + $0xa8] ss:$12 sps:$4 sm:$0xff]  }
 0x63b   : > { %v2176_v63 = vpop.f32.mrb[15].mxu0  ;;  %v24431_v62 = vld [vmem:[#allocation11 + $0xc4] ss:$12 sps:$4 sm:$0xff]  }
 0x63c   : > { %22014 = vmatpush3.bf16.msra.mxu1 %v24370_v60  ;;  %v24427_v60 = vld [vmem:[#allocation11 + $0xac] ss:$12 sps:$4 sm:$0xff]  }
 0x63d   : > { %22015 = vmatprep.subr.bf16.mxu1 %v24374_v9  ;;  %v24428_v9 = vld [vmem:[#allocation11 + $0x4e8] ss:$12 sps:$4 sm:$0xff]   ;;  %v24432_v63 = vld [vmem:[#allocation11 + $0x500] ss:$12 sps:$4 sm:$0xff]  }
 0x640   : > { %22016 = vmatpush3.bf16.msra.mxu1 %v24375_v0  ;;  %v27243_v3 = vpop.f32.mrb[16].mxu0  ;;  %v24438_v0 = vld [vmem:[#allocation11 + $0x184] ss:$12 sps:$4 sm:$0xff]  }
 0x641   : > { %22017 = vmatprep.subr.bf16.mxu1 %v24379_v1  ;;  %v27245_v6 = vpop.f32.mrb[17].mxu0  ;;  %v24429_v1 = vld [vmem:[#allocation11 + $0xc0] ss:$12 sps:$4 sm:$0xff]  }
 0x642   : > { %v2216_v8 = vpop.f32.mrb[18].mxu0 }
 0x643   : > { %v2217_v10 = vpop.f32.mrb[19].mxu0  ;;  %v24444_v8 = vld [vmem:[#allocation11 + $0x19c] ss:$12 sps:$4 sm:$0xff]  }
 0x644   : > { %22018 = vmatpush3.bf16.msra.mxu1 %v24380_v2  ;;  %v24435_v2 = vld [vmem:[#allocation11 + $0xdc] ss:$12 sps:$4 sm:$0xff]   ;;  %v27263_v10 = vpack.c.bf16 %v27245_v6, %v27245_v6 }
 0x645   : > { %22019 = vmatprep.subr.bf16.mxu1 %v24384_v5  ;;  %v24436_v5 = vld [vmem:[#allocation11 + $0x180] ss:$12 sps:$4 sm:$0xff]   ;;  %v24448_v6 = vld [vmem:[#allocation11 + $0x1b0] ss:$12 sps:$4 sm:$0xff]  }
 0x648   : > { %22020 = vmatpush3.bf16.msra.mxu1 %v24385_v11  ;;  %v2370_v13 = vpop.f32.mrb[20].mxu0  ;;  %v24433_v11 = vld [vmem:[#allocation11 + $0xd8] ss:$12 sps:$4 sm:$0xff]  }
 0x649   : > { %v2418_v15 = vpack.c.bf16 %v2370_v13, %v2370_v13  ;;  %22021 = vmatprep.subr.bf16.mxu1 %v24389_v12  ;;  %v2372_v16 = vpop.f32.mrb[21].mxu0  ;;  %v24441_v12 = vld [vmem:[#allocation11 + $0xf4] ss:$12 sps:$4 sm:$0xff]   ;;  %v24442_v13 = vld [vmem:[#allocation11 + $0x198] ss:$12 sps:$4 sm:$0xff]  }
 0x64a   : > { %v2419_v18 = vpack.c.bf16 %v2372_v16, %v2372_v16  ;;  %v2374_v20 = vpop.f32.mrb[22].mxu0  ;;  %v24447_v16 = vld [vmem:[#allocation11 + $0x10c] ss:$12 sps:$4 sm:$0xff]  }
 0x64b   : > { %v2375_v21 = vpop.f32.mrb[23].mxu0  ;;  %v24462_v20 = vld [vmem:[#allocation11 + $0x1e4] ss:$12 sps:$4 sm:$0xff]  }
 0x64c   : > { %22022 = vmatpush3.bf16.msra.mxu1 %v24390_v14  ;;  %2998 = vmatprep.mubr.bf16.mxu0 %v2419_v18  ;;  %v24450_v14 = vld [vmem:[#allocation11 + $0x1b4] ss:$12 sps:$4 sm:$0xff]  }
 0x64d   : > { %22023 = vmatprep.subr.bf16.mxu1 %v24391_v17  ;;  %2999 = vmatmul.mubr.bf16.vlgmr.msra.gmra.mrb[24].mxu0 %v2418_v15  ;;  %v24456_v17 = vld [vmem:[#allocation11 + $0x1cc] ss:$12 sps:$4 sm:$0xff]  }
 0x64e   : > { %3089 = vmatpush1.bf16.msra.mxu0 %v24393_v19  ;;  %19429 = vmatprep.mubr.msk.bf16.mxu0 %vm809_vm5, %v2421_v55  ;;  %v24420_v55 = vld [vmem:[#allocation11 + $0x4b8] ss:$12 sps:$4 sm:$0xff]   ;;  %v24454_v19 = vld [vmem:[#allocation11 + $0x1c8] ss:$12 sps:$4 sm:$0xff]   ;;  %v24451_v21 = vld [vmem:[#allocation11 + $0x120] ss:$12 sps:$4 sm:$0xff]  }
 0x64f   : > { %3090 = vmatprep.subr.bf16.mxu0 %v32791_v37  ;;  %3080 = vmatprep.mubr.bf16.mxu1 %v2419_v18  ;;  %v24445_v18 = vld [vmem:[#allocation11 + $0x108] ss:$12 sps:$4 sm:$0xff]  }
 0x650   : > { %22024 = vmatpush3.bf16.msra.mxu1 %v24392_v22  ;;  %v24459_v22 = vld [vmem:[#allocation11 + $0x13c] ss:$12 sps:$4 sm:$0xff]  }
 0x651   : > { %22025 = vmatprep.subr.bf16.mxu1 %v24394_v23  ;;  %v24460_v23 = vld [vmem:[#allocation11 + $0x1e0] ss:$12 sps:$4 sm:$0xff]  }
 0x652   : > { %3091 = vmatpush1.bf16.msra.mxu0 %v24396_v24  ;;  %v24468_v24 = vld [vmem:[#allocation11 + $0x1fc] ss:$12 sps:$4 sm:$0xff]  }
 0x653   : > { %3092 = vmatprep.subr.bf16.mxu0 %v32791_v37 }
 0x654   : > { %22026 = vmatpush3.bf16.msra.mxu1 %v24395_v25  ;;  %v24457_v25 = vld [vmem:[#allocation11 + $0x138] ss:$12 sps:$4 sm:$0xff]  }
 0x655   : > { %3563 = vmatprep.subr.bf16.mxu1 %v24399_v28  ;;  %v24465_v28 = vld [vmem:[#allocation11 + $0x154] ss:$12 sps:$4 sm:$0xff]  }
 0x656   : > { %3093 = vmatpush1.bf16.msra.mxu0 %v24400_v32  ;;  %v24466_v32 = vld [vmem:[#allocation11 + $0x1f8] ss:$12 sps:$4 sm:$0xff]  }
 0x657   : > { %3081 = vmatmul.mubr.bf16.vlgmr.msra.gmra.mrb[32].mxu1 %v2418_v15  ;;  %3094 = vmatprep.subr.bf16.mxu0 %v32791_v37  ;;  %v24439_v15 = vld [vmem:[#allocation11 + $0xf0] ss:$12 sps:$4 sm:$0xff]  }
 0x658   : > { %3564 = vmatpush1.bf16.msra.mxu1 %v24397_v34  ;;  %3595 = vmatprep.mubr.bf16.mxu1 %v27250_v36  ;;  %v24474_v34 = vld [vmem:[#allocation11 + $0x214] ss:$12 sps:$4 sm:$0xff]  }
 0x659   : > { %3565 = vmatprep.subr.bf16.mxu1 %v24403_v35  ;;  %v24463_v35 = vld [vmem:[#allocation11 + $0x150] ss:$12 sps:$4 sm:$0xff]  }
 0x65a   : > { %3095 = vmatpush1.bf16.msra.mxu0 %v24404_v38  ;;  %v24471_v38 = vld [vmem:[#allocation11 + $0x16c] ss:$12 sps:$4 sm:$0xff]  }
 0x65b   : > { %3096 = vmatprep.subr.bf16.mxu0 %v32791_v37 }
 0x65c   : > { %3566 = vmatpush1.bf16.msra.mxu1 %v24401_v41  ;;  %v24472_v41 = vld [vmem:[#allocation11 + $0x210] ss:$12 sps:$4 sm:$0xff]  }
 0x65d   : > { %3567 = vmatprep.subr.bf16.mxu1 %v24407_v42  ;;  %v24477_v42 = vld [vmem:[#allocation11 + $0x22c] ss:$12 sps:$4 sm:$0xff]  }
 0x65e   : > { %3097 = vmatpush1.bf16.msra.mxu0 %v24408_v43  ;;  %v24469_v43 = vld [vmem:[#allocation11 + $0x168] ss:$12 sps:$4 sm:$0xff]  }
 0x65f   : > { %3098 = vmatprep.subr.bf16.mxu0 %v32791_v37 }
 0x660   : > { %3568 = vmatpush1.bf16.msra.mxu1 %v24405_v45  ;;  %v24478_v45 = vld [vmem:[#allocation11 + $0xc8] ss:$12 sps:$4 sm:$0xff]  }
 0x661   : > { %3569 = vmatprep.subr.bf16.mxu1 %v24411_v46  ;;  %v24475_v46 = vld [vmem:[#allocation11 + $0x228] ss:$12 sps:$4 sm:$0xff]  }
 0x662   : > { %3099 = vmatpush1.bf16.msra.mxu0 %v24412_v47  ;;  %v24482_v47 = vld [vmem:[#allocation11 + $0x244] ss:$12 sps:$4 sm:$0xff]  }
 0x663   : > { %3100 = vmatprep.subr.bf16.mxu0 %v32791_v37 }
 0x664   : > { %3570 = vmatpush1.bf16.msra.mxu1 %v24409_v48  ;;  %v24479_v48 = vld [vmem:[#allocation11 + $0x8] ss:$12 sps:$4 sm:$0xff]  }
 0x665   : > { %3571 = vmatprep.subr.bf16.mxu1 %v24415_v49  ;;  %v27270_v49 = vpack.c.bf16 %v27241_v7, %v27241_v7  ;;  %v24489_v7 = vld [vmem:[#allocation11 + $0x38] ss:$12 sps:$4 sm:$0xff]  }
 0x666   : > { %3101 = vmatpush1.bf16.msra.mxu0 %v24416_v51  ;;  %v24483_v51 = vld [vmem:[#allocation11 + $0xe0] ss:$12 sps:$4 sm:$0xff]  }
 0x667   : > { %3102 = vmatprep.subr.bf16.mxu0 %v32791_v37 }
 0x668   : > { %3572 = vmatpush1.bf16.msra.mxu1 %v24413_v53  ;;  %v24480_v53 = vld [vmem:[#allocation11 + $0x240] ss:$12 sps:$4 sm:$0xff]  }
 0x669   : > { %3573 = vmatprep.subr.bf16.mxu1 %v24419_v54  ;;  %v24487_v54 = vld [vmem:[#allocation11 + $0x25c] ss:$12 sps:$4 sm:$0xff]  }
 0x66a   : > { %3103 = vmatpush1.bf16.msra.mxu0 %v24420_v55  ;;  %v24484_v55 = vld [vmem:[#allocation11 + $0x20] ss:$12 sps:$4 sm:$0xff]  }
 0x66b   : > { %3104 = vmatprep.subr.bf16.mxu0 %v32791_v37 }
 0x66c   : > { %3574 = vmatpush1.bf16.msra.mxu1 %v24417_v56  ;;  %v24488_v56 = vld [vmem:[#allocation11 + $0xf8] ss:$12 sps:$4 sm:$0xff]  }
 0x66d   : > { %3575 = vmatprep.subr.bf16.mxu1 %v24423_v57  ;;  %v24485_v57 = vld [vmem:[#allocation11 + $0x258] ss:$12 sps:$4 sm:$0xff]  }
 0x66e   : > { %3105 = vmatpush1.bf16.msra.mxu0 %v24424_v4  ;;  %v24492_v4 = vld [vmem:[#allocation11 + $0x274] ss:$12 sps:$4 sm:$0xff]  }
 0x66f   : > { %3106 = vmatprep.subr.bf16.mxu0 %v32791_v37 }
 0x670   : > { %3576 = vmatpush1.bf16.msra.mxu1 %v24421_v59  ;;  %v24493_v59 = vld [vmem:[#allocation11 + $0x110] ss:$12 sps:$4 sm:$0xff]  }
 0x671   : > { %3577 = vmatprep.subr.bf16.mxu1 %v24427_v60  ;;  %v24490_v60 = vld [vmem:[#allocation11 + $0x270] ss:$12 sps:$4 sm:$0xff]  }
 0x672   : > { %3107 = vmatpush1.bf16.msra.mxu0 %v24428_v9  ;;  %v24494_v9 = vld [vmem:[#allocation11 + $0x50] ss:$12 sps:$4 sm:$0xff]  }
 0x673   : > { %3108 = vmatprep.subr.bf16.mxu0 %v32791_v37 }
 0x674   : > { %3578 = vmatpush1.bf16.msra.mxu1 %v24425_v61  ;;  %v24495_v61 = vld [vmem:[#allocation11 + $0x128] ss:$12 sps:$4 sm:$0xff]  }
 0x675   : > { %3579 = vmatprep.subr.bf16.mxu1 %v24431_v62  ;;  %v27276_v62 = vpack.c.bf16 %v27243_v3, %v27243_v3  ;;  %v24501_v3 = vld [vmem:[#allocation11 + $0x158] ss:$12 sps:$4 sm:$0xff]  }
 0x676   : > { %3109 = vmatpush1.bf16.msra.mxu0 %v24432_v63  ;;  %v24496_v63 = vld [vmem:[#allocation11 + $0x68] ss:$12 sps:$4 sm:$0xff]  }
 0x677   : > { %3604 = vmatprep.subr.bf16.mxu0 %v24438_v0  ;;  %v24498_v0 = vld [vmem:[#allocation11 + $0x140] ss:$12 sps:$4 sm:$0xff]  }
 0x678   : > { %3580 = vmatpush1.bf16.msra.mxu1 %v24429_v1  ;;  %v24500_v1 = vld [vmem:[#allocation11 + $0x1a0] ss:$12 sps:$4 sm:$0xff]  }
 0x679   : > { %3121 = vmatmul.mubr.bf16.vlgmr.msra.gmra.mrb[28].mxu0 %v27237_v58  ;;  %3581 = vmatprep.subr.bf16.mxu1 %v24435_v2  ;;  %v24453_v58 = vld [vmem:[#allocation11 + $0x124] ss:$12 sps:$4 sm:$0xff]   ;;  %v24499_v2 = vld [vmem:[#allocation11 + $0x80] ss:$12 sps:$4 sm:$0xff]  }
 0x67a   : > { %3605 = vmatpush1.bf16.msra.mxu0 %v24436_v5  ;;  %19511 = vmatprep.mubr.msk.bf16.mxu0 %vm809_vm5, %v27263_v10  ;;  %v24503_v5 = vld [vmem:[#allocation11 + $0x1b8] ss:$12 sps:$4 sm:$0xff]  }
 0x67b   : > { %3606 = vmatprep.subr.bf16.mxu0 %v24444_v8  ;;  %v24502_v8 = vld [vmem:[#allocation11 + $0x98] ss:$12 sps:$4 sm:$0xff]  }
 0x67c   : > { %3582 = vmatpush1.bf16.msra.mxu1 %v24433_v11  ;;  %v24504_v11 = vld [vmem:[#allocation11 + $0x170] ss:$12 sps:$4 sm:$0xff]  }
 0x67d   : > { %3583 = vmatprep.subr.bf16.mxu1 %v24441_v12  ;;  %v24506_v12 = vld [vmem:[#allocation11 + $0x1d0] ss:$12 sps:$4 sm:$0xff]  }
 0x67e   : > { %3607 = vmatpush1.bf16.msra.mxu0 %v24442_v13  ;;  %v24507_v13 = vld [vmem:[#allocation11 + $0x1e8] ss:$12 sps:$4 sm:$0xff]  }
 0x67f   : > { %3608 = vmatprep.subr.bf16.mxu0 %v24450_v14  ;;  %v24508_v14 = vld [vmem:[#allocation11 + $0x200] ss:$12 sps:$4 sm:$0xff]  }
 0x680   : > { %3584 = vmatpush1.bf16.msra.mxu1 %v24439_v15  ;;  %v24509_v15 = vld [vmem:[#allocation11 + $0x218] ss:$12 sps:$4 sm:$0xff]  }
 0x681   : > { %3585 = vmatprep.subr.bf16.mxu1 %v24447_v16  ;;  %v3726_v16 = vld [vmem:[#allocation9 + $0x8] sm:$0xf] }
 0x682   : > { %3609 = vmatpush1.bf16.msra.mxu0 %v24448_v6  ;;  %v24510_v6 = vld [vmem:[#allocation11 + $0x230] ss:$12 sps:$4 sm:$0xff]  }
 0x683   : > { %3610 = vmatprep.subr.bf16.mxu0 %v24456_v17  ;;  %v24511_v17 = vld [vmem:[#allocation11 + $0x248] ss:$12 sps:$4 sm:$0xff]  }
 0x684   : > { %3586 = vmatpush1.bf16.msra.mxu1 %v24445_v18  ;;  %v24512_v18 = vld [vmem:[#allocation11 + $0x260] ss:$12 sps:$4 sm:$0xff]  }
 0x685   : > { %3587 = vmatprep.subr.bf16.mxu1 %v24453_v58  ;;  %v24513_v58 = vld [vmem:[#allocation11 + $0x278] ss:$12 sps:$4 sm:$0xff]  }
 0x686   : > { %3611 = vmatpush1.bf16.msra.mxu0 %v24454_v19  ;;  %v24514_v19 = vld [vmem:[#allocation11 + $0x510] ss:$12 sps:$4 sm:$0xff]  }
 0x687   : > { %3612 = vmatprep.subr.bf16.mxu0 %v24462_v20  ;;  %v24516_v20 = vld [vmem:[#allocation11 + $0x514] ss:$12 sps:$4 sm:$0xff]  }
 0x688   : > { %3588 = vmatpush1.bf16.msra.mxu1 %v24451_v21  ;;  %v24519_v21 = vld [vmem:[#allocation11 + $0x52c] ss:$12 sps:$4 sm:$0xff]  }
 0x689   : > { %3589 = vmatprep.subr.bf16.mxu1 %v24459_v22  ;;  %v24517_v22 = vld [vmem:[#allocation11 + $0x528] ss:$12 sps:$4 sm:$0xff]  }
 0x68a   : > { %3613 = vmatpush1.bf16.msra.mxu0 %v24460_v23  ;;  %v24522_v23 = vld [vmem:[#allocation11 + $0x544] ss:$12 sps:$4 sm:$0xff]  }
 0x68b   : > { %3614 = vmatprep.subr.bf16.mxu0 %v24468_v24  ;;  %v24520_v24 = vld [vmem:[#allocation11 + $0x540] ss:$12 sps:$4 sm:$0xff]  }
 0x68c   : > { %3590 = vmatpush1.bf16.msra.mxu1 %v24457_v25  ;;  %v24525_v25 = vld [vmem:[#allocation11 + $0x55c] ss:$12 sps:$4 sm:$0xff]  }
 0x68d   : > { %3591 = vmatprep.subr.bf16.mxu1 %v24465_v28  ;;  %v24523_v28 = vld [vmem:[#allocation11 + $0x558] ss:$12 sps:$4 sm:$0xff]  }
 0x68e   : > { %3615 = vmatpush1.bf16.msra.mxu0 %v24466_v32  ;;  %v24528_v32 = vld [vmem:[#allocation11 + $0x574] ss:$12 sps:$4 sm:$0xff]  }
 0x68f   : > { %3616 = vmatprep.subr.bf16.mxu0 %v24474_v34  ;;  %v24526_v34 = vld [vmem:[#allocation11 + $0x570] ss:$12 sps:$4 sm:$0xff]  }
 0x690   : > { %3592 = vmatpush1.bf16.msra.mxu1 %v24463_v35  ;;  %v24531_v35 = vld [vmem:[#allocation11 + $0x58c] ss:$12 sps:$4 sm:$0xff]  }
 0x691   : > { %3593 = vmatprep.subr.bf16.mxu1 %v24471_v38  ;;  %v24529_v38 = vld [vmem:[#allocation11 + $0x588] ss:$12 sps:$4 sm:$0xff]  }
 0x692   : > { %3617 = vmatpush1.bf16.msra.mxu0 %v24472_v41  ;;  %v24532_v41 = vld [vmem:[#allocation11 + $0x5a0] ss:$12 sps:$4 sm:$0xff]  }
 0x693   : > { %3618 = vmatprep.subr.bf16.mxu0 %v24477_v42  ;;  %v24534_v42 = vld [vmem:[#allocation11 + $0x5a4] ss:$12 sps:$4 sm:$0xff]  }
 0x694   : > { %3594 = vmatpush1.bf16.msra.mxu1 %v24469_v43  ;;  %v24537_v43 = vld [vmem:[#allocation11 + $0x5bc] ss:$12 sps:$4 sm:$0xff]  }
 0x695   : > { %22033 = vmatprep.subr.bf16.mxu1 %v24478_v45  ;;  %v24538_v45 = vld [vmem:[#allocation11 + $0x690] ss:$12 sps:$4 sm:$0xff]  }
 0x696   : > { %3619 = vmatpush1.bf16.msra.mxu0 %v24475_v46  ;;  %v24540_v46 = vld [vmem:[#allocation11 + $0x694] ss:$12 sps:$4 sm:$0xff]  }
 0x697   : > { %3596 = vmatmul.mubr.bf16.vlgmr.msra.gmra.mrb[36].mxu1 %v27270_v49  ;;  %3620 = vmatprep.subr.bf16.mxu0 %v24482_v47  ;;  %v24546_v47 = vld [vmem:[#allocation11 + $0x6ac] ss:$12 sps:$4 sm:$0xff]  }
 0x698   : > { %22034 = vmatpush3.bf16.msra.mxu1 %v24479_v48  ;;  %3677 = vmatprep.mubr.bf16.mxu1 %v27250_v36  ;;  %v24497_v36 = vld [vmem:[#allocation11 + $0x188] ss:$12 sps:$4 sm:$0xff]   ;;  %v24535_v48 = vld [vmem:[#allocation11 + $0x5b8] ss:$12 sps:$4 sm:$0xff]  }
 0x699   : > { %22035 = vmatprep.subr.bf16.mxu1 %v24483_v51  ;;  %v24543_v51 = vld [vmem:[#allocation11 + $0x5d4] ss:$12 sps:$4 sm:$0xff]  }
 0x69a   : > { %3621 = vmatpush1.bf16.msra.mxu0 %v24480_v53  ;;  %v24541_v53 = vld [vmem:[#allocation11 + $0x5d0] ss:$12 sps:$4 sm:$0xff]  }
 0x69b   : > { %3622 = vmatprep.subr.bf16.mxu0 %v24487_v54  ;;  %v24547_v54 = vld [vmem:[#allocation11 + $0x5e8] ss:$12 sps:$4 sm:$0xff]  }
 0x69c   : > { %22036 = vmatpush3.bf16.msra.mxu1 %v24484_v55  ;;  %v24549_v55 = vld [vmem:[#allocation11 + $0x5ec] ss:$12 sps:$4 sm:$0xff]  }
 0x69d   : > { %22037 = vmatprep.subr.bf16.mxu1 %v24488_v56  ;;  %v24550_v56 = vld [vmem:[#allocation11 + $0x6c0] ss:$12 sps:$4 sm:$0xff]  }
 0x69e   : > { %3623 = vmatpush1.bf16.msra.mxu0 %v24485_v57  ;;  %v24552_v57 = vld [vmem:[#allocation11 + $0x6c4] ss:$12 sps:$4 sm:$0xff]  }
 0x69f   : > { %3624 = vmatprep.subr.bf16.mxu0 %v24492_v4  ;;  %v24555_v4 = vld [vmem:[#allocation11 + $0x604] ss:$12 sps:$4 sm:$0xff]  }
 0x6a0   : > { %22038 = vmatpush3.bf16.msra.mxu1 %v24489_v7  ;;  %v24558_v7 = vld [vmem:[#allocation11 + $0x6dc] ss:$12 sps:$4 sm:$0xff]  }
 0x6a1   : > { %22039 = vmatprep.subr.bf16.mxu1 %v24493_v59  ;;  %v24553_v59 = vld [vmem:[#allocation11 + $0x600] ss:$12 sps:$4 sm:$0xff]  }
 0x6a2   : > { %3625 = vmatpush1.bf16.msra.mxu0 %v24490_v60  ;;  %v24556_v60 = vld [vmem:[#allocation11 + $0x6d8] ss:$12 sps:$4 sm:$0xff]  }
 0x6a3   : > { %3685 = vmatprep.subr.bf16.mxu0 %v32791_v37 }
 0x6a4   : > { %22040 = vmatpush3.bf16.msra.mxu1 %v24494_v9  ;;  %v24561_v9 = vld [vmem:[#allocation11 + $0x61c] ss:$12 sps:$4 sm:$0xff]  }
 0x6a5   : > { %3637 = vmatmul.mubr.bf16.vlgmr.msra.gmra.mrb[32].mxu0 %v27276_v62  ;;  %22041 = vmatprep.subr.bf16.mxu1 %v24495_v61  ;;  %v24564_v61 = vld [vmem:[#allocation11 + $0x6f4] ss:$12 sps:$4 sm:$0xff]  }
 0x6a6   : > { %3686 = vmatpush1.bf16.msra.mxu0 %v24497_v36  ;;  %19512 = vmatprep.mubr.msk.bf16.mxu0 %vm809_vm5, %v27263_v10  ;;  %v24505_v10 = vld [vmem:[#allocation11 + $0xb0] ss:$12 sps:$4 sm:$0xff]   ;;  %v24559_v36 = vld [vmem:[#allocation11 + $0x618] ss:$12 sps:$4 sm:$0xff]  }
 0x6a7   : > { %3687 = vmatprep.subr.bf16.mxu0 %v32791_v37 }
 0x6a8   : > { %22042 = vmatpush3.bf16.msra.mxu1 %v24496_v63  ;;  %v24567_v63 = vld [vmem:[#allocation11 + $0x634] ss:$12 sps:$4 sm:$0xff]  }
 0x6a9   : > { %22043 = vmatprep.subr.bf16.mxu1 %v24498_v0  ;;  %v24570_v0 = vld [vmem:[#allocation11 + $0x70c] ss:$12 sps:$4 sm:$0xff]  }
 0x6aa   : > { %3688 = vmatpush1.bf16.msra.mxu0 %v24500_v1  ;;  %v24565_v1 = vld [vmem:[#allocation11 + $0x630] ss:$12 sps:$4 sm:$0xff]  }
 0x6ab   : > { %3689 = vmatprep.subr.bf16.mxu0 %v32791_v37 }
 0x6ac   : > { %22044 = vmatpush3.bf16.msra.mxu1 %v24499_v2  ;;  %v24568_v2 = vld [vmem:[#allocation11 + $0x708] ss:$12 sps:$4 sm:$0xff]  }
 0x6ad   : > { %22045 = vmatprep.subr.bf16.mxu1 %v24501_v3 }
 0x6ae   : > { %3690 = vmatpush1.bf16.msra.mxu0 %v24503_v5  ;;  %v24571_v5 = vld [vmem:[#allocation11 + $0x648] ss:$12 sps:$4 sm:$0xff]  }
 0x6af   : > { %3691 = vmatprep.subr.bf16.mxu0 %v32791_v37 }
 0x6b0   : > { %22046 = vmatpush3.bf16.msra.mxu1 %v24502_v8  ;;  %v24573_v8 = vld [vmem:[#allocation11 + $0x64c] ss:$12 sps:$4 sm:$0xff]  }
 0x6b1   : > { %22047 = vmatprep.subr.bf16.mxu1 %v24504_v11 }
 0x6b2   : > { %3692 = vmatpush1.bf16.msra.mxu0 %v24506_v12  ;;  %v24574_v12 = vld [vmem:[#allocation11 + $0x720] ss:$12 sps:$4 sm:$0xff]  }
 0x6b3   : > { %3693 = vmatprep.subr.bf16.mxu0 %v32791_v37 }
 0x6b4   : > { %22048 = vmatpush3.bf16.msra.mxu1 %v24505_v10  ;;  %v24576_v10 = vld [vmem:[#allocation11 + $0x724] ss:$12 sps:$4 sm:$0xff]  }
 0x6b5   : > { %3730 = vmatprep.subr.bf16.mxu1 %v27202_v39 }
 0x6b6   : > { %3694 = vmatpush1.bf16.msra.mxu0 %v24507_v13 }
 0x6b7   : > { %3678 = vmatmul.mubr.bf16.vlgmr.msra.gmra.mrb[40].mxu1 %v27270_v49  ;;  %3695 = vmatprep.subr.bf16.mxu0 %v32791_v37  ;;  %v24544_v49 = vld [vmem:[#allocation11 + $0x6a8] ss:$12 sps:$4 sm:$0xff]  }
 0x6b8   : > { %3731 = vmatpush1.bf16.msra.mxu1 %v27209_v44  ;;  %3762 = vmatprep.mubr.bf16.mxu1 %v32791_v37 }
 0x6b9   : > { %19513 = vmatprep.subr.msk.bf16.mxu1 %vm864_vm1, %v27212_v50 }
 0x6ba   : > { %3696 = vmatpush1.bf16.msra.mxu0 %v24508_v14 }
 0x6bb   : > { %3697 = vmatprep.subr.bf16.mxu0 %v32791_v37 }
 0x6bc   : > { %3733 = vmatpush1.bf16.msra.mxu1 %v27218_v52 }
 0x6bd   : > { %3771 = vmatprep.subr.bf16.mxu1 %v27191_v26 }
 0x6be   : > { %3698 = vmatpush1.bf16.msra.mxu0 %v24509_v15  ;;  %v24577_v15 = vld [vmem:[#allocation11 + $0x660] ss:$12 sps:$4 sm:$0xff]  }
 0x6bf   : > { %19514 = vmatmul.mubr.msk.bf16.vlgmr.msra.gmra.mrb[44].mxu1 %vm2121_vm7, %v3726_v16  ;;  %3699 = vmatprep.subr.bf16.mxu0 %v32791_v37 }
 0x6c0   : > { %3772 = vmatpush1.bf16.msra.mxu1 %v27194_v31  ;;  %3803 = vmatprep.mubr.bf16.mxu1 %v32791_v37 }
 0x6c1   : > { %19515 = vmatprep.subr.msk.bf16.mxu1 %vm864_vm1, %v27198_v33 }
 0x6c2   : > { %3700 = vmatpush1.bf16.msra.mxu0 %v24510_v6  ;;  %v24580_v6 = vld [vmem:[#allocation11 + $0x738] ss:$12 sps:$4 sm:$0xff]  }
 0x6c3   : > { %3701 = vmatprep.subr.bf16.mxu0 %v32791_v37 }
 0x6c4   : > { %3774 = vmatpush1.bf16.msra.mxu1 %v27205_v40 }
 0x6c5   : > { %4360 = vmatprep.subr.bf16.mxu1 %v24516_v20  ;;  %v24586_v20 = vld [vmem:[#allocation11 + $0x750] ss:$12 sps:$4 sm:$0xff]  }
 0x6c6   : > { %3702 = vmatpush1.bf16.msra.mxu0 %v24511_v17  ;;  %v24582_v17 = vld [vmem:[#allocation11 + $0x73c] ss:$12 sps:$4 sm:$0xff]  }
 0x6c7   : > { %19516 = vmatmul.mubr.msk.bf16.vlgmr.msra.gmra.mrb[48].mxu1 %vm2121_vm7, %v3726_v16  ;;  %3703 = vmatprep.subr.bf16.mxu0 %v32791_v37  ;;  %v24579_v16 = vld [vmem:[#allocation11 + $0x664] ss:$12 sps:$4 sm:$0xff]  }
 0x6c8   : > { %4361 = vmatpush1.bf16.msra.mxu1 %v24514_v19  ;;  %v24583_v19 = vld [vmem:[#allocation11 + $0x678] ss:$12 sps:$4 sm:$0xff]  }
 0x6c9   : > { %4362 = vmatprep.subr.bf16.mxu1 %v24519_v21  ;;  %v24589_v21 = vld [vmem:[#allocation11 + $0x768] ss:$12 sps:$4 sm:$0xff]  }
 0x6ca   : > { %3704 = vmatpush1.bf16.msra.mxu0 %v24512_v18  ;;  %v24585_v18 = vld [vmem:[#allocation11 + $0x67c] ss:$12 sps:$4 sm:$0xff]  }
 0x6cb   : > { %3705 = vmatprep.subr.bf16.mxu0 %v32791_v37 }
 0x6cc   : > { %4363 = vmatpush1.bf16.msra.mxu1 %v24517_v22  ;;  %v24591_v22 = vld [vmem:[#allocation11 + $0x76c] ss:$12 sps:$4 sm:$0xff]  }
 0x6cd   : > { %4364 = vmatprep.subr.bf16.mxu1 %v24522_v23  ;;  %v24595_v23 = vld [vmem:[#allocation11 + $0x784] ss:$12 sps:$4 sm:$0xff]  }
 0x6ce   : > { %3706 = vmatpush1.bf16.msra.mxu0 %v24513_v58  ;;  %v24588_v58 = vld [vmem:[#allocation11 + $0x754] ss:$12 sps:$4 sm:$0xff]  }
 0x6cf   : > { %4401 = vmatprep.subr.bf16.mxu0 %v24540_v46 }
 0x6d0   : > { %4365 = vmatpush1.bf16.msra.mxu1 %v24520_v24  ;;  %v24593_v24 = vld [vmem:[#allocation11 + $0x780] ss:$12 sps:$4 sm:$0xff]  }
 0x6d1   : > { %3718 = vmatmul.mubr.bf16.vlgmr.msra.gmra.mrb[36].mxu0 %v27276_v62  ;;  %4366 = vmatprep.subr.bf16.mxu1 %v24525_v25  ;;  %v24562_v62 = vld [vmem:[#allocation11 + $0x6f0] ss:$12 sps:$4 sm:$0xff]   ;;  %v24597_v25 = vld [vmem:[#allocation11 + $0x5d8] ss:$12 sps:$4 sm:$0xff]  }
 0x6d2   : > { %4402 = vmatpush1.bf16.msra.mxu0 %v24538_v45 }
 0x6d3   : > { %4403 = vmatprep.subr.bf16.mxu0 %v24546_v47 }
 0x6d4   : > { %4367 = vmatpush1.bf16.msra.mxu1 %v24523_v28 }
 0x6d5   : > { %4368 = vmatprep.subr.bf16.mxu1 %v24528_v32 }
 0x6d6   : > { %4404 = vmatpush1.bf16.msra.mxu0 %v24544_v49 }
 0x6d7   : > { %4405 = vmatprep.subr.bf16.mxu0 %v24552_v57 }
 0x6d8   : > { %4369 = vmatpush1.bf16.msra.mxu1 %v24526_v34 }
 0x6d9   : > { %4370 = vmatprep.subr.bf16.mxu1 %v24531_v35 }
 0x6da   : > { %4406 = vmatpush1.bf16.msra.mxu0 %v24550_v56 }
 0x6db   : > { %4407 = vmatprep.subr.bf16.mxu0 %v24558_v7 }
 0x6dc   : > { %4371 = vmatpush1.bf16.msra.mxu1 %v24529_v38 }
 0x6dd   : > { %4372 = vmatprep.subr.bf16.mxu1 %v24534_v42 }
 0x6de   : > { %4408 = vmatpush1.bf16.msra.mxu0 %v24556_v60 }
 0x6df   : > { %4409 = vmatprep.subr.bf16.mxu0 %v24564_v61 }
 0x6e0   : > { %4373 = vmatpush1.bf16.msra.mxu1 %v24532_v41 }
 0x6e1   : > { %4374 = vmatprep.subr.bf16.mxu1 %v24537_v43 }
 0x6e2   : > { %4410 = vmatpush1.bf16.msra.mxu0 %v24562_v62 }
 0x6e3   : > { %4411 = vmatprep.subr.bf16.mxu0 %v24570_v0 }
 0x6e4   : > { %4375 = vmatpush1.bf16.msra.mxu1 %v24535_v48 }
 0x6e5   : > { %4376 = vmatprep.subr.bf16.mxu1 %v24543_v51 }
 0x6e6   : > { %4412 = vmatpush1.bf16.msra.mxu0 %v24568_v2 }
 0x6e7   : > { %4413 = vmatprep.subr.bf16.mxu0 %v24576_v10 }
 0x6e8   : > { %4377 = vmatpush1.bf16.msra.mxu1 %v24541_v53 }
 0x6e9   : > { %4378 = vmatprep.subr.bf16.mxu1 %v24549_v55 }
 0x6ea   : > { %4414 = vmatpush1.bf16.msra.mxu0 %v24574_v12 }
 0x6eb   : > { %4415 = vmatprep.subr.bf16.mxu0 %v24582_v17 }
 0x6ec   : > { %4379 = vmatpush1.bf16.msra.mxu1 %v24547_v54 }
 0x6ed   : > { %4380 = vmatprep.subr.bf16.mxu1 %v24555_v4 }
 0x6ee   : > { %4416 = vmatpush1.bf16.msra.mxu0 %v24580_v6  ;;  %v24596_v6 = vld [vmem:[#allocation11 + $0x6b0] ss:$12 sps:$4 sm:$0xff]  }
 0x6ef   : > { %4417 = vmatprep.subr.bf16.mxu0 %v24588_v58 }
 0x6f0   : > { %4381 = vmatpush1.bf16.msra.mxu1 %v24553_v59 }
 0x6f1   : > { %4382 = vmatprep.subr.bf16.mxu1 %v24561_v9 }
 0x6f2   : > { %4418 = vmatpush1.bf16.msra.mxu0 %v24586_v20  ;;  %v24598_v20 = vld [vmem:[#allocation11 + $0x518] ss:$12 sps:$4 sm:$0xff]  }
 0x6f3   : > { %4419 = vmatprep.subr.bf16.mxu0 %v24591_v22 }
 0x6f4   : > { %4383 = vmatpush1.bf16.msra.mxu1 %v24559_v36 }
 0x6f5   : > { %4384 = vmatprep.subr.bf16.mxu1 %v24567_v63 }
 0x6f6   : > { %4420 = vmatpush1.bf16.msra.mxu0 %v24589_v21  ;;  %v24599_v21 = vld [vmem:[#allocation11 + $0x6c8] ss:$12 sps:$4 sm:$0xff]  }
 0x6f7   : > { %4421 = vmatprep.subr.bf16.mxu0 %v24595_v23 }
 0x6f8   : > { %4385 = vmatpush1.bf16.msra.mxu1 %v24565_v1 }
 0x6f9   : > { %4386 = vmatprep.subr.bf16.mxu1 %v24573_v8 }
 0x6fa   : > { %4422 = vmatpush1.bf16.msra.mxu0 %v24593_v24  ;;  %v24600_v24 = vld [vmem:[#allocation11 + $0x5f0] ss:$12 sps:$4 sm:$0xff]  }
 0x6fb   : > { %22055 = vmatprep.subr.bf16.mxu0 %v24597_v25  ;;  %v24601_v25 = vld [vmem:[#allocation11 + $0x530] ss:$12 sps:$4 sm:$0xff]  }
 0x6fc   : > { %4387 = vmatpush1.bf16.msra.mxu1 %v24571_v5 }
 0x6fd   : > { %4388 = vmatprep.subr.bf16.mxu1 %v24579_v16 }
 0x700   : > { %4389 = vmatpush1.bf16.msra.mxu1 %v24577_v15 }
 0x701   : > { %4390 = vmatprep.subr.bf16.mxu1 %v24585_v18 }
 0x704   : > { %4391 = vmatpush1.bf16.msra.mxu1 %v24583_v19 }
 0x705   : > { %4482 = vmatprep.subr.bf16.mxu1 %v32791_v37 }
 0x70a   : > { %v3041_v3 = vpop.f32.mrb[28].mxu1 }
 0x70b   : > { %v3043_v11 = vpop.f32.mrb[29].mxu1 }
 0x70c   : > { %v3045_v13 = vpop.f32.mrb[30].mxu1 }
 0x70d   : > { %v3046_v14 = vpop.f32.mrb[31].mxu1 }
 0x70e   : > { %v24592_v14 = vld [vmem:[#allocation11 + $0x698] ss:$12 sps:$4 sm:$0xff]  }
 0x720   : > { %v3000_v28 = vpop.f32.mrb[24].mxu0 }
 0x721   : > { %v3042_v32 = vadd.f32 %v3041_v3, %v3000_v28  ;;  %v3002_v34 = vpop.f32.mrb[25].mxu0  ;;  %v24602_v28 = vld [vmem:[#allocation11 + $0x6e0] ss:$12 sps:$4 sm:$0xff]  }
 0x722   : > { %v3044_v35 = vadd.f32 %v3043_v11, %v3002_v34  ;;  %v3004_v38 = vpop.f32.mrb[26].mxu0 }
 0x723   : > { %v3005_v41 = vpop.f32.mrb[27].mxu0  ;;  %v24605_v38 = vld [vmem:[#allocation11 + $0x6f8] ss:$12 sps:$4 sm:$0xff]  }
 0x72a   : > { %v22027_v42 = vpop.f32.mrb[32].mxu1 }
 0x72b   : > { %v22028_v43 = vpop.f32.mrb[33].mxu1 }
 0x72c   : > { %v22029_v45 = vadd.f32 %v22028_v43, %v22027_v42  ;;  %v22030_v46 = vpop.f32.mrb[34].mxu1  ;;  %v24606_v43 = vld [vmem:[#allocation11 + $0x620] ss:$12 sps:$4 sm:$0xff]  }
 0x72d   : > { %v22031_v47 = vpop.f32.mrb[35].mxu1 }
 0x72e   : > { %v24607_v47 = vld [vmem:[#allocation11 + $0x560] ss:$12 sps:$4 sm:$0xff]  }
 0x74c   : > { %v3122_v48 = vpop.f32.mrb[28].mxu0 }
 0x74d   : > { %v3123_v49 = vadd.f32 %v22029_v45, %v3122_v48  ;;  %v3124_v51 = vpop.f32.mrb[29].mxu0  ;;  %v24608_v48 = vld [vmem:[#allocation11 + $0x710] ss:$12 sps:$4 sm:$0xff]  }
 0x74e   : > { %v3125_v53 = vpop.f32.mrb[30].mxu0  ;;  %v24610_v51 = vld [vmem:[#allocation11 + $0x578] ss:$12 sps:$4 sm:$0xff]  }
 0x74f   : > { %v3126_v54 = vpop.f32.mrb[31].mxu0  ;;  %v24611_v53 = vld [vmem:[#allocation11 + $0x728] ss:$12 sps:$4 sm:$0xff]  }
 0x750   : > { %v24612_v54 = vld [vmem:[#allocation11 + $0x650] ss:$12 sps:$4 sm:$0xff]  }
 0x76a   : > { %v3597_v55 = vpop.f32.mrb[36].mxu1 }
 0x76b   : > { %v3598_v56 = vadd.f32 %v3597_v55, %v3042_v32  ;;  %v3599_v57 = vpop.f32.mrb[37].mxu1  ;;  %v24603_v32 = vld [vmem:[#allocation11 + $0x608] ss:$12 sps:$4 sm:$0xff]   ;;  %v24613_v55 = vld [vmem:[#allocation11 + $0x590] ss:$12 sps:$4 sm:$0xff]  }
 0x76c   : > { %v3600_v4 = vadd.f32 %v3599_v57, %v3044_v35  ;;  %v3601_v7 = vpop.f32.mrb[38].mxu1  ;;  %v24604_v35 = vld [vmem:[#allocation11 + $0x548] ss:$12 sps:$4 sm:$0xff]  }
 0x76d   : > { %v3602_v59 = vpop.f32.mrb[39].mxu1  ;;  %v24615_v57 = vld [vmem:[#allocation11 + $0x668] ss:$12 sps:$4 sm:$0xff]   ;;  %v24617_v7 = vld [vmem:[#allocation11 + $0x758] ss:$12 sps:$4 sm:$0xff]  }
 0x76e   : > { %v24618_v59 = vld [vmem:[#allocation11 + $0x680] ss:$12 sps:$4 sm:$0xff]  }
 0x778   : > { %v3638_v60 = vpop.f32.mrb[32].mxu0 }
 0x779   : > { %v27309_v9 = vadd.f32 %v3638_v60, %v3598_v56  ;;  %v3640_v61 = vpop.f32.mrb[33].mxu0  ;;  %v24614_v56 = vld [vmem:[#allocation11 + $0x740] ss:$12 sps:$4 sm:$0xff]  }
 0x77a   : > { %v27311_v36 = vadd.f32 %v3640_v61, %v3600_v4  ;;  %v3642_v62 = vpop.f32.mrb[34].mxu0  ;;  %v24616_v4 = vld [vmem:[#allocation11 + $0x5a8] ss:$12 sps:$4 sm:$0xff]   ;;  %v24619_v60 = vld [vmem:[#allocation11 + $0x5c0] ss:$12 sps:$4 sm:$0xff]  }
 0x77b   : > { %v3643_v63 = vpop.f32.mrb[35].mxu0  ;;  %v24620_v61 = vld [vmem:[#allocation11 + $0x770] ss:$12 sps:$4 sm:$0xff]   ;;  %v24621_v62 = vld [vmem:[#allocation11 + $0x788] ss:$12 sps:$4 sm:$0xff]  }
 0x77c   : > { %v4526_v63 = vld [vmem:[#allocation9 + $0xc] sm:$0xf] }
 0x78a   : > { %v22049_v0 = vpop.f32.mrb[40].mxu1 }
 0x78b   : > { %v22050_v1 = vpop.f32.mrb[41].mxu1 }
 0x78c   : > { %v22051_v2 = vadd.f32 %v22050_v1, %v22049_v0  ;;  %v22052_v3 = vpop.f32.mrb[42].mxu1  ;;  %v24628_v0 = vld [vmem:[#allocation11 + $0x7c8] ss:$12 sps:$4 sm:$0xff]   ;;  %v24631_v1 = vld [vmem:[#allocation11 + $0x7e0] ss:$12 sps:$4 sm:$0xff]  }
 0x78d   : > { %v22053_v5 = vpop.f32.mrb[43].mxu1  ;;  %v24637_v3 = vld [vmem:[#allocation11 + $0x810] ss:$12 sps:$4 sm:$0xff]  }
 0x78e   : > { %v3680_v8 = vadd.f32 %v22051_v2, %v3123_v49  ;;  %v24609_v49 = vld [vmem:[#allocation11 + $0x638] ss:$12 sps:$4 sm:$0xff]   ;;  %v24636_v2 = vld [vmem:[#allocation11 + $0x7fc] ss:$12 sps:$4 sm:$0xff]  }
 0x78f   : > { %v24642_v5 = vld [vmem:[#allocation11 + $0x82c] ss:$12 sps:$4 sm:$0xff]  }
 0x792   : > { %v3764_v11 = vpop.f32.mrb[44].mxu1 }
 0x793   : > { %v3766_v12 = vpop.f32.mrb[45].mxu1  ;;  %v27313_v15 = vpack.c.bf16 %v3764_v11, %v3764_v11  ;;  %v24645_v11 = vld [vmem:[#allocation11 + $0x844] ss:$12 sps:$4 sm:$0xff]  }
 0x794   : > { %v3813_v10 = vpack.c.bf16 %v3766_v12, %v3766_v12  ;;  %v3768_v13 = vpop.f32.mrb[46].mxu1  ;;  %v24646_v12 = vld [vmem:[#allocation11 + $0x918] ss:$12 sps:$4 sm:$0xff]  }
 0x795   : > { %v3769_v16 = vpop.f32.mrb[47].mxu1  ;;  %v24643_v13 = vld [vmem:[#allocation11 + $0x840] ss:$12 sps:$4 sm:$0xff]  }
 0x796   : > { %4392 = vmatprep.mubr.bf16.mxu1 %v3813_v10  ;;  %v24652_v16 = vld [vmem:[#allocation11 + $0x930] ss:$12 sps:$4 sm:$0xff]  }
 0x797   : > { %4393 = vmatmul.mubr.bf16.vlgmr.msra.gmra.mrb[52].mxu1 %v27313_v15 }
 0x798   : > { %4483 = vmatpush1.bf16.msra.mxu1 %v24592_v14  ;;  %v24654_v14 = vld [vmem:[#allocation11 + $0x934] ss:$12 sps:$4 sm:$0xff]  }
 0x799   : > { %4484 = vmatprep.subr.bf16.mxu1 %v32791_v37 }
 0x79a   : > { %v3805_v17 = vpop.f32.mrb[48].mxu1 }
 0x79b   : > { %v3807_v18 = vpop.f32.mrb[49].mxu1  ;;  %v27317_v22 = vpack.c.bf16 %v3805_v17, %v3805_v17  ;;  %v24649_v17 = vld [vmem:[#allocation11 + $0x858] ss:$12 sps:$4 sm:$0xff]  }
 0x79c   : > { %v3815_v58 = vpack.c.bf16 %v3807_v18, %v3807_v18  ;;  %4485 = vmatpush1.bf16.msra.mxu1 %v24596_v6  ;;  %v3809_v19 = vpop.f32.mrb[50].mxu1  ;;  %v24660_v6 = vld [vmem:[#allocation11 + $0x94c] ss:$12 sps:$4 sm:$0xff]   ;;  %v24657_v18 = vld [vmem:[#allocation11 + $0x874] ss:$12 sps:$4 sm:$0xff]  }
 0x79d   : > { %v3810_v23 = vpop.f32.mrb[51].mxu1  ;;  %4486 = vmatprep.subr.bf16.mxu1 %v32791_v37  ;;  %v24666_v19 = vld [vmem:[#allocation11 + $0x964] ss:$12 sps:$4 sm:$0xff]  }
 0x79e   : > { %19598 = vmatprep.mubr.msk.bf16.mxu0 %vm809_vm5, %v3815_v58  ;;  %19599 = vmatprep.mubr.msk.bf16.mxu1 %vm809_vm5, %v3815_v58  ;;  %v24658_v58 = vld [vmem:[#allocation11 + $0x948] ss:$12 sps:$4 sm:$0xff]  }
 0x79f   : > { %4434 = vmatmul.mubr.bf16.vlgmr.msra.gmra.mrb[40].mxu0 %v27317_v22  ;;  %v24672_v23 = vld [vmem:[#allocation11 + $0x97c] ss:$12 sps:$4 sm:$0xff]  }
 0x7a0   : > { %22056 = vmatpush3.bf16.msra.mxu0 %v24598_v20  ;;  %4487 = vmatpush1.bf16.msra.mxu1 %v24599_v21  ;;  %v24655_v20 = vld [vmem:[#allocation11 + $0x870] ss:$12 sps:$4 sm:$0xff]   ;;  %v24663_v21 = vld [vmem:[#allocation11 + $0x88c] ss:$12 sps:$4 sm:$0xff]  }
 0x7a1   : > { %4474 = vmatprep.mubr.bf16.mxu0 %v3813_v10  ;;  %22057 = vmatprep.subr.bf16.mxu0 %v24600_v24  ;;  %v24648_v10 = vld [vmem:[#allocation11 + $0x91c] ss:$12 sps:$4 sm:$0xff]  }
 0x7a2   : > { %4488 = vmatprep.subr.bf16.mxu1 %v32791_v37  ;;  %v24661_v24 = vld [vmem:[#allocation11 + $0x888] ss:$12 sps:$4 sm:$0xff]  }
 0x7a4   : > { %22058 = vmatpush3.bf16.msra.mxu0 %v24601_v25  ;;  %4489 = vmatpush1.bf16.msra.mxu1 %v24602_v28  ;;  %v3719_v34 = vpop.f32.mrb[36].mxu0  ;;  %v24669_v25 = vld [vmem:[#allocation11 + $0x8a4] ss:$12 sps:$4 sm:$0xff]  }
 0x7a5   : > { %v27324_v41 = vadd.f32 %v3719_v34, %v3680_v8  ;;  %22059 = vmatprep.subr.bf16.mxu0 %v24603_v32  ;;  %4490 = vmatprep.subr.bf16.mxu1 %v32791_v37  ;;  %v3721_v42 = vpop.f32.mrb[37].mxu0  ;;  %v24640_v8 = vld [vmem:[#allocation11 + $0x828] ss:$12 sps:$4 sm:$0xff]   ;;  %v24670_v28 = vld [vmem:[#allocation11 + $0x978] ss:$12 sps:$4 sm:$0xff]  }
 0x7a6   : > { %v3722_v45 = vpop.f32.mrb[38].mxu0  ;;  %v24678_v32 = vld [vmem:[#allocation11 + $0x994] ss:$12 sps:$4 sm:$0xff]   ;;  %v24673_v42 = vld [vmem:[#allocation11 + $0x8b8] ss:$12 sps:$4 sm:$0xff]  }
 0x7a7   : > { %v3723_v46 = vpop.f32.mrb[39].mxu0  ;;  %v24667_v34 = vld [vmem:[#allocation11 + $0x8a0] ss:$12 sps:$4 sm:$0xff]  }
 0x7a8   : > { %22060 = vmatpush3.bf16.msra.mxu0 %v24604_v35  ;;  %4491 = vmatpush1.bf16.msra.mxu1 %v24605_v38  ;;  %v24675_v35 = vld [vmem:[#allocation11 + $0x8bc] ss:$12 sps:$4 sm:$0xff]   ;;  %v24684_v45 = vld [vmem:[#allocation11 + $0x9ac] ss:$12 sps:$4 sm:$0xff]  }
 0x7a9   : > { %22061 = vmatprep.subr.bf16.mxu0 %v24606_v43  ;;  %4492 = vmatprep.subr.bf16.mxu1 %v32791_v37  ;;  %v24676_v38 = vld [vmem:[#allocation11 + $0x990] ss:$12 sps:$4 sm:$0xff]   ;;  %v24681_v43 = vld [vmem:[#allocation11 + $0x8d4] ss:$12 sps:$4 sm:$0xff]  }
 0x7aa   : > { %v24679_v46 = vld [vmem:[#allocation11 + $0x8d0] ss:$12 sps:$4 sm:$0xff]  }
 0x7ac   : > { %22062 = vmatpush3.bf16.msra.mxu0 %v24607_v47  ;;  %4493 = vmatpush1.bf16.msra.mxu1 %v24608_v48  ;;  %v24682_v47 = vld [vmem:[#allocation11 + $0x9a8] ss:$12 sps:$4 sm:$0xff]   ;;  %v24687_v48 = vld [vmem:[#allocation11 + $0x8ec] ss:$12 sps:$4 sm:$0xff]  }
 0x7ad   : > { %22063 = vmatprep.subr.bf16.mxu0 %v24609_v49  ;;  %4494 = vmatprep.subr.bf16.mxu1 %v32791_v37  ;;  %v24690_v49 = vld [vmem:[#allocation11 + $0x9c4] ss:$12 sps:$4 sm:$0xff]  }
 0x7b0   : > { %22064 = vmatpush3.bf16.msra.mxu0 %v24610_v51  ;;  %4495 = vmatpush1.bf16.msra.mxu1 %v24611_v53  ;;  %v24685_v51 = vld [vmem:[#allocation11 + $0x8e8] ss:$12 sps:$4 sm:$0xff]   ;;  %v24688_v53 = vld [vmem:[#allocation11 + $0x9c0] ss:$12 sps:$4 sm:$0xff]  }
 0x7b1   : > { %22065 = vmatprep.subr.bf16.mxu0 %v24612_v54  ;;  %4496 = vmatprep.subr.bf16.mxu1 %v32791_v37  ;;  %v24693_v54 = vld [vmem:[#allocation11 + $0x904] ss:$12 sps:$4 sm:$0xff]  }
 0x7b4   : > { %22066 = vmatpush3.bf16.msra.mxu0 %v24613_v55  ;;  %4497 = vmatpush1.bf16.msra.mxu1 %v24614_v56  ;;  %v24696_v55 = vld [vmem:[#allocation11 + $0x9dc] ss:$12 sps:$4 sm:$0xff]   ;;  %v24691_v56 = vld [vmem:[#allocation11 + $0x900] ss:$12 sps:$4 sm:$0xff]  }
 0x7b5   : > { %22067 = vmatprep.subr.bf16.mxu0 %v24615_v57  ;;  %4498 = vmatprep.subr.bf16.mxu1 %v32791_v37  ;;  %v24694_v57 = vld [vmem:[#allocation11 + $0x9d8] ss:$12 sps:$4 sm:$0xff]  }
 0x7b8   : > { %22068 = vmatpush3.bf16.msra.mxu0 %v24616_v4  ;;  %4499 = vmatpush1.bf16.msra.mxu1 %v24617_v7  ;;  %v24699_v4 = vld [vmem:[#allocation11 + $0x9f4] ss:$12 sps:$4 sm:$0xff]   ;;  %v24697_v7 = vld [vmem:[#allocation11 + $0x9f0] ss:$12 sps:$4 sm:$0xff]  }
 0x7b9   : > { %22069 = vmatprep.subr.bf16.mxu0 %v24618_v59  ;;  %4500 = vmatprep.subr.bf16.mxu1 %v32791_v37  ;;  %v24703_v59 = vld [vmem:[#allocation11 + $0xa0c] ss:$12 sps:$4 sm:$0xff]  }
 0x7bc   : > { %22070 = vmatpush3.bf16.msra.mxu0 %v24619_v60  ;;  %4501 = vmatpush1.bf16.msra.mxu1 %v24620_v61  ;;  %v24701_v60 = vld [vmem:[#allocation11 + $0xa08] ss:$12 sps:$4 sm:$0xff]   ;;  %v24705_v61 = vld [vmem:[#allocation11 + $0x860] ss:$12 sps:$4 sm:$0xff]  }
 0x7bd   : > { %4530 = vmatprep.subr.bf16.mxu0 %v27202_v39  ;;  %4502 = vmatprep.subr.bf16.mxu1 %v32791_v37  ;;  %v24624_v39 = vld [vmem:[#allocation11 + $0x79c] ss:$12 sps:$4 sm:$0xff]  }
 0x7bf   : > { %4475 = vmatmul.mubr.bf16.vlgmr.msra.gmra.mrb[44].mxu0 %v27313_v15  ;;  %v24651_v15 = vld [vmem:[#allocation11 + $0x85c] ss:$12 sps:$4 sm:$0xff]  }
 0x7c0   : > { %4503 = vmatpush1.bf16.msra.mxu1 %v24621_v62  ;;  %4531 = vmatpush1.bf16.msra.mxu0 %v27209_v44  ;;  %v24622_v44 = vld [vmem:[#allocation11 + $0x798] ss:$12 sps:$4 sm:$0xff]  }
 0x7c1   : > { %19600 = vmatprep.subr.msk.bf16.mxu0 %vm864_vm1, %v27212_v50  ;;  %4562 = vmatprep.mubr.bf16.mxu0 %v32791_v37  ;;  %v24627_v50 = vld [vmem:[#allocation11 + $0x7b4] ss:$12 sps:$4 sm:$0xff]  }
 0x7c2   : > { %5201 = vmatprep.subr.bf16.mxu1 %v24648_v10 }
 0x7c3   : > { %4515 = vmatmul.mubr.bf16.vlgmr.msra.gmra.mrb[56].mxu1 %v27317_v22  ;;  %v24664_v22 = vld [vmem:[#allocation11 + $0x960] ss:$12 sps:$4 sm:$0xff]  }
 0x7c4   : > { %4533 = vmatpush1.bf16.msra.mxu0 %v27218_v52  ;;  %v24625_v52 = vld [vmem:[#allocation11 + $0x7b0] ss:$12 sps:$4 sm:$0xff]   ;;  %5202 = vmatpush1.bf16.msra.mxu1 %v24646_v12 }
 0x7c5   : > { %4571 = vmatprep.subr.bf16.mxu0 %v27191_v26  ;;  %v24630_v26 = vld [vmem:[#allocation11 + $0x7cc] ss:$12 sps:$4 sm:$0xff]   ;;  %5203 = vmatprep.subr.bf16.mxu1 %v24654_v14 }
 0x7c7   : > { %19601 = vmatmul.mubr.msk.bf16.vlgmr.msra.gmra.mrb[48].mxu0 %vm2121_vm7, %v4526_v63 }
 0x7c8   : > { %4572 = vmatpush1.bf16.msra.mxu0 %v27194_v31  ;;  %4603 = vmatprep.mubr.bf16.mxu0 %v32791_v37  ;;  %v24633_v31 = vld [vmem:[#allocation11 + $0x7e4] ss:$12 sps:$4 sm:$0xff]  }
 0x7c9   : > { %19602 = vmatprep.subr.msk.bf16.mxu0 %vm864_vm1, %v27198_v33  ;;  %v24634_v33 = vld [vmem:[#allocation11 + $0x7f8] ss:$12 sps:$4 sm:$0xff]   ;;  %5204 = vmatpush1.bf16.msra.mxu1 %v24652_v16  ;;  %vm823_vm1 = vcmask 785408  }
 0x7ca   : > { %5205 = vmatprep.subr.bf16.mxu1 %v24660_v6 }
 0x7cc   : > { %4574 = vmatpush1.bf16.msra.mxu0 %v27205_v40  ;;  %v24639_v40 = vld [vmem:[#allocation11 + $0x814] ss:$12 sps:$4 sm:$0xff]  }
 0x7cd   : > { %5160 = vmatprep.subr.bf16.mxu0 %v24624_v39  ;;  %5206 = vmatpush1.bf16.msra.mxu1 %v24658_v58  ;;  %v24700_v58 = vld [vmem:[#allocation11 + $0x920] ss:$12 sps:$4 sm:$0xff]  }
 0x7ce   : > { %5207 = vmatprep.subr.bf16.mxu1 %v24666_v19 }
 0x7cf   : > { %19603 = vmatmul.mubr.msk.bf16.vlgmr.msra.gmra.mrb[52].mxu0 %vm2121_vm7, %v4526_v63 }
 0x7d0   : > { %5161 = vmatpush1.bf16.msra.mxu0 %v24622_v44 }
 0x7d1   : > { %5162 = vmatprep.subr.bf16.mxu0 %v24627_v50  ;;  %5208 = vmatpush1.bf16.msra.mxu1 %v24664_v22 }
 0x7d2   : > { %5209 = vmatprep.subr.bf16.mxu1 %v24672_v23 }
 0x7d4   : > { %5163 = vmatpush1.bf16.msra.mxu0 %v24625_v52 }
 0x7d5   : > { %5164 = vmatprep.subr.bf16.mxu0 %v24630_v26  ;;  %5210 = vmatpush1.bf16.msra.mxu1 %v24670_v28  ;;  %v24707_v28 = vld [vmem:[#allocation11 + $0x950] ss:$12 sps:$4 sm:$0xff]  }
 0x7d6   : > { %5211 = vmatprep.subr.bf16.mxu1 %v24678_v32 }
 0x7d8   : > { %5165 = vmatpush1.bf16.msra.mxu0 %v24628_v0 }
 0x7d9   : > { %5166 = vmatprep.subr.bf16.mxu0 %v24633_v31  ;;  %5212 = vmatpush1.bf16.msra.mxu1 %v24676_v38  ;;  %v24710_v38 = vld [vmem:[#allocation11 + $0x968] ss:$12 sps:$4 sm:$0xff]  }
 0x7da   : > { %5213 = vmatprep.subr.bf16.mxu1 %v24684_v45  ;;  %v24713_v45 = vld [vmem:[#allocation11 + $0x980] ss:$12 sps:$4 sm:$0xff]  }
 0x7dc   : > { %5167 = vmatpush1.bf16.msra.mxu0 %v24631_v1 }
 0x7dd   : > { %5168 = vmatprep.subr.bf16.mxu0 %v24636_v2  ;;  %5214 = vmatpush1.bf16.msra.mxu1 %v24682_v47  ;;  %v24715_v47 = vld [vmem:[#allocation11 + $0x7e8] ss:$12 sps:$4 sm:$0xff]  }
 0x7de   : > { %5215 = vmatprep.subr.bf16.mxu1 %v24690_v49  ;;  %v24717_v49 = vld [vmem:[#allocation11 + $0x8c0] ss:$12 sps:$4 sm:$0xff]  }
 0x7e0   : > { %5169 = vmatpush1.bf16.msra.mxu0 %v24634_v33 }
 0x7e1   : > { %5170 = vmatprep.subr.bf16.mxu0 %v24639_v40  ;;  %5216 = vmatpush1.bf16.msra.mxu1 %v24688_v53  ;;  %v24719_v53 = vld [vmem:[#allocation11 + $0x9b0] ss:$12 sps:$4 sm:$0xff]  }
 0x7e2   : > { %5217 = vmatprep.subr.bf16.mxu1 %v24696_v55  ;;  %v24721_v55 = vld [vmem:[#allocation11 + $0x818] ss:$12 sps:$4 sm:$0xff]  }
 0x7e4   : > { %5171 = vmatpush1.bf16.msra.mxu0 %v24637_v3 }
 0x7e5   : > { %5172 = vmatprep.subr.bf16.mxu0 %v24642_v5  ;;  %5218 = vmatpush1.bf16.msra.mxu1 %v24694_v57  ;;  %v24723_v57 = vld [vmem:[#allocation11 + $0x8f0] ss:$12 sps:$4 sm:$0xff]  }
 0x7e6   : > { %5219 = vmatprep.subr.bf16.mxu1 %v24699_v4  ;;  %v24724_v4 = vld [vmem:[#allocation11 + $0x830] ss:$12 sps:$4 sm:$0xff]  }
 0x7e8   : > { %5173 = vmatpush1.bf16.msra.mxu0 %v24640_v8 }
 0x7e9   : > { %5174 = vmatprep.subr.bf16.mxu0 %v24645_v11  ;;  %5220 = vmatpush1.bf16.msra.mxu1 %v24697_v7  ;;  %v24725_v7 = vld [vmem:[#allocation11 + $0x9e0] ss:$12 sps:$4 sm:$0xff]  }
 0x7ea   : > { %5221 = vmatprep.subr.bf16.mxu1 %v24703_v59  ;;  %v24726_v59 = vld [vmem:[#allocation11 + $0x908] ss:$12 sps:$4 sm:$0xff]  }
 0x7ec   : > { %5175 = vmatpush1.bf16.msra.mxu0 %v24643_v13 }
 0x7ed   : > { %5176 = vmatprep.subr.bf16.mxu0 %v24651_v15  ;;  %5222 = vmatpush1.bf16.msra.mxu1 %v24701_v60  ;;  %v5379_v60 = vld [vmem:[%s32752_s7 + $0x80] sm:$0xff] }
 0x7ee   : > { %22077 = vmatprep.subr.bf16.mxu1 %v24705_v61  ;;  %v5380_v61 = vld [vmem:[%s32752_s7 + $0x88] sm:$0xff] }
 0x7f0   : > { %5177 = vmatpush1.bf16.msra.mxu0 %v24649_v17 }
 0x7f1   : > { %5178 = vmatprep.subr.bf16.mxu0 %v24657_v18 }
 0x7f4   : > { %5179 = vmatpush1.bf16.msra.mxu0 %v24655_v20  ;;  %v24704_v20 = vld [vmem:[#allocation11 + $0x938] ss:$12 sps:$4 sm:$0xff]  }
 0x7f5   : > { %5180 = vmatprep.subr.bf16.mxu0 %v24663_v21 }
 0x7f8   : > { %5181 = vmatpush1.bf16.msra.mxu0 %v24661_v24 }
 0x7f9   : > { %5182 = vmatprep.subr.bf16.mxu0 %v24669_v25  ;;  %v24706_v25 = vld [vmem:[#allocation11 + $0x7a0] ss:$12 sps:$4 sm:$0xff]  }
 0x7fc   : > { %5183 = vmatpush1.bf16.msra.mxu0 %v24667_v34  ;;  %v24708_v34 = vld [vmem:[#allocation11 + $0x878] ss:$12 sps:$4 sm:$0xff]  }
 0x7fd   : > { %5184 = vmatprep.subr.bf16.mxu0 %v24675_v35  ;;  %v24709_v35 = vld [vmem:[#allocation11 + $0x7b8] ss:$12 sps:$4 sm:$0xff]  }
 0x800   : > { %5185 = vmatpush1.bf16.msra.mxu0 %v24673_v42  ;;  %v24711_v42 = vld [vmem:[#allocation11 + $0x890] ss:$12 sps:$4 sm:$0xff]  }
 0x801   : > { %5186 = vmatprep.subr.bf16.mxu0 %v24681_v43  ;;  %v24712_v43 = vld [vmem:[#allocation11 + $0x7d0] ss:$12 sps:$4 sm:$0xff]  }
 0x804   : > { %5187 = vmatpush1.bf16.msra.mxu0 %v24679_v46  ;;  %v24714_v46 = vld [vmem:[#allocation11 + $0x8a8] ss:$12 sps:$4 sm:$0xff]  }
 0x805   : > { %5188 = vmatprep.subr.bf16.mxu0 %v24687_v48  ;;  %v24716_v48 = vld [vmem:[#allocation11 + $0x998] ss:$12 sps:$4 sm:$0xff]  }
 0x808   : > { %5189 = vmatpush1.bf16.msra.mxu0 %v24685_v51  ;;  %v24718_v51 = vld [vmem:[#allocation11 + $0x800] ss:$12 sps:$4 sm:$0xff]  }
 0x809   : > { %5190 = vmatprep.subr.bf16.mxu0 %v24693_v54  ;;  %v24720_v54 = vld [vmem:[#allocation11 + $0x8d8] ss:$12 sps:$4 sm:$0xff]  }
 0x80c   : > { %5191 = vmatpush1.bf16.msra.mxu0 %v24691_v56  ;;  %v24722_v56 = vld [vmem:[#allocation11 + $0x9c8] ss:$12 sps:$4 sm:$0xff]  }
 0x80d   : > { %5282 = vmatprep.subr.bf16.mxu0 %v32791_v37 }
 0x86a   : > { %v4394_v62 = vpop.f32.mrb[52].mxu1 }
 0x86b   : > { %v4396_v63 = vpop.f32.mrb[53].mxu1 }
 0x86c   : > { %v4398_v39 = vpop.f32.mrb[54].mxu1 }
 0x86d   : > { %v4399_v44 = vpop.f32.mrb[55].mxu1  ;;  %v27382_v39 = vpack.c.bf16 %v5380_v61, %v5379_v60  ;;  %v5398_v60 = vld [vmem:[%s32752_s7 + $0x118] sm:$0xff] }
 0x86e   : > { %v5363_v44 = vld [vmem:[%s32752_s7] sm:$0xff] }
 0x872   : > { %v4435_v50 = vpop.f32.mrb[40].mxu0 }
 0x873   : > { %v4436_v52 = vadd.f32 %v4435_v50, %v4394_v62  ;;  %v4437_v26 = vpop.f32.mrb[41].mxu0  ;;  %v24727_v62 = vld [vmem:[#allocation11 + $0x848] ss:$12 sps:$4 sm:$0xff]   ;;  %v5364_v50 = vld [vmem:[%s32752_s7 + $0x8] sm:$0xff] }
 0x874   : > { %v4438_v0 = vadd.f32 %v4437_v26, %v4396_v63  ;;  %v4439_v31 = vpop.f32.mrb[42].mxu0  ;;  %v24728_v63 = vld [vmem:[#allocation11 + $0x9f8] ss:$12 sps:$4 sm:$0xff]   ;;  %v27390_v26 = vpack.c.bf16 %v5364_v50, %v5363_v44 }
 0x875   : > { %v27351_v1 = vadd.f32 %v4436_v52, %v27309_v9  ;;  %v4440_v33 = vpop.f32.mrb[43].mxu0  ;;  %v24729_v52 = vld [vmem:[#allocation11 + $0xa10] ss:$12 sps:$4 sm:$0xff]   ;;  %v5381_v31 = vld [vmem:[%s32752_s7 + $0x90] sm:$0xff] }
 0x876   : > { %v27354_v2 = vadd.f32 %v4438_v0, %v27311_v36  ;;  %v27397_v0 = vld [vmem:[#allocation3] sm:$0xff]  ;;  %v5382_v33 = vld [vmem:[%s32752_s7 + $0x98] sm:$0xff]  ;;  %v5401_v50 = vld [vmem:[%s32752_s7 + $0x130] sm:$0xff] }
 0x877   : > { %824 = vst.msk [vmem:[#allocation3 + $0x18] sm:$0xff] %vm823_vm1, %v27397_v0 }
 0x878   : > { %829 = vst.msk [vmem:[#allocation3 + $0x38] sm:$0x3] %vm828_vm8, %v27397_v0 }
 0x892   : > { %v22071_v40 = vpop.f32.mrb[44].mxu0 }
 0x893   : > { %v22072_v3 = vpop.f32.mrb[45].mxu0 }
 0x894   : > { %v22073_v5 = vadd.f32 %v22072_v3, %v22071_v40  ;;  %v22074_v8 = vpop.f32.mrb[46].mxu0  ;;  %v27407_v40 = vpack.c.bf16 %v5382_v33, %v5381_v31  ;;  %v5365_v3 = vld [vmem:[%s32752_s7 + $0x10] sm:$0xff]  ;;  %v5403_v33 = vld [vmem:[%s32752_s7 + $0x140] sm:$0xff] }
 0x895   : > { %v22075_v11 = vpop.f32.mrb[47].mxu0 }
 0x896   : > { %v4516_v12 = vpop.f32.mrb[56].mxu1  ;;  %v5383_v11 = vld [vmem:[%s32752_s7 + $0xa0] sm:$0xff] }
 0x897   : > { %v4517_v10 = vadd.f32 %v22073_v5, %v4516_v12  ;;  %v4518_v13 = vpop.f32.mrb[57].mxu1  ;;  %v5366_v5 = vld [vmem:[%s32752_s7 + $0x18] sm:$0xff]  ;;  %v5384_v12 = vld [vmem:[%s32752_s7 + $0xa8] sm:$0xff] }
 0x898   : > { %v4519_v14 = vpop.f32.mrb[58].mxu1  ;;  %v27415_v8 = vpack.c.bf16 %v5366_v5, %v5365_v3  ;;  %v27428_v13 = vpack.c.bf16 %v5384_v12, %v5383_v11  ;;  %v5404_v3 = vld [vmem:[%s32752_s7 + $0x148] sm:$0xff]  ;;  %v5405_v11 = vld [vmem:[%s32752_s7 + $0x150] sm:$0xff]  ;;  %v5406_v12 = vld [vmem:[%s32752_s7 + $0x158] sm:$0xff] }
 0x899   : > { %v27357_v15 = vadd.f32 %v4517_v10, %v27324_v41  ;;  %v4520_v16 = vpop.f32.mrb[59].mxu1  ;;  %v5367_v10 = vld [vmem:[%s32752_s7 + $0x20] sm:$0xff]  ;;  %v5368_v14 = vld [vmem:[%s32752_s7 + $0x28] sm:$0xff]  ;;  %v27574_v5 = vpack.c.bf16 %v5404_v3, %v5403_v33 }
 0x89a   : > { %v4564_v6 = vpop.f32.mrb[48].mxu0  ;;  %v27433_v16 = vpack.c.bf16 %v5368_v14, %v5367_v10  ;;  %v27584_v10 = vpack.c.bf16 %v5406_v12, %v5405_v11  ;;  %v5407_v14 = vld [vmem:[%s32752_s7 + $0x160] sm:$0xff] }
 0x89b   : > { %v4566_v9 = vpop.f32.mrb[49].mxu0  ;;  %v27359_v36 = vpack.c.bf16 %v4564_v6, %v4564_v6  ;;  %v5385_v6 = vld [vmem:[%s32752_s7 + $0xb0] sm:$0xff] }
 0x89c   : > { %v4613_v17 = vpack.c.bf16 %v4566_v9, %v4566_v9  ;;  %v4568_v18 = vpop.f32.mrb[50].mxu0  ;;  %v5386_v9 = vld [vmem:[%s32752_s7 + $0xb8] sm:$0xff] }
 0x89d   : > { %v4569_v19 = vpop.f32.mrb[51].mxu0  ;;  %v5369_v18 = vld [vmem:[%s32752_s7 + $0x30] sm:$0xff] }
 0x89e   : > { %5192 = vmatprep.mubr.bf16.mxu0 %v4613_v17  ;;  %v5387_v19 = vld [vmem:[%s32752_s7 + $0xc0] sm:$0xff] }
 0x89f   : > { %5193 = vmatmul.mubr.bf16.vlgmr.msra.gmra.mrb[56].mxu0 %v27359_v36 }
 0x8a0   : > { %5283 = vmatpush1.bf16.msra.mxu0 %v24700_v58  ;;  %v5370_v58 = vld [vmem:[%s32752_s7 + $0x38] sm:$0xff] }
 0x8a1   : > { %5284 = vmatprep.subr.bf16.mxu0 %v32791_v37 }
 0x8a2   : > { %v4605_v21 = vpop.f32.mrb[52].mxu0 }
 0x8a3   : > { %v27363_v22 = vpack.c.bf16 %v4605_v21, %v4605_v21  ;;  %v4607_v41 = vpop.f32.mrb[53].mxu0 }
 0x8a4   : > { %v4615_v23 = vpack.c.bf16 %v4607_v41, %v4607_v41  ;;  %5285 = vmatpush1.bf16.msra.mxu0 %v24704_v20  ;;  %v4609_v24 = vpop.f32.mrb[54].mxu0  ;;  %v5388_v20 = vld [vmem:[%s32752_s7 + $0xc8] sm:$0xff] }
 0x8a5   : > { %v4610_v32 = vpop.f32.mrb[55].mxu0  ;;  %5286 = vmatprep.subr.bf16.mxu0 %v32791_v37  ;;  %v27461_v21 = vpack.c.bf16 %v5388_v20, %v5387_v19  ;;  %v5372_v41 = vld [vmem:[%s32752_s7 + $0x48] sm:$0xff]  ;;  %v5389_v24 = vld [vmem:[%s32752_s7 + $0xd0] sm:$0xff] }
 0x8a6   : > { %19685 = vmatprep.mubr.msk.bf16.mxu1 %vm809_vm5, %v4615_v23  ;;  %19686 = vmatprep.mubr.msk.bf16.mxu0 %vm809_vm5, %v4615_v23  ;;  %v5373_v32 = vld [vmem:[%s32752_s7 + $0x50] sm:$0xff] }
 0x8a7   : > { %5234 = vmatmul.mubr.bf16.vlgmr.msra.gmra.mrb[60].mxu1 %v27363_v22 }
 0x8a8   : > { %22078 = vmatpush3.bf16.msra.mxu1 %v24706_v25  ;;  %5287 = vmatpush1.bf16.msra.mxu0 %v24707_v28  ;;  %v5390_v25 = vld [vmem:[%s32752_s7 + $0xd8] sm:$0xff] }
 0x8a9   : > { %5274 = vmatprep.mubr.bf16.mxu1 %v4613_v17  ;;  %22079 = vmatprep.subr.bf16.mxu1 %v24708_v34  ;;  %v27443_v17 = vpack.c.bf16 %v5386_v9, %v5385_v6  ;;  %v27479_v28 = vpack.c.bf16 %v5390_v25, %v5389_v24  ;;  %v5374_v34 = vld [vmem:[%s32752_s7 + $0x58] sm:$0xff]  ;;  %v5408_v6 = vld [vmem:[%s32752_s7 + $0x168] sm:$0xff] }
 0x8aa   : > { %5288 = vmatprep.subr.bf16.mxu0 %v32791_v37  ;;  %v27594_v9 = vpack.c.bf16 %v5408_v6, %v5407_v14  ;;  %v5325_v25 = vld [vmem:[#allocation12] sm:$0x7] }
 0x8ac   : > { %22080 = vmatpush3.bf16.msra.mxu1 %v24709_v35  ;;  %5289 = vmatpush1.bf16.msra.mxu0 %v24710_v38  ;;  %v27487_v35 = vpack.c.bf16 %v5374_v34, %v5373_v32  ;;  %v5391_v38 = vld [vmem:[%s32752_s7 + $0xe0] sm:$0xff] }
 0x8ad   : > { %22081 = vmatprep.subr.bf16.mxu1 %v24711_v42  ;;  %5290 = vmatprep.subr.bf16.mxu0 %v32791_v37  ;;  %v5392_v42 = vld [vmem:[%s32752_s7 + $0xe8] sm:$0xff] }
 0x8b0   : > { %22082 = vmatpush3.bf16.msra.mxu1 %v24712_v43  ;;  %5291 = vmatpush1.bf16.msra.mxu0 %v24713_v45  ;;  %v5375_v43 = vld [vmem:[%s32752_s7 + $0x60] sm:$0xff]  ;;  %v27500_v45 = vpack.c.bf16 %v5392_v42, %v5391_v38  ;;  %v5330_v38 = vrot.slane %v5325_v25, %v27171_v27 }
 0x8b1   : > { %22083 = vmatprep.subr.bf16.mxu1 %v24714_v46  ;;  %5292 = vmatprep.subr.bf16.mxu0 %v32791_v37  ;;  %v5376_v46 = vld [vmem:[%s32752_s7 + $0x68] sm:$0xff] }
 0x8b4   : > { %22084 = vmatpush3.bf16.msra.mxu1 %v24715_v47  ;;  %5293 = vmatpush1.bf16.msra.mxu0 %v24716_v48  ;;  %v5393_v47 = vld [vmem:[%s32752_s7 + $0xf0] sm:$0xff]  ;;  %v5394_v48 = vld [vmem:[%s32752_s7 + $0xf8] sm:$0xff] }
 0x8b5   : > { %22085 = vmatprep.subr.bf16.mxu1 %v24717_v49  ;;  %5294 = vmatprep.subr.bf16.mxu0 %v32791_v37  ;;  %v27511_v49 = vpack.c.bf16 %v5376_v46, %v5375_v43  ;;  %v5334_v46 = vrot.slane %v5325_v25, %v27173_v29 }
 0x8b8   : > { %22086 = vmatpush3.bf16.msra.mxu1 %v24718_v51  ;;  %5295 = vmatpush1.bf16.msra.mxu0 %v24719_v53  ;;  %v27513_v51 = vpack.c.bf16 %v5394_v48, %v5393_v47  ;;  %v5377_v53 = vld [vmem:[%s32752_s7 + $0x70] sm:$0xff] }
 0x8b9   : > { %22087 = vmatprep.subr.bf16.mxu1 %v24720_v54  ;;  %5296 = vmatprep.subr.bf16.mxu0 %v32791_v37  ;;  %v5378_v54 = vld [vmem:[%s32752_s7 + $0x78] sm:$0xff] }
 0x8bc   : > { %22088 = vmatpush3.bf16.msra.mxu1 %v24721_v55  ;;  %5297 = vmatpush1.bf16.msra.mxu0 %v24722_v56  ;;  %v27523_v55 = vpack.c.bf16 %v5378_v54, %v5377_v53  ;;  %v5395_v56 = vld [vmem:[%s32752_s7 + $0x100] sm:$0xff] }
 0x8bd   : > { %22089 = vmatprep.subr.bf16.mxu1 %v24723_v57  ;;  %5298 = vmatprep.subr.bf16.mxu0 %v32791_v37  ;;  %v5396_v57 = vld [vmem:[%s32752_s7 + $0x108] sm:$0xff] }
 0x8c0   : > { %22090 = vmatpush3.bf16.msra.mxu1 %v24724_v4  ;;  %5299 = vmatpush1.bf16.msra.mxu0 %v24725_v7  ;;  %v5397_v4 = vld [vmem:[%s32752_s7 + $0x110] sm:$0xff]  ;;  %v32793_v7 = vmov 0.0|0.0  }
 0x8c1   : > { %22091 = vmatprep.subr.bf16.mxu1 %v24726_v59  ;;  %5300 = vmatprep.subr.bf16.mxu0 %v32791_v37  ;;  %v27537_v59 = vpack.c.bf16 %v5396_v57, %v5395_v56  ;;  %v27543_v61 = vpack.c.bf16 %v5398_v60, %v5397_v4 }
 0x8c4   : > { %22092 = vmatpush3.bf16.msra.mxu1 %v24727_v62  ;;  %5301 = vmatpush1.bf16.msra.mxu0 %v24728_v63  ;;  %v5399_v62 = vld [vmem:[%s32752_s7 + $0x120] sm:$0xff]  ;;  %v5400_v63 = vld [vmem:[%s32752_s7 + $0x128] sm:$0xff] }
 0x8c5   : > { %5302 = vmatprep.subr.bf16.mxu0 %v32791_v37  ;;  %23312 = vmatprep.subr.bf16.mxu1 %v27382_v39  ;;  %v27554_v44 = vpack.c.bf16 %v5400_v63, %v5399_v62 }
 0x8c7   : > { %5275 = vmatmul.mubr.bf16.vlgmr.msra.gmra.mrb[64].mxu1 %v27359_v36  ;;  %v27451_v36 = vpack.c.bf16 %v5370_v58, %v5369_v18  ;;  %v5409_v18 = vld [vmem:[%s32752_s7 + $0x170] sm:$0xff]  ;;  %v5410_v58 = vld [vmem:[%s32752_s7 + $0x178] sm:$0xff] }
 0x8c8   : > { %5303 = vmatpush1.bf16.msra.mxu0 %v24729_v52  ;;  %23314 = vmatpush3.bf16.msra.mxu1 %v27390_v26  ;;  %v5402_v52 = vld [vmem:[%s32752_s7 + $0x138] sm:$0xff]  ;;  %v27603_v19 = vpack.c.bf16 %v5410_v58, %v5409_v18 }
 0x8c9   : > { %23316 = vmatprep.subr.bf16.mxu1 %v27407_v40  ;;  %23343 = vmatprep.subr.bf16.mxu0 %v32793_v7  ;;  %v27564_v31 = vpack.c.bf16 %v5402_v52, %v5401_v50 }
 0x8cb   : > { %5315 = vmatmul.mubr.bf16.vlgmr.msra.gmra.mrb[60].mxu0 %v27363_v22  ;;  %v5371_v22 = vld [vmem:[%s32752_s7 + $0x40] sm:$0xff] }
 0x8cc   : > { %23047 = vmatprep.mubr.msk.f32.mxu0 %vm26394_vm0, %v27397_v0  ;;  %23318 = vmatpush3.bf16.msra.mxu1 %v27415_v8  ;;  %v27469_v23 = vpack.c.bf16 %v5372_v41, %v5371_v22 }
 0x8cd   : > { %23320 = vmatprep.subr.bf16.mxu1 %v27428_v13  ;;  %23345 = vmatpush3.bf16.msra.mxu0 %v27537_v59 }
 0x8ce   : > { %23346 = vmatprep.subr.bf16.mxu0 %v32793_v7 }
 0x8d0   : > { %23322 = vmatpush3.bf16.msra.mxu1 %v27433_v16 }
 0x8d1   : > { %23324 = vmatprep.subr.bf16.mxu1 %v27443_v17  ;;  %23348 = vmatpush3.bf16.msra.mxu0 %v27543_v61 }
 0x8d2   : > { %23349 = vmatprep.subr.bf16.mxu0 %v32793_v7 }
 0x8d4   : > { %23326 = vmatpush3.bf16.msra.mxu1 %v27451_v36 }
 0x8d5   : > { %23328 = vmatprep.subr.bf16.mxu1 %v27461_v21  ;;  %23351 = vmatpush3.bf16.msra.mxu0 %v27554_v44 }
 0x8d6   : > { %23352 = vmatprep.subr.bf16.mxu0 %v32793_v7 }
 0x8d8   : > { %23330 = vmatpush3.bf16.msra.mxu1 %v27469_v23 }
 0x8d9   : > { %23332 = vmatprep.subr.bf16.mxu1 %v27479_v28  ;;  %23354 = vmatpush3.bf16.msra.mxu0 %v27564_v31 }
 0x8da   : > { %23355 = vmatprep.subr.bf16.mxu0 %v32793_v7 }
 0x8dc   : > { %23334 = vmatpush3.bf16.msra.mxu1 %v27487_v35 }
 0x8dd   : > { %23336 = vmatprep.subr.bf16.mxu1 %v27500_v45  ;;  %23357 = vmatpush3.bf16.msra.mxu0 %v27574_v5 }
 0x8de   : > { %23358 = vmatprep.subr.bf16.mxu0 %v32793_v7 }
 0x8e0   : > { %23338 = vmatpush3.bf16.msra.mxu1 %v27511_v49 }
 0x8e1   : > { %23340 = vmatprep.subr.bf16.mxu1 %v27513_v51  ;;  %23360 = vmatpush3.bf16.msra.mxu0 %v27584_v10 }
 0x8e2   : > { %23361 = vmatprep.subr.bf16.mxu0 %v32793_v7 }
 0x8e4   : > { %23342 = vmatpush3.bf16.msra.mxu1 %v27523_v55 }
 0x8e5   : > { %23363 = vmatpush3.bf16.msra.mxu0 %v27594_v9 }
 0x8e6   : > { %23364 = vmatprep.subr.bf16.mxu0 %v32793_v7 }
 0x8e9   : > { %23366 = vmatpush3.bf16.msra.mxu0 %v27603_v19 }
 0x8ea   : > { %23389 = vmatprep.subr.bf16.mxu0 %v27382_v39 }
 0x972   : > { %v5194_v20 = vpop.f32.mrb[56].mxu0 }
 0x973   : > { %v5196_v22 = vpop.f32.mrb[57].mxu0 }
 0x974   : > { %v5198_v41 = vpop.f32.mrb[58].mxu0 }
 0x975   : > { %v5199_v24 = vpop.f32.mrb[59].mxu0  ;;  %v5338_v41 = vrot.slane %v5325_v25, %v27175_v30  ;;  %v5568_v25 = vld [vmem:[%s32753_s8 + $0x78] sm:$0xff] }
 0x97a   : > { %v5235_v32 = vpop.f32.mrb[60].mxu1 }
 0x97b   : > { %v5236_v34 = vadd.f32 %v5235_v32, %v5194_v20  ;;  %v5237_v42 = vpop.f32.mrb[61].mxu1 }
 0x97c   : > { %v5238_v43 = vadd.f32 %v5237_v42, %v5196_v22  ;;  %v5239_v47 = vpop.f32.mrb[62].mxu1 }
 0x97d   : > { %v5322_v48 = vadd.f32 %v5236_v34, %v27351_v1  ;;  %v5240_v53 = vpop.f32.mrb[63].mxu1 }
 0x97e   : > { %v5323_v54 = vadd.f32 %v5238_v43, %v27354_v2 }
 0x97f   : > { %v27612_v39 = vadd.f32 %v5330_v38, %v5322_v48 }
 0x980   : > { %v27614_v56 = vadd.f32 %v5334_v46, %v5323_v54 }
 0x981   : > { %v5345_v57 = vrot.slane %v27612_v39, 4 }
 0x982   : > { %v5351_v4 = vrot.slane %v27614_v56, 4 }
 0x983   : > { %v5346_v60 = vadd.f32 %v5345_v57, %v27612_v39 }
 0x984   : > { %v5352_v62 = vadd.f32 %v5351_v4, %v27614_v56 }
 0x985   : > { %v5347_v63 = vrot.slane %v5346_v60, 2 }
 0x986   : > { %v5353_v50 = vrot.slane %v5352_v62, 2 }
 0x987   : > { %v5348_v52 = vadd.f32 %v5347_v63, %v5346_v60  ;;  %v5555_v63 = vld [vmem:[%s32753_s8 + $0x10] sm:$0xff] }
 0x988   : > { %v5354_v33 = vadd.f32 %v5353_v50, %v5352_v62  ;;  %v5558_v50 = vld [vmem:[%s32753_s8 + $0x28] sm:$0xff] }
 0x989   : > { %v5349_v1 = vrot.slane %v5348_v52, 1 }
 0x98a   : > { %v5355_v3 = vrot.slane %v5354_v33, 1 }
 0x98b   : > { %v5350_v2 = vadd.f32 %v5349_v1, %v5348_v52 }
 0x98c   : > { %v5356_v11 = vadd.f32 %v5355_v3, %v5354_v33  ;;  %v27700_v3 = vpack.c.bf16 %v5558_v50, %v5555_v63 }
 0x98e   : > { %5475 = vmatprep.mubr.f32.mxu1 %v5356_v11 }
 0x98f   : > { %5476 = vmatmul.mubr.f32.vlgmr.msra.gmra.mrb[68].mxu1 %v5350_v2  ;;  %v5561_v2 = vld [vmem:[%s32753_s8 + $0x40] sm:$0xff] }
 0x990   : > { %5638 = vmatprep.mubr.f32.mxu1 %v27397_v0 }
 0x99a   : > { %v22093_v12 = vpop.f32.mrb[64].mxu1 }
 0x99b   : > { %v22094_v14 = vpop.f32.mrb[65].mxu1 }
 0x99c   : > { %v22095_v6 = vadd.f32 %v22094_v14, %v22093_v12  ;;  %v22096_v18 = vpop.f32.mrb[66].mxu1  ;;  %v5564_v12 = vld [vmem:[%s32753_s8 + $0x58] sm:$0xff] }
 0x99d   : > { %v22097_v58 = vpop.f32.mrb[67].mxu1  ;;  %v27710_v14 = vpack.c.bf16 %v5564_v12, %v5561_v2  ;;  %v5570_v18 = vld [vmem:[%s32753_s8 + $0x88] sm:$0xff] }
 0x99e   : > { %v5316_v20 = vpop.f32.mrb[60].mxu0 }
 0x99f   : > { %v5317_v22 = vadd.f32 %v22095_v6, %v5316_v20  ;;  %v5318_v24 = vpop.f32.mrb[61].mxu0  ;;  %v5567_v6 = vld [vmem:[%s32753_s8 + $0x70] sm:$0xff] }
 0x9a0   : > { %v5319_v32 = vpop.f32.mrb[62].mxu0  ;;  %v27722_v58 = vpack.c.bf16 %v5570_v18, %v5567_v6 }
 0x9a1   : > { %v5324_v34 = vadd.f32 %v5317_v22, %v27357_v15  ;;  %v5320_v38 = vpop.f32.mrb[63].mxu0  ;;  %v5554_v15 = vld [vmem:[%s32753_s8 + $0x8] sm:$0xff] }
 0x9a3   : > { %v27623_v42 = vadd.f32 %v5338_v41, %v5324_v34 }
 0x9a5   : > { %v5357_v43 = vrot.slane %v27623_v42, 4 }
 0x9a7   : > { %v5358_v46 = vadd.f32 %v5357_v43, %v27623_v42 }
 0x9a9   : > { %v5359_v47 = vrot.slane %v5358_v46, 2 }
 0x9ab   : > { %v5360_v48 = vadd.f32 %v5359_v47, %v5358_v46 }
 0x9ad   : > { %v5361_v53 = vrot.slane %v5360_v48, 1 }
 0x9af   : > { %v5362_v54 = vadd.f32 %v5361_v53, %v5360_v48 }
 0x9b1   : > { %23048 = vmatmul.mubr.f32.vlgmr.msra.gmra.mrb[64].mxu0 %v5362_v54 }
 0x9b2   : > { %23391 = vmatpush3.bf16.msra.mxu0 %v27390_v26  ;;  %v5557_v26 = vld [vmem:[%s32753_s8 + $0x20] sm:$0xff] }
 0x9b3   : > { %23393 = vmatprep.subr.bf16.mxu0 %v27407_v40  ;;  %v5553_v40 = vld [vmem:[%s32753_s8] sm:$0xff] }
 0x9b6   : > { %23395 = vmatpush3.bf16.msra.mxu0 %v27415_v8  ;;  %v23367_v8 = vpack.c.bf16 %v5557_v26, %v5554_v15 }
 0x9b7   : > { %23397 = vmatprep.subr.bf16.mxu0 %v27428_v13  ;;  %v5556_v13 = vld [vmem:[%s32753_s8 + $0x18] sm:$0xff] }
 0x9b8   : > { %23368 = vmatprep.subr.bf16.mxu1 %v23367_v8 }
 0x9ba   : > { %23399 = vmatpush3.bf16.msra.mxu0 %v27433_v16  ;;  %v5560_v16 = vld [vmem:[%s32753_s8 + $0x38] sm:$0xff] }
 0x9bb   : > { %23401 = vmatprep.subr.bf16.mxu0 %v27443_v17  ;;  %v5563_v17 = vld [vmem:[%s32753_s8 + $0x50] sm:$0xff] }
 0x9be   : > { %23403 = vmatpush3.bf16.msra.mxu0 %v27451_v36  ;;  %v27660_v36 = vpack.c.bf16 %v5556_v13, %v5553_v40 }
 0x9bf   : > { %23405 = vmatprep.subr.bf16.mxu0 %v27461_v21  ;;  %v27662_v21 = vpack.c.bf16 %v5563_v17, %v5560_v16 }
 0x9c0   : > { %23370 = vmatpush1.bf16.msra.mxu1 %v27660_v36 }
 0x9c1   : > { %23372 = vmatprep.subr.bf16.mxu1 %v27662_v21 }
 0x9c2   : > { %23407 = vmatpush3.bf16.msra.mxu0 %v27469_v23  ;;  %v5559_v23 = vld [vmem:[%s32753_s8 + $0x30] sm:$0xff] }
 0x9c3   : > { %23409 = vmatprep.subr.bf16.mxu0 %v27479_v28  ;;  %v5562_v28 = vld [vmem:[%s32753_s8 + $0x48] sm:$0xff] }
 0x9c6   : > { %23411 = vmatpush3.bf16.msra.mxu0 %v27487_v35  ;;  %v27671_v35 = vpack.c.bf16 %v5562_v28, %v5559_v23 }
 0x9c7   : > { %23413 = vmatprep.subr.bf16.mxu0 %v27500_v45  ;;  %v5566_v45 = vld [vmem:[%s32753_s8 + $0x68] sm:$0xff] }
 0x9c8   : > { %23374 = vmatpush1.bf16.msra.mxu1 %v27671_v35 }
 0x9ca   : > { %23415 = vmatpush3.bf16.msra.mxu0 %v27511_v49  ;;  %v5569_v49 = vld [vmem:[%s32753_s8 + $0x80] sm:$0xff] }
 0x9cb   : > { %23417 = vmatprep.subr.bf16.mxu0 %v27513_v51  ;;  %v27681_v51 = vpack.c.bf16 %v5569_v49, %v5566_v45 }
 0x9cd   : > { %23376 = vmatprep.subr.bf16.mxu1 %v27681_v51 }
 0x9ce   : > { %23419 = vmatpush3.bf16.msra.mxu0 %v27523_v55  ;;  %v5565_v55 = vld [vmem:[%s32753_s8 + $0x60] sm:$0xff] }
 0x9cf   : > { %23445 = vmatprep.subr.bf16.mxu0 %v23367_v8  ;;  %v27689_v57 = vpack.c.bf16 %v5568_v25, %v5565_v55 }
 0x9d1   : > { %23378 = vmatpush1.bf16.msra.mxu1 %v27689_v57 }
 0x9d2   : > { %23379 = vmatprep.subr.bf16.mxu1 %v32793_v7 }
 0xa62   : > { %v22131_v4 = vpop.f32.mrb[68].mxu1 }
 0xa63   : > { %v22132_v60 = vpop.f32.mrb[69].mxu1 }
 0xa64   : > { %v22133_v62 = vadd.f32 %v22132_v60, %v22131_v4 }
 0xa84   : > { %v5547_v52 = vpop.f32.mrb[64].mxu0 }
 0xa85   : > { %v5548_v33 = vadd.f32 %v22133_v62, %v5547_v52  ;;  %v23049_v1 = vpop.f32.mrb[65].mxu0 }
 0xa87   : > { %v5552_v11 = vmul.f32 0.015625, %v5548_v33 }
 0xa89   : > { %19687 = vmatmul.mubr.msk.f32.vlgmr.msra.gmra.mrb[70].mxu1 %vm809_vm5, %v5552_v11 }
 0xa8a   : > { %23381 = vmatpush3.bf16.msra.mxu1 %v27700_v3  ;;  %23062 = vmatprep.mubr.msk.f32.mxu1 %vm26394_vm0, %v27397_v0 }
 0xa8b   : > { %23382 = vmatprep.subr.bf16.mxu1 %v32793_v7 }
 0xa8e   : > { %23384 = vmatpush3.bf16.msra.mxu1 %v27710_v14 }
 0xa8f   : > { %23385 = vmatprep.subr.bf16.mxu1 %v32793_v7 }
 0xa92   : > { %23387 = vmatpush3.bf16.msra.mxu1 %v27722_v58 }
 0xa93   : > { %23420 = vmatprep.subr.bf16.mxu1 %v32793_v7 }
 0xa95   : > { %23063 = vmatmul.mubr.msk.f32.vlgmr.msra.gmra.mrb[72].mxu1 %vm809_vm5, %v5552_v11 }
 0xa96   : > { %23422 = vmatpush3.bf16.msra.mxu1 %v27537_v59  ;;  %23097 = vmatprep.mubr.msk.f32.mxu1 %vm26394_vm0, %v27397_v0 }
 0xa97   : > { %23423 = vmatprep.subr.bf16.mxu1 %v32793_v7 }
 0xa9a   : > { %23425 = vmatpush3.bf16.msra.mxu1 %v27543_v61 }
 0xa9b   : > { %23426 = vmatprep.subr.bf16.mxu1 %v32793_v7 }
 0xa9e   : > { %23428 = vmatpush3.bf16.msra.mxu1 %v27554_v44 }
 0xa9f   : > { %23429 = vmatprep.subr.bf16.mxu1 %v32793_v7 }
 0xaa2   : > { %23431 = vmatpush3.bf16.msra.mxu1 %v27564_v31 }
 0xaa3   : > { %23432 = vmatprep.subr.bf16.mxu1 %v32793_v7 }
 0xaa6   : > { %23434 = vmatpush3.bf16.msra.mxu1 %v27574_v5 }
 0xaa7   : > { %23435 = vmatprep.subr.bf16.mxu1 %v32793_v7 }
 0xaaa   : > { %23437 = vmatpush3.bf16.msra.mxu1 %v27584_v10 }
 0xaab   : > { %23438 = vmatprep.subr.bf16.mxu1 %v32793_v7 }
 0xaae   : > { %23440 = vmatpush3.bf16.msra.mxu1 %v27594_v9 }
 0xaaf   : > { %23441 = vmatprep.subr.bf16.mxu1 %v32793_v7 }
 0xab2   : > { %23443 = vmatpush3.bf16.msra.mxu1 %v27603_v19 }
 0xab3   : > { %23456 = vmatprep.subr.bf16.mxu1 %v32793_v7 }
 0xb5c   : > { %v5640_v59 = vpop.f32.mrb[70].mxu1 }
 0xb5d   : > { %v5718_v61 = vrot.slane %v5640_v59, %v27171_v27  ;;  %v5642_v44 = vpop.f32.mrb[71].mxu1 }
 0xb5e   : > { %v5722_v31 = vrot.slane %v5642_v44, %v27171_v27 }
 0xb5f   : > { %v27749_v5 = vsub.f32 %v27612_v39, %v5718_v61 }
 0xb60   : > { %v27752_v10 = vsub.f32 %v27614_v56, %v5722_v31 }
 0xb61   : > { %v5730_v9 = vmul.f32 %v27749_v5, %v27749_v5 }
 0xb62   : > { %v5731_v19 = vmul.f32 %v27752_v10, %v27752_v10 }
 0xb63   : > { %v5733_v20 = vrot.slane %v5730_v9, 4 }
 0xb64   : > { %v5739_v22 = vrot.slane %v5731_v19, 4 }
 0xb65   : > { %v5734_v41 = vadd.f32 %v5733_v20, %v5730_v9 }
 0xb66   : > { %v5740_v24 = vadd.f32 %v5739_v22, %v5731_v19 }
 0xb67   : > { %v5735_v32 = vrot.slane %v5734_v41, 2 }
 0xb68   : > { %v5711_v34 = vpop.f32.mrb[72].mxu1  ;;  %v5741_v38 = vrot.slane %v5740_v24, 2 }
 0xb69   : > { %v5736_v43 = vadd.f32 %v5735_v32, %v5734_v41  ;;  %v5726_v39 = vrot.slane %v5711_v34, %v27171_v27  ;;  %v23064_v46 = vpop.f32.mrb[73].mxu1 }
 0xb6a   : > { %v5742_v47 = vadd.f32 %v5741_v38, %v5740_v24  ;;  %v6104_v46 = vld [vmem:[#allocation14] sm:$0x3] }
 0xb6b   : > { %v5729_v56 = vsub.f32 %v27623_v42, %v5726_v39  ;;  %v5737_v48 = vrot.slane %v5736_v43, 1 }
 0xb6c   : > { %v5743_v53 = vrot.slane %v5742_v47, 1 }
 0xb6d   : > { %v5732_v54 = vmul.f32 %v5729_v56, %v5729_v56  ;;  %v5738_v40 = vadd.f32 %v5737_v48, %v5736_v43 }
 0xb6e   : > { %v5744_v15 = vadd.f32 %v5743_v53, %v5742_v47  ;;  %v24738_v53 = vld [vmem:[%s32755_s10 + $0x454] ss:$12 sps:$4 sm:$0xff]  }
 0xb6f   : > { %v5745_v26 = vrot.slane %v5732_v54, 4 }
 0xb70   : > { %5815 = vmatprep.mubr.f32.mxu0 %v5744_v15  ;;  %v6329_v15 = vld [vmem:[#allocation14 + $0x2] sm:$0x3] }
 0xb71   : > { %v5746_v8 = vadd.f32 %v5745_v26, %v5732_v54  ;;  %5816 = vmatmul.mubr.f32.vlgmr.msra.gmra.mrb[66].mxu0 %v5738_v40  ;;  %v24732_v54 = vld [vmem:[%s32755_s10 + $0x2d4] ss:$12 sps:$4 sm:$0xff]   ;;  %v24736_v26 = vld [vmem:[%s32755_s10 + $0x450] ss:$12 sps:$4 sm:$0xff]   ;;  %v24744_v40 = vld [vmem:[%s32755_s10 + $0x46c] ss:$12 sps:$4 sm:$0xff]  }
 0xb72   : > { %23447 = vmatpush1.bf16.msra.mxu0 %v27660_v36  ;;  %5961 = vmatprep.mubr.f32.mxu0 %v27397_v0 }
 0xb73   : > { %v5747_v13 = vrot.slane %v5746_v8, 2  ;;  %23449 = vmatprep.subr.bf16.mxu0 %v27662_v21 }
 0xb75   : > { %v5748_v16 = vadd.f32 %v5747_v13, %v5746_v8  ;;  %v24730_v8 = vld [vmem:[%s32755_s10 + $0x2d0] ss:$12 sps:$4 sm:$0xff]   ;;  %v24742_v13 = vld [vmem:[%s32755_s10 + $0x468] ss:$12 sps:$4 sm:$0xff]  }
 0xb76   : > { %23451 = vmatpush1.bf16.msra.mxu0 %v27671_v35 }
 0xb77   : > { %v5749_v42 = vrot.slane %v5748_v16, 1  ;;  %23453 = vmatprep.subr.bf16.mxu0 %v27681_v51 }
 0xb79   : > { %v5750_v17 = vadd.f32 %v5749_v42, %v5748_v16  ;;  %v24735_v16 = vld [vmem:[%s32755_s10 + $0x2ec] ss:$12 sps:$4 sm:$0xff]   ;;  %v24750_v42 = vld [vmem:[%s32755_s10 + $0x484] ss:$12 sps:$4 sm:$0xff]  }
 0xb7a   : > { %23455 = vmatpush1.bf16.msra.mxu0 %v27689_v57 }
 0xb7b   : > { %23098 = vmatmul.mubr.f32.vlgmr.msra.gmra.mrb[74].mxu1 %v5750_v17  ;;  %v24733_v17 = vld [vmem:[%s32755_s10 + $0x2e8] ss:$12 sps:$4 sm:$0xff]  }
 0xb7c   : > { %23458 = vmatpush3.bf16.msra.mxu1 %v27700_v3  ;;  %23112 = vmatprep.mubr.msk.f32.mxu1 %vm26394_vm0, %v27397_v0 }
 0xb7d   : > { %23459 = vmatprep.subr.bf16.mxu1 %v32793_v7 }
 0xb80   : > { %23461 = vmatpush3.bf16.msra.mxu1 %v27710_v14 }
 0xb81   : > { %23462 = vmatprep.subr.bf16.mxu1 %v32793_v7 }
 0xb84   : > { %23464 = vmatpush3.bf16.msra.mxu1 %v27722_v58 }
 0xc44   : > { %v22190_v36 = vpop.f32.mrb[66].mxu0 }
 0xc45   : > { %v22191_v21 = vpop.f32.mrb[67].mxu0 }
 0xc46   : > { %v22192_v23 = vadd.f32 %v22191_v21, %v22190_v36  ;;  %v24748_v36 = vld [vmem:[%s32755_s10 + $0x480] ss:$12 sps:$4 sm:$0xff]   ;;  %v24741_v21 = vld [vmem:[%s32755_s10 + $0x304] ss:$12 sps:$4 sm:$0xff]  }
 0xc4e   : > { %v5887_v28 = vpop.f32.mrb[74].mxu1 }
 0xc4f   : > { %v5888_v35 = vadd.f32 %v22192_v23, %v5887_v28  ;;  %v23099_v45 = vpop.f32.mrb[75].mxu1  ;;  %v24756_v23 = vld [vmem:[%s32755_s10 + $0x49c] ss:$12 sps:$4 sm:$0xff]   ;;  %v24739_v28 = vld [vmem:[%s32755_s10 + $0x300] ss:$12 sps:$4 sm:$0xff]  }
 0xc50   : > { %v24747_v45 = vld [vmem:[%s32755_s10 + $0x31c] ss:$12 sps:$4 sm:$0xff]  }
 0xc51   : > { %v5891_v49 = vmul.f32 0.015625, %v5888_v35  ;;  %v24754_v35 = vld [vmem:[%s32755_s10 + $0x498] ss:$12 sps:$4 sm:$0xff]  }
 0xc53   : > { %v5892_v51 = vadd.f32 1e-05, %v5891_v49  ;;  %v24762_v49 = vld [vmem:[%s32755_s10 + $0x4b4] ss:$12 sps:$4 sm:$0xff]  }
 0xc55   : > { %26026 = vrsqrt.f32 %v5892_v51  ;;  %v24745_v51 = vld [vmem:[%s32755_s10 + $0x318] ss:$12 sps:$4 sm:$0xff]  }
 0xc5f   : > { %v26027_v55 = vpop.eup %26026 }
 0xc60   : > { %19689 = vmatmul.mubr.msk.f32.vlgmr.msra.gmra.mrb[68].mxu0 %vm809_vm5, %v26027_v55  ;;  %23113 = vmatmul.mubr.msk.f32.vlgmr.msra.gmra.mrb[76].mxu1 %vm809_vm5, %v26027_v55  ;;  %v24760_v55 = vld [vmem:[%s32755_s10 + $0x4b0] ss:$12 sps:$4 sm:$0xff]  }
 0xc61   : > { %6195 = vmatprep.mubr.bf16.mxu1 %v32791_v37  ;;  %6154 = vmatprep.mubr.bf16.mxu0 %v32791_v37 }
 0xd33   : > { %v5963_v25 = vpop.f32.mrb[68].mxu0  ;;  %v6034_v57 = vpop.f32.mrb[76].mxu1 }
 0xd34   : > { %v6041_v4 = vrot.slane %v5963_v25, %v27171_v27  ;;  %v6049_v60 = vrot.slane %v6034_v57, %v27171_v27  ;;  %v5965_v62 = vpop.f32.mrb[69].mxu0  ;;  %v23114_v63 = vpop.f32.mrb[77].mxu1  ;;  %v24753_v25 = vld [vmem:[%s32755_s10 + $0x334] ss:$12 sps:$4 sm:$0xff]   ;;  %v24768_v57 = vld [vmem:[%s32755_s10 + $0x4cc] ss:$12 sps:$4 sm:$0xff]  }
 0xd35   : > { %v6045_v50 = vrot.slane %v5965_v62, %v27171_v27  ;;  %v24759_v62 = vld [vmem:[%s32755_s10 + $0x34c] ss:$12 sps:$4 sm:$0xff]   ;;  %v24774_v63 = vld [vmem:[%s32755_s10 + $0x4e4] ss:$12 sps:$4 sm:$0xff]  }
 0xd36   : > { %v6050_v52 = vmul.f32 %v6041_v4, %v27749_v5  ;;  %v6052_v33 = vmul.f32 %v6049_v60, %v5729_v56  ;;  %v24751_v4 = vld [vmem:[%s32755_s10 + $0x330] ss:$12 sps:$4 sm:$0xff]   ;;  %v24766_v60 = vld [vmem:[%s32755_s10 + $0x4c8] ss:$12 sps:$4 sm:$0xff]  }
 0xd37   : > { %v6051_v1 = vmul.f32 %v6045_v50, %v27752_v10  ;;  %v24757_v50 = vld [vmem:[%s32755_s10 + $0x348] ss:$12 sps:$4 sm:$0xff]  }
 0xd38   : > { %v6058_v3 = vmul.f32 0.2, %v6052_v33  ;;  %vm6055_vm9 = vcmp.ge.f32.partialorder %v6052_v33, 0.0  ;;  %v6056_v11 = vmul.f32 0.2, %v6050_v52  ;;  %vm6053_vm11 = vcmp.ge.f32.partialorder %v6050_v52, 0.0 }
 0xd39   : > { %v6057_v2 = vmul.f32 0.2, %v6051_v1  ;;  %vm6054_vm10 = vcmp.ge.f32.partialorder %v6051_v1, 0.0 }
 0xd3a   : > { %v6061_v12 = vsel %vm6055_vm9, %v6052_v33, %v6058_v3  ;;  %v6059_v58 = vsel %vm6053_vm11, %v6050_v52, %v6056_v11  ;;  %v24772_v52 = vld [vmem:[%s32755_s10 + $0x4e0] ss:$12 sps:$4 sm:$0xff]   ;;  %v24765_v33 = vld [vmem:[%s32755_s10 + $0x364] ss:$12 sps:$4 sm:$0xff]   ;;  %vm834_vm9 = vcmask 521216   ;;  %vm10334_vm11 = vcmask 782337  }
 0xd3b   : > { %v6067_v14 = vrot.slane %v6061_v12, 7  ;;  %v6060_v6 = vsel %vm6054_vm10, %v6051_v1, %v6057_v2  ;;  %v6065_v59 = vrot.slane %v6059_v58, 7  ;;  %v24780_v1 = vld [vmem:[%s32755_s10 + $0x4fc] ss:$12 sps:$4 sm:$0xff]   ;;  %v24763_v3 = vld [vmem:[%s32755_s10 + $0x360] ss:$12 sps:$4 sm:$0xff]  }
 0xd3c   : > { %v6066_v18 = vrot.slane %v6060_v6, 7  ;;  %v24778_v11 = vld [vmem:[%s32755_s10 + $0x4f8] ss:$12 sps:$4 sm:$0xff]   ;;  %v24771_v2 = vld [vmem:[%s32755_s10 + $0x37c] ss:$12 sps:$4 sm:$0xff]   ;;  %vm10330_vm10 = vcmask 1045249  }
 0xd3d   : > { %6072 = vrot.lane.b32.xlu0 %v6067_v14, %s26398_s29  ;;  %v24786_v12 = vld [vmem:[%s32755_s10 + $0x514] ss:$12 sps:$4 sm:$0xff]   ;;  %v24769_v14 = vld [vmem:[%s32755_s10 + $0x378] ss:$12 sps:$4 sm:$0xff]   ;;  %v24784_v6 = vld [vmem:[%s32755_s10 + $0x510] ss:$12 sps:$4 sm:$0xff]  }
 0xd3e   : > { %6070 = vrot.lane.b32.xlu1 %v6066_v18, %s26398_s29  ;;  %v24777_v18 = vld [vmem:[%s32755_s10 + $0x394] ss:$12 sps:$4 sm:$0xff]   ;;  %v24792_v58 = vld [vmem:[%s32755_s10 + $0x52c] ss:$12 sps:$4 sm:$0xff]   ;;  %835 = vst.msk [vmem:[#allocation4 + $0x20] sm:$0x3f] %vm834_vm9, %v27397_v0 }
 0xd42   : > { %6068 = vrot.lane.b32.xlu1 %v6065_v59, %s26398_s29  ;;  %v24775_v59 = vld [vmem:[%s32755_s10 + $0x390] ss:$12 sps:$4 sm:$0xff]   ;;  %s32920_s29 = sld [smem:[#allocation34_spill]] }
 0xd48   : > { %p32922_p9 = scmp.ne.s32.totalorder %s32920_s29, 0 }
 0xd4a   : > { %p26292_p5 = pnand %p26291_p6, %p32922_p9 }
 0xd4c   : > { %p26293_p10 = pneg %p26292_p5 }
 0xdaf   : > { %v6073_v61 = vpop.permute.xlu0 %6072 }
 0xdb0   : > { %6085 = vst.msk [vmem:[#allocation3 + $0x18] sm:$0xfe] %vm6084_vm12, %v6073_v61  ;;  %v6071_v44 = vpop.permute.xlu1 %6070  ;;  %vm11490_vm12 = vcmask 523264  }
 0xdb1   : > { %6091 = vst.msk [vmem:[#allocation3 + $0x38] sm:$0x1] %vm6090_vm13, %v6073_v61  ;;  %v6075_v31 = vsel %vm809_vm5, %v6071_v44, %v6073_v61  ;;  %v24790_v61 = vld [vmem:[%s32755_s10 + $0x528] ss:$12 sps:$4 sm:$0xff]   ;;  %vm843_vm13 = vcmask 520192  }
 0xdb2   : > { %6083 = vst [vmem:[#allocation3 + $0x10] sm:$0xfe] %v6075_v31  ;;  %6089 = vst [vmem:[#allocation3 + $0x30] sm:$0x1] %v6075_v31  ;;  %v24798_v31 = vld [vmem:[%s32755_s10 + $0x544] ss:$12 sps:$4 sm:$0xff]  }
 0xdb3   : > { %844 = vst.msk [vmem:[#allocation5 + $0x38] sm:$0x1f] %vm843_vm13, %v27397_v0 }
 0xdb4   : > { %v6069_v5 = vpop.permute.xlu1 %6068 }
 0xdb5   : > { %v6074_v10 = vsel %vm809_vm5, %v6069_v5, %v6071_v44  ;;  %6081 = vst.msk [vmem:[#allocation3] sm:$0xfe] %vm6080_vm14, %v6069_v5  ;;  %vm6105_vm5 = vcmask 80896   ;;  %v24783_v44 = vld [vmem:[%s32755_s10 + $0x3ac] ss:$12 sps:$4 sm:$0xff]   ;;  %vm15646_vm14 = vcmask 39936  }
 0xdb6   : > { %6087 = vst.msk [vmem:[#allocation3 + $0x20] sm:$0x1] %vm6086_vm15, %v6069_v5  ;;  %6082 = vst [vmem:[#allocation3 + $0x8] sm:$0xfe] %v6074_v10  ;;  %v24781_v5 = vld [vmem:[%s32755_s10 + $0x3a8] ss:$12 sps:$4 sm:$0xff]  }
 0xdb7   : > { %6088 = vst [vmem:[#allocation3 + $0x28] sm:$0x1] %v6074_v10  ;;  %v6095_v9 = vld [vmem:[#allocation3 + $0x18] sm:$0xff]  ;;  %v24796_v10 = vld [vmem:[%s32755_s10 + $0x540] ss:$12 sps:$4 sm:$0xff]  }
 0xdb8   : > { %v6099_v19 = vld [vmem:[#allocation3 + $0x38] sm:$0x3] }
 0xdb9   : > { %v27787_v20 = vpack.c.bf16 %v6099_v19, %v6095_v9  ;;  %v6094_v22 = vld [vmem:[#allocation3 + $0x10] sm:$0xff]  ;;  %v24787_v19 = vld [vmem:[%s32755_s10 + $0x3c0] ss:$12 sps:$4 sm:$0xff]  }
 0xdba   : > { %v6098_v41 = vld [vmem:[#allocation3 + $0x30] sm:$0x3] }
 0xdbb   : > { %19693 = vmatprep.subr.msk.bf16.mxu1 %vm6109_vm2, %v27787_v20  ;;  %v6102_v24 = vpack.c.bf16 %v6098_v41, %v6094_v22  ;;  %v24789_v9 = vld [vmem:[%s32755_s10 + $0x3c4] ss:$12 sps:$4 sm:$0xff]   ;;  %v24795_v22 = vld [vmem:[%s32755_s10 + $0x3dc] ss:$12 sps:$4 sm:$0xff]  }
 0xdbc   : > { %v6092_v34 = vld [vmem:[#allocation3] sm:$0xff] }
 0xdbd   : > { %v27792_v32 = vsel %vm6109_vm2, %v6102_v24, 0  ;;  %v6096_v38 = vld [vmem:[#allocation3 + $0x20] sm:$0x3]  ;;  %v6093_v43 = vld [vmem:[#allocation3 + $0x8] sm:$0xff]  ;;  %v24793_v41 = vld [vmem:[%s32755_s10 + $0x3d8] ss:$12 sps:$4 sm:$0xff]  }
 0xdbe   : > { %6164 = vmatpush1.bf16.msra.mxu1 %v27792_v32  ;;  %v6097_v39 = vld [vmem:[#allocation3 + $0x28] sm:$0x3]  ;;  %v6100_v47 = vpack.c.bf16 %v6096_v38, %v6092_v34  ;;  %v24801_v24 = vld [vmem:[%s32755_s10 + $0x3f4] ss:$12 sps:$4 sm:$0xff]   ;;  %v24799_v38 = vld [vmem:[%s32755_s10 + $0x3f0] ss:$12 sps:$4 sm:$0xff]  }
 0xdbf   : > { %19697 = vmatprep.subr.msk.bf16.mxu1 %vm6109_vm2, %v27787_v20  ;;  %v27797_v56 = vpack.c.bf16 %v6097_v39, %v6093_v43  ;;  %v24804_v34 = vld [vmem:[%s32755_s10 + $0x55c] ss:$12 sps:$4 sm:$0xff]   ;;  %v24802_v43 = vld [vmem:[%s32755_s10 + $0x558] ss:$12 sps:$4 sm:$0xff]  }
 0xdc0   : > { %v27800_v48 = vsel %vm6109_vm2, %v6100_v47, 0  ;;  %v24807_v39 = vld [vmem:[%s32755_s10 + $0x40c] ss:$12 sps:$4 sm:$0xff]   ;;  %v24805_v47 = vld [vmem:[%s32755_s10 + $0x408] ss:$12 sps:$4 sm:$0xff]  }
 0xdc1   : > { %19691 = vmatprep.subr.msk.bf16.mxu0 %vm6109_vm2, %v27797_v56  ;;  %19694 = vmatmul.mubr.msk.bf16.vlgmr.msra.gmra.mrb[80].mxu1 %vm6105_vm5, %v6104_v46 }
 0xdc2   : > { %6123 = vmatpush1.bf16.msra.mxu0 %v27800_v48  ;;  %6375 = vmatpush1.bf16.msra.mxu1 %v27792_v32 }
 0xdc3   : > { %19695 = vmatprep.subr.msk.bf16.mxu0 %vm6109_vm2, %v27797_v56  ;;  %6406 = vmatprep.mubr.bf16.mxu1 %v32791_v37 }
 0xdc4   : > { %7064 = vmatprep.subr.bf16.mxu1 %v24738_v53  ;;  %v24808_v53 = vld [vmem:[%s32755_s10 + $0x570] ss:$12 sps:$4 sm:$0xff]  }
 0xdc5   : > { %19692 = vmatmul.mubr.msk.bf16.vlgmr.msra.gmra.mrb[72].mxu0 %vm6105_vm5, %v6104_v46  ;;  %v24810_v46 = vld [vmem:[%s32755_s10 + $0x574] ss:$12 sps:$4 sm:$0xff]  }
 0xdc6   : > { %6334 = vmatpush1.bf16.msra.mxu0 %v27800_v48  ;;  %6365 = vmatprep.mubr.bf16.mxu0 %v32791_v37 }
 0xdc7   : > { %7023 = vmatprep.subr.bf16.mxu0 %v24732_v54  ;;  %v24813_v54 = vld [vmem:[%s32755_s10 + $0x424] ss:$12 sps:$4 sm:$0xff]  }
 0xdc9   : > { %19698 = vmatmul.mubr.msk.bf16.vlgmr.msra.gmra.mrb[84].mxu1 %vm6105_vm5, %v6329_v15 }
 0xdca   : > { %7065 = vmatpush1.bf16.msra.mxu1 %v24736_v26  ;;  %v24811_v26 = vld [vmem:[%s32755_s10 + $0x420] ss:$12 sps:$4 sm:$0xff]  }
 0xdcb   : > { %7066 = vmatprep.subr.bf16.mxu1 %v24744_v40  ;;  %v24814_v40 = vld [vmem:[%s32755_s10 + $0x588] ss:$12 sps:$4 sm:$0xff]  }
 0xdcd   : > { %19696 = vmatmul.mubr.msk.bf16.vlgmr.msra.gmra.mrb[76].mxu0 %vm6105_vm5, %v6329_v15  ;;  %v24816_v15 = vld [vmem:[%s32755_s10 + $0x58c] ss:$12 sps:$4 sm:$0xff]  }
 0xdce   : > { %7024 = vmatpush1.bf16.msra.mxu0 %v24730_v8  ;;  %7067 = vmatpush1.bf16.msra.mxu1 %v24742_v13  ;;  %v24819_v8 = vld [vmem:[%s32755_s10 + $0x43c] ss:$12 sps:$4 sm:$0xff]   ;;  %v24820_v13 = vld [vmem:[%s32755_s10 + $0x398] ss:$12 sps:$4 sm:$0xff]  }
 0xdcf   : > { %7025 = vmatprep.subr.bf16.mxu0 %v24735_v16  ;;  %7068 = vmatprep.subr.bf16.mxu1 %v24750_v42  ;;  %v24817_v16 = vld [vmem:[%s32755_s10 + $0x438] ss:$12 sps:$4 sm:$0xff]  }
 0xdd2   : > { %7026 = vmatpush1.bf16.msra.mxu0 %v24733_v17  ;;  %7069 = vmatpush1.bf16.msra.mxu1 %v24748_v36 }
 0xdd3   : > { %7027 = vmatprep.subr.bf16.mxu0 %v24741_v21  ;;  %7070 = vmatprep.subr.bf16.mxu1 %v24756_v23 }
 0xdd6   : > { %7028 = vmatpush1.bf16.msra.mxu0 %v24739_v28  ;;  %7071 = vmatpush1.bf16.msra.mxu1 %v24754_v35 }
 0xdd7   : > { %7029 = vmatprep.subr.bf16.mxu0 %v24747_v45  ;;  %7072 = vmatprep.subr.bf16.mxu1 %v24762_v49 }
 0xdda   : > { %7030 = vmatpush1.bf16.msra.mxu0 %v24745_v51  ;;  %7073 = vmatpush1.bf16.msra.mxu1 %v24760_v55 }
 0xddb   : > { %7031 = vmatprep.subr.bf16.mxu0 %v24753_v25  ;;  %7074 = vmatprep.subr.bf16.mxu1 %v24768_v57  ;;  %v24821_v57 = vld [vmem:[%s32755_s10 + $0x2d8] ss:$12 sps:$4 sm:$0xff]  }
 0xdde   : > { %7032 = vmatpush1.bf16.msra.mxu0 %v24751_v4  ;;  %7075 = vmatpush1.bf16.msra.mxu1 %v24766_v60 }
 0xddf   : > { %7033 = vmatprep.subr.bf16.mxu0 %v24759_v62  ;;  %7076 = vmatprep.subr.bf16.mxu1 %v24774_v63  ;;  %v24822_v62 = vld [vmem:[%s32755_s10 + $0x3b0] ss:$12 sps:$4 sm:$0xff]  }
 0xde2   : > { %7034 = vmatpush1.bf16.msra.mxu0 %v24757_v50  ;;  %7077 = vmatpush1.bf16.msra.mxu1 %v24772_v52 }
 0xde3   : > { %7035 = vmatprep.subr.bf16.mxu0 %v24765_v33  ;;  %7078 = vmatprep.subr.bf16.mxu1 %v24780_v1  ;;  %v24823_v1 = vld [vmem:[%s32755_s10 + $0x2f0] ss:$12 sps:$4 sm:$0xff]  }
 0xde6   : > { %7036 = vmatpush1.bf16.msra.mxu0 %v24763_v3  ;;  %7079 = vmatpush1.bf16.msra.mxu1 %v24778_v11  ;;  %v24824_v3 = vld [vmem:[%s32755_s10 + $0x458] ss:$12 sps:$4 sm:$0xff]  }
 0xde7   : > { %7037 = vmatprep.subr.bf16.mxu0 %v24771_v2  ;;  %7080 = vmatprep.subr.bf16.mxu1 %v24786_v12  ;;  %v24825_v2 = vld [vmem:[%s32755_s10 + $0x3c8] ss:$12 sps:$4 sm:$0xff]  }
 0xdea   : > { %7038 = vmatpush1.bf16.msra.mxu0 %v24769_v14  ;;  %7081 = vmatpush1.bf16.msra.mxu1 %v24784_v6  ;;  %v24826_v14 = vld [vmem:[%s32755_s10 + $0x308] ss:$12 sps:$4 sm:$0xff]   ;;  %v24827_v6 = vld [vmem:[%s32755_s10 + $0x470] ss:$12 sps:$4 sm:$0xff]  }
 0xdeb   : > { %7039 = vmatprep.subr.bf16.mxu0 %v24777_v18  ;;  %7082 = vmatprep.subr.bf16.mxu1 %v24792_v58  ;;  %v24828_v18 = vld [vmem:[%s32755_s10 + $0x3e0] ss:$12 sps:$4 sm:$0xff]  }
 0xdec   : > { %v24829_v58 = vld [vmem:[%s32755_s10 + $0x320] ss:$12 sps:$4 sm:$0xff]  }
 0xdee   : > { %7040 = vmatpush1.bf16.msra.mxu0 %v24775_v59  ;;  %7083 = vmatpush1.bf16.msra.mxu1 %v24790_v61  ;;  %v24830_v59 = vld [vmem:[%s32755_s10 + $0x488] ss:$12 sps:$4 sm:$0xff]   ;;  %v24831_v61 = vld [vmem:[%s32755_s10 + $0x3f8] ss:$12 sps:$4 sm:$0xff]  }
 0xdef   : > { %7041 = vmatprep.subr.bf16.mxu0 %v24783_v44  ;;  %7084 = vmatprep.subr.bf16.mxu1 %v24798_v31  ;;  %v24832_v44 = vld [vmem:[%s32755_s10 + $0x338] ss:$12 sps:$4 sm:$0xff]   ;;  %v24833_v31 = vld [vmem:[%s32755_s10 + $0x4a0] ss:$12 sps:$4 sm:$0xff]  }
 0xdf2   : > { %7042 = vmatpush1.bf16.msra.mxu0 %v24781_v5  ;;  %7085 = vmatpush1.bf16.msra.mxu1 %v24796_v10  ;;  %v24834_v5 = vld [vmem:[%s32755_s10 + $0x410] ss:$12 sps:$4 sm:$0xff]  }
 0xdf3   : > { %7043 = vmatprep.subr.bf16.mxu0 %v24789_v9  ;;  %7086 = vmatprep.subr.bf16.mxu1 %v24804_v34  ;;  %v24835_v10 = vld [vmem:[%s32755_s10 + $0x350] ss:$12 sps:$4 sm:$0xff]   ;;  %v24836_v9 = vld [vmem:[%s32755_s10 + $0x4b8] ss:$12 sps:$4 sm:$0xff]   ;;  %v24841_v34 = vld [vmem:[%s32755_s10 + $0x380] ss:$12 sps:$4 sm:$0xff]  }
 0xdf6   : > { %7044 = vmatpush1.bf16.msra.mxu0 %v24787_v19  ;;  %7087 = vmatpush1.bf16.msra.mxu1 %v24802_v43  ;;  %v24837_v19 = vld [vmem:[%s32755_s10 + $0x428] ss:$12 sps:$4 sm:$0xff]   ;;  %v24845_v43 = vld [vmem:[%s32755_s10 + $0x4] ss:$12 sps:$4 sm:$0xff]  }
 0xdf7   : > { %7045 = vmatprep.subr.bf16.mxu0 %v24795_v22  ;;  %7088 = vmatprep.subr.bf16.mxu1 %v24810_v46  ;;  %v24838_v22 = vld [vmem:[%s32755_s10 + $0x368] ss:$12 sps:$4 sm:$0xff]   ;;  %v24846_v46 = vld [vmem:[%s32755_s10 + $0x500] ss:$12 sps:$4 sm:$0xff]  }
 0xdfa   : > { %7046 = vmatpush1.bf16.msra.mxu0 %v24793_v41  ;;  %7089 = vmatpush1.bf16.msra.mxu1 %v24808_v53  ;;  %v24839_v41 = vld [vmem:[%s32755_s10 + $0x4d0] ss:$12 sps:$4 sm:$0xff]  }
 0xdfb   : > { %7047 = vmatprep.subr.bf16.mxu0 %v24801_v24  ;;  %7090 = vmatprep.subr.bf16.mxu1 %v24816_v15  ;;  %v24840_v24 = vld [vmem:[%s32755_s10 + $0x440] ss:$12 sps:$4 sm:$0xff]   ;;  %v24850_v15 = vld [vmem:[%s32755_s10 + $0x518] ss:$12 sps:$4 sm:$0xff]  }
 0xdfe   : > { %7048 = vmatpush1.bf16.msra.mxu0 %v24799_v38  ;;  %7091 = vmatpush1.bf16.msra.mxu1 %v24814_v40  ;;  %v24842_v38 = vld [vmem:[%s32755_s10 + $0x4e8] ss:$12 sps:$4 sm:$0xff]   ;;  %v24851_v40 = vld [vmem:[%s32755_s10 + $0x30] ss:$12 sps:$4 sm:$0xff]  }
 0xdff   : > { %7049 = vmatprep.subr.bf16.mxu0 %v24807_v39  ;;  %22217 = vmatprep.subr.bf16.mxu1 %v24820_v13  ;;  %v24843_v39 = vld [vmem:[%s32755_s10] ss:$12 sps:$4 sm:$0xff]  }
 0xe00   : > { %v24857_v13 = vld [vmem:[%s32755_s10 + $0x4c] ss:$12 sps:$4 sm:$0xff]  }
 0xe02   : > { %7050 = vmatpush1.bf16.msra.mxu0 %v24805_v47  ;;  %v24849_v47 = vld [vmem:[%s32755_s10 + $0x1c] ss:$12 sps:$4 sm:$0xff]  }
 0xe03   : > { %7051 = vmatprep.subr.bf16.mxu0 %v24813_v54  ;;  %v24847_v54 = vld [vmem:[%s32755_s10 + $0x18] ss:$12 sps:$4 sm:$0xff]  }
 0xe06   : > { %7052 = vmatpush1.bf16.msra.mxu0 %v24811_v26  ;;  %v24853_v26 = vld [vmem:[%s32755_s10 + $0x34] ss:$12 sps:$4 sm:$0xff]  }
 0xe07   : > { %7053 = vmatprep.subr.bf16.mxu0 %v24819_v8  ;;  %v24854_v8 = vld [vmem:[%s32755_s10 + $0x530] ss:$12 sps:$4 sm:$0xff]  }
 0xe0a   : > { %7054 = vmatpush1.bf16.msra.mxu0 %v24817_v16  ;;  %v24855_v16 = vld [vmem:[%s32755_s10 + $0x48] ss:$12 sps:$4 sm:$0xff]  }
 0xe0b   : > { %7145 = vmatprep.subr.bf16.mxu0 %v32791_v37 }
 0xe94   : > { %v27999_v42 = vpop.f32.mrb[80].mxu1 }
 0xe95   : > { %v28001_v17 = vpop.f32.mrb[81].mxu1 }
 0xe96   : > { %v6201_v36 = vpop.f32.mrb[82].mxu1 }
 0xe97   : > { %v6202_v21 = vpop.f32.mrb[83].mxu1  ;;  %v24858_v36 = vld [vmem:[%s32755_s10 + $0x548] ss:$12 sps:$4 sm:$0xff]  }
 0xe98   : > { %v28003_v23 = vpop.f32.mrb[72].mxu0  ;;  %v24861_v21 = vld [vmem:[%s32755_s10 + $0x64] ss:$12 sps:$4 sm:$0xff]  }
 0xe99   : > { %v28005_v28 = vpop.f32.mrb[73].mxu0 }
 0xe9a   : > { %v6160_v35 = vpop.f32.mrb[74].mxu0  ;;  %v28102_v53 = vpack.c.bf16 %v28005_v28, %v28005_v28  ;;  %v24859_v28 = vld [vmem:[%s32755_s10 + $0x60] ss:$12 sps:$4 sm:$0xff]  }
 0xe9b   : > { %v6161_v45 = vpop.f32.mrb[75].mxu0  ;;  %v24862_v35 = vld [vmem:[%s32755_s10 + $0x560] ss:$12 sps:$4 sm:$0xff]  }
 0xe9c   : > { %v6408_v49 = vpop.f32.mrb[84].mxu1  ;;  %v24865_v45 = vld [vmem:[%s32755_s10 + $0x7c] ss:$12 sps:$4 sm:$0xff]  }
 0xe9d   : > { %v6410_v51 = vpop.f32.mrb[85].mxu1  ;;  %v28010_v4 = vpack.c.bf16 %v6408_v49, %v6408_v49  ;;  %v24863_v49 = vld [vmem:[%s32755_s10 + $0x78] ss:$12 sps:$4 sm:$0xff]  }
 0xe9e   : > { %v6418_v55 = vpack.c.bf16 %v6410_v51, %v6410_v51  ;;  %v6412_v25 = vpop.f32.mrb[86].mxu1  ;;  %v24866_v51 = vld [vmem:[%s32755_s10 + $0x578] ss:$12 sps:$4 sm:$0xff]  }
 0xe9f   : > { %v6413_v60 = vpop.f32.mrb[87].mxu1  ;;  %v24867_v25 = vld [vmem:[%s32755_s10 + $0x90] ss:$12 sps:$4 sm:$0xff]  }
 0xea0   : > { %v6367_v63 = vpop.f32.mrb[76].mxu0  ;;  %19909 = vmatprep.mubr.msk.bf16.mxu1 %vm823_vm1, %v6418_v55  ;;  %v24873_v60 = vld [vmem:[%s32755_s10 + $0xac] ss:$12 sps:$4 sm:$0xff]  }
 0xea1   : > { %v28016_v50 = vpack.c.bf16 %v6367_v63, %v6367_v63  ;;  %v6369_v52 = vpop.f32.mrb[77].mxu0  ;;  %7097 = vmatmul.mubr.bf16.vlgmr.msra.gmra.mrb[88].mxu1 %v28010_v4  ;;  %v24871_v63 = vld [vmem:[%s32755_s10 + $0xa8] ss:$12 sps:$4 sm:$0xff]  }
 0xea2   : > { %v6416_v33 = vpack.c.bf16 %v6369_v52, %v6369_v52  ;;  %22218 = vmatpush3.bf16.msra.mxu1 %v24821_v57  ;;  %v6371_v11 = vpop.f32.mrb[78].mxu0  ;;  %v24870_v57 = vld [vmem:[%s32755_s10 + $0x590] ss:$12 sps:$4 sm:$0xff]  }
 0xea3   : > { %22219 = vmatprep.subr.bf16.mxu1 %v24822_v62  ;;  %v6372_v12 = vpop.f32.mrb[79].mxu0  ;;  %v24876_v62 = vld [vmem:[%s32755_s10 + $0x184] ss:$12 sps:$4 sm:$0xff]  }
 0xea4   : > { %7055 = vmatprep.mubr.bf16.mxu0 %v6416_v33  ;;  %7137 = vmatprep.mubr.bf16.mxu1 %v6416_v33  ;;  %v24879_v52 = vld [vmem:[%s32755_s10 + $0xc4] ss:$12 sps:$4 sm:$0xff]   ;;  %v24882_v33 = vld [vmem:[%s32755_s10 + $0x19c] ss:$12 sps:$4 sm:$0xff]  }
 0xea5   : > { %7056 = vmatmul.mubr.bf16.vlgmr.msra.gmra.mrb[80].mxu0 %v28016_v50  ;;  %v24880_v11 = vld [vmem:[%s32755_s10 + $0x198] ss:$12 sps:$4 sm:$0xff]   ;;  %v24886_v12 = vld [vmem:[%s32755_s10 + $0x1b0] ss:$12 sps:$4 sm:$0xff]  }
 0xea6   : > { %22220 = vmatpush3.bf16.msra.mxu1 %v24823_v1  ;;  %7146 = vmatpush1.bf16.msra.mxu0 %v24824_v3  ;;  %v28183_v1 = vpack.c.bf16 %v28001_v17, %v28001_v17  ;;  %v24877_v3 = vld [vmem:[%s32755_s10 + $0xc0] ss:$12 sps:$4 sm:$0xff]   ;;  %v24885_v17 = vld [vmem:[%s32755_s10 + $0xdc] ss:$12 sps:$4 sm:$0xff]  }
 0xea7   : > { %19910 = vmatprep.mubr.msk.bf16.mxu0 %vm823_vm1, %v6418_v55  ;;  %22221 = vmatprep.subr.bf16.mxu1 %v24825_v2  ;;  %v24869_v55 = vld [vmem:[%s32755_s10 + $0x94] ss:$12 sps:$4 sm:$0xff]   ;;  %v24883_v2 = vld [vmem:[%s32755_s10 + $0xd8] ss:$12 sps:$4 sm:$0xff]  }
 0xea8   : > { %7147 = vmatprep.subr.bf16.mxu0 %v32791_v37 }
 0xeaa   : > { %22222 = vmatpush3.bf16.msra.mxu1 %v24826_v14  ;;  %7148 = vmatpush1.bf16.msra.mxu0 %v24827_v6  ;;  %v24891_v14 = vld [vmem:[%s32755_s10 + $0xf4] ss:$12 sps:$4 sm:$0xff]   ;;  %v24894_v6 = vld [vmem:[%s32755_s10 + $0x1cc] ss:$12 sps:$4 sm:$0xff]  }
 0xeab   : > { %22223 = vmatprep.subr.bf16.mxu1 %v24828_v18  ;;  %7149 = vmatprep.subr.bf16.mxu0 %v32791_v37  ;;  %v24889_v18 = vld [vmem:[%s32755_s10 + $0xf0] ss:$12 sps:$4 sm:$0xff]  }
 0xeae   : > { %22224 = vmatpush3.bf16.msra.mxu1 %v24829_v58  ;;  %7150 = vmatpush1.bf16.msra.mxu0 %v24830_v59  ;;  %v24892_v58 = vld [vmem:[%s32755_s10 + $0x1c8] ss:$12 sps:$4 sm:$0xff]   ;;  %v24897_v59 = vld [vmem:[%s32755_s10 + $0x10c] ss:$12 sps:$4 sm:$0xff]  }
 0xeaf   : > { %22225 = vmatprep.subr.bf16.mxu1 %v24831_v61  ;;  %7151 = vmatprep.subr.bf16.mxu0 %v32791_v37  ;;  %v24900_v61 = vld [vmem:[%s32755_s10 + $0x1e4] ss:$12 sps:$4 sm:$0xff]  }
 0xeb2   : > { %22226 = vmatpush3.bf16.msra.mxu1 %v24832_v44  ;;  %7152 = vmatpush1.bf16.msra.mxu0 %v24833_v31  ;;  %v24895_v44 = vld [vmem:[%s32755_s10 + $0x108] ss:$12 sps:$4 sm:$0xff]   ;;  %v24898_v31 = vld [vmem:[%s32755_s10 + $0x1e0] ss:$12 sps:$4 sm:$0xff]  }
 0xeb3   : > { %22227 = vmatprep.subr.bf16.mxu1 %v24834_v5  ;;  %7153 = vmatprep.subr.bf16.mxu0 %v32791_v37  ;;  %v24903_v5 = vld [vmem:[%s32755_s10 + $0x124] ss:$12 sps:$4 sm:$0xff]  }
 0xeb6   : > { %22228 = vmatpush3.bf16.msra.mxu1 %v24835_v10  ;;  %7154 = vmatpush1.bf16.msra.mxu0 %v24836_v9  ;;  %v24906_v10 = vld [vmem:[%s32755_s10 + $0x1fc] ss:$12 sps:$4 sm:$0xff]   ;;  %v24901_v9 = vld [vmem:[%s32755_s10 + $0x120] ss:$12 sps:$4 sm:$0xff]  }
 0xeb7   : > { %22229 = vmatprep.subr.bf16.mxu1 %v24837_v19  ;;  %7155 = vmatprep.subr.bf16.mxu0 %v32791_v37  ;;  %v24904_v19 = vld [vmem:[%s32755_s10 + $0x1f8] ss:$12 sps:$4 sm:$0xff]  }
 0xeba   : > { %22230 = vmatpush3.bf16.msra.mxu1 %v24838_v22  ;;  %7156 = vmatpush1.bf16.msra.mxu0 %v24839_v41  ;;  %v24909_v22 = vld [vmem:[%s32755_s10 + $0x13c] ss:$12 sps:$4 sm:$0xff]   ;;  %v24912_v41 = vld [vmem:[%s32755_s10 + $0x214] ss:$12 sps:$4 sm:$0xff]  }
 0xebb   : > { %22231 = vmatprep.subr.bf16.mxu1 %v24840_v24  ;;  %7157 = vmatprep.subr.bf16.mxu0 %v32791_v37  ;;  %v24907_v24 = vld [vmem:[%s32755_s10 + $0x138] ss:$12 sps:$4 sm:$0xff]  }
 0xebe   : > { %22232 = vmatpush3.bf16.msra.mxu1 %v24841_v34  ;;  %7158 = vmatpush1.bf16.msra.mxu0 %v24842_v38  ;;  %v24910_v34 = vld [vmem:[%s32755_s10 + $0x210] ss:$12 sps:$4 sm:$0xff]   ;;  %v24915_v38 = vld [vmem:[%s32755_s10 + $0x154] ss:$12 sps:$4 sm:$0xff]  }
 0xebf   : > { %7159 = vmatprep.subr.bf16.mxu0 %v32791_v37  ;;  %7668 = vmatprep.subr.bf16.mxu1 %v24845_v43  ;;  %v24918_v43 = vld [vmem:[%s32755_s10 + $0x22c] ss:$12 sps:$4 sm:$0xff]  }
 0xec1   : > { %7138 = vmatmul.mubr.bf16.vlgmr.msra.gmra.mrb[92].mxu1 %v28016_v50  ;;  %v24874_v50 = vld [vmem:[%s32755_s10 + $0x180] ss:$12 sps:$4 sm:$0xff]  }
 0xec2   : > { %7160 = vmatpush1.bf16.msra.mxu0 %v24846_v46  ;;  %7669 = vmatpush1.bf16.msra.mxu1 %v24843_v39  ;;  %v24913_v39 = vld [vmem:[%s32755_s10 + $0x150] ss:$12 sps:$4 sm:$0xff]   ;;  %v24916_v46 = vld [vmem:[%s32755_s10 + $0x228] ss:$12 sps:$4 sm:$0xff]  }
 0xec3   : > { %7700 = vmatprep.mubr.bf16.mxu1 %v28102_v53  ;;  %7161 = vmatprep.subr.bf16.mxu0 %v32791_v37 }
 0xec4   : > { %7670 = vmatprep.subr.bf16.mxu1 %v24849_v47  ;;  %v24921_v47 = vld [vmem:[%s32755_s10 + $0x16c] ss:$12 sps:$4 sm:$0xff]  }
 0xec6   : > { %7162 = vmatpush1.bf16.msra.mxu0 %v24850_v15  ;;  %7671 = vmatpush1.bf16.msra.mxu1 %v24847_v54  ;;  %v24924_v54 = vld [vmem:[%s32755_s10 + $0x244] ss:$12 sps:$4 sm:$0xff]   ;;  %v24919_v15 = vld [vmem:[%s32755_s10 + $0x168] ss:$12 sps:$4 sm:$0xff]  }
 0xec7   : > { %7163 = vmatprep.subr.bf16.mxu0 %v32791_v37  ;;  %7672 = vmatprep.subr.bf16.mxu1 %v24853_v26  ;;  %v24922_v26 = vld [vmem:[%s32755_s10 + $0x240] ss:$12 sps:$4 sm:$0xff]  }
 0xeca   : > { %7164 = vmatpush1.bf16.msra.mxu0 %v24854_v8  ;;  %7673 = vmatpush1.bf16.msra.mxu1 %v24851_v40  ;;  %v24927_v40 = vld [vmem:[%s32755_s10 + $0x25c] ss:$12 sps:$4 sm:$0xff]  }
 0xecb   : > { %7165 = vmatprep.subr.bf16.mxu0 %v32791_v37  ;;  %7674 = vmatprep.subr.bf16.mxu1 %v24857_v13  ;;  %v24928_v8 = vld [vmem:[%s32755_s10 + $0xc8] ss:$12 sps:$4 sm:$0xff]   ;;  %v24925_v13 = vld [vmem:[%s32755_s10 + $0x258] ss:$12 sps:$4 sm:$0xff]  }
 0xece   : > { %7166 = vmatpush1.bf16.msra.mxu0 %v24858_v36  ;;  %7675 = vmatpush1.bf16.msra.mxu1 %v24855_v16  ;;  %v24929_v16 = vld [vmem:[%s32755_s10 + $0x8] ss:$12 sps:$4 sm:$0xff]   ;;  %v28292_v36 = vpack.c.bf16 %v28003_v23, %v28003_v23  ;;  %v24934_v23 = vld [vmem:[%s32755_s10 + $0x20] ss:$12 sps:$4 sm:$0xff]  }
 0xecf   : > { %7167 = vmatprep.subr.bf16.mxu0 %v32791_v37  ;;  %7676 = vmatprep.subr.bf16.mxu1 %v24861_v21  ;;  %v24932_v21 = vld [vmem:[%s32755_s10 + $0x274] ss:$12 sps:$4 sm:$0xff]  }
 0xed2   : > { %7168 = vmatpush1.bf16.msra.mxu0 %v24862_v35  ;;  %7677 = vmatpush1.bf16.msra.mxu1 %v24859_v28  ;;  %v24933_v28 = vld [vmem:[%s32755_s10 + $0xe0] ss:$12 sps:$4 sm:$0xff]   ;;  %v24930_v35 = vld [vmem:[%s32755_s10 + $0x270] ss:$12 sps:$4 sm:$0xff]  }
 0xed3   : > { %7169 = vmatprep.subr.bf16.mxu0 %v32791_v37  ;;  %7678 = vmatprep.subr.bf16.mxu1 %v24865_v45  ;;  %v24937_v45 = vld [vmem:[%s32755_s10 + $0x28c] ss:$12 sps:$4 sm:$0xff]  }
 0xed6   : > { %7170 = vmatpush1.bf16.msra.mxu0 %v24866_v51  ;;  %7679 = vmatpush1.bf16.msra.mxu1 %v24863_v49  ;;  %v24938_v49 = vld [vmem:[%s32755_s10 + $0xf8] ss:$12 sps:$4 sm:$0xff]   ;;  %v24935_v51 = vld [vmem:[%s32755_s10 + $0x288] ss:$12 sps:$4 sm:$0xff]  }
 0xed7   : > { %7171 = vmatprep.subr.bf16.mxu0 %v32791_v37  ;;  %7680 = vmatprep.subr.bf16.mxu1 %v24869_v55  ;;  %v24942_v55 = vld [vmem:[%s32755_s10 + $0x2a4] ss:$12 sps:$4 sm:$0xff]  }
 0xeda   : > { %7172 = vmatpush1.bf16.msra.mxu0 %v24870_v57  ;;  %7681 = vmatpush1.bf16.msra.mxu1 %v24867_v25  ;;  %v24943_v25 = vld [vmem:[%s32755_s10 + $0x110] ss:$12 sps:$4 sm:$0xff]   ;;  %v24940_v57 = vld [vmem:[%s32755_s10 + $0x2a0] ss:$12 sps:$4 sm:$0xff]  }
 0xedb   : > { %7682 = vmatprep.subr.bf16.mxu1 %v24873_v60  ;;  %7709 = vmatprep.subr.bf16.mxu0 %v24876_v62  ;;  %v24944_v60 = vld [vmem:[%s32755_s10 + $0x50] ss:$12 sps:$4 sm:$0xff]  }
 0xedc   : > { %v24947_v62 = vld [vmem:[%s32755_s10 + $0x2bc] ss:$12 sps:$4 sm:$0xff]  }
 0xedd   : > { %7178 = vmatmul.mubr.bf16.vlgmr.msra.gmra.mrb[84].mxu0 %v28010_v4  ;;  %v24888_v4 = vld [vmem:[%s32755_s10 + $0x1b4] ss:$12 sps:$4 sm:$0xff]  }
 0xede   : > { %7683 = vmatpush1.bf16.msra.mxu1 %v24871_v63  ;;  %7710 = vmatpush1.bf16.msra.mxu0 %v24874_v50  ;;  %v24948_v63 = vld [vmem:[%s32755_s10 + $0x128] ss:$12 sps:$4 sm:$0xff]   ;;  %v24945_v50 = vld [vmem:[%s32755_s10 + $0x2b8] ss:$12 sps:$4 sm:$0xff]  }
 0xedf   : > { %20001 = vmatprep.mubr.msk.bf16.mxu0 %vm823_vm1, %v28183_v1  ;;  %7684 = vmatprep.subr.bf16.mxu1 %v24879_v52  ;;  %v24949_v52 = vld [vmem:[%s32755_s10 + $0x68] ss:$12 sps:$4 sm:$0xff]  }
 0xee0   : > { %7711 = vmatprep.subr.bf16.mxu0 %v24882_v33  ;;  %v24950_v33 = vld [vmem:[%s32755_s10 + $0x140] ss:$12 sps:$4 sm:$0xff]  }
 0xee2   : > { %7685 = vmatpush1.bf16.msra.mxu1 %v24877_v3  ;;  %7712 = vmatpush1.bf16.msra.mxu0 %v24880_v11  ;;  %v24951_v3 = vld [vmem:[%s32755_s10 + $0x80] ss:$12 sps:$4 sm:$0xff]   ;;  %v24952_v11 = vld [vmem:[%s32755_s10 + $0x188] ss:$12 sps:$4 sm:$0xff]  }
 0xee3   : > { %7686 = vmatprep.subr.bf16.mxu1 %v24885_v17  ;;  %7713 = vmatprep.subr.bf16.mxu0 %v24888_v4  ;;  %v28355_v17 = vpack.c.bf16 %v27999_v42, %v27999_v42  ;;  %v24953_v4 = vld [vmem:[%s32755_s10 + $0x158] ss:$12 sps:$4 sm:$0xff]   ;;  %v24955_v42 = vld [vmem:[%s32755_s10 + $0x1a0] ss:$12 sps:$4 sm:$0xff]  }
 0xee6   : > { %7687 = vmatpush1.bf16.msra.mxu1 %v24883_v2  ;;  %7714 = vmatpush1.bf16.msra.mxu0 %v24886_v12  ;;  %v24954_v2 = vld [vmem:[%s32755_s10 + $0x98] ss:$12 sps:$4 sm:$0xff]   ;;  %v24956_v12 = vld [vmem:[%s32755_s10 + $0x170] ss:$12 sps:$4 sm:$0xff]  }
 0xee7   : > { %7688 = vmatprep.subr.bf16.mxu1 %v24891_v14  ;;  %7715 = vmatprep.subr.bf16.mxu0 %v24894_v6  ;;  %v24957_v14 = vld [vmem:[%s32755_s10 + $0xb0] ss:$12 sps:$4 sm:$0xff]   ;;  %v24958_v6 = vld [vmem:[%s32755_s10 + $0x1b8] ss:$12 sps:$4 sm:$0xff]  }
 0xeea   : > { %7689 = vmatpush1.bf16.msra.mxu1 %v24889_v18  ;;  %7716 = vmatpush1.bf16.msra.mxu0 %v24892_v58  ;;  %v24960_v18 = vld [vmem:[%s32755_s10 + $0x1e8] ss:$12 sps:$4 sm:$0xff]   ;;  %v7831_v58 = vld [vmem:[#allocation14 + $0x4] sm:$0x3] }
 0xeeb   : > { %7690 = vmatprep.subr.bf16.mxu1 %v24897_v59  ;;  %7717 = vmatprep.subr.bf16.mxu0 %v24900_v61  ;;  %v24961_v59 = vld [vmem:[%s32755_s10 + $0x200] ss:$12 sps:$4 sm:$0xff]   ;;  %v24962_v61 = vld [vmem:[%s32755_s10 + $0x218] ss:$12 sps:$4 sm:$0xff]  }
 0xeee   : > { %7691 = vmatpush1.bf16.msra.mxu1 %v24895_v44  ;;  %7718 = vmatpush1.bf16.msra.mxu0 %v24898_v31  ;;  %v24963_v44 = vld [vmem:[%s32755_s10 + $0x230] ss:$12 sps:$4 sm:$0xff]   ;;  %v24964_v31 = vld [vmem:[%s32755_s10 + $0x248] ss:$12 sps:$4 sm:$0xff]  }
 0xeef   : > { %7692 = vmatprep.subr.bf16.mxu1 %v24903_v5  ;;  %7719 = vmatprep.subr.bf16.mxu0 %v24906_v10  ;;  %v24970_v5 = vld [vmem:[%s32755_s10 + $0x5a0] ss:$12 sps:$4 sm:$0xff]   ;;  %v24972_v10 = vld [vmem:[%s32755_s10 + $0x5a4] ss:$12 sps:$4 sm:$0xff]  }
 0xef2   : > { %7693 = vmatpush1.bf16.msra.mxu1 %v24901_v9  ;;  %7720 = vmatpush1.bf16.msra.mxu0 %v24904_v19  ;;  %v24975_v9 = vld [vmem:[%s32755_s10 + $0x5bc] ss:$12 sps:$4 sm:$0xff]   ;;  %v24965_v19 = vld [vmem:[%s32755_s10 + $0x260] ss:$12 sps:$4 sm:$0xff]  }
 0xef3   : > { %7694 = vmatprep.subr.bf16.mxu1 %v24909_v22  ;;  %7721 = vmatprep.subr.bf16.mxu0 %v24912_v41  ;;  %v24973_v22 = vld [vmem:[%s32755_s10 + $0x5b8] ss:$12 sps:$4 sm:$0xff]   ;;  %v24978_v41 = vld [vmem:[%s32755_s10 + $0x5d4] ss:$12 sps:$4 sm:$0xff]  }
 0xef6   : > { %7695 = vmatpush1.bf16.msra.mxu1 %v24907_v24  ;;  %7722 = vmatpush1.bf16.msra.mxu0 %v24910_v34  ;;  %v24966_v24 = vld [vmem:[%s32755_s10 + $0x278] ss:$12 sps:$4 sm:$0xff]   ;;  %v24976_v34 = vld [vmem:[%s32755_s10 + $0x5d0] ss:$12 sps:$4 sm:$0xff]  }
 0xef7   : > { %7696 = vmatprep.subr.bf16.mxu1 %v24915_v38  ;;  %7723 = vmatprep.subr.bf16.mxu0 %v24918_v43  ;;  %v24981_v38 = vld [vmem:[%s32755_s10 + $0x5ec] ss:$12 sps:$4 sm:$0xff]   ;;  %v24967_v43 = vld [vmem:[%s32755_s10 + $0x290] ss:$12 sps:$4 sm:$0xff]  }
 0xefa   : > { %7697 = vmatpush1.bf16.msra.mxu1 %v24913_v39  ;;  %7724 = vmatpush1.bf16.msra.mxu0 %v24916_v46  ;;  %v24979_v39 = vld [vmem:[%s32755_s10 + $0x5e8] ss:$12 sps:$4 sm:$0xff]   ;;  %v24984_v46 = vld [vmem:[%s32755_s10 + $0x604] ss:$12 sps:$4 sm:$0xff]  }
 0xefb   : > { %7698 = vmatprep.subr.bf16.mxu1 %v24921_v47  ;;  %7725 = vmatprep.subr.bf16.mxu0 %v24924_v54  ;;  %v24968_v47 = vld [vmem:[%s32755_s10 + $0x2a8] ss:$12 sps:$4 sm:$0xff]   ;;  %v24982_v54 = vld [vmem:[%s32755_s10 + $0x600] ss:$12 sps:$4 sm:$0xff]  }
 0xefe   : > { %7699 = vmatpush1.bf16.msra.mxu1 %v24919_v15  ;;  %7726 = vmatpush1.bf16.msra.mxu0 %v24922_v26  ;;  %v24969_v15 = vld [vmem:[%s32755_s10 + $0x2c0] ss:$12 sps:$4 sm:$0xff]   ;;  %v24987_v26 = vld [vmem:[%s32755_s10 + $0x724] ss:$12 sps:$4 sm:$0xff]  }
 0xeff   : > { %7727 = vmatprep.subr.bf16.mxu0 %v24927_v40  ;;  %22239 = vmatprep.subr.bf16.mxu1 %v24928_v8  ;;  %v24985_v40 = vld [vmem:[%s32755_s10 + $0x720] ss:$12 sps:$4 sm:$0xff]   ;;  %v24990_v8 = vld [vmem:[%s32755_s10 + $0x61c] ss:$12 sps:$4 sm:$0xff]  }
 0xf01   : > { %7701 = vmatmul.mubr.bf16.vlgmr.msra.gmra.mrb[96].mxu1 %v28292_v36 }
 0xf02   : > { %7728 = vmatpush1.bf16.msra.mxu0 %v24925_v13  ;;  %22240 = vmatpush3.bf16.msra.mxu1 %v24929_v16  ;;  %v24993_v13 = vld [vmem:[%s32755_s10 + $0x73c] ss:$12 sps:$4 sm:$0xff]   ;;  %v24988_v16 = vld [vmem:[%s32755_s10 + $0x618] ss:$12 sps:$4 sm:$0xff]  }
 0xf03   : > { %7782 = vmatprep.mubr.bf16.mxu1 %v28102_v53  ;;  %7729 = vmatprep.subr.bf16.mxu0 %v24932_v21  ;;  %v24939_v53 = vld [vmem:[%s32755_s10 + $0x38] ss:$12 sps:$4 sm:$0xff]   ;;  %v24994_v21 = vld [vmem:[%s32755_s10 + $0x630] ss:$12 sps:$4 sm:$0xff]  }
 0xf04   : > { %22241 = vmatprep.subr.bf16.mxu1 %v24933_v28  ;;  %v24996_v28 = vld [vmem:[%s32755_s10 + $0x634] ss:$12 sps:$4 sm:$0xff]  }
 0xf06   : > { %7730 = vmatpush1.bf16.msra.mxu0 %v24930_v35  ;;  %22242 = vmatpush3.bf16.msra.mxu1 %v24934_v23  ;;  %v24997_v35 = vld [vmem:[%s32755_s10 + $0x750] ss:$12 sps:$4 sm:$0xff]   ;;  %v24999_v23 = vld [vmem:[%s32755_s10 + $0x754] ss:$12 sps:$4 sm:$0xff]  }
 0xf07   : > { %7731 = vmatprep.subr.bf16.mxu0 %v24937_v45  ;;  %22243 = vmatprep.subr.bf16.mxu1 %v24938_v49  ;;  %v25002_v45 = vld [vmem:[%s32755_s10 + $0x64c] ss:$12 sps:$4 sm:$0xff]  }
 0xf08   : > { %v25005_v49 = vld [vmem:[%s32755_s10 + $0x76c] ss:$12 sps:$4 sm:$0xff]  }
 0xf0a   : > { %7732 = vmatpush1.bf16.msra.mxu0 %v24935_v51  ;;  %22244 = vmatpush3.bf16.msra.mxu1 %v24939_v53  ;;  %v25000_v51 = vld [vmem:[%s32755_s10 + $0x648] ss:$12 sps:$4 sm:$0xff]  }
 0xf0b   : > { %7733 = vmatprep.subr.bf16.mxu0 %v24942_v55  ;;  %22245 = vmatprep.subr.bf16.mxu1 %v24943_v25  ;;  %v25003_v53 = vld [vmem:[%s32755_s10 + $0x768] ss:$12 sps:$4 sm:$0xff]   ;;  %v25008_v55 = vld [vmem:[%s32755_s10 + $0x664] ss:$12 sps:$4 sm:$0xff]  }
 0xf0c   : > { %v25011_v25 = vld [vmem:[%s32755_s10 + $0x784] ss:$12 sps:$4 sm:$0xff]  }
 0xf0e   : > { %7734 = vmatpush1.bf16.msra.mxu0 %v24940_v57  ;;  %22246 = vmatpush3.bf16.msra.mxu1 %v24944_v60  ;;  %v25006_v57 = vld [vmem:[%s32755_s10 + $0x660] ss:$12 sps:$4 sm:$0xff]  }
 0xf0f   : > { %7735 = vmatprep.subr.bf16.mxu0 %v24947_v62  ;;  %22247 = vmatprep.subr.bf16.mxu1 %v24948_v63  ;;  %v25009_v60 = vld [vmem:[%s32755_s10 + $0x780] ss:$12 sps:$4 sm:$0xff]   ;;  %v25014_v62 = vld [vmem:[%s32755_s10 + $0x67c] ss:$12 sps:$4 sm:$0xff]  }
 0xf10   : > { %v25017_v63 = vld [vmem:[%s32755_s10 + $0x79c] ss:$12 sps:$4 sm:$0xff]  }
 0xf12   : > { %7736 = vmatpush1.bf16.msra.mxu0 %v24945_v50  ;;  %22248 = vmatpush3.bf16.msra.mxu1 %v24949_v52  ;;  %v25012_v50 = vld [vmem:[%s32755_s10 + $0x678] ss:$12 sps:$4 sm:$0xff]  }
 0xf13   : > { %22249 = vmatprep.subr.bf16.mxu1 %v24950_v33  ;;  %7790 = vmatprep.subr.bf16.mxu0 %v32791_v37  ;;  %v25015_v52 = vld [vmem:[%s32755_s10 + $0x798] ss:$12 sps:$4 sm:$0xff]   ;;  %v25020_v33 = vld [vmem:[%s32755_s10 + $0x694] ss:$12 sps:$4 sm:$0xff]  }
 0xf15   : > { %7742 = vmatmul.mubr.bf16.vlgmr.msra.gmra.mrb[88].mxu0 %v28355_v17 }
 0xf16   : > { %22250 = vmatpush3.bf16.msra.mxu1 %v24951_v3  ;;  %7791 = vmatpush1.bf16.msra.mxu0 %v24952_v11  ;;  %v25023_v3 = vld [vmem:[%s32755_s10 + $0x7b4] ss:$12 sps:$4 sm:$0xff]   ;;  %v25018_v11 = vld [vmem:[%s32755_s10 + $0x690] ss:$12 sps:$4 sm:$0xff]  }
 0xf17   : > { %20002 = vmatprep.mubr.msk.bf16.mxu0 %vm823_vm1, %v28183_v1  ;;  %22251 = vmatprep.subr.bf16.mxu1 %v24953_v4  ;;  %v24959_v1 = vld [vmem:[%s32755_s10 + $0x1d0] ss:$12 sps:$4 sm:$0xff]   ;;  %v25024_v4 = vld [vmem:[%s32755_s10 + $0x6a8] ss:$12 sps:$4 sm:$0xff]  }
 0xf18   : > { %7792 = vmatprep.subr.bf16.mxu0 %v32791_v37 }
 0xf1a   : > { %22252 = vmatpush3.bf16.msra.mxu1 %v24954_v2  ;;  %7793 = vmatpush1.bf16.msra.mxu0 %v24955_v42  ;;  %v25026_v2 = vld [vmem:[%s32755_s10 + $0x6ac] ss:$12 sps:$4 sm:$0xff]   ;;  %v25027_v42 = vld [vmem:[%s32755_s10 + $0x7c8] ss:$12 sps:$4 sm:$0xff]  }
 0xf1b   : > { %22253 = vmatprep.subr.bf16.mxu1 %v24956_v12  ;;  %7794 = vmatprep.subr.bf16.mxu0 %v32791_v37  ;;  %v25029_v12 = vld [vmem:[%s32755_s10 + $0x7cc] ss:$12 sps:$4 sm:$0xff]  }
 0xf1e   : > { %22254 = vmatpush3.bf16.msra.mxu1 %v24957_v14  ;;  %7795 = vmatpush1.bf16.msra.mxu0 %v24958_v6  ;;  %v25032_v14 = vld [vmem:[%s32755_s10 + $0x6c4] ss:$12 sps:$4 sm:$0xff]  }
 0xf1f   : > { %20003 = vmatprep.subr.msk.bf16.mxu1 %vm6109_vm2, %v27797_v56  ;;  %7796 = vmatprep.subr.bf16.mxu0 %v32791_v37  ;;  %v25035_v6 = vld [vmem:[%s32755_s10 + $0x7e4] ss:$12 sps:$4 sm:$0xff]  }
 0xf21   : > { %7783 = vmatmul.mubr.bf16.vlgmr.msra.gmra.mrb[100].mxu1 %v28292_v36  ;;  %v24991_v36 = vld [vmem:[%s32755_s10 + $0x738] ss:$12 sps:$4 sm:$0xff]  }
 0xf22   : > { %7797 = vmatpush1.bf16.msra.mxu0 %v24959_v1  ;;  %7836 = vmatpush1.bf16.msra.mxu1 %v27800_v48  ;;  %v25030_v1 = vld [vmem:[%s32755_s10 + $0x6c0] ss:$12 sps:$4 sm:$0xff]  }
 0xf23   : > { %20005 = vmatprep.subr.msk.bf16.mxu1 %vm6109_vm2, %v27787_v20  ;;  %7798 = vmatprep.subr.bf16.mxu0 %v32791_v37 }
 0xf24   : > { %7867 = vmatprep.mubr.bf16.mxu1 %v32791_v37 }
 0xf26   : > { %7799 = vmatpush1.bf16.msra.mxu0 %v24960_v18  ;;  %v25033_v18 = vld [vmem:[%s32755_s10 + $0x7e0] ss:$12 sps:$4 sm:$0xff]  }
 0xf27   : > { %7800 = vmatprep.subr.bf16.mxu0 %v32791_v37 }
 0xf29   : > { %20004 = vmatmul.mubr.msk.bf16.vlgmr.msra.gmra.mrb[104].mxu1 %vm6105_vm5, %v7831_v58 }
 0xf2a   : > { %7877 = vmatpush1.bf16.msra.mxu1 %v27792_v32  ;;  %7801 = vmatpush1.bf16.msra.mxu0 %v24961_v59  ;;  %v25041_v59 = vld [vmem:[%s32755_s10 + $0x7fc] ss:$12 sps:$4 sm:$0xff]  }
 0xf2b   : > { %7802 = vmatprep.subr.bf16.mxu0 %v32791_v37  ;;  %7908 = vmatprep.mubr.bf16.mxu1 %v32791_v37 }
 0xf2c   : > { %8525 = vmatprep.subr.bf16.mxu1 %v24972_v10 }
 0xf2e   : > { %7803 = vmatpush1.bf16.msra.mxu0 %v24962_v61 }
 0xf2f   : > { %7804 = vmatprep.subr.bf16.mxu0 %v32791_v37 }
 0xf31   : > { %20006 = vmatmul.mubr.msk.bf16.vlgmr.msra.gmra.mrb[108].mxu1 %vm6105_vm5, %v7831_v58  ;;  %v25038_v58 = vld [vmem:[%s32755_s10 + $0x6dc] ss:$12 sps:$4 sm:$0xff]  }
 0xf32   : > { %7805 = vmatpush1.bf16.msra.mxu0 %v24963_v44  ;;  %8526 = vmatpush1.bf16.msra.mxu1 %v24970_v5  ;;  %v25036_v44 = vld [vmem:[%s32755_s10 + $0x6d8] ss:$12 sps:$4 sm:$0xff]  }
 0xf33   : > { %7806 = vmatprep.subr.bf16.mxu0 %v32791_v37  ;;  %8527 = vmatprep.subr.bf16.mxu1 %v24975_v9 }
 0xf36   : > { %7807 = vmatpush1.bf16.msra.mxu0 %v24964_v31  ;;  %8528 = vmatpush1.bf16.msra.mxu1 %v24973_v22  ;;  %v25039_v31 = vld [vmem:[%s32755_s10 + $0x7f8] ss:$12 sps:$4 sm:$0xff]   ;;  %v25044_v22 = vld [vmem:[%s32755_s10 + $0x6f4] ss:$12 sps:$4 sm:$0xff]  }
 0xf37   : > { %7808 = vmatprep.subr.bf16.mxu0 %v32791_v37  ;;  %8529 = vmatprep.subr.bf16.mxu1 %v24978_v41 }
 0xf3a   : > { %7809 = vmatpush1.bf16.msra.mxu0 %v24965_v19  ;;  %8530 = vmatpush1.bf16.msra.mxu1 %v24976_v34  ;;  %v25042_v19 = vld [vmem:[%s32755_s10 + $0x6f0] ss:$12 sps:$4 sm:$0xff]   ;;  %v25047_v34 = vld [vmem:[%s32755_s10 + $0x814] ss:$12 sps:$4 sm:$0xff]  }
 0xf3b   : > { %7810 = vmatprep.subr.bf16.mxu0 %v32791_v37  ;;  %8531 = vmatprep.subr.bf16.mxu1 %v24981_v38 }
 0xf3e   : > { %7811 = vmatpush1.bf16.msra.mxu0 %v24966_v24  ;;  %8532 = vmatpush1.bf16.msra.mxu1 %v24979_v39  ;;  %v25045_v24 = vld [vmem:[%s32755_s10 + $0x810] ss:$12 sps:$4 sm:$0xff]  }
 0xf3f   : > { %7812 = vmatprep.subr.bf16.mxu0 %v32791_v37  ;;  %8533 = vmatprep.subr.bf16.mxu1 %v24984_v46 }
 0xf42   : > { %7813 = vmatpush1.bf16.msra.mxu0 %v24967_v43  ;;  %8534 = vmatpush1.bf16.msra.mxu1 %v24982_v54  ;;  %v25050_v54 = vld [vmem:[%s32755_s10 + $0x70c] ss:$12 sps:$4 sm:$0xff]  }
 0xf43   : > { %7814 = vmatprep.subr.bf16.mxu0 %v32791_v37  ;;  %8535 = vmatprep.subr.bf16.mxu1 %v24990_v8  ;;  %v25056_v8 = vld [vmem:[%s32755_s10 + $0x844] ss:$12 sps:$4 sm:$0xff]  }
 0xf46   : > { %7815 = vmatpush1.bf16.msra.mxu0 %v24968_v47  ;;  %8536 = vmatpush1.bf16.msra.mxu1 %v24988_v16  ;;  %v25054_v16 = vld [vmem:[%s32755_s10 + $0x840] ss:$12 sps:$4 sm:$0xff]  }
 0xf47   : > { %7816 = vmatprep.subr.bf16.mxu0 %v32791_v37  ;;  %8537 = vmatprep.subr.bf16.mxu1 %v24996_v28 }
 0xf4a   : > { %7817 = vmatpush1.bf16.msra.mxu0 %v24969_v15  ;;  %8538 = vmatpush1.bf16.msra.mxu1 %v24994_v21  ;;  %v25053_v15 = vld [vmem:[%s32755_s10 + $0x82c] ss:$12 sps:$4 sm:$0xff]  }
 0xf4b   : > { %8566 = vmatprep.subr.bf16.mxu0 %v24987_v26  ;;  %8539 = vmatprep.subr.bf16.mxu1 %v25002_v45  ;;  %v25048_v26 = vld [vmem:[%s32755_s10 + $0x708] ss:$12 sps:$4 sm:$0xff]   ;;  %v25059_v21 = vld [vmem:[%s32755_s10 + $0x858] ss:$12 sps:$4 sm:$0xff]  }
 0xf4d   : > { %7823 = vmatmul.mubr.bf16.vlgmr.msra.gmra.mrb[92].mxu0 %v28355_v17  ;;  %v25021_v17 = vld [vmem:[%s32755_s10 + $0x7b0] ss:$12 sps:$4 sm:$0xff]  }
 0xf4e   : > { %8567 = vmatpush1.bf16.msra.mxu0 %v24985_v40  ;;  %8540 = vmatpush1.bf16.msra.mxu1 %v25000_v51  ;;  %v25051_v40 = vld [vmem:[%s32755_s10 + $0x828] ss:$12 sps:$4 sm:$0xff]  }
 0xf4f   : > { %8568 = vmatprep.subr.bf16.mxu0 %v24993_v13  ;;  %8541 = vmatprep.subr.bf16.mxu1 %v25008_v55  ;;  %v25057_v13 = vld [vmem:[%s32755_s10 + $0x668] ss:$12 sps:$4 sm:$0xff]  }
 0xf52   : > { %8569 = vmatpush1.bf16.msra.mxu0 %v24991_v36  ;;  %8542 = vmatpush1.bf16.msra.mxu1 %v25006_v57  ;;  %v25061_v36 = vld [vmem:[%s32755_s10 + $0x85c] ss:$12 sps:$4 sm:$0xff]  }
 0xf53   : > { %8570 = vmatprep.subr.bf16.mxu0 %v24999_v23  ;;  %8543 = vmatprep.subr.bf16.mxu1 %v25014_v62 }
 0xf56   : > { %8571 = vmatpush1.bf16.msra.mxu0 %v24997_v35  ;;  %8544 = vmatpush1.bf16.msra.mxu1 %v25012_v50 }
 0xf57   : > { %8572 = vmatprep.subr.bf16.mxu0 %v25005_v49  ;;  %8545 = vmatprep.subr.bf16.mxu1 %v25020_v33 }
 0xf5a   : > { %8573 = vmatpush1.bf16.msra.mxu0 %v25003_v53  ;;  %8546 = vmatpush1.bf16.msra.mxu1 %v25018_v11 }
 0xf5b   : > { %8574 = vmatprep.subr.bf16.mxu0 %v25011_v25  ;;  %8547 = vmatprep.subr.bf16.mxu1 %v25026_v2 }
 0xf5e   : > { %8575 = vmatpush1.bf16.msra.mxu0 %v25009_v60  ;;  %8548 = vmatpush1.bf16.msra.mxu1 %v25024_v4 }
 0xf5f   : > { %8576 = vmatprep.subr.bf16.mxu0 %v25017_v63  ;;  %8549 = vmatprep.subr.bf16.mxu1 %v25032_v14 }
 0xf62   : > { %8577 = vmatpush1.bf16.msra.mxu0 %v25015_v52  ;;  %8550 = vmatpush1.bf16.msra.mxu1 %v25030_v1 }
 0xf63   : > { %8578 = vmatprep.subr.bf16.mxu0 %v25023_v3  ;;  %8551 = vmatprep.subr.bf16.mxu1 %v25038_v58 }
 0xf66   : > { %8579 = vmatpush1.bf16.msra.mxu0 %v25021_v17  ;;  %8552 = vmatpush1.bf16.msra.mxu1 %v25036_v44 }
 0xf67   : > { %8580 = vmatprep.subr.bf16.mxu0 %v25029_v12  ;;  %8553 = vmatprep.subr.bf16.mxu1 %v25044_v22  ;;  %v25063_v22 = vld [vmem:[%s32755_s10 + $0x5c0] ss:$12 sps:$4 sm:$0xff]  }
 0xf6a   : > { %8581 = vmatpush1.bf16.msra.mxu0 %v25027_v42  ;;  %8554 = vmatpush1.bf16.msra.mxu1 %v25042_v19  ;;  %v25062_v19 = vld [vmem:[%s32755_s10 + $0x680] ss:$12 sps:$4 sm:$0xff]  }
 0xf6b   : > { %8582 = vmatprep.subr.bf16.mxu0 %v25035_v6  ;;  %8555 = vmatprep.subr.bf16.mxu1 %v25050_v54  ;;  %v25067_v54 = vld [vmem:[%s32755_s10 + $0x6b0] ss:$12 sps:$4 sm:$0xff]  }
 0xf6e   : > { %8583 = vmatpush1.bf16.msra.mxu0 %v25033_v18  ;;  %8556 = vmatpush1.bf16.msra.mxu1 %v25048_v26  ;;  %v25068_v26 = vld [vmem:[%s32755_s10 + $0x5f0] ss:$12 sps:$4 sm:$0xff]  }
 0xf6f   : > { %8584 = vmatprep.subr.bf16.mxu0 %v25041_v59  ;;  %22261 = vmatprep.subr.bf16.mxu1 %v25057_v13  ;;  %v25071_v13 = vld [vmem:[%s32755_s10 + $0x608] ss:$12 sps:$4 sm:$0xff]  }
 0xf72   : > { %8585 = vmatpush1.bf16.msra.mxu0 %v25039_v31 }
 0xf73   : > { %8586 = vmatprep.subr.bf16.mxu0 %v25047_v34 }
 0xf74   : > { %v7098_v61 = vpop.f32.mrb[88].mxu1 }
 0xf75   : > { %v7100_v5 = vpop.f32.mrb[89].mxu1 }
 0xf76   : > { %v7102_v10 = vpop.f32.mrb[90].mxu1  ;;  %8587 = vmatpush1.bf16.msra.mxu0 %v25045_v24 }
 0xf77   : > { %v7103_v9 = vpop.f32.mrb[91].mxu1  ;;  %8588 = vmatprep.subr.bf16.mxu0 %v25053_v15 }
 0xf78   : > { %v7057_v41 = vpop.f32.mrb[80].mxu0 }
 0xf79   : > { %v7099_v38 = vadd.f32 %v7098_v61, %v7057_v41  ;;  %v7059_v43 = vpop.f32.mrb[81].mxu0  ;;  %v25064_v41 = vld [vmem:[%s32755_s10 + $0x698] ss:$12 sps:$4 sm:$0xff]  }
 0xf7a   : > { %v7101_v39 = vadd.f32 %v7100_v5, %v7059_v43  ;;  %v7061_v46 = vpop.f32.mrb[82].mxu0  ;;  %8589 = vmatpush1.bf16.msra.mxu0 %v25051_v40  ;;  %v25058_v5 = vld [vmem:[%s32755_s10 + $0x5a8] ss:$12 sps:$4 sm:$0xff]   ;;  %v25069_v40 = vld [vmem:[%s32755_s10 + $0x740] ss:$12 sps:$4 sm:$0xff]  }
 0xf7b   : > { %v7062_v47 = vpop.f32.mrb[83].mxu0  ;;  %8590 = vmatprep.subr.bf16.mxu0 %v25056_v8  ;;  %v25066_v46 = vld [vmem:[%s32755_s10 + $0x728] ss:$12 sps:$4 sm:$0xff]  }
 0xf7c   : > { %v25070_v8 = vld [vmem:[%s32755_s10 + $0x6c8] ss:$12 sps:$4 sm:$0xff]  }
 0xf7e   : > { %8591 = vmatpush1.bf16.msra.mxu0 %v25054_v16  ;;  %v25072_v16 = vld [vmem:[%s32755_s10 + $0x758] ss:$12 sps:$4 sm:$0xff]  }
 0xf7f   : > { %8592 = vmatprep.subr.bf16.mxu0 %v25061_v36  ;;  %v25073_v36 = vld [vmem:[%s32755_s10 + $0x6e0] ss:$12 sps:$4 sm:$0xff]  }
 0xf82   : > { %8593 = vmatpush1.bf16.msra.mxu0 %v25059_v21  ;;  %v25074_v21 = vld [vmem:[%s32755_s10 + $0x620] ss:$12 sps:$4 sm:$0xff]  }
 0xf83   : > { %8647 = vmatprep.subr.bf16.mxu0 %v32791_v37 }
 0xf94   : > { %v22233_v28 = vpop.f32.mrb[92].mxu1 }
 0xf95   : > { %v22234_v35 = vpop.f32.mrb[93].mxu1 }
 0xf96   : > { %v22235_v23 = vadd.f32 %v22234_v35, %v22233_v28  ;;  %v22236_v45 = vpop.f32.mrb[94].mxu1  ;;  %v25075_v28 = vld [vmem:[%s32755_s10 + $0x770] ss:$12 sps:$4 sm:$0xff]   ;;  %v25076_v35 = vld [vmem:[%s32755_s10 + $0x6f8] ss:$12 sps:$4 sm:$0xff]  }
 0xf97   : > { %v22237_v49 = vpop.f32.mrb[95].mxu1  ;;  %v25078_v45 = vld [vmem:[%s32755_s10 + $0x788] ss:$12 sps:$4 sm:$0xff]  }
 0xf98   : > { %v25079_v49 = vld [vmem:[%s32755_s10 + $0x710] ss:$12 sps:$4 sm:$0xff]  }
 0xfb0   : > { %v7179_v51 = vpop.f32.mrb[84].mxu0 }
 0xfb1   : > { %v7180_v53 = vadd.f32 %v22235_v23, %v7179_v51  ;;  %v7181_v55 = vpop.f32.mrb[85].mxu0  ;;  %v25077_v23 = vld [vmem:[%s32755_s10 + $0x638] ss:$12 sps:$4 sm:$0xff]   ;;  %v25080_v51 = vld [vmem:[%s32755_s10 + $0x650] ss:$12 sps:$4 sm:$0xff]  }
 0xfb2   : > { %v7182_v25 = vpop.f32.mrb[86].mxu0  ;;  %v25082_v55 = vld [vmem:[%s32755_s10 + $0x7b8] ss:$12 sps:$4 sm:$0xff]  }
 0xfb3   : > { %v7183_v57 = vpop.f32.mrb[87].mxu0 }
 0xfd4   : > { %v7702_v60 = vpop.f32.mrb[96].mxu1 }
 0xfd5   : > { %v7703_v62 = vadd.f32 %v7702_v60, %v7099_v38  ;;  %v7704_v63 = vpop.f32.mrb[97].mxu1 }
 0xfd6   : > { %v7705_v50 = vadd.f32 %v7704_v63, %v7101_v39  ;;  %v7706_v52 = vpop.f32.mrb[98].mxu1  ;;  %v25065_v39 = vld [vmem:[%s32755_s10 + $0x5d8] ss:$12 sps:$4 sm:$0xff]   ;;  %v25083_v63 = vld [vmem:[%s32755_s10 + $0x7d0] ss:$12 sps:$4 sm:$0xff]  }
 0xfd7   : > { %v7707_v33 = vpop.f32.mrb[99].mxu1  ;;  %v25084_v52 = vld [vmem:[%s32755_s10 + $0x7e8] ss:$12 sps:$4 sm:$0xff]  }
 0xfd8   : > { %v25086_v33 = vld [vmem:[%s32755_s10 + $0x818] ss:$12 sps:$4 sm:$0xff]  }
 0xfe8   : > { %v7743_v3 = vpop.f32.mrb[88].mxu0 }
 0xfe9   : > { %v28621_v11 = vadd.f32 %v7743_v3, %v7703_v62  ;;  %v7745_v17 = vpop.f32.mrb[89].mxu0  ;;  %v25090_v3 = vld [vmem:[%s32755_s10 + $0x870] ss:$12 sps:$4 sm:$0xff]  }
 0xfea   : > { %v28623_v4 = vadd.f32 %v7745_v17, %v7705_v50  ;;  %v7747_v2 = vpop.f32.mrb[90].mxu0  ;;  %v8691_v50 = vld [vmem:[#allocation14 + $0x6] sm:$0x3]  ;;  %v25087_v17 = vld [vmem:[%s32755_s10 + $0x830] ss:$12 sps:$4 sm:$0xff]  }
 0xfeb   : > { %v7748_v42 = vpop.f32.mrb[91].mxu0  ;;  %v25093_v2 = vld [vmem:[%s32755_s10 + $0x888] ss:$12 sps:$4 sm:$0xff]  }
 0xfec   : > { %v25098_v42 = vld [vmem:[%s32755_s10 + $0x8a4] ss:$12 sps:$4 sm:$0xff]  }
 0xff4   : > { %v22255_v12 = vpop.f32.mrb[100].mxu1 }
 0xff5   : > { %v22256_v14 = vpop.f32.mrb[101].mxu1 }
 0xff6   : > { %v22257_v6 = vadd.f32 %v22256_v14, %v22255_v12  ;;  %v22258_v1 = vpop.f32.mrb[102].mxu1  ;;  %v25088_v12 = vld [vmem:[%s32755_s10 + $0x848] ss:$12 sps:$4 sm:$0xff]   ;;  %v25096_v14 = vld [vmem:[%s32755_s10 + $0x8a0] ss:$12 sps:$4 sm:$0xff]  }
 0xff7   : > { %v22259_v18 = vpop.f32.mrb[103].mxu1  ;;  %v25089_v1 = vld [vmem:[%s32755_s10 + $0x860] ss:$12 sps:$4 sm:$0xff]  }
 0xff8   : > { %v28625_v58 = vadd.f32 %v22257_v6, %v7180_v53  ;;  %v25081_v53 = vld [vmem:[%s32755_s10 + $0x7a0] ss:$12 sps:$4 sm:$0xff]   ;;  %v25101_v6 = vld [vmem:[%s32755_s10 + $0x8bc] ss:$12 sps:$4 sm:$0xff]   ;;  %v25099_v18 = vld [vmem:[%s32755_s10 + $0x8b8] ss:$12 sps:$4 sm:$0xff]  }
 0xffc   : > { %v7869_v59 = vpop.f32.mrb[104].mxu1 }
 0xffd   : > { %v7871_v61 = vpop.f32.mrb[105].mxu1  ;;  %v28630_v10 = vpack.c.bf16 %v7869_v59, %v7869_v59  ;;  %v25107_v59 = vld [vmem:[%s32755_s10 + $0x9f4] ss:$12 sps:$4 sm:$0xff]  }
 0xffe   : > { %v7918_v44 = vpack.c.bf16 %v7871_v61, %v7871_v61  ;;  %v7873_v31 = vpop.f32.mrb[106].mxu1  ;;  %v25102_v61 = vld [vmem:[%s32755_s10 + $0x8d0] ss:$12 sps:$4 sm:$0xff]  }
 0xfff   : > { %v7874_v9 = vpop.f32.mrb[107].mxu1  ;;  %v25110_v31 = vld [vmem:[%s32755_s10 + $0x8ec] ss:$12 sps:$4 sm:$0xff]  }
0x1000   : > { %8557 = vmatprep.mubr.bf16.mxu1 %v7918_v44  ;;  %v25111_v9 = vld [vmem:[%s32755_s10 + $0xa08] ss:$12 sps:$4 sm:$0xff]  }
0x1001   : > { %8558 = vmatmul.mubr.bf16.vlgmr.msra.gmra.mrb[112].mxu1 %v28630_v10 }
0x1002   : > { %22262 = vmatpush3.bf16.msra.mxu1 %v25058_v5  ;;  %8639 = vmatprep.mubr.bf16.mxu1 %v7918_v44  ;;  %v25105_v44 = vld [vmem:[%s32755_s10 + $0x9f0] ss:$12 sps:$4 sm:$0xff]   ;;  %v25113_v5 = vld [vmem:[%s32755_s10 + $0xa0c] ss:$12 sps:$4 sm:$0xff]  }
0x1003   : > { %22263 = vmatprep.subr.bf16.mxu1 %v25062_v19  ;;  %v25114_v19 = vld [vmem:[%s32755_s10 + $0x900] ss:$12 sps:$4 sm:$0xff]  }
0x1004   : > { %v7910_v24 = vpop.f32.mrb[108].mxu1 }
0x1005   : > { %v28642_v34 = vpack.c.bf16 %v7910_v24, %v7910_v24  ;;  %v7912_v38 = vpop.f32.mrb[109].mxu1  ;;  %v25119_v24 = vld [vmem:[%s32755_s10 + $0xa24] ss:$12 sps:$4 sm:$0xff]  }
0x1006   : > { %v7920_v43 = vpack.c.bf16 %v7912_v38, %v7912_v38  ;;  %22264 = vmatpush3.bf16.msra.mxu1 %v25063_v22  ;;  %v7914_v47 = vpop.f32.mrb[110].mxu1  ;;  %v25116_v22 = vld [vmem:[%s32755_s10 + $0x904] ss:$12 sps:$4 sm:$0xff]   ;;  %v25125_v38 = vld [vmem:[%s32755_s10 + $0xa3c] ss:$12 sps:$4 sm:$0xff]  }
0x1007   : > { %22265 = vmatprep.subr.bf16.mxu1 %v25064_v41  ;;  %v7915_v15 = vpop.f32.mrb[111].mxu1  ;;  %v25117_v41 = vld [vmem:[%s32755_s10 + $0xa20] ss:$12 sps:$4 sm:$0xff]  }
0x1008   : > { %20217 = vmatprep.mubr.msk.bf16.mxu0 %vm823_vm1, %v7920_v43  ;;  %v25131_v47 = vld [vmem:[%s32755_s10 + $0xa54] ss:$12 sps:$4 sm:$0xff]   ;;  %v25129_v15 = vld [vmem:[%s32755_s10 + $0xa50] ss:$12 sps:$4 sm:$0xff]  }
0x1009   : > { %8599 = vmatmul.mubr.bf16.vlgmr.msra.gmra.mrb[96].mxu0 %v28642_v34 }
0x100a   : > { %22266 = vmatpush3.bf16.msra.mxu1 %v25065_v39  ;;  %8648 = vmatpush1.bf16.msra.mxu0 %v25066_v46  ;;  %v25123_v39 = vld [vmem:[%s32755_s10 + $0xa38] ss:$12 sps:$4 sm:$0xff]   ;;  %v25128_v46 = vld [vmem:[%s32755_s10 + $0x934] ss:$12 sps:$4 sm:$0xff]  }
0x100b   : > { %22267 = vmatprep.subr.bf16.mxu1 %v25067_v54  ;;  %8649 = vmatprep.subr.bf16.mxu0 %v32791_v37  ;;  %v25126_v54 = vld [vmem:[%s32755_s10 + $0x930] ss:$12 sps:$4 sm:$0xff]  }
0x100c   : > { %20218 = vmatprep.mubr.msk.bf16.mxu0 %vm823_vm1, %v7920_v43  ;;  %v25120_v43 = vld [vmem:[%s32755_s10 + $0x918] ss:$12 sps:$4 sm:$0xff]  }
0x100e   : > { %22268 = vmatpush3.bf16.msra.mxu1 %v25068_v26  ;;  %8650 = vmatpush1.bf16.msra.mxu0 %v25069_v40  ;;  %v25134_v26 = vld [vmem:[%s32755_s10 + $0x94c] ss:$12 sps:$4 sm:$0xff]  }
0x100f   : > { %22269 = vmatprep.subr.bf16.mxu1 %v25070_v8  ;;  %8651 = vmatprep.subr.bf16.mxu0 %v32791_v37  ;;  %v25137_v40 = vld [vmem:[%s32755_s10 + $0xa6c] ss:$12 sps:$4 sm:$0xff]   ;;  %v25132_v8 = vld [vmem:[%s32755_s10 + $0x948] ss:$12 sps:$4 sm:$0xff]  }
0x1012   : > { %22270 = vmatpush3.bf16.msra.mxu1 %v25071_v13  ;;  %8652 = vmatpush1.bf16.msra.mxu0 %v25072_v16  ;;  %v25135_v13 = vld [vmem:[%s32755_s10 + $0xa68] ss:$12 sps:$4 sm:$0xff]   ;;  %v25140_v16 = vld [vmem:[%s32755_s10 + $0x964] ss:$12 sps:$4 sm:$0xff]  }
0x1013   : > { %22271 = vmatprep.subr.bf16.mxu1 %v25073_v36  ;;  %8653 = vmatprep.subr.bf16.mxu0 %v32791_v37  ;;  %v25143_v36 = vld [vmem:[%s32755_s10 + $0xa84] ss:$12 sps:$4 sm:$0xff]  }
0x1016   : > { %22272 = vmatpush3.bf16.msra.mxu1 %v25074_v21  ;;  %8654 = vmatpush1.bf16.msra.mxu0 %v25075_v28  ;;  %v25138_v21 = vld [vmem:[%s32755_s10 + $0x960] ss:$12 sps:$4 sm:$0xff]  }
0x1017   : > { %22273 = vmatprep.subr.bf16.mxu1 %v25076_v35  ;;  %8655 = vmatprep.subr.bf16.mxu0 %v32791_v37  ;;  %v25141_v28 = vld [vmem:[%s32755_s10 + $0xa80] ss:$12 sps:$4 sm:$0xff]   ;;  %v25146_v35 = vld [vmem:[%s32755_s10 + $0x97c] ss:$12 sps:$4 sm:$0xff]  }
0x101a   : > { %22274 = vmatpush3.bf16.msra.mxu1 %v25077_v23  ;;  %8656 = vmatpush1.bf16.msra.mxu0 %v25078_v45  ;;  %v25149_v23 = vld [vmem:[%s32755_s10 + $0xa9c] ss:$12 sps:$4 sm:$0xff]   ;;  %v25144_v45 = vld [vmem:[%s32755_s10 + $0x978] ss:$12 sps:$4 sm:$0xff]  }
0x101b   : > { %22275 = vmatprep.subr.bf16.mxu1 %v25079_v49  ;;  %8657 = vmatprep.subr.bf16.mxu0 %v32791_v37  ;;  %v25147_v49 = vld [vmem:[%s32755_s10 + $0xa98] ss:$12 sps:$4 sm:$0xff]  }
0x101e   : > { %22276 = vmatpush3.bf16.msra.mxu1 %v25080_v51  ;;  %8658 = vmatpush1.bf16.msra.mxu0 %v25081_v53  ;;  %v25152_v51 = vld [vmem:[%s32755_s10 + $0x994] ss:$12 sps:$4 sm:$0xff]  }
0x101f   : > { %20219 = vmatprep.subr.msk.bf16.mxu1 %vm6109_vm2, %v27797_v56  ;;  %8659 = vmatprep.subr.bf16.mxu0 %v32791_v37  ;;  %v25155_v53 = vld [vmem:[%s32755_s10 + $0xab4] ss:$12 sps:$4 sm:$0xff]  }
0x1020   : > { %v7824_v25 = vpop.f32.mrb[92].mxu0 }
0x1021   : > { %v28710_v57 = vadd.f32 %v7824_v25, %v28625_v58  ;;  %8640 = vmatmul.mubr.bf16.vlgmr.msra.gmra.mrb[116].mxu1 %v28630_v10  ;;  %v7826_v60 = vpop.f32.mrb[93].mxu0  ;;  %v25104_v58 = vld [vmem:[%s32755_s10 + $0x8d4] ss:$12 sps:$4 sm:$0xff]   ;;  %v25153_v25 = vld [vmem:[%s32755_s10 + $0xab0] ss:$12 sps:$4 sm:$0xff]  }
0x1022   : > { %8660 = vmatpush1.bf16.msra.mxu0 %v25082_v55  ;;  %8696 = vmatpush1.bf16.msra.mxu1 %v27800_v48  ;;  %v7827_v62 = vpop.f32.mrb[94].mxu0  ;;  %v25092_v48 = vld [vmem:[%s32755_s10 + $0x874] ss:$12 sps:$4 sm:$0xff]   ;;  %v25150_v55 = vld [vmem:[%s32755_s10 + $0x990] ss:$12 sps:$4 sm:$0xff]  }
0x1023   : > { %20221 = vmatprep.subr.msk.bf16.mxu1 %vm6109_vm2, %v27787_v20  ;;  %v7828_v56 = vpop.f32.mrb[95].mxu0  ;;  %8661 = vmatprep.subr.bf16.mxu0 %v32791_v37  ;;  %v25085_v20 = vld [vmem:[%s32755_s10 + $0x800] ss:$12 sps:$4 sm:$0xff]   ;;  %v25108_v10 = vld [vmem:[%s32755_s10 + $0x8e8] ss:$12 sps:$4 sm:$0xff]  }
0x1024   : > { %8727 = vmatprep.mubr.bf16.mxu1 %v32791_v37  ;;  %v25158_v60 = vld [vmem:[%s32755_s10 + $0x9ac] ss:$12 sps:$4 sm:$0xff]   ;;  %v25159_v56 = vld [vmem:[%s32755_s10 + $0xac8] ss:$12 sps:$4 sm:$0xff]  }
0x1025   : > { %v25161_v62 = vld [vmem:[%s32755_s10 + $0xacc] ss:$12 sps:$4 sm:$0xff]  }
0x1026   : > { %8662 = vmatpush1.bf16.msra.mxu0 %v25083_v63  ;;  %v25156_v63 = vld [vmem:[%s32755_s10 + $0x9a8] ss:$12 sps:$4 sm:$0xff]  }
0x1027   : > { %8663 = vmatprep.subr.bf16.mxu0 %v32791_v37 }
0x1029   : > { %20220 = vmatmul.mubr.msk.bf16.vlgmr.msra.gmra.mrb[120].mxu1 %vm6105_vm5, %v8691_v50 }
0x102a   : > { %8737 = vmatpush1.bf16.msra.mxu1 %v27792_v32  ;;  %8664 = vmatpush1.bf16.msra.mxu0 %v25084_v52  ;;  %v25095_v32 = vld [vmem:[%s32755_s10 + $0x88c] ss:$12 sps:$4 sm:$0xff]   ;;  %v25164_v52 = vld [vmem:[%s32755_s10 + $0x9c4] ss:$12 sps:$4 sm:$0xff]  }
0x102b   : > { %8665 = vmatprep.subr.bf16.mxu0 %v32791_v37  ;;  %8768 = vmatprep.mubr.bf16.mxu1 %v32791_v37 }
0x102c   : > { %9385 = vmatprep.subr.bf16.mxu1 %v25092_v48  ;;  %v25165_v48 = vld [vmem:[%s32755_s10 + $0xae0] ss:$12 sps:$4 sm:$0xff]  }
0x102e   : > { %8666 = vmatpush1.bf16.msra.mxu0 %v25085_v20  ;;  %v25167_v20 = vld [vmem:[%s32755_s10 + $0xae4] ss:$12 sps:$4 sm:$0xff]  }
0x102f   : > { %8667 = vmatprep.subr.bf16.mxu0 %v32791_v37 }
0x1031   : > { %20222 = vmatmul.mubr.msk.bf16.vlgmr.msra.gmra.mrb[124].mxu1 %vm6105_vm5, %v8691_v50  ;;  %v25162_v50 = vld [vmem:[%s32755_s10 + $0x9c0] ss:$12 sps:$4 sm:$0xff]   ;;  %vm18964_vm5 = vcmask 9216  }
0x1032   : > { %8668 = vmatpush1.bf16.msra.mxu0 %v25086_v33  ;;  %9386 = vmatpush1.bf16.msra.mxu1 %v25090_v3  ;;  %v25170_v33 = vld [vmem:[%s32755_s10 + $0x9dc] ss:$12 sps:$4 sm:$0xff]  }
0x1033   : > { %8669 = vmatprep.subr.bf16.mxu0 %v32791_v37  ;;  %9387 = vmatprep.subr.bf16.mxu1 %v25095_v32  ;;  %v25173_v3 = vld [vmem:[%s32755_s10 + $0xafc] ss:$12 sps:$4 sm:$0xff]   ;;  %v25168_v32 = vld [vmem:[%s32755_s10 + $0x9d8] ss:$12 sps:$4 sm:$0xff]  }
0x1036   : > { %8670 = vmatpush1.bf16.msra.mxu0 %v25087_v17  ;;  %9388 = vmatpush1.bf16.msra.mxu1 %v25093_v2  ;;  %v25171_v17 = vld [vmem:[%s32755_s10 + $0xaf8] ss:$12 sps:$4 sm:$0xff]   ;;  %v25176_v2 = vld [vmem:[%s32755_s10 + $0xb14] ss:$12 sps:$4 sm:$0xff]  }
0x1037   : > { %8671 = vmatprep.subr.bf16.mxu0 %v32791_v37  ;;  %9389 = vmatprep.subr.bf16.mxu1 %v25098_v42  ;;  %v25177_v42 = vld [vmem:[%s32755_s10 + $0x938] ss:$12 sps:$4 sm:$0xff]  }
0x103a   : > { %8672 = vmatpush1.bf16.msra.mxu0 %v25088_v12  ;;  %9390 = vmatpush1.bf16.msra.mxu1 %v25096_v14  ;;  %v25174_v12 = vld [vmem:[%s32755_s10 + $0xb10] ss:$12 sps:$4 sm:$0xff]   ;;  %v25181_v14 = vld [vmem:[%s32755_s10 + $0xb2c] ss:$12 sps:$4 sm:$0xff]  }
0x103b   : > { %8673 = vmatprep.subr.bf16.mxu0 %v32791_v37  ;;  %9391 = vmatprep.subr.bf16.mxu1 %v25101_v6  ;;  %v25179_v6 = vld [vmem:[%s32755_s10 + $0xb28] ss:$12 sps:$4 sm:$0xff]  }
0x103e   : > { %8674 = vmatpush1.bf16.msra.mxu0 %v25089_v1  ;;  %9392 = vmatpush1.bf16.msra.mxu1 %v25099_v18 }
0x103f   : > { %9393 = vmatprep.subr.bf16.mxu1 %v25104_v58  ;;  %9426 = vmatprep.subr.bf16.mxu0 %v25107_v59 }
0x1041   : > { %8680 = vmatmul.mubr.bf16.vlgmr.msra.gmra.mrb[100].mxu0 %v28642_v34  ;;  %v25122_v34 = vld [vmem:[%s32755_s10 + $0x91c] ss:$12 sps:$4 sm:$0xff]  }
0x1042   : > { %9394 = vmatpush1.bf16.msra.mxu1 %v25102_v61  ;;  %9427 = vmatpush1.bf16.msra.mxu0 %v25105_v44 }
0x1043   : > { %9395 = vmatprep.subr.bf16.mxu1 %v25110_v31  ;;  %9428 = vmatprep.subr.bf16.mxu0 %v25113_v5 }
0x1046   : > { %9396 = vmatpush1.bf16.msra.mxu1 %v25108_v10  ;;  %9429 = vmatpush1.bf16.msra.mxu0 %v25111_v9 }
0x1047   : > { %9397 = vmatprep.subr.bf16.mxu1 %v25116_v22  ;;  %9430 = vmatprep.subr.bf16.mxu0 %v25119_v24 }
0x104a   : > { %9398 = vmatpush1.bf16.msra.mxu1 %v25114_v19  ;;  %9431 = vmatpush1.bf16.msra.mxu0 %v25117_v41 }
0x104b   : > { %9399 = vmatprep.subr.bf16.mxu1 %v25122_v34  ;;  %9432 = vmatprep.subr.bf16.mxu0 %v25125_v38 }
0x104e   : > { %9400 = vmatpush1.bf16.msra.mxu1 %v25120_v43  ;;  %9433 = vmatpush1.bf16.msra.mxu0 %v25123_v39 }
0x104f   : > { %9401 = vmatprep.subr.bf16.mxu1 %v25128_v46  ;;  %9434 = vmatprep.subr.bf16.mxu0 %v25131_v47 }
0x1052   : > { %9402 = vmatpush1.bf16.msra.mxu1 %v25126_v54  ;;  %9435 = vmatpush1.bf16.msra.mxu0 %v25129_v15  ;;  %v25178_v15 = vld [vmem:[%s32755_s10 + $0x878] ss:$12 sps:$4 sm:$0xff]  }
0x1053   : > { %9403 = vmatprep.subr.bf16.mxu1 %v25134_v26  ;;  %9436 = vmatprep.subr.bf16.mxu0 %v25137_v40  ;;  %v25183_v40 = vld [vmem:[%s32755_s10 + $0x890] ss:$12 sps:$4 sm:$0xff]  }
0x1056   : > { %9404 = vmatpush1.bf16.msra.mxu1 %v25132_v8  ;;  %9437 = vmatpush1.bf16.msra.mxu0 %v25135_v13  ;;  %v25184_v8 = vld [vmem:[%s32755_s10 + $0x968] ss:$12 sps:$4 sm:$0xff]  }
0x1057   : > { %9405 = vmatprep.subr.bf16.mxu1 %v25140_v16  ;;  %9438 = vmatprep.subr.bf16.mxu0 %v25143_v36 }
0x105a   : > { %9406 = vmatpush1.bf16.msra.mxu1 %v25138_v21  ;;  %9439 = vmatpush1.bf16.msra.mxu0 %v25141_v28  ;;  %v25185_v28 = vld [vmem:[%s32755_s10 + $0x8a8] ss:$12 sps:$4 sm:$0xff]  }
0x105b   : > { %9407 = vmatprep.subr.bf16.mxu1 %v25146_v35  ;;  %9440 = vmatprep.subr.bf16.mxu0 %v25149_v23  ;;  %v25186_v35 = vld [vmem:[%s32755_s10 + $0x9f8] ss:$12 sps:$4 sm:$0xff]  }
0x105e   : > { %9408 = vmatpush1.bf16.msra.mxu1 %v25144_v45  ;;  %9441 = vmatpush1.bf16.msra.mxu0 %v25147_v49  ;;  %v25187_v49 = vld [vmem:[%s32755_s10 + $0x980] ss:$12 sps:$4 sm:$0xff]  }
0x105f   : > { %9409 = vmatprep.subr.bf16.mxu1 %v25152_v51  ;;  %9442 = vmatprep.subr.bf16.mxu0 %v25155_v53  ;;  %v25188_v51 = vld [vmem:[%s32755_s10 + $0x8c0] ss:$12 sps:$4 sm:$0xff]   ;;  %v25189_v53 = vld [vmem:[%s32755_s10 + $0xa10] ss:$12 sps:$4 sm:$0xff]  }
0x1062   : > { %9410 = vmatpush1.bf16.msra.mxu1 %v25150_v55  ;;  %9443 = vmatpush1.bf16.msra.mxu0 %v25153_v25  ;;  %v25190_v55 = vld [vmem:[%s32755_s10 + $0x998] ss:$12 sps:$4 sm:$0xff]  }
0x1063   : > { %9411 = vmatprep.subr.bf16.mxu1 %v25158_v60  ;;  %9444 = vmatprep.subr.bf16.mxu0 %v25161_v62  ;;  %v25191_v25 = vld [vmem:[%s32755_s10 + $0x8d8] ss:$12 sps:$4 sm:$0xff]   ;;  %v25192_v60 = vld [vmem:[%s32755_s10 + $0xa28] ss:$12 sps:$4 sm:$0xff]   ;;  %v25193_v62 = vld [vmem:[%s32755_s10 + $0x9b0] ss:$12 sps:$4 sm:$0xff]  }
0x1066   : > { %9412 = vmatpush1.bf16.msra.mxu1 %v25156_v63  ;;  %9445 = vmatpush1.bf16.msra.mxu0 %v25159_v56  ;;  %v25194_v63 = vld [vmem:[%s32755_s10 + $0x8f0] ss:$12 sps:$4 sm:$0xff]   ;;  %v25195_v56 = vld [vmem:[%s32755_s10 + $0xa40] ss:$12 sps:$4 sm:$0xff]  }
0x1067   : > { %9413 = vmatprep.subr.bf16.mxu1 %v25164_v52  ;;  %9446 = vmatprep.subr.bf16.mxu0 %v25167_v20 }
0x106a   : > { %9414 = vmatpush1.bf16.msra.mxu1 %v25162_v50  ;;  %9447 = vmatpush1.bf16.msra.mxu0 %v25165_v48  ;;  %v25196_v50 = vld [vmem:[%s32755_s10 + $0x9c8] ss:$12 sps:$4 sm:$0xff]  }
0x106b   : > { %9415 = vmatprep.subr.bf16.mxu1 %v25170_v33  ;;  %9448 = vmatprep.subr.bf16.mxu0 %v25173_v3  ;;  %v25197_v33 = vld [vmem:[%s32755_s10 + $0x908] ss:$12 sps:$4 sm:$0xff]   ;;  %v25198_v3 = vld [vmem:[%s32755_s10 + $0xa58] ss:$12 sps:$4 sm:$0xff]  }
0x106e   : > { %9416 = vmatpush1.bf16.msra.mxu1 %v25168_v32  ;;  %9449 = vmatpush1.bf16.msra.mxu0 %v25171_v17 }
0x106f   : > { %9450 = vmatprep.subr.bf16.mxu0 %v25176_v2  ;;  %22283 = vmatprep.subr.bf16.mxu1 %v25177_v42  ;;  %v25199_v2 = vld [vmem:[%s32755_s10 + $0x9e0] ss:$12 sps:$4 sm:$0xff]  }
0x1072   : > { %9451 = vmatpush1.bf16.msra.mxu0 %v25174_v12  ;;  %v9608_v12 = vld [vmem:[%s32757_s12 + $0x80] sm:$0xff] }
0x1073   : > { %9452 = vmatprep.subr.bf16.mxu0 %v25181_v14  ;;  %v9609_v14 = vld [vmem:[%s32757_s12 + $0x88] sm:$0xff] }
0x1076   : > { %9453 = vmatpush1.bf16.msra.mxu0 %v25179_v6  ;;  %v25201_v6 = vld [vmem:[%s32755_s10 + $0xa70] ss:$12 sps:$4 sm:$0xff]  }
0x1077   : > { %9507 = vmatprep.subr.bf16.mxu0 %v32791_v37 }
0x10d4   : > { %v8559_v1 = vpop.f32.mrb[112].mxu1 }
0x10d5   : > { %v8561_v18 = vpop.f32.mrb[113].mxu1 }
0x10d6   : > { %v8563_v58 = vpop.f32.mrb[114].mxu1 }
0x10d7   : > { %v8564_v59 = vpop.f32.mrb[115].mxu1  ;;  %v9593_v58 = vld [vmem:[%s32757_s12 + $0x8] sm:$0xff] }
0x10d8   : > { %v25202_v59 = vld [vmem:[%s32755_s10 + $0xa88] ss:$12 sps:$4 sm:$0xff]  }
0x10dc   : > { %v8600_v61 = vpop.f32.mrb[96].mxu0 }
0x10dd   : > { %v8601_v44 = vadd.f32 %v8600_v61, %v8559_v1  ;;  %v8602_v31 = vpop.f32.mrb[97].mxu0  ;;  %v29025_v1 = vpack.c.bf16 %v9609_v14, %v9608_v12  ;;  %v9606_v12 = vld [vmem:[%s32757_s12 + $0x70] sm:$0xff]  ;;  %v9607_v14 = vld [vmem:[%s32757_s12 + $0x78] sm:$0xff] }
0x10de   : > { %v8603_v5 = vadd.f32 %v8602_v31, %v8561_v18  ;;  %v8604_v10 = vpop.f32.mrb[98].mxu0  ;;  %v9592_v18 = vld [vmem:[%s32757_s12] sm:$0xff] }
0x10df   : > { %v28935_v9 = vadd.f32 %v8601_v44, %v28621_v11  ;;  %v8605_v19 = vpop.f32.mrb[99].mxu0  ;;  %v29036_v61 = vpack.c.bf16 %v9593_v58, %v9592_v18  ;;  %v25203_v44 = vld [vmem:[%s32755_s10 + $0xaa0] ss:$12 sps:$4 sm:$0xff]   ;;  %v25204_v31 = vld [vmem:[%s32755_s10 + $0xab8] ss:$12 sps:$4 sm:$0xff]  }
0x10e0   : > { %v28938_v22 = vadd.f32 %v8603_v5, %v28623_v4  ;;  %v25182_v4 = vld [vmem:[%s32755_s10 + $0x950] ss:$12 sps:$4 sm:$0xff]   ;;  %v25206_v10 = vld [vmem:[%s32755_s10 + $0xae8] ss:$12 sps:$4 sm:$0xff]   ;;  %v25207_v19 = vld [vmem:[%s32755_s10 + $0xb00] ss:$12 sps:$4 sm:$0xff]  }
0x10e1   : > { %v25205_v5 = vld [vmem:[%s32755_s10 + $0xad0] ss:$12 sps:$4 sm:$0xff]  }
0x10f4   : > { %v22277_v41 = vpop.f32.mrb[116].mxu1 }
0x10f5   : > { %v22278_v24 = vpop.f32.mrb[117].mxu1 }
0x10f6   : > { %v22279_v34 = vadd.f32 %v22278_v24, %v22277_v41  ;;  %v22280_v38 = vpop.f32.mrb[118].mxu1  ;;  %v25208_v41 = vld [vmem:[%s32755_s10 + $0xb18] ss:$12 sps:$4 sm:$0xff]   ;;  %v25209_v24 = vld [vmem:[%s32755_s10 + $0xb30] ss:$12 sps:$4 sm:$0xff]  }
0x10f7   : > { %v22281_v43 = vpop.f32.mrb[119].mxu1  ;;  %v9611_v38 = vld [vmem:[%s32757_s12 + $0x98] sm:$0xff] }
0x10fc   : > { %v8729_v39 = vpop.f32.mrb[120].mxu1 }
0x10fd   : > { %v8731_v46 = vpop.f32.mrb[121].mxu1  ;;  %v28943_v26 = vpack.c.bf16 %v8729_v39, %v8729_v39  ;;  %v9594_v39 = vld [vmem:[%s32757_s12 + $0x10] sm:$0xff] }
0x10fe   : > { %v8778_v47 = vpack.c.bf16 %v8731_v46, %v8731_v46  ;;  %v8733_v54 = vpop.f32.mrb[122].mxu1  ;;  %v9595_v46 = vld [vmem:[%s32757_s12 + $0x18] sm:$0xff] }
0x10ff   : > { %v8734_v11 = vpop.f32.mrb[123].mxu1  ;;  %v9612_v54 = vld [vmem:[%s32757_s12 + $0xa0] sm:$0xff] }
0x1100   : > { %9417 = vmatprep.mubr.bf16.mxu1 %v8778_v47 }
0x1101   : > { %9418 = vmatmul.mubr.bf16.vlgmr.msra.gmra.mrb[128].mxu1 %v28943_v26 }
0x1102   : > { %22284 = vmatpush3.bf16.msra.mxu1 %v25178_v15  ;;  %9499 = vmatprep.mubr.bf16.mxu1 %v8778_v47  ;;  %v29086_v47 = vpack.c.bf16 %v9595_v46, %v9594_v39  ;;  %v9613_v15 = vld [vmem:[%s32757_s12 + $0xa8] sm:$0xff] }
0x1103   : > { %22285 = vmatprep.subr.bf16.mxu1 %v25182_v4  ;;  %v29099_v11 = vpack.c.bf16 %v9613_v15, %v9612_v54  ;;  %v9597_v4 = vld [vmem:[%s32757_s12 + $0x28] sm:$0xff] }
0x1104   : > { %v8770_v13 = vpop.f32.mrb[124].mxu1 }
0x1105   : > { %v8772_v16 = vpop.f32.mrb[125].mxu1  ;;  %v28961_v23 = vpack.c.bf16 %v8770_v13, %v8770_v13  ;;  %v9615_v13 = vld [vmem:[%s32757_s12 + $0xb8] sm:$0xff] }
0x1106   : > { %v8780_v36 = vpack.c.bf16 %v8772_v16, %v8772_v16  ;;  %22286 = vmatpush3.bf16.msra.mxu1 %v25183_v40  ;;  %v8774_v21 = vpop.f32.mrb[126].mxu1 }
0x1107   : > { %v8775_v45 = vpop.f32.mrb[127].mxu1  ;;  %22287 = vmatprep.subr.bf16.mxu1 %v25184_v8  ;;  %v9614_v8 = vld [vmem:[%s32757_s12 + $0xb0] sm:$0xff]  ;;  %v9599_v21 = vld [vmem:[%s32757_s12 + $0x38] sm:$0xff] }
0x1108   : > { %20433 = vmatprep.mubr.msk.bf16.mxu0 %vm823_vm1, %v8780_v36  ;;  %v29114_v16 = vpack.c.bf16 %v9615_v13, %v9614_v8 }
0x1109   : > { %9459 = vmatmul.mubr.bf16.vlgmr.msra.gmra.mrb[104].mxu0 %v28961_v23 }
0x110a   : > { %22288 = vmatpush3.bf16.msra.mxu1 %v25185_v28  ;;  %9508 = vmatpush1.bf16.msra.mxu0 %v25186_v35  ;;  %v9616_v35 = vld [vmem:[%s32757_s12 + $0xc0] sm:$0xff] }
0x110b   : > { %20434 = vmatprep.mubr.msk.bf16.mxu0 %vm823_vm1, %v8780_v36  ;;  %22289 = vmatprep.subr.bf16.mxu1 %v25187_v49  ;;  %v9598_v36 = vld [vmem:[%s32757_s12 + $0x30] sm:$0xff]  ;;  %v9600_v49 = vld [vmem:[%s32757_s12 + $0x40] sm:$0xff] }
0x110c   : > { %9509 = vmatprep.subr.bf16.mxu0 %v32791_v37  ;;  %v29122_v28 = vpack.c.bf16 %v9599_v21, %v9598_v36 }
0x110e   : > { %22290 = vmatpush3.bf16.msra.mxu1 %v25188_v51  ;;  %9510 = vmatpush1.bf16.msra.mxu0 %v25189_v53  ;;  %v9601_v51 = vld [vmem:[%s32757_s12 + $0x48] sm:$0xff] }
0x110f   : > { %22291 = vmatprep.subr.bf16.mxu1 %v25190_v55  ;;  %9511 = vmatprep.subr.bf16.mxu0 %v32791_v37  ;;  %v29140_v53 = vpack.c.bf16 %v9601_v51, %v9600_v49  ;;  %v9618_v55 = vld [vmem:[%s32757_s12 + $0xd0] sm:$0xff] }
0x1112   : > { %22292 = vmatpush3.bf16.msra.mxu1 %v25191_v25  ;;  %9512 = vmatpush1.bf16.msra.mxu0 %v25192_v60  ;;  %v9619_v25 = vld [vmem:[%s32757_s12 + $0xd8] sm:$0xff] }
0x1113   : > { %22293 = vmatprep.subr.bf16.mxu1 %v25193_v62  ;;  %9513 = vmatprep.subr.bf16.mxu0 %v32791_v37  ;;  %v29150_v60 = vpack.c.bf16 %v9619_v25, %v9618_v55  ;;  %v9602_v62 = vld [vmem:[%s32757_s12 + $0x50] sm:$0xff]  ;;  %v9625_v55 = vld [vmem:[%s32757_s12 + $0x108] sm:$0xff] }
0x1114   : > { %v8681_v52 = vpop.f32.mrb[100].mxu0 }
0x1115   : > { %v8682_v48 = vadd.f32 %v22279_v34, %v8681_v52  ;;  %v8683_v20 = vpop.f32.mrb[101].mxu0  ;;  %v9610_v34 = vld [vmem:[%s32757_s12 + $0x90] sm:$0xff]  ;;  %v9621_v52 = vld [vmem:[%s32757_s12 + $0xe8] sm:$0xff] }
0x1116   : > { %22294 = vmatpush3.bf16.msra.mxu1 %v25194_v63  ;;  %9514 = vmatpush1.bf16.msra.mxu0 %v25195_v56  ;;  %v8684_v32 = vpop.f32.mrb[102].mxu0  ;;  %v29078_v43 = vpack.c.bf16 %v9611_v38, %v9610_v34  ;;  %v9603_v63 = vld [vmem:[%s32757_s12 + $0x58] sm:$0xff] }
0x1117   : > { %v29006_v17 = vadd.f32 %v8682_v48, %v28710_v57  ;;  %22295 = vmatprep.subr.bf16.mxu1 %v25196_v50  ;;  %9515 = vmatprep.subr.bf16.mxu0 %v32791_v37  ;;  %v8685_v42 = vpop.f32.mrb[103].mxu0  ;;  %v25200_v57 = vld [vmem:[%s32755_s10 + $0x920] ss:$12 sps:$4 sm:$0xff]   ;;  %v29158_v56 = vpack.c.bf16 %v9603_v63, %v9602_v62  ;;  %v9623_v32 = vld [vmem:[%s32757_s12 + $0xf8] sm:$0xff] }
0x1118   : > { %v9620_v50 = vld [vmem:[%s32757_s12 + $0xe0] sm:$0xff] }
0x1119   : > { %v9604_v48 = vld [vmem:[%s32757_s12 + $0x60] sm:$0xff]  ;;  %v29171_v20 = vpack.c.bf16 %v9621_v52, %v9620_v50  ;;  %v9626_v52 = vld [vmem:[%s32757_s12 + $0x110] sm:$0xff] }
0x111a   : > { %22296 = vmatpush3.bf16.msra.mxu1 %v25197_v33  ;;  %9516 = vmatpush1.bf16.msra.mxu0 %v25198_v3  ;;  %v9605_v33 = vld [vmem:[%s32757_s12 + $0x68] sm:$0xff]  ;;  %v9622_v3 = vld [vmem:[%s32757_s12 + $0xf0] sm:$0xff] }
0x111b   : > { %22297 = vmatprep.subr.bf16.mxu1 %v25199_v2  ;;  %9517 = vmatprep.subr.bf16.mxu0 %v32791_v37  ;;  %v29182_v2 = vpack.c.bf16 %v9605_v33, %v9604_v48  ;;  %v29184_v42 = vpack.c.bf16 %v9623_v32, %v9622_v3  ;;  %v9627_v48 = vld [vmem:[%s32757_s12 + $0x118] sm:$0xff]  ;;  %v9628_v32 = vld [vmem:[%s32757_s12 + $0x120] sm:$0xff] }
0x111c   : > { %v29230_v33 = vpack.c.bf16 %v9627_v48, %v9626_v52 }
0x111e   : > { %22298 = vmatpush3.bf16.msra.mxu1 %v25200_v57  ;;  %9518 = vmatpush1.bf16.msra.mxu0 %v25201_v6  ;;  %v29194_v57 = vpack.c.bf16 %v9607_v14, %v9606_v12  ;;  %v9629_v12 = vld [vmem:[%s32757_s12 + $0x128] sm:$0xff] }
0x111f   : > { %9519 = vmatprep.subr.bf16.mxu0 %v32791_v37  ;;  %23466 = vmatprep.subr.bf16.mxu1 %v29025_v1 }
0x1121   : > { %9500 = vmatmul.mubr.bf16.vlgmr.msra.gmra.mrb[132].mxu1 %v28943_v26  ;;  %v9596_v26 = vld [vmem:[%s32757_s12 + $0x20] sm:$0xff] }
0x1122   : > { %9520 = vmatpush1.bf16.msra.mxu0 %v25202_v59  ;;  %23468 = vmatpush3.bf16.msra.mxu1 %v29036_v61  ;;  %v29104_v40 = vpack.c.bf16 %v9597_v4, %v9596_v26 }
0x1123   : > { %9521 = vmatprep.subr.bf16.mxu0 %v32791_v37  ;;  %23470 = vmatprep.subr.bf16.mxu1 %v29078_v43 }
0x1126   : > { %9522 = vmatpush1.bf16.msra.mxu0 %v25203_v44  ;;  %23472 = vmatpush3.bf16.msra.mxu1 %v29086_v47  ;;  %v29199_v44 = vld [vmem:[#allocation15] sm:$0x7] }
0x1127   : > { %9523 = vmatprep.subr.bf16.mxu0 %v32791_v37  ;;  %23474 = vmatprep.subr.bf16.mxu1 %v29099_v11 }
0x112a   : > { %9524 = vmatpush1.bf16.msra.mxu0 %v25204_v31  ;;  %23476 = vmatpush3.bf16.msra.mxu1 %v29104_v40 }
0x112b   : > { %9525 = vmatprep.subr.bf16.mxu0 %v32791_v37  ;;  %23478 = vmatprep.subr.bf16.mxu1 %v29114_v16 }
0x112e   : > { %9526 = vmatpush1.bf16.msra.mxu0 %v25205_v5  ;;  %23480 = vmatpush3.bf16.msra.mxu1 %v29122_v28 }
0x112f   : > { %9527 = vmatprep.subr.bf16.mxu0 %v32791_v37 }
0x1132   : > { %9528 = vmatpush1.bf16.msra.mxu0 %v25206_v10  ;;  %v9555_v10 = vrot.slane %v29199_v44, %v27171_v27 }
0x1133   : > { %9529 = vmatprep.subr.bf16.mxu0 %v32791_v37 }
0x1136   : > { %9530 = vmatpush1.bf16.msra.mxu0 %v25207_v19 }
0x1137   : > { %9531 = vmatprep.subr.bf16.mxu0 %v32791_v37 }
0x113a   : > { %9532 = vmatpush1.bf16.msra.mxu0 %v25208_v41 }
0x113b   : > { %9533 = vmatprep.subr.bf16.mxu0 %v32791_v37 }
0x113e   : > { %9534 = vmatpush1.bf16.msra.mxu0 %v25209_v24  ;;  %v9559_v24 = vrot.slane %v29199_v44, %v27173_v29 }
0x1141   : > { %9540 = vmatmul.mubr.bf16.vlgmr.msra.gmra.mrb[108].mxu0 %v28961_v23  ;;  %v9617_v23 = vld [vmem:[%s32757_s12 + $0xc8] sm:$0xff] }
0x1142   : > { %9885 = vmatprep.mubr.f32.mxu0 %v27397_v0  ;;  %v29132_v45 = vpack.c.bf16 %v9617_v23, %v9616_v35 }
0x1144   : > { %23482 = vmatprep.subr.bf16.mxu1 %v29132_v45 }
0x1145   : > { %23484 = vmatpush3.bf16.msra.mxu1 %v29140_v53 }
0x1146   : > { %23486 = vmatprep.subr.bf16.mxu1 %v29150_v60 }
0x1149   : > { %23488 = vmatpush3.bf16.msra.mxu1 %v29158_v56 }
0x114a   : > { %23490 = vmatprep.subr.bf16.mxu1 %v29171_v20 }
0x114d   : > { %23492 = vmatpush3.bf16.msra.mxu1 %v29182_v2 }
0x114e   : > { %23494 = vmatprep.subr.bf16.mxu1 %v29184_v42 }
0x1151   : > { %23496 = vmatpush3.bf16.msra.mxu1 %v29194_v57 }
0x1152   : > { %23497 = vmatprep.subr.bf16.mxu1 %v32793_v7 }
0x11d4   : > { %v9419_v6 = vpop.f32.mrb[128].mxu1 }
0x11d5   : > { %v9421_v18 = vpop.f32.mrb[129].mxu1 }
0x11d6   : > { %v9423_v58 = vpop.f32.mrb[130].mxu1 }
0x11d7   : > { %v9424_v59 = vpop.f32.mrb[131].mxu1 }
0x11d8   : > { %v29242_v59 = vpack.c.bf16 %v9629_v12, %v9628_v32  ;;  %v9782_v12 = vld [vmem:[%s32758_s13] sm:$0xff] }
0x11dc   : > { %v9460_v31 = vpop.f32.mrb[104].mxu0 }
0x11dd   : > { %v9461_v5 = vadd.f32 %v9460_v31, %v9419_v6  ;;  %v9462_v19 = vpop.f32.mrb[105].mxu0  ;;  %v9630_v31 = vld [vmem:[%s32757_s12 + $0x130] sm:$0xff] }
0x11de   : > { %v9463_v41 = vadd.f32 %v9462_v19, %v9421_v18  ;;  %v9464_v34 = vpop.f32.mrb[106].mxu0  ;;  %v9632_v19 = vld [vmem:[%s32757_s12 + $0x140] sm:$0xff] }
0x11df   : > { %v9547_v38 = vadd.f32 %v9461_v5, %v28935_v9  ;;  %v9465_v39 = vpop.f32.mrb[107].mxu0  ;;  %v9631_v5 = vld [vmem:[%s32757_s12 + $0x138] sm:$0xff]  ;;  %v9634_v34 = vld [vmem:[%s32757_s12 + $0x150] sm:$0xff] }
0x11e0   : > { %v9548_v46 = vadd.f32 %v9463_v41, %v28938_v22  ;;  %v9624_v22 = vld [vmem:[%s32757_s12 + $0x100] sm:$0xff]  ;;  %v9633_v41 = vld [vmem:[%s32757_s12 + $0x148] sm:$0xff] }
0x11e1   : > { %v29207_v54 = vadd.f32 %v9555_v10, %v9547_v38  ;;  %v29221_v63 = vpack.c.bf16 %v9625_v55, %v9624_v22  ;;  %v29252_v10 = vpack.c.bf16 %v9631_v5, %v9630_v31  ;;  %v9635_v38 = vld [vmem:[%s32757_s12 + $0x158] sm:$0xff] }
0x11e2   : > { %v29209_v15 = vadd.f32 %v9559_v24, %v9548_v46  ;;  %v29262_v24 = vpack.c.bf16 %v9633_v41, %v9632_v19  ;;  %v29272_v39 = vpack.c.bf16 %v9635_v38, %v9634_v34  ;;  %v9636_v46 = vld [vmem:[%s32757_s12 + $0x160] sm:$0xff]  ;;  %v9789_v19 = vld [vmem:[%s32758_s13 + $0x38] sm:$0xff]  ;;  %v9792_v41 = vld [vmem:[%s32758_s13 + $0x50] sm:$0xff] }
0x11e3   : > { %v9571_v26 = vsel %vm9570_vm4, %v29207_v54, 0.0  ;;  %v9788_v34 = vld [vmem:[%s32758_s13 + $0x30] sm:$0xff]  ;;  %v29340_v38 = vpack.c.bf16 %v9792_v41, %v9789_v19  ;;  %v9806_v41 = vld [vmem:[%s32758_s13 + $0xc0] sm:$0xff] }
0x11e4   : > { %v9572_v4 = vrot.slane %v9571_v26, 4  ;;  %v9578_v8 = vsel %vm9570_vm4, %v29209_v15, 0.0 }
0x11e5   : > { %v9579_v13 = vrot.slane %v9578_v8, 4 }
0x11e6   : > { %v9573_v36 = vadd.f32 %v9572_v4, %v9571_v26  ;;  %v9637_v26 = vld [vmem:[%s32757_s12 + $0x168] sm:$0xff] }
0x11e7   : > { %v9580_v21 = vadd.f32 %v9579_v13, %v9578_v8  ;;  %v29282_v4 = vpack.c.bf16 %v9637_v26, %v9636_v46  ;;  %v9638_v8 = vld [vmem:[%s32757_s12 + $0x170] sm:$0xff]  ;;  %v9639_v13 = vld [vmem:[%s32757_s12 + $0x178] sm:$0xff]  ;;  %v9791_v46 = vld [vmem:[%s32758_s13 + $0x48] sm:$0xff] }
0x11e8   : > { %v9574_v35 = vrot.slane %v9573_v36, 2  ;;  %v9790_v26 = vld [vmem:[%s32758_s13 + $0x40] sm:$0xff] }
0x11e9   : > { %v9581_v9 = vrot.slane %v9580_v21, 2 }
0x11ea   : > { %v9575_v23 = vadd.f32 %v9574_v35, %v9573_v36  ;;  %v29292_v36 = vpack.c.bf16 %v9639_v13, %v9638_v8  ;;  %v9793_v8 = vld [vmem:[%s32758_s13 + $0x58] sm:$0xff]  ;;  %v29353_v13 = vpack.c.bf16 %v9791_v46, %v9788_v34 }
0x11eb   : > { %v9582_v49 = vadd.f32 %v9581_v9, %v9580_v21  ;;  %v9563_v9 = vrot.slane %v29199_v44, %v27175_v30  ;;  %v9786_v44 = vld [vmem:[%s32758_s13 + $0x20] sm:$0xff]  ;;  %v9809_v46 = vld [vmem:[%s32758_s13 + $0xd8] sm:$0xff] }
0x11ec   : > { %v9576_v51 = vrot.slane %v9575_v23, 1 }
0x11ed   : > { %v9583_v25 = vrot.slane %v9582_v49, 1 }
0x11ee   : > { %v9577_v50 = vadd.f32 %v9576_v51, %v9575_v23 }
0x11ef   : > { %v9584_v62 = vadd.f32 %v9583_v25, %v9582_v49 }
0x11f1   : > { %9704 = vmatprep.mubr.f32.mxu1 %v9584_v62 }
0x11f2   : > { %9705 = vmatmul.mubr.f32.vlgmr.msra.gmra.mrb[78].mxu1 %v9577_v50 }
0x11f3   : > { %23499 = vmatpush3.bf16.msra.mxu1 %v29221_v63  ;;  %23147 = vmatprep.mubr.msk.f32.mxu1 %vm26394_vm0, %v27397_v0 }
0x11f4   : > { %v22299_v3 = vpop.f32.mrb[132].mxu1  ;;  %23500 = vmatprep.subr.bf16.mxu1 %v32793_v7 }
0x11f5   : > { %v22300_v14 = vpop.f32.mrb[133].mxu1 }
0x11f6   : > { %v22301_v6 = vadd.f32 %v22300_v14, %v22299_v3  ;;  %v22302_v18 = vpop.f32.mrb[134].mxu1 }
0x11f7   : > { %v22303_v58 = vpop.f32.mrb[135].mxu1  ;;  %23502 = vmatpush3.bf16.msra.mxu1 %v29230_v33  ;;  %v9784_v18 = vld [vmem:[%s32758_s13 + $0x10] sm:$0xff] }
0x11f8   : > { %23503 = vmatprep.subr.bf16.mxu1 %v32793_v7  ;;  %v9787_v58 = vld [vmem:[%s32758_s13 + $0x28] sm:$0xff] }
0x11f9   : > { %v29328_v5 = vpack.c.bf16 %v9787_v58, %v9784_v18  ;;  %v9810_v18 = vld [vmem:[%s32758_s13 + $0xe0] sm:$0xff] }
0x11fb   : > { %23505 = vmatpush3.bf16.msra.mxu1 %v29242_v59 }
0x11fc   : > { %23506 = vmatprep.subr.bf16.mxu1 %v32793_v7 }
0x11ff   : > { %23508 = vmatpush3.bf16.msra.mxu1 %v29252_v10 }
0x1200   : > { %23509 = vmatprep.subr.bf16.mxu1 %v32793_v7 }
0x1203   : > { %23511 = vmatpush3.bf16.msra.mxu1 %v29262_v24 }
0x1204   : > { %23512 = vmatprep.subr.bf16.mxu1 %v32793_v7 }
0x1207   : > { %23514 = vmatpush3.bf16.msra.mxu1 %v29272_v39 }
0x1208   : > { %23515 = vmatprep.subr.bf16.mxu1 %v32793_v7 }
0x120b   : > { %23517 = vmatpush3.bf16.msra.mxu1 %v29282_v4 }
0x120c   : > { %23518 = vmatprep.subr.bf16.mxu1 %v32793_v7 }
0x120f   : > { %23520 = vmatpush3.bf16.msra.mxu1 %v29292_v36 }
0x1210   : > { %23545 = vmatprep.subr.bf16.mxu1 %v32793_v7 }
0x1214   : > { %v9541_v21 = vpop.f32.mrb[108].mxu0 }
0x1215   : > { %v9542_v35 = vadd.f32 %v22301_v6, %v9541_v21  ;;  %v9543_v23 = vpop.f32.mrb[109].mxu0  ;;  %v9785_v6 = vld [vmem:[%s32758_s13 + $0x18] sm:$0xff]  ;;  %v29355_v21 = vpack.c.bf16 %v9793_v8, %v9790_v26  ;;  %v9808_v26 = vld [vmem:[%s32758_s13 + $0xd0] sm:$0xff]  ;;  %v9811_v8 = vld [vmem:[%s32758_s13 + $0xe8] sm:$0xff] }
0x1216   : > { %v9544_v49 = vpop.f32.mrb[110].mxu0  ;;  %v29326_v31 = vpack.c.bf16 %v9785_v6, %v9782_v12  ;;  %v9794_v23 = vld [vmem:[%s32758_s13 + $0x60] sm:$0xff]  ;;  %v9805_v12 = vld [vmem:[%s32758_s13 + $0xb8] sm:$0xff]  ;;  %v9807_v6 = vld [vmem:[%s32758_s13 + $0xc8] sm:$0xff] }
0x1217   : > { %v9549_v51 = vadd.f32 %v9542_v35, %v29006_v17  ;;  %v9545_v22 = vpop.f32.mrb[111].mxu0  ;;  %v9783_v17 = vld [vmem:[%s32758_s13 + $0x8] sm:$0xff]  ;;  %v29424_v34 = vpack.c.bf16 %v9810_v18, %v9807_v6 }
0x1218   : > { %v29315_v14 = vpack.c.bf16 %v9786_v44, %v9783_v17  ;;  %v9795_v35 = vld [vmem:[%s32758_s13 + $0x68] sm:$0xff]  ;;  %v9796_v22 = vld [vmem:[%s32758_s13 + $0x70] sm:$0xff]  ;;  %v9802_v44 = vld [vmem:[%s32758_s13 + $0xa0] sm:$0xff] }
0x1219   : > { %v29300_v55 = vadd.f32 %v9563_v9, %v9549_v51  ;;  %v9798_v9 = vld [vmem:[%s32758_s13 + $0x80] sm:$0xff]  ;;  %v9797_v51 = vld [vmem:[%s32758_s13 + $0x78] sm:$0xff]  ;;  %v9803_v17 = vld [vmem:[%s32758_s13 + $0xa8] sm:$0xff]  ;;  %v29417_v19 = vpack.c.bf16 %v9805_v12, %v9802_v44 }
0x121a   : > { %23522 = vmatprep.subr.bf16.mxu0 %v29315_v14  ;;  %v29368_v49 = vpack.c.bf16 %v9798_v9, %v9795_v35  ;;  %v29437_v35 = vpack.c.bf16 %v9809_v46, %v9806_v41  ;;  %v29439_v9 = vpack.c.bf16 %v9811_v8, %v9808_v26 }
0x121b   : > { %v9585_v25 = vsel %vm9570_vm4, %v29300_v55, 0.0  ;;  %23524 = vmatpush1.bf16.msra.mxu0 %v29326_v31 }
0x121c   : > { %v9586_v62 = vrot.slane %v9585_v25, 4  ;;  %23526 = vmatprep.subr.bf16.mxu0 %v29340_v38 }
0x121e   : > { %v9587_v50 = vadd.f32 %v9586_v62, %v9585_v25  ;;  %v9799_v25 = vld [vmem:[%s32758_s13 + $0x88] sm:$0xff]  ;;  %v9801_v62 = vld [vmem:[%s32758_s13 + $0x98] sm:$0xff] }
0x121f   : > { %23528 = vmatpush1.bf16.msra.mxu0 %v29353_v13 }
0x1220   : > { %v9588_v52 = vrot.slane %v9587_v50, 2  ;;  %23530 = vmatprep.subr.bf16.mxu0 %v29368_v49 }
0x1222   : > { %v9589_v48 = vadd.f32 %v9588_v52, %v9587_v50  ;;  %v9804_v50 = vld [vmem:[%s32758_s13 + $0xb0] sm:$0xff]  ;;  %v29387_v52 = vpack.c.bf16 %v9797_v51, %v9794_v23  ;;  %v9813_v23 = vld [vmem:[%s32758_s13 + $0xf8] sm:$0xff] }
0x1223   : > { %v9816_v51 = vld [vmem:[%s32758_s13 + $0x110] sm:$0xff] }
0x1224   : > { %v9590_v3 = vrot.slane %v9589_v48, 1  ;;  %23532 = vmatpush1.bf16.msra.mxu0 %v29387_v52 }
0x1226   : > { %v9591_v32 = vadd.f32 %v9590_v3, %v9589_v48  ;;  %v29389_v48 = vpack.c.bf16 %v9799_v25, %v9796_v22  ;;  %v9800_v3 = vld [vmem:[%s32758_s13 + $0x90] sm:$0xff]  ;;  %v29452_v22 = vpack.c.bf16 %v9816_v51, %v9813_v23 }
0x1227   : > { %v29415_v58 = vpack.c.bf16 %v9803_v17, %v9800_v3  ;;  %v9812_v25 = vld [vmem:[%s32758_s13 + $0xf0] sm:$0xff]  ;;  %v9817_v17 = vld [vmem:[%s32758_s13 + $0x118] sm:$0xff] }
0x1228   : > { %23148 = vmatmul.mubr.f32.vlgmr.msra.gmra.mrb[136].mxu1 %v9591_v32  ;;  %v29396_v32 = vpack.c.bf16 %v9804_v50, %v9801_v62  ;;  %v9815_v62 = vld [vmem:[%s32758_s13 + $0x108] sm:$0xff]  ;;  %v9814_v50 = vld [vmem:[%s32758_s13 + $0x100] sm:$0xff] }
0x1229   : > { %23174 = vmatprep.mubr.msk.f32.mxu1 %vm26394_vm0, %v27397_v0  ;;  %23547 = vmatpush3.bf16.msra.mxu1 %v29328_v5  ;;  %v29463_v3 = vpack.c.bf16 %v9815_v62, %v9812_v25  ;;  %v29469_v44 = vpack.c.bf16 %v9817_v17, %v9814_v50 }
0x122a   : > { %23548 = vmatprep.subr.bf16.mxu1 %v32793_v7  ;;  %23534 = vmatprep.subr.bf16.mxu0 %v29396_v32 }
0x122b   : > { %23536 = vmatpush1.bf16.msra.mxu0 %v29415_v58 }
0x122c   : > { %23538 = vmatprep.subr.bf16.mxu0 %v29424_v34 }
0x122d   : > { %23550 = vmatpush3.bf16.msra.mxu1 %v29355_v21 }
0x122e   : > { %23551 = vmatprep.subr.bf16.mxu1 %v32793_v7 }
0x122f   : > { %23540 = vmatpush1.bf16.msra.mxu0 %v29437_v35 }
0x1230   : > { %23542 = vmatprep.subr.bf16.mxu0 %v29452_v22 }
0x1231   : > { %23553 = vmatpush3.bf16.msra.mxu1 %v29389_v48 }
0x1232   : > { %23554 = vmatprep.subr.bf16.mxu1 %v32793_v7 }
0x1233   : > { %23544 = vmatpush1.bf16.msra.mxu0 %v29463_v3 }
0x1234   : > { %23564 = vmatprep.subr.bf16.mxu0 %v29025_v1 }
0x1235   : > { %23556 = vmatpush3.bf16.msra.mxu1 %v29417_v19 }
0x1236   : > { %23557 = vmatprep.subr.bf16.mxu1 %v32793_v7 }
0x1239   : > { %23559 = vmatpush3.bf16.msra.mxu1 %v29439_v9 }
0x123a   : > { %23560 = vmatprep.subr.bf16.mxu1 %v32793_v7 }
0x123d   : > { %23562 = vmatpush3.bf16.msra.mxu1 %v29469_v44 }
0x123e   : > { %23595 = vmatprep.subr.bf16.mxu1 %v32793_v7 }
0x12c5   : > { %v22337_v12 = vpop.f32.mrb[78].mxu1 }
0x12c6   : > { %v22338_v6 = vpop.f32.mrb[79].mxu1 }
0x12c7   : > { %v22339_v18 = vadd.f32 %v22338_v6, %v22337_v12 }
0x12fb   : > { %v9776_v41 = vpop.f32.mrb[136].mxu1 }
0x12fc   : > { %v9777_v46 = vadd.f32 %v22339_v18, %v9776_v41  ;;  %v23149_v26 = vpop.f32.mrb[137].mxu1 }
0x12fe   : > { %v9781_v8 = vmul.f32 0.0625, %v9777_v46 }
0x1300   : > { %20435 = vmatmul.mubr.msk.f32.vlgmr.msra.gmra.mrb[70].mxu0 %vm823_vm1, %v9781_v8  ;;  %23175 = vmatmul.mubr.msk.f32.vlgmr.msra.gmra.mrb[138].mxu1 %vm823_vm1, %v9781_v8 }
0x1301   : > { %23597 = vmatpush3.bf16.msra.mxu1 %v29221_v63  ;;  %23566 = vmatpush3.bf16.msra.mxu0 %v29036_v61 }
0x1302   : > { %23598 = vmatprep.subr.bf16.mxu1 %v32793_v7  ;;  %23568 = vmatprep.subr.bf16.mxu0 %v29078_v43 }
0x1303   : > { %23209 = vmatprep.mubr.msk.f32.mxu1 %vm26394_vm0, %v27397_v0 }
0x1305   : > { %23600 = vmatpush3.bf16.msra.mxu1 %v29230_v33  ;;  %23570 = vmatpush3.bf16.msra.mxu0 %v29086_v47 }
0x1306   : > { %23601 = vmatprep.subr.bf16.mxu1 %v32793_v7  ;;  %23572 = vmatprep.subr.bf16.mxu0 %v29099_v11 }
0x1309   : > { %23603 = vmatpush3.bf16.msra.mxu1 %v29242_v59  ;;  %23574 = vmatpush3.bf16.msra.mxu0 %v29104_v40 }
0x130a   : > { %23604 = vmatprep.subr.bf16.mxu1 %v32793_v7  ;;  %23576 = vmatprep.subr.bf16.mxu0 %v29114_v16 }
0x130d   : > { %23606 = vmatpush3.bf16.msra.mxu1 %v29252_v10  ;;  %23578 = vmatpush3.bf16.msra.mxu0 %v29122_v28 }
0x130e   : > { %23607 = vmatprep.subr.bf16.mxu1 %v32793_v7  ;;  %23580 = vmatprep.subr.bf16.mxu0 %v29132_v45 }
0x1311   : > { %23609 = vmatpush3.bf16.msra.mxu1 %v29262_v24  ;;  %23582 = vmatpush3.bf16.msra.mxu0 %v29140_v53 }
0x1312   : > { %23610 = vmatprep.subr.bf16.mxu1 %v32793_v7  ;;  %23584 = vmatprep.subr.bf16.mxu0 %v29150_v60 }
0x1315   : > { %23612 = vmatpush3.bf16.msra.mxu1 %v29272_v39  ;;  %23586 = vmatpush3.bf16.msra.mxu0 %v29158_v56 }
0x1316   : > { %23613 = vmatprep.subr.bf16.mxu1 %v32793_v7  ;;  %23588 = vmatprep.subr.bf16.mxu0 %v29171_v20 }
0x1319   : > { %23615 = vmatpush3.bf16.msra.mxu1 %v29282_v4  ;;  %23590 = vmatpush3.bf16.msra.mxu0 %v29182_v2 }
0x131a   : > { %23616 = vmatprep.subr.bf16.mxu1 %v32793_v7  ;;  %23592 = vmatprep.subr.bf16.mxu0 %v29184_v42 }
0x131d   : > { %23618 = vmatpush3.bf16.msra.mxu1 %v29292_v36  ;;  %23594 = vmatpush3.bf16.msra.mxu0 %v29194_v57 }
0x131e   : > { %23620 = vmatprep.subr.bf16.mxu0 %v29315_v14  ;;  %23643 = vmatprep.subr.bf16.mxu1 %v32793_v7 }
0x13d3   : > { %v9887_v1 = vpop.f32.mrb[70].mxu0  ;;  %v9958_v61 = vpop.f32.mrb[138].mxu1 }
0x13d4   : > { %v9965_v43 = vrot.slane %v9887_v1, %v27171_v27  ;;  %v9973_v47 = vrot.slane %v9958_v61, %v27171_v27  ;;  %v9889_v11 = vpop.f32.mrb[71].mxu0  ;;  %v23176_v40 = vpop.f32.mrb[139].mxu1 }
0x13d5   : > { %v9969_v16 = vrot.slane %v9889_v11, %v27171_v27 }
0x13d6   : > { %v29515_v28 = vsub.f32 %v29207_v54, %v9965_v43  ;;  %v29518_v45 = vsub.f32 %v29300_v55, %v9973_v47 }
0x13d7   : > { %v29521_v53 = vsub.f32 %v29209_v15, %v9969_v16 }
0x13d8   : > { %v9977_v60 = vmul.f32 %v29515_v28, %v29515_v28  ;;  %v9979_v56 = vmul.f32 %v29518_v45, %v29518_v45 }
0x13d9   : > { %v9978_v20 = vmul.f32 %v29521_v53, %v29521_v53 }
0x13da   : > { %v9980_v2 = vsel %vm9570_vm4, %v9977_v60, 0.0  ;;  %v9994_v42 = vsel %vm9570_vm4, %v9979_v56, 0.0 }
0x13db   : > { %v9981_v57 = vrot.slane %v9980_v2, 4  ;;  %v9995_v54 = vrot.slane %v9994_v42, 4  ;;  %v9987_v63 = vsel %vm9570_vm4, %v9978_v20, 0.0 }
0x13dc   : > { %v9988_v33 = vrot.slane %v9987_v63, 4 }
0x13dd   : > { %v9982_v15 = vadd.f32 %v9981_v57, %v9980_v2  ;;  %v9996_v59 = vadd.f32 %v9995_v54, %v9994_v42  ;;  %v10340_v2 = vld [vmem:[#allocation4 + $0x20] sm:$0x3f] }
0x13de   : > { %v9989_v10 = vadd.f32 %v9988_v33, %v9987_v63  ;;  %v10346_v33 = vld [vmem:[#allocation17] sm:$0x1] }
0x13df   : > { %v9983_v24 = vrot.slane %v9982_v15, 2  ;;  %v9997_v39 = vrot.slane %v9996_v59, 2 }
0x13e0   : > { %v9990_v4 = vrot.slane %v9989_v10, 2 }
0x13e1   : > { %v9998_v36 = vadd.f32 %v9997_v39, %v9996_v59  ;;  %v9984_v55 = vadd.f32 %v9983_v24, %v9982_v15  ;;  %v10638_v15 = vld [vmem:[#allocation17 + $0x1] sm:$0x1]  ;;  %v25233_v39 = vld [vmem:[%s32760_s15 + $0x4e4] ss:$12 sps:$4 sm:$0xff]  }
0x13e2   : > { %v9991_v14 = vadd.f32 %v9990_v4, %v9989_v10  ;;  %v10345_v10 = vpack.c.bf16 %v10340_v2, %v10340_v2  ;;  %v25278_v2 = vld [vmem:[%s32760_s15 + $0x4b4] ss:$12 sps:$4 sm:$0xff]  }
0x13e3   : > { %v9999_v23 = vrot.slane %v9998_v36, 1  ;;  %v9985_v51 = vrot.slane %v9984_v55, 1 }
0x13e4   : > { %v9992_v25 = vrot.slane %v9991_v14, 1  ;;  %v29597_v4 = vsel %vm1124_vm3, %v10345_v10, 0  ;;  %v25290_v10 = vld [vmem:[%s32760_s15 + $0x5d4] ss:$12 sps:$4 sm:$0xff]  }
0x13e5   : > { %v10000_v62 = vadd.f32 %v9999_v23, %v9998_v36  ;;  %v9986_v17 = vadd.f32 %v9985_v51, %v9984_v55  ;;  %v25231_v36 = vld [vmem:[%s32760_s15 + $0x4e0] ss:$12 sps:$4 sm:$0xff]   ;;  %v25239_v55 = vld [vmem:[%s32760_s15 + $0x4fc] ss:$12 sps:$4 sm:$0xff]   ;;  %v25212_v51 = vld [vmem:[%s32760_s15 + $0x364] ss:$12 sps:$4 sm:$0xff]  }
0x13e6   : > { %v9993_v50 = vadd.f32 %v9992_v25, %v9991_v14  ;;  %v25237_v14 = vld [vmem:[%s32760_s15 + $0x4f8] ss:$12 sps:$4 sm:$0xff]   ;;  %v25245_v23 = vld [vmem:[%s32760_s15 + $0x514] ss:$12 sps:$4 sm:$0xff]   ;;  %v25243_v25 = vld [vmem:[%s32760_s15 + $0x510] ss:$12 sps:$4 sm:$0xff]  }
0x13e7   : > { %23210 = vmatmul.mubr.f32.vlgmr.msra.gmra.mrb[140].mxu1 %v10000_v62  ;;  %v25251_v62 = vld [vmem:[%s32760_s15 + $0x52c] ss:$12 sps:$4 sm:$0xff]  }
0x13e8   : > { %10065 = vmatprep.mubr.f32.mxu0 %v9993_v50  ;;  %23645 = vmatpush3.bf16.msra.mxu1 %v29328_v5  ;;  %v25249_v50 = vld [vmem:[%s32760_s15 + $0x528] ss:$12 sps:$4 sm:$0xff]  }
0x13e9   : > { %10066 = vmatmul.mubr.f32.vlgmr.msra.gmra.mrb[112].mxu0 %v9986_v17  ;;  %23646 = vmatprep.subr.bf16.mxu1 %v32793_v7  ;;  %v25257_v17 = vld [vmem:[%s32760_s15 + $0x544] ss:$12 sps:$4 sm:$0xff]  }
0x13ea   : > { %23622 = vmatpush1.bf16.msra.mxu0 %v29326_v31  ;;  %10211 = vmatprep.mubr.f32.mxu0 %v27397_v0 }
0x13eb   : > { %23624 = vmatprep.subr.bf16.mxu0 %v29340_v38  ;;  %23236 = vmatprep.mubr.msk.f32.mxu1 %vm26394_vm0, %v27397_v0 }
0x13ec   : > { %23648 = vmatpush3.bf16.msra.mxu1 %v29355_v21 }
0x13ed   : > { %23649 = vmatprep.subr.bf16.mxu1 %v32793_v7 }
0x13ee   : > { %23626 = vmatpush1.bf16.msra.mxu0 %v29353_v13 }
0x13ef   : > { %23628 = vmatprep.subr.bf16.mxu0 %v29368_v49 }
0x13f0   : > { %23651 = vmatpush3.bf16.msra.mxu1 %v29389_v48 }
0x13f1   : > { %23652 = vmatprep.subr.bf16.mxu1 %v32793_v7 }
0x13f2   : > { %23630 = vmatpush1.bf16.msra.mxu0 %v29387_v52 }
0x13f3   : > { %23632 = vmatprep.subr.bf16.mxu0 %v29396_v32 }
0x13f4   : > { %23654 = vmatpush3.bf16.msra.mxu1 %v29417_v19 }
0x13f5   : > { %23655 = vmatprep.subr.bf16.mxu1 %v32793_v7 }
0x13f6   : > { %23634 = vmatpush1.bf16.msra.mxu0 %v29415_v58 }
0x13f7   : > { %23636 = vmatprep.subr.bf16.mxu0 %v29424_v34 }
0x13f8   : > { %23657 = vmatpush3.bf16.msra.mxu1 %v29439_v9 }
0x13f9   : > { %23658 = vmatprep.subr.bf16.mxu1 %v32793_v7  ;;  %v15088_v7 = vld [vmem:[#allocation20 + $0x150] sm:$0xff] }
0x13fa   : > { %23638 = vmatpush1.bf16.msra.mxu0 %v29437_v35 }
0x13fb   : > { %23640 = vmatprep.subr.bf16.mxu0 %v29452_v22 }
0x13fc   : > { %23660 = vmatpush3.bf16.msra.mxu1 %v29469_v44 }
0x13fe   : > { %23642 = vmatpush1.bf16.msra.mxu0 %v29463_v3 }
0x14ba   : > { %v10137_v31 = vpop.f32.mrb[140].mxu1 }
0x14bb   : > { %v23211_v5 = vpop.f32.mrb[141].mxu1 }
0x14bc   : > { %v22402_v38 = vpop.f32.mrb[112].mxu0  ;;  %v25215_v5 = vld [vmem:[%s32760_s15 + $0x37c] ss:$12 sps:$4 sm:$0xff]  }
0x14bd   : > { %v22403_v13 = vpop.f32.mrb[113].mxu0 }
0x14be   : > { %v22404_v21 = vadd.f32 %v22403_v13, %v22402_v38  ;;  %v25255_v38 = vld [vmem:[%s32760_s15 + $0x540] ss:$12 sps:$4 sm:$0xff]   ;;  %v25263_v13 = vld [vmem:[%s32760_s15 + $0x55c] ss:$12 sps:$4 sm:$0xff]  }
0x14c0   : > { %v10138_v49 = vadd.f32 %v22404_v21, %v10137_v31  ;;  %v25210_v31 = vld [vmem:[%s32760_s15 + $0x360] ss:$12 sps:$4 sm:$0xff]   ;;  %v25213_v21 = vld [vmem:[%s32760_s15 + $0x378] ss:$12 sps:$4 sm:$0xff]  }
0x14c2   : > { %v10141_v52 = vmul.f32 0.0625, %v10138_v49  ;;  %v25218_v49 = vld [vmem:[%s32760_s15 + $0x394] ss:$12 sps:$4 sm:$0xff]  }
0x14c4   : > { %v10142_v48 = vadd.f32 1e-05, %v10141_v52  ;;  %v25261_v52 = vld [vmem:[%s32760_s15 + $0x558] ss:$12 sps:$4 sm:$0xff]  }
0x14c6   : > { %26028 = vrsqrt.f32 %v10142_v48  ;;  %v25269_v48 = vld [vmem:[%s32760_s15 + $0x574] ss:$12 sps:$4 sm:$0xff]  }
0x14d0   : > { %v26029_v32 = vpop.eup %26028 }
0x14d1   : > { %20437 = vmatmul.mubr.msk.f32.vlgmr.msra.gmra.mrb[114].mxu0 %vm823_vm1, %v26029_v32  ;;  %23237 = vmatmul.mubr.msk.f32.vlgmr.msra.gmra.mrb[142].mxu1 %vm823_vm1, %v26029_v32  ;;  %v25216_v32 = vld [vmem:[%s32760_s15 + $0x390] ss:$12 sps:$4 sm:$0xff]  }
0x14d2   : > { %10398 = vmatprep.mubr.bf16.mxu0 %v32791_v37  ;;  %10674 = vmatprep.mubr.bf16.mxu1 %v32791_v37 }
0x15a4   : > { %v10213_v58 = vpop.f32.mrb[114].mxu0  ;;  %v10284_v19 = vpop.f32.mrb[142].mxu1 }
0x15a5   : > { %v10291_v34 = vrot.slane %v10213_v58, %v27171_v27  ;;  %v10299_v35 = vrot.slane %v10284_v19, %v27171_v27  ;;  %v10215_v9 = vpop.f32.mrb[115].mxu0  ;;  %v23238_v22 = vpop.f32.mrb[143].mxu1  ;;  %v25221_v58 = vld [vmem:[%s32760_s15 + $0x3ac] ss:$12 sps:$4 sm:$0xff]   ;;  %v25267_v19 = vld [vmem:[%s32760_s15 + $0x570] ss:$12 sps:$4 sm:$0xff]  }
0x15a6   : > { %v10295_v3 = vrot.slane %v10215_v9, %v27171_v27  ;;  %v25224_v9 = vld [vmem:[%s32760_s15 + $0x3c4] ss:$12 sps:$4 sm:$0xff]   ;;  %v25273_v22 = vld [vmem:[%s32760_s15 + $0x588] ss:$12 sps:$4 sm:$0xff]  }
0x15a7   : > { %v10300_v44 = vmul.f32 %v10291_v34, %v29515_v28  ;;  %v10302_v12 = vmul.f32 %v10299_v35, %v29518_v45  ;;  %v25275_v34 = vld [vmem:[%s32760_s15 + $0x58c] ss:$12 sps:$4 sm:$0xff]   ;;  %v25219_v35 = vld [vmem:[%s32760_s15 + $0x3a8] ss:$12 sps:$4 sm:$0xff]  }
0x15a8   : > { %v10301_v6 = vmul.f32 %v10295_v3, %v29521_v53  ;;  %v25281_v3 = vld [vmem:[%s32760_s15 + $0x5a4] ss:$12 sps:$4 sm:$0xff]  }
0x15a9   : > { %v10306_v18 = vmul.f32 0.2, %v10300_v44  ;;  %v10308_v41 = vmul.f32 0.2, %v10302_v12  ;;  %vm10303_vm6 = vcmp.ge.f32.partialorder %v10300_v44, 0.0  ;;  %vm10305_vm8 = vcmp.ge.f32.partialorder %v10302_v12, 0.0 }
0x15aa   : > { %v10307_v46 = vmul.f32 0.2, %v10301_v6  ;;  %vm10304_vm7 = vcmp.ge.f32.partialorder %v10301_v6, 0.0 }
0x15ab   : > { %v10309_v26 = vsel %vm10303_vm6, %v10300_v44, %v10306_v18  ;;  %v10311_v43 = vsel %vm10305_vm8, %v10302_v12, %v10308_v41  ;;  %v25222_v44 = vld [vmem:[%s32760_s15 + $0x3c0] ss:$12 sps:$4 sm:$0xff]   ;;  %v25227_v12 = vld [vmem:[%s32760_s15 + $0x3dc] ss:$12 sps:$4 sm:$0xff]   ;;  %v25225_v18 = vld [vmem:[%s32760_s15 + $0x3d8] ss:$12 sps:$4 sm:$0xff]  }
0x15ac   : > { %v10315_v8 = vrot.slane %v10309_v26, 7  ;;  %v10310_v1 = vsel %vm10304_vm7, %v10301_v6, %v10307_v46  ;;  %v10317_v47 = vrot.slane %v10311_v43, 7  ;;  %v25279_v6 = vld [vmem:[%s32760_s15 + $0x5a0] ss:$12 sps:$4 sm:$0xff]   ;;  %v25228_v46 = vld [vmem:[%s32760_s15 + $0x3f0] ss:$12 sps:$4 sm:$0xff]  }
0x15ad   : > { %v10316_v61 = vrot.slane %v10310_v1, 7  ;;  %v25230_v41 = vld [vmem:[%s32760_s15 + $0x3f4] ss:$12 sps:$4 sm:$0xff]   ;;  %v25236_v26 = vld [vmem:[%s32760_s15 + $0x40c] ss:$12 sps:$4 sm:$0xff]  }
0x15ae   : > { %10318 = vrot.lane.b32.xlu0 %v10315_v8, %s26399_s27  ;;  %v25234_v8 = vld [vmem:[%s32760_s15 + $0x408] ss:$12 sps:$4 sm:$0xff]   ;;  %v25242_v1 = vld [vmem:[%s32760_s15 + $0x424] ss:$12 sps:$4 sm:$0xff]  }
0x15af   : > { %10320 = vrot.lane.b32.xlu1 %v10316_v61, %s26399_s27  ;;  %v25240_v61 = vld [vmem:[%s32760_s15 + $0x420] ss:$12 sps:$4 sm:$0xff]   ;;  %v25248_v43 = vld [vmem:[%s32760_s15 + $0x43c] ss:$12 sps:$4 sm:$0xff]  }
0x15b2   : > { %10322 = vrot.lane.b32.xlu0 %v10317_v47, %s26399_s27  ;;  %v25246_v47 = vld [vmem:[%s32760_s15 + $0x438] ss:$12 sps:$4 sm:$0xff]   ;;  %s32917_s27 = sld [smem:[#allocation70_spill]] }
0x1620   : > { %v10319_v11 = vpop.permute.xlu0 %10318 }
0x1621   : > { %10331 = vst.msk [vmem:[#allocation4] sm:$0x1e] %vm10330_vm10, %v10319_v11  ;;  %v10321_v40 = vpop.permute.xlu1 %10320 }
0x1622   : > { %v10324_v16 = vsel %vm823_vm1, %v10319_v11, %v10321_v40  ;;  %v25254_v11 = vld [vmem:[%s32760_s15 + $0x454] ss:$12 sps:$4 sm:$0xff]  }
0x1623   : > { %10332 = vst [vmem:[#allocation4 + $0x8] sm:$0x1e] %v10324_v16  ;;  %v25260_v16 = vld [vmem:[%s32760_s15 + $0x46c] ss:$12 sps:$4 sm:$0xff]  }
0x1624   : > { %v10323_v28 = vpop.permute.xlu0 %10322 }
0x1625   : > { %v10325_v45 = vsel %vm823_vm1, %v10321_v40, %v10323_v28  ;;  %10335 = vst.msk [vmem:[#allocation4 + $0x18] sm:$0x1e] %vm10334_vm11, %v10323_v28  ;;  %vm10347_vm1 = vcmask 48128   ;;  %v25252_v40 = vld [vmem:[%s32760_s15 + $0x450] ss:$12 sps:$4 sm:$0xff]  }
0x1626   : > { %10333 = vst [vmem:[#allocation4 + $0x10] sm:$0x1e] %v10325_v45  ;;  %v25258_v28 = vld [vmem:[%s32760_s15 + $0x468] ss:$12 sps:$4 sm:$0xff]   ;;  %v25266_v45 = vld [vmem:[%s32760_s15 + $0x484] ss:$12 sps:$4 sm:$0xff]  }
0x1628   : > { %v10336_v53 = vld [vmem:[#allocation4] sm:$0x3f] }
0x1629   : > { %v10341_v60 = vpack.c.bf16 %v10336_v53, %v10336_v53  ;;  %v25264_v53 = vld [vmem:[%s32760_s15 + $0x480] ss:$12 sps:$4 sm:$0xff]  }
0x162a   : > { %v10337_v56 = vld [vmem:[#allocation4 + $0x8] sm:$0x3f] }
0x162b   : > { %v29570_v20 = vpack.c.bf16 %v10337_v56, %v10337_v56  ;;  %v29577_v57 = vsel %vm1124_vm3, %v10341_v60, 0  ;;  %v25272_v60 = vld [vmem:[%s32760_s15 + $0x49c] ss:$12 sps:$4 sm:$0xff]   ;;  %v25270_v56 = vld [vmem:[%s32760_s15 + $0x498] ss:$12 sps:$4 sm:$0xff]  }
0x162c   : > { %v10339_v42 = vld [vmem:[#allocation4 + $0x18] sm:$0x3f] }
0x162d   : > { %20439 = vmatprep.subr.msk.bf16.mxu0 %vm1124_vm3, %v29570_v20  ;;  %20444 = vmatprep.subr.msk.bf16.mxu1 %vm1124_vm3, %v29570_v20  ;;  %v29579_v54 = vpack.c.bf16 %v10339_v42, %v10339_v42  ;;  %v10338_v63 = vld [vmem:[#allocation4 + $0x10] sm:$0x3f] }
0x162e   : > { %10367 = vmatpush1.bf16.msra.mxu0 %v29577_v57  ;;  %10643 = vmatpush1.bf16.msra.mxu1 %v29577_v57  ;;  %v10343_v59 = vpack.c.bf16 %v10338_v63, %v10338_v63  ;;  %v25276_v42 = vld [vmem:[%s32760_s15 + $0x4b0] ss:$12 sps:$4 sm:$0xff]   ;;  %v25284_v63 = vld [vmem:[%s32760_s15 + $0x4cc] ss:$12 sps:$4 sm:$0xff]  }
0x162f   : > { %20441 = vmatprep.subr.msk.bf16.mxu0 %vm1124_vm3, %v29579_v54  ;;  %23245 = vmatprep.subr.bf16.mxu1 %v27397_v0 }
0x1630   : > { %v29587_v24 = vsel %vm1124_vm3, %v10343_v59, 0  ;;  %v25285_v59 = vld [vmem:[%s32760_s15 + $0x5b8] ss:$12 sps:$4 sm:$0xff]  }
0x1631   : > { %20440 = vmatmul.mubr.msk.bf16.vlgmr.msra.gmra.mrb[116].mxu0 %vm10347_vm1, %v10346_v33  ;;  %20445 = vmatmul.mubr.msk.bf16.vlgmr.msra.gmra.mrb[144].mxu1 %vm10347_vm1, %v10638_v15 }
0x1632   : > { %10408 = vmatpush1.bf16.msra.mxu0 %v29587_v24  ;;  %10439 = vmatprep.mubr.bf16.mxu0 %v32791_v37 }
0x1633   : > { %23239 = vmatprep.subr.bf16.mxu0 %v27397_v0  ;;  %23246 = vmatpush3.bf16.msra.mxu1 %v29597_v4 }
0x1634   : > { %23247 = vmatprep.mubr.msk.bf16.mxu1 %vm26394_vm0, %v27397_v0  ;;  %11535 = vmatprep.subr.bf16.mxu1 %v25233_v39  ;;  %v25293_v39 = vld [vmem:[%s32760_s15 + $0x664] ss:$12 sps:$4 sm:$0xff]  }
0x1639   : > { %20442 = vmatmul.mubr.msk.bf16.vlgmr.msra.gmra.mrb[120].mxu0 %vm10347_vm1, %v10346_v33  ;;  %23248 = vmatmul.mubr.msk.bf16.vlgmr.msra.gmra.mrb[148].mxu1 %vm10347_vm1, %v10638_v15 }
0x163a   : > { %23240 = vmatpush3.bf16.msra.mxu0 %v29597_v4  ;;  %23241 = vmatprep.mubr.msk.bf16.mxu0 %vm26394_vm0, %v27397_v0 }
0x163b   : > { %20446 = vmatprep.subr.msk.bf16.mxu0 %vm1124_vm3, %v29579_v54  ;;  %11536 = vmatpush1.bf16.msra.mxu1 %v25231_v36  ;;  %v25288_v36 = vld [vmem:[%s32760_s15 + $0x5d0] ss:$12 sps:$4 sm:$0xff]  }
0x163c   : > { %11537 = vmatprep.subr.bf16.mxu1 %v25239_v55  ;;  %v25296_v55 = vld [vmem:[%s32760_s15 + $0x5ec] ss:$12 sps:$4 sm:$0xff]  }
0x163f   : > { %11538 = vmatpush1.bf16.msra.mxu1 %v25237_v14  ;;  %v25294_v14 = vld [vmem:[%s32760_s15 + $0x5e8] ss:$12 sps:$4 sm:$0xff]  }
0x1640   : > { %11539 = vmatprep.subr.bf16.mxu1 %v25245_v23  ;;  %v25300_v23 = vld [vmem:[%s32760_s15 + $0x600] ss:$12 sps:$4 sm:$0xff]  }
0x1641   : > { %23242 = vmatmul.mubr.msk.bf16.vlgmr.msra.gmra.mrb[124].mxu0 %vm10347_vm1, %v10346_v33  ;;  %v25287_v33 = vld [vmem:[%s32760_s15 + $0x5bc] ss:$12 sps:$4 sm:$0xff]  }
0x1642   : > { %10684 = vmatpush1.bf16.msra.mxu0 %v29587_v24  ;;  %10715 = vmatprep.mubr.bf16.mxu0 %v32791_v37 }
0x1643   : > { %11494 = vmatprep.subr.bf16.mxu0 %v25212_v51  ;;  %11540 = vmatpush1.bf16.msra.mxu1 %v25243_v25  ;;  %v25302_v51 = vld [vmem:[%s32760_s15 + $0x604] ss:$12 sps:$4 sm:$0xff]   ;;  %v25308_v25 = vld [vmem:[%s32760_s15 + $0x61c] ss:$12 sps:$4 sm:$0xff]  }
0x1644   : > { %11541 = vmatprep.subr.bf16.mxu1 %v25251_v62  ;;  %v25306_v62 = vld [vmem:[%s32760_s15 + $0x618] ss:$12 sps:$4 sm:$0xff]  }
0x1647   : > { %11542 = vmatpush1.bf16.msra.mxu1 %v25249_v50  ;;  %v25312_v50 = vld [vmem:[%s32760_s15 + $0x630] ss:$12 sps:$4 sm:$0xff]  }
0x1648   : > { %11543 = vmatprep.subr.bf16.mxu1 %v25257_v17  ;;  %v25314_v17 = vld [vmem:[%s32760_s15 + $0x634] ss:$12 sps:$4 sm:$0xff]  }
0x1649   : > { %20447 = vmatmul.mubr.msk.bf16.vlgmr.msra.gmra.mrb[128].mxu0 %vm10347_vm1, %v10638_v15  ;;  %v25282_v15 = vld [vmem:[%s32760_s15 + $0x4c8] ss:$12 sps:$4 sm:$0xff]  }
0x164a   : > { %11495 = vmatpush1.bf16.msra.mxu0 %v25210_v31  ;;  %v25319_v31 = vld [vmem:[%s32760_s15 + $0x64c] ss:$12 sps:$4 sm:$0xff]  }
0x164b   : > { %11496 = vmatprep.subr.bf16.mxu0 %v25215_v5  ;;  %11544 = vmatpush1.bf16.msra.mxu1 %v25255_v38  ;;  %v25317_v5 = vld [vmem:[%s32760_s15 + $0x648] ss:$12 sps:$4 sm:$0xff]  }
0x164c   : > { %11545 = vmatprep.subr.bf16.mxu1 %v25263_v13  ;;  %v25322_v38 = vld [vmem:[%s32760_s15 + $0x428] ss:$12 sps:$4 sm:$0xff]  }
0x164e   : > { %11497 = vmatpush1.bf16.msra.mxu0 %v25213_v21 }
0x164f   : > { %11498 = vmatprep.subr.bf16.mxu0 %v25218_v49  ;;  %11546 = vmatpush1.bf16.msra.mxu1 %v25261_v52 }
0x1650   : > { %11547 = vmatprep.subr.bf16.mxu1 %v25269_v48 }
0x1652   : > { %11499 = vmatpush1.bf16.msra.mxu0 %v25216_v32 }
0x1653   : > { %11500 = vmatprep.subr.bf16.mxu0 %v25221_v58  ;;  %11548 = vmatpush1.bf16.msra.mxu1 %v25267_v19  ;;  %v25291_v19 = vld [vmem:[%s32760_s15 + $0x660] ss:$12 sps:$4 sm:$0xff]  }
0x1654   : > { %11549 = vmatprep.subr.bf16.mxu1 %v25275_v34 }
0x1656   : > { %11501 = vmatpush1.bf16.msra.mxu0 %v25219_v35 }
0x1657   : > { %11502 = vmatprep.subr.bf16.mxu0 %v25224_v9  ;;  %11550 = vmatpush1.bf16.msra.mxu1 %v25273_v22  ;;  %v25299_v9 = vld [vmem:[%s32760_s15 + $0x67c] ss:$12 sps:$4 sm:$0xff]  }
0x1658   : > { %11551 = vmatprep.subr.bf16.mxu1 %v25281_v3  ;;  %v25297_v3 = vld [vmem:[%s32760_s15 + $0x678] ss:$12 sps:$4 sm:$0xff]  }
0x165a   : > { %11503 = vmatpush1.bf16.msra.mxu0 %v25222_v44  ;;  %v25305_v44 = vld [vmem:[%s32760_s15 + $0x694] ss:$12 sps:$4 sm:$0xff]  }
0x165b   : > { %11504 = vmatprep.subr.bf16.mxu0 %v25227_v12  ;;  %11552 = vmatpush1.bf16.msra.mxu1 %v25279_v6 }
0x165c   : > { %11553 = vmatprep.subr.bf16.mxu1 %v25287_v33 }
0x165e   : > { %11505 = vmatpush1.bf16.msra.mxu0 %v25225_v18 }
0x165f   : > { %11506 = vmatprep.subr.bf16.mxu0 %v25230_v41  ;;  %11554 = vmatpush1.bf16.msra.mxu1 %v25285_v59 }
0x1660   : > { %11555 = vmatprep.subr.bf16.mxu1 %v25290_v10  ;;  %v25324_v10 = vld [vmem:[%s32760_s15 + $0x368] ss:$12 sps:$4 sm:$0xff]  }
0x1662   : > { %11507 = vmatpush1.bf16.msra.mxu0 %v25228_v46 }
0x1663   : > { %11508 = vmatprep.subr.bf16.mxu0 %v25236_v26  ;;  %11556 = vmatpush1.bf16.msra.mxu1 %v25288_v36  ;;  %v25303_v26 = vld [vmem:[%s32760_s15 + $0x690] ss:$12 sps:$4 sm:$0xff]  }
0x1664   : > { %11557 = vmatprep.subr.bf16.mxu1 %v25296_v55 }
0x1666   : > { %11509 = vmatpush1.bf16.msra.mxu0 %v25234_v8 }
0x1667   : > { %11510 = vmatprep.subr.bf16.mxu0 %v25242_v1  ;;  %11558 = vmatpush1.bf16.msra.mxu1 %v25294_v14  ;;  %v25326_v14 = vld [vmem:[%s32760_s15 + $0x440] ss:$12 sps:$4 sm:$0xff]  }
0x1668   : > { %11559 = vmatprep.subr.bf16.mxu1 %v25302_v51  ;;  %v25328_v51 = vld [vmem:[%s32760_s15 + $0x380] ss:$12 sps:$4 sm:$0xff]  }
0x166a   : > { %11511 = vmatpush1.bf16.msra.mxu0 %v25240_v61  ;;  %v25311_v61 = vld [vmem:[%s32760_s15 + $0x6ac] ss:$12 sps:$4 sm:$0xff]  }
0x166b   : > { %11512 = vmatprep.subr.bf16.mxu0 %v25248_v43  ;;  %11560 = vmatpush1.bf16.msra.mxu1 %v25300_v23  ;;  %v25327_v23 = vld [vmem:[%s32760_s15 + $0x5f0] ss:$12 sps:$4 sm:$0xff]  }
0x166c   : > { %11561 = vmatprep.subr.bf16.mxu1 %v25308_v25  ;;  %v25329_v25 = vld [vmem:[%s32760_s15 + $0x530] ss:$12 sps:$4 sm:$0xff]  }
0x166e   : > { %11513 = vmatpush1.bf16.msra.mxu0 %v25246_v47  ;;  %v25309_v47 = vld [vmem:[%s32760_s15 + $0x6a8] ss:$12 sps:$4 sm:$0xff]  }
0x166f   : > { %11514 = vmatprep.subr.bf16.mxu0 %v25254_v11  ;;  %11562 = vmatpush1.bf16.msra.mxu1 %v25306_v62  ;;  %v25315_v11 = vld [vmem:[%s32760_s15 + $0x5a8] ss:$12 sps:$4 sm:$0xff]   ;;  %v25330_v62 = vld [vmem:[%s32760_s15 + $0x458] ss:$12 sps:$4 sm:$0xff]  }
0x1670   : > { %11563 = vmatprep.subr.bf16.mxu1 %v25314_v17  ;;  %v25332_v17 = vld [vmem:[%s32760_s15 + $0x398] ss:$12 sps:$4 sm:$0xff]  }
0x1672   : > { %11515 = vmatpush1.bf16.msra.mxu0 %v25252_v40 }
0x1673   : > { %11516 = vmatprep.subr.bf16.mxu0 %v25260_v16  ;;  %11564 = vmatpush1.bf16.msra.mxu1 %v25312_v50  ;;  %v25331_v50 = vld [vmem:[%s32760_s15 + $0x608] ss:$12 sps:$4 sm:$0xff]  }
0x1674   : > { %11565 = vmatprep.subr.bf16.mxu1 %v25319_v31  ;;  %v25333_v31 = vld [vmem:[%s32760_s15 + $0x548] ss:$12 sps:$4 sm:$0xff]  }
0x1676   : > { %11517 = vmatpush1.bf16.msra.mxu0 %v25258_v28 }
0x1677   : > { %11518 = vmatprep.subr.bf16.mxu0 %v25266_v45  ;;  %11566 = vmatpush1.bf16.msra.mxu1 %v25317_v5  ;;  %v25334_v5 = vld [vmem:[%s32760_s15 + $0x470] ss:$12 sps:$4 sm:$0xff]  }
0x1678   : > { %22439 = vmatprep.subr.bf16.mxu1 %v25322_v38  ;;  %v25335_v38 = vld [vmem:[%s32760_s15 + $0x620] ss:$12 sps:$4 sm:$0xff]  }
0x167a   : > { %11519 = vmatpush1.bf16.msra.mxu0 %v25264_v53  ;;  %v25316_v53 = vld [vmem:[%s32760_s15 + $0x4e8] ss:$12 sps:$4 sm:$0xff]  }
0x167b   : > { %11520 = vmatprep.subr.bf16.mxu0 %v25272_v60 }
0x167e   : > { %11521 = vmatpush1.bf16.msra.mxu0 %v25270_v56  ;;  %v25320_v56 = vld [vmem:[%s32760_s15 + $0x5c0] ss:$12 sps:$4 sm:$0xff]  }
0x167f   : > { %11522 = vmatprep.subr.bf16.mxu0 %v25278_v2  ;;  %v25321_v2 = vld [vmem:[%s32760_s15 + $0x500] ss:$12 sps:$4 sm:$0xff]  }
0x1682   : > { %11523 = vmatpush1.bf16.msra.mxu0 %v25276_v42  ;;  %v25323_v42 = vld [vmem:[%s32760_s15 + $0x5d8] ss:$12 sps:$4 sm:$0xff]  }
0x1683   : > { %11524 = vmatprep.subr.bf16.mxu0 %v25284_v63 }
0x1686   : > { %11525 = vmatpush1.bf16.msra.mxu0 %v25282_v15 }
0x1687   : > { %11576 = vmatprep.subr.bf16.mxu0 %v25293_v39  ;;  %v25325_v39 = vld [vmem:[%s32760_s15 + $0x518] ss:$12 sps:$4 sm:$0xff]  }
0x1704   : > { %v29809_v13 = vpop.f32.mrb[116].mxu0  ;;  %v10676_v21 = vpop.f32.mrb[144].mxu1 }
0x1705   : > { %v29811_v49 = vpack.c.bf16 %v10676_v21, %v10676_v21  ;;  %v29813_v52 = vpop.f32.mrb[117].mxu0  ;;  %v10678_v48 = vpop.f32.mrb[145].mxu1  ;;  %v25336_v21 = vld [vmem:[%s32760_s15 + $0x3b0] ss:$12 sps:$4 sm:$0xff]  }
0x1706   : > { %v29815_v32 = vpack.c.bf16 %v10678_v48, %v10678_v48  ;;  %v10404_v58 = vpop.f32.mrb[118].mxu0  ;;  %v10680_v34 = vpop.f32.mrb[146].mxu1  ;;  %v25337_v48 = vld [vmem:[%s32760_s15 + $0x560] ss:$12 sps:$4 sm:$0xff]  }
0x1707   : > { %v10405_v35 = vpop.f32.mrb[119].mxu0  ;;  %v10681_v22 = vpop.f32.mrb[147].mxu1  ;;  %v25339_v58 = vld [vmem:[%s32760_s15 + $0x638] ss:$12 sps:$4 sm:$0xff]  }
0x1708   : > { %11526 = vmatprep.mubr.bf16.mxu0 %v29815_v32  ;;  %v25341_v34 = vld [vmem:[%s32760_s15 + $0x578] ss:$12 sps:$4 sm:$0xff]   ;;  %v25342_v35 = vld [vmem:[%s32760_s15 + $0x4a0] ss:$12 sps:$4 sm:$0xff]  }
0x1709   : > { %11527 = vmatmul.mubr.bf16.vlgmr.msra.gmra.mrb[132].mxu0 %v29811_v49  ;;  %v25344_v22 = vld [vmem:[%s32760_s15 + $0x3e0] ss:$12 sps:$4 sm:$0xff]  }
0x170a   : > { %11577 = vmatpush1.bf16.msra.mxu0 %v25291_v19  ;;  %11608 = vmatprep.mubr.bf16.mxu0 %v32791_v37  ;;  %v25340_v19 = vld [vmem:[%s32760_s15 + $0x3c8] ss:$12 sps:$4 sm:$0xff]  }
0x170b   : > { %11578 = vmatprep.subr.bf16.mxu0 %v25299_v9  ;;  %v25343_v9 = vld [vmem:[%s32760_s15 + $0x650] ss:$12 sps:$4 sm:$0xff]  }
0x170c   : > { %v29832_v12 = vpop.f32.mrb[120].mxu0  ;;  %v10758_v6 = vpop.f32.mrb[148].mxu1 }
0x170d   : > { %v29834_v18 = vpop.f32.mrb[121].mxu0  ;;  %v23249_v41 = vpop.f32.mrb[149].mxu1  ;;  %v29850_v28 = vpack.c.bf16 %v10758_v6, %v10758_v6  ;;  %v25349_v6 = vld [vmem:[%s32760_s15 + $0x4] ss:$12 sps:$4 sm:$0xff]  }
0x170e   : > { %11579 = vmatpush1.bf16.msra.mxu0 %v25297_v3  ;;  %v10445_v46 = vpop.f32.mrb[122].mxu0  ;;  %v10761_v8 = vpop.f32.mrb[150].mxu1  ;;  %v25345_v3 = vld [vmem:[%s32760_s15 + $0x590] ss:$12 sps:$4 sm:$0xff]   ;;  %v25347_v41 = vld [vmem:[%s32760_s15] ss:$12 sps:$4 sm:$0xff]  }
0x170f   : > { %v10446_v1 = vpop.f32.mrb[123].mxu0  ;;  %11580 = vmatprep.subr.bf16.mxu0 %v25305_v44  ;;  %v23250_v43 = vpop.f32.mrb[151].mxu1  ;;  %v25346_v44 = vld [vmem:[%s32760_s15 + $0x4b8] ss:$12 sps:$4 sm:$0xff]   ;;  %v25354_v8 = vld [vmem:[%s32760_s15 + $0x1c] ss:$12 sps:$4 sm:$0xff]  }
0x1710   : > { %v25350_v46 = vld [vmem:[%s32760_s15 + $0x3f8] ss:$12 sps:$4 sm:$0xff]   ;;  %v29953_v1 = vpack.c.bf16 %v29813_v52, %v29813_v52  ;;  %v25355_v43 = vld [vmem:[%s32760_s15 + $0x410] ss:$12 sps:$4 sm:$0xff]  }
0x1711   : > { %v25356_v52 = vld [vmem:[%s32760_s15 + $0x30] ss:$12 sps:$4 sm:$0xff]  }
0x1712   : > { %11581 = vmatpush1.bf16.msra.mxu0 %v25303_v26  ;;  %v25351_v26 = vld [vmem:[%s32760_s15 + $0x4d0] ss:$12 sps:$4 sm:$0xff]  }
0x1713   : > { %11582 = vmatprep.subr.bf16.mxu0 %v25311_v61  ;;  %v25352_v61 = vld [vmem:[%s32760_s15 + $0x18] ss:$12 sps:$4 sm:$0xff]  }
0x1714   : > { %v29848_v40 = vpop.f32.mrb[124].mxu0 }
0x1715   : > { %v23243_v16 = vpop.f32.mrb[125].mxu0 }
0x1716   : > { %11583 = vmatpush1.bf16.msra.mxu0 %v25309_v47  ;;  %v10485_v45 = vpop.f32.mrb[126].mxu0  ;;  %v25358_v47 = vld [vmem:[%s32760_s15 + $0x34] ss:$12 sps:$4 sm:$0xff]   ;;  %v25362_v16 = vld [vmem:[%s32760_s15 + $0x4c] ss:$12 sps:$4 sm:$0xff]  }
0x1717   : > { %v23244_v60 = vpop.f32.mrb[127].mxu0  ;;  %22461 = vmatprep.subr.bf16.mxu0 %v25315_v11  ;;  %v25359_v11 = vld [vmem:[%s32760_s15 + $0x668] ss:$12 sps:$4 sm:$0xff]  }
0x1718   : > { %v25360_v45 = vld [vmem:[%s32760_s15 + $0x48] ss:$12 sps:$4 sm:$0xff]   ;;  %v25366_v60 = vld [vmem:[%s32760_s15 + $0x64] ss:$12 sps:$4 sm:$0xff]  }
0x1719   : > { %20701 = vmatmul.mubr.msk.bf16.vlgmr.msra.gmra.mrb[136].mxu0 %vm11490_vm12, %v29850_v28 }
0x171a   : > { %22462 = vmatpush3.bf16.msra.mxu0 %v25316_v53  ;;  %v25363_v53 = vld [vmem:[%s32760_s15 + $0x680] ss:$12 sps:$4 sm:$0xff]  }
0x171b   : > { %22463 = vmatprep.subr.bf16.mxu0 %v25320_v56  ;;  %v25367_v56 = vld [vmem:[%s32760_s15 + $0x698] ss:$12 sps:$4 sm:$0xff]  }
0x171c   : > { %v10717_v63 = vpop.f32.mrb[128].mxu0 }
0x171d   : > { %v10719_v33 = vpop.f32.mrb[129].mxu0  ;;  %v10766_v36 = vpack.c.bf16 %v10717_v63, %v10717_v63  ;;  %v25371_v63 = vld [vmem:[%s32760_s15 + $0x6b0] ss:$12 sps:$4 sm:$0xff]  }
0x171e   : > { %v10767_v15 = vpack.c.bf16 %v10719_v33, %v10719_v33  ;;  %22464 = vmatpush3.bf16.msra.mxu0 %v25321_v2  ;;  %v10721_v59 = vpop.f32.mrb[130].mxu0  ;;  %v25370_v2 = vld [vmem:[%s32760_s15 + $0x7c] ss:$12 sps:$4 sm:$0xff]   ;;  %v25374_v33 = vld [vmem:[%s32760_s15 + $0x94] ss:$12 sps:$4 sm:$0xff]  }
0x171f   : > { %v10722_v55 = vpop.f32.mrb[131].mxu0  ;;  %22465 = vmatprep.subr.bf16.mxu0 %v25323_v42  ;;  %v25368_v42 = vld [vmem:[%s32760_s15 + $0x78] ss:$12 sps:$4 sm:$0xff]   ;;  %v25372_v59 = vld [vmem:[%s32760_s15 + $0x90] ss:$12 sps:$4 sm:$0xff]  }
0x1720   : > { %11567 = vmatprep.mubr.bf16.mxu1 %v10767_v15  ;;  %11689 = vmatprep.mubr.bf16.mxu0 %v10767_v15  ;;  %v25377_v15 = vld [vmem:[%s32760_s15 + $0x184] ss:$12 sps:$4 sm:$0xff]   ;;  %v30025_v55 = vpack.c.bf16 %v29834_v18, %v29834_v18 }
0x1721   : > { %11568 = vmatmul.mubr.bf16.vlgmr.msra.gmra.mrb[152].mxu1 %v10766_v36  ;;  %v25386_v18 = vld [vmem:[%s32760_s15 + $0xc4] ss:$12 sps:$4 sm:$0xff]  }
0x1722   : > { %22440 = vmatpush3.bf16.msra.mxu1 %v25324_v10  ;;  %22466 = vmatpush3.bf16.msra.mxu0 %v25325_v39  ;;  %v25375_v10 = vld [vmem:[%s32760_s15 + $0x180] ss:$12 sps:$4 sm:$0xff]  }
0x1723   : > { %11649 = vmatprep.mubr.bf16.mxu1 %v29815_v32  ;;  %22441 = vmatprep.subr.bf16.mxu1 %v25326_v14  ;;  %v25338_v32 = vld [vmem:[%s32760_s15 + $0x488] ss:$12 sps:$4 sm:$0xff]   ;;  %v25380_v39 = vld [vmem:[%s32760_s15 + $0xac] ss:$12 sps:$4 sm:$0xff]  }
0x1724   : > { %22467 = vmatprep.subr.bf16.mxu0 %v25327_v23  ;;  %v25378_v14 = vld [vmem:[%s32760_s15 + $0xa8] ss:$12 sps:$4 sm:$0xff]   ;;  %v25381_v23 = vld [vmem:[%s32760_s15 + $0x198] ss:$12 sps:$4 sm:$0xff]  }
0x1726   : > { %22442 = vmatpush3.bf16.msra.mxu1 %v25328_v51  ;;  %22468 = vmatpush3.bf16.msra.mxu0 %v25329_v25  ;;  %v25384_v51 = vld [vmem:[%s32760_s15 + $0xc0] ss:$12 sps:$4 sm:$0xff]   ;;  %v25387_v25 = vld [vmem:[%s32760_s15 + $0x1b0] ss:$12 sps:$4 sm:$0xff]  }
0x1727   : > { %22443 = vmatprep.subr.bf16.mxu1 %v25330_v62  ;;  %22469 = vmatprep.subr.bf16.mxu0 %v25331_v50  ;;  %v25392_v62 = vld [vmem:[%s32760_s15 + $0xdc] ss:$12 sps:$4 sm:$0xff]   ;;  %v25395_v50 = vld [vmem:[%s32760_s15 + $0x1cc] ss:$12 sps:$4 sm:$0xff]  }
0x172a   : > { %22444 = vmatpush3.bf16.msra.mxu1 %v25332_v17  ;;  %22470 = vmatpush3.bf16.msra.mxu0 %v25333_v31  ;;  %v25390_v17 = vld [vmem:[%s32760_s15 + $0xd8] ss:$12 sps:$4 sm:$0xff]   ;;  %v25393_v31 = vld [vmem:[%s32760_s15 + $0x1c8] ss:$12 sps:$4 sm:$0xff]  }
0x172b   : > { %22445 = vmatprep.subr.bf16.mxu1 %v25334_v5  ;;  %22471 = vmatprep.subr.bf16.mxu0 %v25335_v38  ;;  %v25398_v5 = vld [vmem:[%s32760_s15 + $0xf4] ss:$12 sps:$4 sm:$0xff]   ;;  %v25401_v38 = vld [vmem:[%s32760_s15 + $0x1e4] ss:$12 sps:$4 sm:$0xff]  }
0x172e   : > { %22446 = vmatpush3.bf16.msra.mxu1 %v25336_v21  ;;  %22472 = vmatpush3.bf16.msra.mxu0 %v25337_v48  ;;  %v25396_v21 = vld [vmem:[%s32760_s15 + $0xf0] ss:$12 sps:$4 sm:$0xff]   ;;  %v25399_v48 = vld [vmem:[%s32760_s15 + $0x1e0] ss:$12 sps:$4 sm:$0xff]  }
0x172f   : > { %22447 = vmatprep.subr.bf16.mxu1 %v25338_v32  ;;  %22473 = vmatprep.subr.bf16.mxu0 %v25339_v58  ;;  %v25404_v32 = vld [vmem:[%s32760_s15 + $0x10c] ss:$12 sps:$4 sm:$0xff]   ;;  %v25407_v58 = vld [vmem:[%s32760_s15 + $0x1fc] ss:$12 sps:$4 sm:$0xff]  }
0x1732   : > { %22448 = vmatpush3.bf16.msra.mxu1 %v25340_v19  ;;  %22474 = vmatpush3.bf16.msra.mxu0 %v25341_v34  ;;  %v25402_v19 = vld [vmem:[%s32760_s15 + $0x108] ss:$12 sps:$4 sm:$0xff]   ;;  %v25405_v34 = vld [vmem:[%s32760_s15 + $0x1f8] ss:$12 sps:$4 sm:$0xff]  }
0x1733   : > { %22449 = vmatprep.subr.bf16.mxu1 %v25342_v35  ;;  %22475 = vmatprep.subr.bf16.mxu0 %v25343_v9  ;;  %v25410_v35 = vld [vmem:[%s32760_s15 + $0x124] ss:$12 sps:$4 sm:$0xff]   ;;  %v25413_v9 = vld [vmem:[%s32760_s15 + $0x214] ss:$12 sps:$4 sm:$0xff]  }
0x1736   : > { %22450 = vmatpush3.bf16.msra.mxu1 %v25344_v22  ;;  %22476 = vmatpush3.bf16.msra.mxu0 %v25345_v3  ;;  %v25408_v22 = vld [vmem:[%s32760_s15 + $0x120] ss:$12 sps:$4 sm:$0xff]   ;;  %v25411_v3 = vld [vmem:[%s32760_s15 + $0x210] ss:$12 sps:$4 sm:$0xff]  }
0x1737   : > { %22451 = vmatprep.subr.bf16.mxu1 %v25346_v44  ;;  %12316 = vmatprep.subr.bf16.mxu0 %v25349_v6  ;;  %v25416_v44 = vld [vmem:[%s32760_s15 + $0x13c] ss:$12 sps:$4 sm:$0xff]   ;;  %v25419_v6 = vld [vmem:[%s32760_s15 + $0x22c] ss:$12 sps:$4 sm:$0xff]  }
0x1739   : > { %11690 = vmatmul.mubr.bf16.vlgmr.msra.gmra.mrb[140].mxu0 %v10766_v36  ;;  %v25383_v36 = vld [vmem:[%s32760_s15 + $0x19c] ss:$12 sps:$4 sm:$0xff]  }
0x173a   : > { %22452 = vmatpush3.bf16.msra.mxu1 %v25350_v46  ;;  %12317 = vmatpush1.bf16.msra.mxu0 %v25347_v41  ;;  %v25414_v41 = vld [vmem:[%s32760_s15 + $0x138] ss:$12 sps:$4 sm:$0xff]   ;;  %v25417_v46 = vld [vmem:[%s32760_s15 + $0x228] ss:$12 sps:$4 sm:$0xff]  }
0x173b   : > { %12348 = vmatprep.mubr.bf16.mxu0 %v29953_v1  ;;  %22453 = vmatprep.subr.bf16.mxu1 %v25351_v26  ;;  %v25422_v26 = vld [vmem:[%s32760_s15 + $0x154] ss:$12 sps:$4 sm:$0xff]  }
0x173c   : > { %12318 = vmatprep.subr.bf16.mxu0 %v25354_v8  ;;  %v25425_v8 = vld [vmem:[%s32760_s15 + $0x244] ss:$12 sps:$4 sm:$0xff]  }
0x173e   : > { %22454 = vmatpush3.bf16.msra.mxu1 %v25355_v43  ;;  %12319 = vmatpush1.bf16.msra.mxu0 %v25352_v61  ;;  %v25420_v61 = vld [vmem:[%s32760_s15 + $0x150] ss:$12 sps:$4 sm:$0xff]   ;;  %v25423_v43 = vld [vmem:[%s32760_s15 + $0x240] ss:$12 sps:$4 sm:$0xff]  }
0x173f   : > { %23251 = vmatprep.subr.bf16.mxu1 %v27397_v0  ;;  %12320 = vmatprep.subr.bf16.mxu0 %v25358_v47  ;;  %v25428_v47 = vld [vmem:[%s32760_s15 + $0x16c] ss:$12 sps:$4 sm:$0xff]  }
0x1741   : > { %11650 = vmatmul.mubr.bf16.vlgmr.msra.gmra.mrb[156].mxu1 %v29811_v49  ;;  %v25364_v49 = vld [vmem:[%s32760_s15 + $0x60] ss:$12 sps:$4 sm:$0xff]  }
0x1742   : > { %23252 = vmatpush3.bf16.msra.mxu1 %v25359_v11  ;;  %12321 = vmatpush1.bf16.msra.mxu0 %v25356_v52  ;;  %v25431_v52 = vld [vmem:[%s32760_s15 + $0x25c] ss:$12 sps:$4 sm:$0xff]  }
0x1743   : > { %23253 = vmatprep.subr.bf16.mxu1 %v27397_v0  ;;  %12322 = vmatprep.subr.bf16.mxu0 %v25362_v16  ;;  %v25426_v11 = vld [vmem:[%s32760_s15 + $0x168] ss:$12 sps:$4 sm:$0xff]   ;;  %v25429_v16 = vld [vmem:[%s32760_s15 + $0x258] ss:$12 sps:$4 sm:$0xff]  }
0x1744   : > { %23259 = vmatprep.mubr.msk.bf16.mxu1 %vm26394_vm0, %v27397_v0 }
0x1746   : > { %23254 = vmatpush3.bf16.msra.mxu1 %v25363_v53  ;;  %12323 = vmatpush1.bf16.msra.mxu0 %v25360_v45  ;;  %v25434_v45 = vld [vmem:[%s32760_s15 + $0x274] ss:$12 sps:$4 sm:$0xff]   ;;  %v25437_v53 = vld [vmem:[%s32760_s15 + $0x304] ss:$12 sps:$4 sm:$0xff]  }
0x1747   : > { %23255 = vmatprep.subr.bf16.mxu1 %v27397_v0  ;;  %12324 = vmatprep.subr.bf16.mxu0 %v25366_v60  ;;  %v25432_v60 = vld [vmem:[%s32760_s15 + $0x270] ss:$12 sps:$4 sm:$0xff]  }
0x174a   : > { %23256 = vmatpush3.bf16.msra.mxu1 %v25367_v56  ;;  %12325 = vmatpush1.bf16.msra.mxu0 %v25364_v49  ;;  %v25435_v49 = vld [vmem:[%s32760_s15 + $0x300] ss:$12 sps:$4 sm:$0xff]   ;;  %v30146_v56 = vpack.c.bf16 %v29809_v13, %v29809_v13  ;;  %v25441_v13 = vld [vmem:[%s32760_s15 + $0x318] ss:$12 sps:$4 sm:$0xff]  }
0x174b   : > { %23257 = vmatprep.subr.bf16.mxu1 %v27397_v0  ;;  %12326 = vmatprep.subr.bf16.mxu0 %v25370_v2  ;;  %v25440_v2 = vld [vmem:[%s32760_s15 + $0x28c] ss:$12 sps:$4 sm:$0xff]  }
0x174e   : > { %23258 = vmatpush3.bf16.msra.mxu1 %v25371_v63  ;;  %12327 = vmatpush1.bf16.msra.mxu0 %v25368_v42  ;;  %v25443_v42 = vld [vmem:[%s32760_s15 + $0x31c] ss:$12 sps:$4 sm:$0xff]  }
0x174f   : > { %12328 = vmatprep.subr.bf16.mxu0 %v25374_v33  ;;  %12357 = vmatprep.subr.bf16.mxu1 %v25377_v15  ;;  %v25438_v63 = vld [vmem:[%s32760_s15 + $0x288] ss:$12 sps:$4 sm:$0xff]   ;;  %v25446_v33 = vld [vmem:[%s32760_s15 + $0x2a4] ss:$12 sps:$4 sm:$0xff]  }
0x1750   : > { %v25449_v15 = vld [vmem:[%s32760_s15 + $0x334] ss:$12 sps:$4 sm:$0xff]  }
0x1751   : > { %23260 = vmatmul.mubr.msk.bf16.vlgmr.msra.gmra.mrb[160].mxu1 %vm11490_vm12, %v29850_v28  ;;  %v25389_v28 = vld [vmem:[%s32760_s15 + $0x1b4] ss:$12 sps:$4 sm:$0xff]  }
0x1752   : > { %12329 = vmatpush1.bf16.msra.mxu0 %v25372_v59  ;;  %12358 = vmatpush1.bf16.msra.mxu1 %v25375_v10  ;;  %v25444_v59 = vld [vmem:[%s32760_s15 + $0x2a0] ss:$12 sps:$4 sm:$0xff]   ;;  %v25447_v10 = vld [vmem:[%s32760_s15 + $0x330] ss:$12 sps:$4 sm:$0xff]  }
0x1753   : > { %12389 = vmatprep.mubr.bf16.mxu1 %v30025_v55  ;;  %12330 = vmatprep.subr.bf16.mxu0 %v25380_v39  ;;  %v25452_v39 = vld [vmem:[%s32760_s15 + $0x2bc] ss:$12 sps:$4 sm:$0xff]  }
0x1754   : > { %12359 = vmatprep.subr.bf16.mxu1 %v25383_v36  ;;  %v25455_v36 = vld [vmem:[%s32760_s15 + $0x34c] ss:$12 sps:$4 sm:$0xff]  }
0x1756   : > { %12331 = vmatpush1.bf16.msra.mxu0 %v25378_v14  ;;  %12360 = vmatpush1.bf16.msra.mxu1 %v25381_v23  ;;  %v25450_v14 = vld [vmem:[%s32760_s15 + $0x2b8] ss:$12 sps:$4 sm:$0xff]   ;;  %v25453_v23 = vld [vmem:[%s32760_s15 + $0x348] ss:$12 sps:$4 sm:$0xff]  }
0x1757   : > { %12332 = vmatprep.subr.bf16.mxu0 %v25386_v18  ;;  %12361 = vmatprep.subr.bf16.mxu1 %v25389_v28  ;;  %v25458_v18 = vld [vmem:[%s32760_s15 + $0x2d4] ss:$12 sps:$4 sm:$0xff]  }
0x1758   : > { %v25459_v28 = vld [vmem:[%s32760_s15 + $0x248] ss:$12 sps:$4 sm:$0xff]  }
0x175a   : > { %12333 = vmatpush1.bf16.msra.mxu0 %v25384_v51  ;;  %12362 = vmatpush1.bf16.msra.mxu1 %v25387_v25  ;;  %v25456_v51 = vld [vmem:[%s32760_s15 + $0x2d0] ss:$12 sps:$4 sm:$0xff]   ;;  %v25460_v25 = vld [vmem:[%s32760_s15 + $0x188] ss:$12 sps:$4 sm:$0xff]  }
0x175b   : > { %12334 = vmatprep.subr.bf16.mxu0 %v25392_v62  ;;  %12363 = vmatprep.subr.bf16.mxu1 %v25395_v50  ;;  %v30200_v62 = vpack.c.bf16 %v29848_v40, %v29848_v40  ;;  %v25463_v50 = vld [vmem:[%s32760_s15 + $0x2ec] ss:$12 sps:$4 sm:$0xff]   ;;  %v25461_v40 = vld [vmem:[%s32760_s15 + $0x2e8] ss:$12 sps:$4 sm:$0xff]  }
0x175e   : > { %12335 = vmatpush1.bf16.msra.mxu0 %v25390_v17  ;;  %12364 = vmatpush1.bf16.msra.mxu1 %v25393_v31  ;;  %v25464_v17 = vld [vmem:[%s32760_s15 + $0x260] ss:$12 sps:$4 sm:$0xff]  }
0x175f   : > { %12336 = vmatprep.subr.bf16.mxu0 %v25398_v5  ;;  %12365 = vmatprep.subr.bf16.mxu1 %v25401_v38  ;;  %v25465_v31 = vld [vmem:[%s32760_s15 + $0x1a0] ss:$12 sps:$4 sm:$0xff]   ;;  %v25466_v5 = vld [vmem:[%s32760_s15 + $0xc8] ss:$12 sps:$4 sm:$0xff]   ;;  %v25467_v38 = vld [vmem:[%s32760_s15 + $0x278] ss:$12 sps:$4 sm:$0xff]  }
0x1762   : > { %12337 = vmatpush1.bf16.msra.mxu0 %v25396_v21  ;;  %12366 = vmatpush1.bf16.msra.mxu1 %v25399_v48  ;;  %v25468_v21 = vld [vmem:[%s32760_s15 + $0x8] ss:$12 sps:$4 sm:$0xff]   ;;  %v10490_v48 = vpack.c.bf16 %v29832_v12, %v29832_v12  ;;  %v25472_v12 = vld [vmem:[%s32760_s15 + $0x20] ss:$12 sps:$4 sm:$0xff]  }
0x1763   : > { %12338 = vmatprep.subr.bf16.mxu0 %v25404_v32  ;;  %12367 = vmatprep.subr.bf16.mxu1 %v25407_v58  ;;  %v25470_v32 = vld [vmem:[%s32760_s15 + $0xe0] ss:$12 sps:$4 sm:$0xff]   ;;  %v25471_v58 = vld [vmem:[%s32760_s15 + $0x290] ss:$12 sps:$4 sm:$0xff]  }
0x1766   : > { %12339 = vmatpush1.bf16.msra.mxu0 %v25402_v19  ;;  %12368 = vmatpush1.bf16.msra.mxu1 %v25405_v34  ;;  %v25473_v19 = vld [vmem:[%s32760_s15 + $0x1d0] ss:$12 sps:$4 sm:$0xff]   ;;  %v25474_v34 = vld [vmem:[%s32760_s15 + $0xf8] ss:$12 sps:$4 sm:$0xff]  }
0x1767   : > { %12340 = vmatprep.subr.bf16.mxu0 %v25410_v35  ;;  %12369 = vmatprep.subr.bf16.mxu1 %v25413_v9  ;;  %v25475_v35 = vld [vmem:[%s32760_s15 + $0x2a8] ss:$12 sps:$4 sm:$0xff]  }
0x1768   : > { %v25477_v9 = vld [vmem:[%s32760_s15 + $0x1e8] ss:$12 sps:$4 sm:$0xff]  }
0x176a   : > { %12341 = vmatpush1.bf16.msra.mxu0 %v25408_v22  ;;  %12370 = vmatpush1.bf16.msra.mxu1 %v25411_v3  ;;  %v25478_v22 = vld [vmem:[%s32760_s15 + $0x110] ss:$12 sps:$4 sm:$0xff]   ;;  %v25479_v3 = vld [vmem:[%s32760_s15 + $0x2c0] ss:$12 sps:$4 sm:$0xff]  }
0x176b   : > { %12342 = vmatprep.subr.bf16.mxu0 %v25416_v44  ;;  %12371 = vmatprep.subr.bf16.mxu1 %v25419_v6  ;;  %v25480_v44 = vld [vmem:[%s32760_s15 + $0x50] ss:$12 sps:$4 sm:$0xff]   ;;  %v25481_v6 = vld [vmem:[%s32760_s15 + $0x200] ss:$12 sps:$4 sm:$0xff]  }
0x176e   : > { %12343 = vmatpush1.bf16.msra.mxu0 %v25414_v41  ;;  %12372 = vmatpush1.bf16.msra.mxu1 %v25417_v46  ;;  %v25482_v41 = vld [vmem:[%s32760_s15 + $0x128] ss:$12 sps:$4 sm:$0xff]   ;;  %v25483_v46 = vld [vmem:[%s32760_s15 + $0x2d8] ss:$12 sps:$4 sm:$0xff]  }
0x176f   : > { %12344 = vmatprep.subr.bf16.mxu0 %v25422_v26  ;;  %12373 = vmatprep.subr.bf16.mxu1 %v25425_v8  ;;  %v25484_v26 = vld [vmem:[%s32760_s15 + $0x68] ss:$12 sps:$4 sm:$0xff]   ;;  %v25485_v8 = vld [vmem:[%s32760_s15 + $0x218] ss:$12 sps:$4 sm:$0xff]  }
0x1772   : > { %12345 = vmatpush1.bf16.msra.mxu0 %v25420_v61  ;;  %12374 = vmatpush1.bf16.msra.mxu1 %v25423_v43  ;;  %v25486_v61 = vld [vmem:[%s32760_s15 + $0x140] ss:$12 sps:$4 sm:$0xff]   ;;  %v25487_v43 = vld [vmem:[%s32760_s15 + $0x2f0] ss:$12 sps:$4 sm:$0xff]  }
0x1773   : > { %12346 = vmatprep.subr.bf16.mxu0 %v25428_v47  ;;  %12375 = vmatprep.subr.bf16.mxu1 %v25431_v52  ;;  %v25488_v47 = vld [vmem:[%s32760_s15 + $0x80] ss:$12 sps:$4 sm:$0xff]   ;;  %v25489_v52 = vld [vmem:[%s32760_s15 + $0x230] ss:$12 sps:$4 sm:$0xff]  }
0x1776   : > { %12347 = vmatpush1.bf16.msra.mxu0 %v25426_v11  ;;  %12376 = vmatpush1.bf16.msra.mxu1 %v25429_v16  ;;  %v25490_v11 = vld [vmem:[%s32760_s15 + $0x158] ss:$12 sps:$4 sm:$0xff]  }
0x1777   : > { %12377 = vmatprep.subr.bf16.mxu1 %v25434_v45  ;;  %12398 = vmatprep.subr.bf16.mxu0 %v25437_v53  ;;  %v25491_v16 = vld [vmem:[%s32760_s15 + $0x98] ss:$12 sps:$4 sm:$0xff]   ;;  %v25492_v45 = vld [vmem:[%s32760_s15 + $0x170] ss:$12 sps:$4 sm:$0xff]  }
0x1778   : > { %v25493_v53 = vld [vmem:[%s32760_s15 + $0xb0] ss:$12 sps:$4 sm:$0xff]  }
0x1779   : > { %12349 = vmatmul.mubr.bf16.vlgmr.msra.gmra.mrb[144].mxu0 %v30146_v56 }
0x177a   : > { %12378 = vmatpush1.bf16.msra.mxu1 %v25432_v60  ;;  %12399 = vmatpush1.bf16.msra.mxu0 %v25435_v49  ;;  %v25494_v60 = vld [vmem:[%s32760_s15 + $0x308] ss:$12 sps:$4 sm:$0xff]   ;;  %v12560_v49 = vld [vmem:[#allocation17 + $0x2] sm:$0x1] }
0x177b   : > { %12379 = vmatprep.subr.bf16.mxu1 %v25440_v2  ;;  %12400 = vmatprep.subr.bf16.mxu0 %v25443_v42  ;;  %v25495_v2 = vld [vmem:[%s32760_s15 + $0x320] ss:$12 sps:$4 sm:$0xff]   ;;  %v25497_v42 = vld [vmem:[%s32760_s15 + $0x350] ss:$12 sps:$4 sm:$0xff]  }
0x177c   : > { %12430 = vmatprep.mubr.bf16.mxu0 %v32791_v37 }
0x177e   : > { %12380 = vmatpush1.bf16.msra.mxu1 %v25438_v63  ;;  %12401 = vmatpush1.bf16.msra.mxu0 %v25441_v13  ;;  %v25500_v63 = vld [vmem:[%s32760_s15 + $0x6c4] ss:$12 sps:$4 sm:$0xff]   ;;  %v25498_v13 = vld [vmem:[%s32760_s15 + $0x6c0] ss:$12 sps:$4 sm:$0xff]  }
0x177f   : > { %12381 = vmatprep.subr.bf16.mxu1 %v25446_v33  ;;  %12402 = vmatprep.subr.bf16.mxu0 %v25449_v15  ;;  %v25503_v33 = vld [vmem:[%s32760_s15 + $0x6dc] ss:$12 sps:$4 sm:$0xff]   ;;  %v25501_v15 = vld [vmem:[%s32760_s15 + $0x6d8] ss:$12 sps:$4 sm:$0xff]  }
0x1782   : > { %12382 = vmatpush1.bf16.msra.mxu1 %v25444_v59  ;;  %12403 = vmatpush1.bf16.msra.mxu0 %v25447_v10  ;;  %v25504_v59 = vld [vmem:[%s32760_s15 + $0x6f0] ss:$12 sps:$4 sm:$0xff]   ;;  %v25506_v10 = vld [vmem:[%s32760_s15 + $0x6f4] ss:$12 sps:$4 sm:$0xff]  }
0x1783   : > { %12383 = vmatprep.subr.bf16.mxu1 %v25452_v39  ;;  %12404 = vmatprep.subr.bf16.mxu0 %v25455_v36  ;;  %v25509_v39 = vld [vmem:[%s32760_s15 + $0x70c] ss:$12 sps:$4 sm:$0xff]   ;;  %v25507_v36 = vld [vmem:[%s32760_s15 + $0x708] ss:$12 sps:$4 sm:$0xff]  }
0x1786   : > { %12384 = vmatpush1.bf16.msra.mxu1 %v25450_v14  ;;  %12405 = vmatpush1.bf16.msra.mxu0 %v25453_v23  ;;  %v25512_v14 = vld [vmem:[%s32760_s15 + $0x724] ss:$12 sps:$4 sm:$0xff]   ;;  %v25510_v23 = vld [vmem:[%s32760_s15 + $0x720] ss:$12 sps:$4 sm:$0xff]  }
0x1787   : > { %12385 = vmatprep.subr.bf16.mxu1 %v25458_v18  ;;  %22510 = vmatprep.subr.bf16.mxu0 %v25459_v28  ;;  %v25515_v18 = vld [vmem:[%s32760_s15 + $0x73c] ss:$12 sps:$4 sm:$0xff]  }
0x1789   : > { %20811 = vmatmul.mubr.msk.bf16.vlgmr.msra.gmra.mrb[148].mxu0 %vm11490_vm12, %v30200_v62 }
0x178a   : > { %12386 = vmatpush1.bf16.msra.mxu1 %v25456_v51  ;;  %22511 = vmatpush3.bf16.msra.mxu0 %v25460_v25  ;;  %v25513_v51 = vld [vmem:[%s32760_s15 + $0x738] ss:$12 sps:$4 sm:$0xff]  }
0x178b   : > { %12511 = vmatprep.mubr.bf16.mxu0 %v30025_v55  ;;  %12387 = vmatprep.subr.bf16.mxu1 %v25463_v50  ;;  %v25469_v55 = vld [vmem:[%s32760_s15 + $0x1b8] ss:$12 sps:$4 sm:$0xff]  }
0x178c   : > { %22512 = vmatprep.subr.bf16.mxu0 %v25464_v17  ;;  %v25516_v17 = vld [vmem:[%s32760_s15 + $0x750] ss:$12 sps:$4 sm:$0xff]  }
0x178e   : > { %12388 = vmatpush1.bf16.msra.mxu1 %v25461_v40  ;;  %22513 = vmatpush3.bf16.msra.mxu0 %v25465_v31  ;;  %v25518_v40 = vld [vmem:[%s32760_s15 + $0x754] ss:$12 sps:$4 sm:$0xff]  }
0x178f   : > { %22488 = vmatprep.subr.bf16.mxu1 %v25466_v5  ;;  %22514 = vmatprep.subr.bf16.mxu0 %v25467_v38  ;;  %v25519_v31 = vld [vmem:[%s32760_s15 + $0x840] ss:$12 sps:$4 sm:$0xff]   ;;  %v25521_v5 = vld [vmem:[%s32760_s15 + $0x844] ss:$12 sps:$4 sm:$0xff]  }
0x1790   : > { %v25524_v38 = vld [vmem:[%s32760_s15 + $0x76c] ss:$12 sps:$4 sm:$0xff]  }
0x1791   : > { %12390 = vmatmul.mubr.bf16.vlgmr.msra.gmra.mrb[164].mxu1 %v10490_v48 }
0x1792   : > { %22489 = vmatpush3.bf16.msra.mxu1 %v25468_v21  ;;  %12471 = vmatprep.mubr.bf16.mxu1 %v29953_v1  ;;  %v25476_v1 = vld [vmem:[%s32760_s15 + $0x38] ss:$12 sps:$4 sm:$0xff]   ;;  %v25527_v21 = vld [vmem:[%s32760_s15 + $0x85c] ss:$12 sps:$4 sm:$0xff]  }
0x1793   : > { %22515 = vmatpush3.bf16.msra.mxu0 %v25469_v55  ;;  %22490 = vmatprep.subr.bf16.mxu1 %v25470_v32  ;;  %v25525_v55 = vld [vmem:[%s32760_s15 + $0x858] ss:$12 sps:$4 sm:$0xff]  }
0x1794   : > { %22516 = vmatprep.subr.bf16.mxu0 %v25471_v58  ;;  %v25530_v32 = vld [vmem:[%s32760_s15 + $0x784] ss:$12 sps:$4 sm:$0xff]   ;;  %v25533_v58 = vld [vmem:[%s32760_s15 + $0x874] ss:$12 sps:$4 sm:$0xff]  }
0x1796   : > { %22491 = vmatpush3.bf16.msra.mxu1 %v25472_v12  ;;  %v25528_v12 = vld [vmem:[%s32760_s15 + $0x780] ss:$12 sps:$4 sm:$0xff]  }
0x1797   : > { %22517 = vmatpush3.bf16.msra.mxu0 %v25473_v19  ;;  %22492 = vmatprep.subr.bf16.mxu1 %v25474_v34  ;;  %v25531_v19 = vld [vmem:[%s32760_s15 + $0x870] ss:$12 sps:$4 sm:$0xff]  }
0x1798   : > { %22518 = vmatprep.subr.bf16.mxu0 %v25475_v35  ;;  %v25536_v34 = vld [vmem:[%s32760_s15 + $0x79c] ss:$12 sps:$4 sm:$0xff]   ;;  %v25539_v35 = vld [vmem:[%s32760_s15 + $0x88c] ss:$12 sps:$4 sm:$0xff]  }
0x179a   : > { %22493 = vmatpush3.bf16.msra.mxu1 %v25476_v1  ;;  %v25534_v1 = vld [vmem:[%s32760_s15 + $0x798] ss:$12 sps:$4 sm:$0xff]  }
0x179b   : > { %22519 = vmatpush3.bf16.msra.mxu0 %v25477_v9  ;;  %22494 = vmatprep.subr.bf16.mxu1 %v25478_v22  ;;  %v25537_v9 = vld [vmem:[%s32760_s15 + $0x888] ss:$12 sps:$4 sm:$0xff]  }
0x179c   : > { %22520 = vmatprep.subr.bf16.mxu0 %v25479_v3  ;;  %v25542_v22 = vld [vmem:[%s32760_s15 + $0x7b4] ss:$12 sps:$4 sm:$0xff]  }
0x179e   : > { %22495 = vmatpush3.bf16.msra.mxu1 %v25480_v44  ;;  %v25545_v44 = vld [vmem:[%s32760_s15 + $0x8a4] ss:$12 sps:$4 sm:$0xff]  }
0x179f   : > { %22521 = vmatpush3.bf16.msra.mxu0 %v25481_v6  ;;  %22496 = vmatprep.subr.bf16.mxu1 %v25482_v41 }
0x17a0   : > { %22522 = vmatprep.subr.bf16.mxu0 %v25483_v46  ;;  %v25540_v46 = vld [vmem:[%s32760_s15 + $0x7b0] ss:$12 sps:$4 sm:$0xff]  }
0x17a2   : > { %22497 = vmatpush3.bf16.msra.mxu1 %v25484_v26 }
0x17a3   : > { %22523 = vmatpush3.bf16.msra.mxu0 %v25485_v8  ;;  %22498 = vmatprep.subr.bf16.mxu1 %v25486_v61  ;;  %v25543_v8 = vld [vmem:[%s32760_s15 + $0x8a0] ss:$12 sps:$4 sm:$0xff]  }
0x17a4   : > { %22524 = vmatprep.subr.bf16.mxu0 %v25487_v43  ;;  %v25548_v61 = vld [vmem:[%s32760_s15 + $0x7cc] ss:$12 sps:$4 sm:$0xff]   ;;  %v25551_v43 = vld [vmem:[%s32760_s15 + $0x8bc] ss:$12 sps:$4 sm:$0xff]  }
0x17a6   : > { %22499 = vmatpush3.bf16.msra.mxu1 %v25488_v47  ;;  %v25546_v47 = vld [vmem:[%s32760_s15 + $0x7c8] ss:$12 sps:$4 sm:$0xff]  }
0x17a7   : > { %22525 = vmatpush3.bf16.msra.mxu0 %v25489_v52  ;;  %22500 = vmatprep.subr.bf16.mxu1 %v25490_v11  ;;  %v25549_v52 = vld [vmem:[%s32760_s15 + $0x8b8] ss:$12 sps:$4 sm:$0xff]  }
0x17a8   : > { %20813 = vmatprep.subr.msk.bf16.mxu0 %vm1124_vm3, %v29570_v20  ;;  %v25554_v11 = vld [vmem:[%s32760_s15 + $0x7e4] ss:$12 sps:$4 sm:$0xff]  }
0x17aa   : > { %12512 = vmatmul.mubr.bf16.vlgmr.msra.gmra.mrb[152].mxu0 %v10490_v48  ;;  %22501 = vmatpush3.bf16.msra.mxu1 %v25491_v16  ;;  %v25522_v48 = vld [vmem:[%s32760_s15 + $0x768] ss:$12 sps:$4 sm:$0xff]  }
0x17ab   : > { %12565 = vmatpush1.bf16.msra.mxu0 %v29577_v57  ;;  %22502 = vmatprep.subr.bf16.mxu1 %v25492_v45  ;;  %v25557_v45 = vld [vmem:[%s32760_s15 + $0x8d4] ss:$12 sps:$4 sm:$0xff]  }
0x17ac   : > { %12596 = vmatprep.mubr.bf16.mxu0 %v32791_v37  ;;  %23275 = vmatprep.subr.bf16.mxu0 %v27397_v0 }
0x17ae   : > { %22503 = vmatpush3.bf16.msra.mxu1 %v25493_v53 }
0x17af   : > { %23263 = vmatprep.subr.bf16.mxu1 %v27397_v0 }
0x17b1   : > { %12472 = vmatmul.mubr.bf16.vlgmr.msra.gmra.mrb[168].mxu1 %v30146_v56  ;;  %v25496_v56 = vld [vmem:[%s32760_s15 + $0x338] ss:$12 sps:$4 sm:$0xff]  }
0x17b2   : > { %20814 = vmatmul.mubr.msk.bf16.vlgmr.msra.gmra.mrb[156].mxu0 %vm10347_vm1, %v12560_v49  ;;  %23264 = vmatpush3.bf16.msra.mxu1 %v25494_v60 }
0x17b3   : > { %23265 = vmatprep.subr.bf16.mxu1 %v27397_v0  ;;  %23271 = vmatprep.mubr.msk.bf16.mxu1 %vm26394_vm0, %v27397_v0 }
0x17b4   : > { %23276 = vmatpush3.bf16.msra.mxu0 %v29597_v4  ;;  %23277 = vmatprep.mubr.msk.bf16.mxu0 %vm26394_vm0, %v27397_v0 }
0x17b5   : > { %13456 = vmatprep.subr.bf16.mxu0 %v25521_v5  ;;  %v25584_v5 = vld [vmem:[%s32760_s15 + $0x94c] ss:$12 sps:$4 sm:$0xff]  }
0x17b6   : > { %23266 = vmatpush3.bf16.msra.mxu1 %v25495_v2 }
0x17b7   : > { %23267 = vmatprep.subr.bf16.mxu1 %v27397_v0 }
0x17ba   : > { %23268 = vmatpush3.bf16.msra.mxu1 %v25496_v56  ;;  %23278 = vmatmul.mubr.msk.bf16.vlgmr.msra.gmra.mrb[160].mxu0 %vm10347_vm1, %v12560_v49  ;;  %v25552_v56 = vld [vmem:[%s32760_s15 + $0x7e0] ss:$12 sps:$4 sm:$0xff]  }
0x17bb   : > { %23269 = vmatprep.subr.bf16.mxu1 %v27397_v0  ;;  %13457 = vmatpush1.bf16.msra.mxu0 %v25519_v31  ;;  %v25582_v31 = vld [vmem:[%s32760_s15 + $0x948] ss:$12 sps:$4 sm:$0xff]  }
0x17bc   : > { %13458 = vmatprep.subr.bf16.mxu0 %v25527_v21 }
0x17be   : > { %23270 = vmatpush3.bf16.msra.mxu1 %v25497_v42 }
0x17bf   : > { %20815 = vmatprep.subr.msk.bf16.mxu1 %vm1124_vm3, %v29579_v54  ;;  %13459 = vmatpush1.bf16.msra.mxu0 %v25525_v55 }
0x17c0   : > { %13460 = vmatprep.subr.bf16.mxu0 %v25533_v58  ;;  %v25588_v58 = vld [vmem:[%s32760_s15 + $0x960] ss:$12 sps:$4 sm:$0xff]  }
0x17c1   : > { %23272 = vmatmul.mubr.msk.bf16.vlgmr.msra.gmra.mrb[172].mxu1 %vm11490_vm12, %v30200_v62 }
0x17c2   : > { %12606 = vmatpush1.bf16.msra.mxu1 %v29587_v24  ;;  %12637 = vmatprep.mubr.bf16.mxu1 %v32791_v37 }
0x17c3   : > { %13415 = vmatprep.subr.bf16.mxu1 %v25500_v63  ;;  %13461 = vmatpush1.bf16.msra.mxu0 %v25531_v19 }
0x17c4   : > { %13462 = vmatprep.subr.bf16.mxu0 %v25539_v35 }
0x17c7   : > { %13463 = vmatpush1.bf16.msra.mxu0 %v25537_v9 }
0x17c8   : > { %13464 = vmatprep.subr.bf16.mxu0 %v25545_v44  ;;  %v25600_v44 = vld [vmem:[%s32760_s15 + $0x990] ss:$12 sps:$4 sm:$0xff]  }
0x17c9   : > { %20816 = vmatmul.mubr.msk.bf16.vlgmr.msra.gmra.mrb[176].mxu1 %vm10347_vm1, %v12560_v49 }
0x17ca   : > { %13416 = vmatpush1.bf16.msra.mxu1 %v25498_v13  ;;  %v25555_v13 = vld [vmem:[%s32760_s15 + $0x8d0] ss:$12 sps:$4 sm:$0xff]  }
0x17cb   : > { %13417 = vmatprep.subr.bf16.mxu1 %v25503_v33  ;;  %13465 = vmatpush1.bf16.msra.mxu0 %v25543_v8  ;;  %v25610_v8 = vld [vmem:[%s32760_s15 + $0x788] ss:$12 sps:$4 sm:$0xff]  }
0x17cc   : > { %13466 = vmatprep.subr.bf16.mxu0 %v25551_v43 }
0x17ce   : > { %13418 = vmatpush1.bf16.msra.mxu1 %v25501_v15  ;;  %v25560_v15 = vld [vmem:[%s32760_s15 + $0x7fc] ss:$12 sps:$4 sm:$0xff]  }
0x17cf   : > { %13419 = vmatprep.subr.bf16.mxu1 %v25506_v10  ;;  %13467 = vmatpush1.bf16.msra.mxu0 %v25549_v52  ;;  %v25558_v10 = vld [vmem:[%s32760_s15 + $0x7f8] ss:$12 sps:$4 sm:$0xff]  }
0x17d0   : > { %13468 = vmatprep.subr.bf16.mxu0 %v25557_v45 }
0x17d2   : > { %13420 = vmatpush1.bf16.msra.mxu1 %v25504_v59  ;;  %v25563_v59 = vld [vmem:[%s32760_s15 + $0x8ec] ss:$12 sps:$4 sm:$0xff]  }
0x17d3   : > { %13421 = vmatprep.subr.bf16.mxu1 %v25509_v39  ;;  %13469 = vmatpush1.bf16.msra.mxu0 %v25555_v13  ;;  %v25561_v39 = vld [vmem:[%s32760_s15 + $0x8e8] ss:$12 sps:$4 sm:$0xff]  }
0x17d4   : > { %13470 = vmatprep.subr.bf16.mxu0 %v25563_v59 }
0x17d6   : > { %13422 = vmatpush1.bf16.msra.mxu1 %v25507_v36  ;;  %v25566_v36 = vld [vmem:[%s32760_s15 + $0x814] ss:$12 sps:$4 sm:$0xff]  }
0x17d7   : > { %13423 = vmatprep.subr.bf16.mxu1 %v25512_v14  ;;  %13471 = vmatpush1.bf16.msra.mxu0 %v25561_v39  ;;  %v25569_v14 = vld [vmem:[%s32760_s15 + $0x904] ss:$12 sps:$4 sm:$0xff]  }
0x17d8   : > { %13472 = vmatprep.subr.bf16.mxu0 %v25569_v14 }
0x17da   : > { %13424 = vmatpush1.bf16.msra.mxu1 %v25510_v23  ;;  %v25564_v23 = vld [vmem:[%s32760_s15 + $0x810] ss:$12 sps:$4 sm:$0xff]  }
0x17db   : > { %13425 = vmatprep.subr.bf16.mxu1 %v25515_v18  ;;  %v25567_v18 = vld [vmem:[%s32760_s15 + $0x900] ss:$12 sps:$4 sm:$0xff]  }
0x17dc   : > { %v11528_v28 = vpop.f32.mrb[132].mxu0  ;;  %13473 = vmatpush1.bf16.msra.mxu0 %v25567_v18 }
0x17dd   : > { %v11530_v25 = vpop.f32.mrb[133].mxu0 }
0x17de   : > { %v11532_v62 = vpop.f32.mrb[134].mxu0  ;;  %13426 = vmatpush1.bf16.msra.mxu1 %v25513_v51  ;;  %v25575_v51 = vld [vmem:[%s32760_s15 + $0x91c] ss:$12 sps:$4 sm:$0xff]  }
0x17df   : > { %v11533_v50 = vpop.f32.mrb[135].mxu0  ;;  %13427 = vmatprep.subr.bf16.mxu1 %v25518_v40  ;;  %v25573_v62 = vld [vmem:[%s32760_s15 + $0x918] ss:$12 sps:$4 sm:$0xff]   ;;  %13474 = vmatprep.subr.bf16.mxu0 %v25575_v51  ;;  %v25576_v40 = vld [vmem:[%s32760_s15 + $0x930] ss:$12 sps:$4 sm:$0xff]  }
0x17e0   : > { %13475 = vmatpush1.bf16.msra.mxu0 %v25573_v62  ;;  %v25578_v50 = vld [vmem:[%s32760_s15 + $0x934] ss:$12 sps:$4 sm:$0xff]  }
0x17e1   : > { %13476 = vmatprep.subr.bf16.mxu0 %v25578_v50 }
0x17e2   : > { %13428 = vmatpush1.bf16.msra.mxu1 %v25516_v17  ;;  %v25581_v17 = vld [vmem:[%s32760_s15 + $0x9c4] ss:$12 sps:$4 sm:$0xff]  }
0x17e3   : > { %13429 = vmatprep.subr.bf16.mxu1 %v25524_v38 }
0x17e4   : > { %13477 = vmatpush1.bf16.msra.mxu0 %v25576_v40 }
0x17e5   : > { %13478 = vmatprep.subr.bf16.mxu0 %v25584_v5 }
0x17e6   : > { %13430 = vmatpush1.bf16.msra.mxu1 %v25522_v48 }
0x17e7   : > { %13431 = vmatprep.subr.bf16.mxu1 %v25530_v32 }
0x17e8   : > { %13479 = vmatpush1.bf16.msra.mxu0 %v25582_v31 }
0x17ea   : > { %13432 = vmatpush1.bf16.msra.mxu1 %v25528_v12  ;;  %v25590_v12 = vld [vmem:[%s32760_s15 + $0x964] ss:$12 sps:$4 sm:$0xff]  }
0x17eb   : > { %13433 = vmatprep.subr.bf16.mxu1 %v25536_v34  ;;  %13480 = vmatprep.subr.bf16.mxu0 %v25590_v12  ;;  %v25596_v34 = vld [vmem:[%s32760_s15 + $0x97c] ss:$12 sps:$4 sm:$0xff]  }
0x17ec   : > { %v11610_v3 = vpop.f32.mrb[136].mxu0  ;;  %13481 = vmatpush1.bf16.msra.mxu0 %v25588_v58 }
0x17ed   : > { %v11612_v6 = vpop.f32.mrb[137].mxu0  ;;  %13482 = vmatprep.subr.bf16.mxu0 %v25596_v34 }
0x17ee   : > { %v11614_v41 = vpop.f32.mrb[138].mxu0  ;;  %13434 = vmatpush1.bf16.msra.mxu1 %v25534_v1  ;;  %v25594_v1 = vld [vmem:[%s32760_s15 + $0x978] ss:$12 sps:$4 sm:$0xff]  }
0x17ef   : > { %v11615_v26 = vpop.f32.mrb[139].mxu0  ;;  %13435 = vmatprep.subr.bf16.mxu1 %v25542_v22 }
0x17f0   : > { %13483 = vmatpush1.bf16.msra.mxu0 %v25594_v1  ;;  %v25605_v26 = vld [vmem:[%s32760_s15 + $0x9a8] ss:$12 sps:$4 sm:$0xff]   ;;  %v25585_v1 = vld [vmem:[%s32760_s15 + $0x9d8] ss:$12 sps:$4 sm:$0xff]  }
0x17f2   : > { %13436 = vmatpush1.bf16.msra.mxu1 %v25540_v46  ;;  %v25607_v46 = vld [vmem:[%s32760_s15 + $0x9ac] ss:$12 sps:$4 sm:$0xff]  }
0x17f3   : > { %13437 = vmatprep.subr.bf16.mxu1 %v25548_v61 }
0x17f4   : > { %v11569_v16 = vpop.f32.mrb[152].mxu1 }
0x17f5   : > { %v11570_v53 = vadd.f32 %v11569_v16, %v11528_v28  ;;  %v11571_v60 = vpop.f32.mrb[153].mxu1  ;;  %v25572_v28 = vld [vmem:[%s32760_s15 + $0x82c] ss:$12 sps:$4 sm:$0xff]  }
0x17f6   : > { %v11572_v49 = vadd.f32 %v11571_v60, %v11530_v25  ;;  %v11573_v2 = vpop.f32.mrb[154].mxu1  ;;  %13438 = vmatpush1.bf16.msra.mxu1 %v25546_v47  ;;  %v25570_v25 = vld [vmem:[%s32760_s15 + $0x828] ss:$12 sps:$4 sm:$0xff]  }
0x17f7   : > { %v30457_v42 = vadd.f32 %v11610_v3, %v11570_v53  ;;  %v11574_v63 = vpop.f32.mrb[155].mxu1  ;;  %13439 = vmatprep.subr.bf16.mxu1 %v25554_v11 }
0x17f8   : > { %v30462_v33 = vadd.f32 %v11612_v6, %v11572_v49  ;;  %v25602_v6 = vld [vmem:[%s32760_s15 + $0x994] ss:$12 sps:$4 sm:$0xff]  }
0x17f9   : > { %13484 = vmatprep.subr.bf16.mxu0 %v25602_v6 }
0x17fa   : > { %13440 = vmatpush1.bf16.msra.mxu1 %v25552_v56  ;;  %13485 = vmatpush1.bf16.msra.mxu0 %v25600_v44  ;;  %v25591_v44 = vld [vmem:[%s32760_s15 + $0x9f0] ss:$12 sps:$4 sm:$0xff]  }
0x17fb   : > { %13441 = vmatprep.subr.bf16.mxu1 %v25560_v15  ;;  %13486 = vmatprep.subr.bf16.mxu0 %v25607_v46 }
0x17fe   : > { %13442 = vmatpush1.bf16.msra.mxu1 %v25558_v10  ;;  %13487 = vmatpush1.bf16.msra.mxu0 %v25605_v26  ;;  %v25597_v26 = vld [vmem:[%s32760_s15 + $0xa08] ss:$12 sps:$4 sm:$0xff]  }
0x17ff   : > { %13443 = vmatprep.subr.bf16.mxu1 %v25566_v36  ;;  %22539 = vmatprep.subr.bf16.mxu0 %v25610_v8 }
0x1802   : > { %13444 = vmatpush1.bf16.msra.mxu1 %v25564_v23 }
0x1803   : > { %13445 = vmatprep.subr.bf16.mxu1 %v25572_v28 }
0x1806   : > { %13446 = vmatpush1.bf16.msra.mxu1 %v25570_v25 }
0x1807   : > { %13497 = vmatprep.subr.bf16.mxu1 %v25581_v17 }
0x180c   : > { %v22477_v38 = vpop.f32.mrb[140].mxu0 }
0x180d   : > { %v22478_v21 = vpop.f32.mrb[141].mxu0 }
0x180e   : > { %v22479_v48 = vadd.f32 %v22478_v21, %v22477_v38  ;;  %v22480_v55 = vpop.f32.mrb[142].mxu0 }
0x180f   : > { %v22481_v32 = vpop.f32.mrb[143].mxu0 }
0x1810   : > { %v25579_v32 = vld [vmem:[%s32760_s15 + $0x9c0] ss:$12 sps:$4 sm:$0xff]  }
0x1814   : > { %v22455_v19 = vpop.f32.mrb[156].mxu1 }
0x1815   : > { %v22456_v35 = vpop.f32.mrb[157].mxu1 }
0x1816   : > { %v22457_v9 = vadd.f32 %v22456_v35, %v22455_v19  ;;  %v22458_v22 = vpop.f32.mrb[158].mxu1  ;;  %v25587_v19 = vld [vmem:[%s32760_s15 + $0x9dc] ss:$12 sps:$4 sm:$0xff]  }
0x1817   : > { %v22459_v3 = vpop.f32.mrb[159].mxu1 }
0x1818   : > { %v11692_v41 = vadd.f32 %v22479_v48, %v22457_v9  ;;  %v25593_v9 = vld [vmem:[%s32760_s15 + $0x9f4] ss:$12 sps:$4 sm:$0xff]  }
0x1824   : > { %v11731_v61 = vpop.f32.mrb[160].mxu1 }
0x1825   : > { %v11732_v43 = vadd.f32 %v11731_v61, %v11692_v41  ;;  %v23261_v47 = vpop.f32.mrb[161].mxu1  ;;  %v25599_v41 = vld [vmem:[%s32760_s15 + $0xa0c] ss:$12 sps:$4 sm:$0xff]   ;;  %v25603_v61 = vld [vmem:[%s32760_s15 + $0x908] ss:$12 sps:$4 sm:$0xff]  }
0x1826   : > { %v11734_v52 = vpop.f32.mrb[162].mxu1 }
0x1827   : > { %v23262_v11 = vpop.f32.mrb[163].mxu1 }
0x184c   : > { %v12350_v16 = vpop.f32.mrb[144].mxu0 }
0x184d   : > { %v12351_v45 = vadd.f32 %v12350_v16, %v30457_v42  ;;  %v12352_v53 = vpop.f32.mrb[145].mxu0 }
0x184e   : > { %v12353_v60 = vadd.f32 %v12352_v53, %v30462_v33  ;;  %v12354_v49 = vpop.f32.mrb[146].mxu0  ;;  %v25608_v53 = vld [vmem:[%s32760_s15 + $0x920] ss:$12 sps:$4 sm:$0xff]  }
0x184f   : > { %v12355_v2 = vpop.f32.mrb[147].mxu0 }
0x1850   : > { %v25611_v2 = vld [vmem:[%s32760_s15 + $0x938] ss:$12 sps:$4 sm:$0xff]  }
0x185c   : > { %v12432_v56 = vpop.f32.mrb[148].mxu0 }
0x185d   : > { %v12434_v63 = vpop.f32.mrb[149].mxu0 }
0x185e   : > { %v12436_v13 = vpop.f32.mrb[150].mxu0 }
0x185f   : > { %v12437_v15 = vpop.f32.mrb[151].mxu0 }
0x1860   : > { %v25612_v15 = vld [vmem:[%s32760_s15 + $0x6c8] ss:$12 sps:$4 sm:$0xff]  }
0x1864   : > { %v12391_v59 = vpop.f32.mrb[164].mxu1 }
0x1865   : > { %v12392_v10 = vadd.f32 %v12391_v59, %v12351_v45  ;;  %v12393_v39 = vpop.f32.mrb[165].mxu1  ;;  %v25604_v45 = vld [vmem:[%s32760_s15 + $0x848] ss:$12 sps:$4 sm:$0xff]  }
0x1866   : > { %v12394_v36 = vadd.f32 %v12393_v39, %v12353_v60  ;;  %v12395_v14 = vpop.f32.mrb[166].mxu1  ;;  %v25609_v60 = vld [vmem:[%s32760_s15 + $0x860] ss:$12 sps:$4 sm:$0xff]   ;;  %v25613_v39 = vld [vmem:[%s32760_s15 + $0x878] ss:$12 sps:$4 sm:$0xff]  }
0x1867   : > { %v30544_v23 = vadd.f32 %v12432_v56, %v12392_v10  ;;  %v12396_v18 = vpop.f32.mrb[167].mxu1  ;;  %v25615_v14 = vld [vmem:[%s32760_s15 + $0x950] ss:$12 sps:$4 sm:$0xff]  }
0x1868   : > { %v30546_v28 = vadd.f32 %v12434_v63, %v12394_v36  ;;  %v25614_v36 = vld [vmem:[%s32760_s15 + $0x7a0] ss:$12 sps:$4 sm:$0xff]  }
0x1869   : > { %v25616_v18 = vld [vmem:[%s32760_s15 + $0x6e0] ss:$12 sps:$4 sm:$0xff]  }
0x187d   : > { %v22526_v42 = vpop.f32.mrb[152].mxu0 }
0x187e   : > { %v22527_v51 = vpop.f32.mrb[153].mxu0 }
0x187f   : > { %v22528_v25 = vadd.f32 %v22527_v51, %v22526_v42  ;;  %v22529_v33 = vpop.f32.mrb[154].mxu0  ;;  %v25617_v42 = vld [vmem:[%s32760_s15 + $0x890] ss:$12 sps:$4 sm:$0xff]   ;;  %v25618_v51 = vld [vmem:[%s32760_s15 + $0x7b8] ss:$12 sps:$4 sm:$0xff]  }
0x1880   : > { %v22530_v62 = vpop.f32.mrb[155].mxu0  ;;  %v25620_v33 = vld [vmem:[%s32760_s15 + $0x6f8] ss:$12 sps:$4 sm:$0xff]  }
0x1881   : > { %v25621_v62 = vld [vmem:[%s32760_s15 + $0x8a8] ss:$12 sps:$4 sm:$0xff]  }
0x1884   : > { %v22504_v50 = vpop.f32.mrb[168].mxu1 }
0x1885   : > { %v12598_v17 = vpop.f32.mrb[156].mxu0  ;;  %v22505_v40 = vpop.f32.mrb[169].mxu1 }
0x1886   : > { %v30548_v31 = vpack.c.bf16 %v12598_v17, %v12598_v17  ;;  %v22506_v5 = vadd.f32 %v22505_v40, %v22504_v50  ;;  %v12600_v38 = vpop.f32.mrb[157].mxu0  ;;  %v22507_v21 = vpop.f32.mrb[170].mxu1  ;;  %v25622_v50 = vld [vmem:[%s32760_s15 + $0x7d0] ss:$12 sps:$4 sm:$0xff]   ;;  %v25623_v17 = vld [vmem:[%s32760_s15 + $0x980] ss:$12 sps:$4 sm:$0xff]  }
0x1887   : > { %v12687_v48 = vpack.c.bf16 %v12600_v38, %v12600_v38  ;;  %v22508_v55 = vpop.f32.mrb[171].mxu1  ;;  %v12602_v58 = vpop.f32.mrb[158].mxu0  ;;  %v25624_v40 = vld [vmem:[%s32760_s15 + $0x710] ss:$12 sps:$4 sm:$0xff]   ;;  %v25626_v38 = vld [vmem:[%s32760_s15 + $0x7e8] ss:$12 sps:$4 sm:$0xff]  }
0x1888   : > { %v12474_v12 = vadd.f32 %v22506_v5, %v11732_v43  ;;  %v12603_v34 = vpop.f32.mrb[159].mxu0  ;;  %v25625_v5 = vld [vmem:[%s32760_s15 + $0x8c0] ss:$12 sps:$4 sm:$0xff]   ;;  %v25627_v21 = vld [vmem:[%s32760_s15 + $0x998] ss:$12 sps:$4 sm:$0xff]  }
0x1889   : > { %13447 = vmatprep.mubr.bf16.mxu1 %v12687_v48  ;;  %v25629_v55 = vld [vmem:[%s32760_s15 + $0x8d8] ss:$12 sps:$4 sm:$0xff]   ;;  %v25631_v58 = vld [vmem:[%s32760_s15 + $0x9b0] ss:$12 sps:$4 sm:$0xff]  }
0x188a   : > { %13448 = vmatmul.mubr.bf16.vlgmr.msra.gmra.mrb[180].mxu1 %v30548_v31  ;;  %v12514_v35 = vadd.f32 %v22528_v25, %v12474_v12  ;;  %v25619_v25 = vld [vmem:[%s32760_s15 + $0x968] ss:$12 sps:$4 sm:$0xff]   ;;  %v25632_v12 = vld [vmem:[%s32760_s15 + $0x740] ss:$12 sps:$4 sm:$0xff]   ;;  %v25634_v34 = vld [vmem:[%s32760_s15 + $0x818] ss:$12 sps:$4 sm:$0xff]  }
0x188b   : > { %13498 = vmatpush1.bf16.msra.mxu1 %v25579_v32  ;;  %13529 = vmatprep.mubr.bf16.mxu1 %v32791_v37  ;;  %v25630_v32 = vld [vmem:[%s32760_s15 + $0x800] ss:$12 sps:$4 sm:$0xff]  }
0x188c   : > { %13499 = vmatprep.subr.bf16.mxu1 %v25587_v19  ;;  %v25633_v19 = vld [vmem:[%s32760_s15 + $0x8f0] ss:$12 sps:$4 sm:$0xff]  }
0x188d   : > { %v12680_v22 = vpop.f32.mrb[160].mxu0 }
0x188e   : > { %v23279_v3 = vpop.f32.mrb[161].mxu0  ;;  %v30578_v11 = vpack.c.bf16 %v12680_v22, %v12680_v22  ;;  %v25638_v22 = vld [vmem:[%s32760_s15 + $0x9c8] ss:$12 sps:$4 sm:$0xff]  }
0x188f   : > { %13500 = vmatpush1.bf16.msra.mxu1 %v25585_v1  ;;  %v12683_v6 = vpop.f32.mrb[162].mxu0  ;;  %v25636_v1 = vld [vmem:[%s32760_s15 + $0x830] ss:$12 sps:$4 sm:$0xff]  }
0x1890   : > { %13501 = vmatprep.subr.bf16.mxu1 %v25593_v9  ;;  %v23280_v46 = vpop.f32.mrb[163].mxu0  ;;  %v25637_v9 = vld [vmem:[%s32760_s15 + $0x770] ss:$12 sps:$4 sm:$0xff]   ;;  %v25645_v6 = vld [vmem:[%s32760_s15 + $0xa38] ss:$12 sps:$4 sm:$0xff]  }
0x1891   : > { %v25641_v3 = vld [vmem:[%s32760_s15 + $0xa10] ss:$12 sps:$4 sm:$0xff]   ;;  %v25653_v46 = vld [vmem:[%s32760_s15 + $0xa6c] ss:$12 sps:$4 sm:$0xff]  }
0x1893   : > { %13502 = vmatpush1.bf16.msra.mxu1 %v25591_v44  ;;  %v25642_v44 = vld [vmem:[%s32760_s15 + $0xa20] ss:$12 sps:$4 sm:$0xff]  }
0x1894   : > { %v12553_v8 = vpop.f32.mrb[172].mxu1  ;;  %13503 = vmatprep.subr.bf16.mxu1 %v25599_v41  ;;  %v25648_v41 = vld [vmem:[%s32760_s15 + $0xa50] ss:$12 sps:$4 sm:$0xff]  }
0x1895   : > { %v30576_v43 = vadd.f32 %v12553_v8, %v12514_v35  ;;  %v23273_v47 = vpop.f32.mrb[173].mxu1  ;;  %v25635_v35 = vld [vmem:[%s32760_s15 + $0x758] ss:$12 sps:$4 sm:$0xff]  }
0x1896   : > { %v12556_v52 = vpop.f32.mrb[174].mxu1  ;;  %v25665_v8 = vld [vmem:[%s32760_s15 + $0xba4] ss:$12 sps:$4 sm:$0xff]   ;;  %v25671_v47 = vld [vmem:[%s32760_s15 + $0xbbc] ss:$12 sps:$4 sm:$0xff]  }
0x1897   : > { %13504 = vmatpush1.bf16.msra.mxu1 %v25597_v26  ;;  %v23274_v16 = vpop.f32.mrb[175].mxu1  ;;  %v25663_v26 = vld [vmem:[%s32760_s15 + $0xba0] ss:$12 sps:$4 sm:$0xff]   ;;  %v25656_v52 = vld [vmem:[%s32760_s15 + $0xa84] ss:$12 sps:$4 sm:$0xff]  }
0x1898   : > { %22561 = vmatprep.subr.bf16.mxu1 %v25603_v61  ;;  %v25651_v61 = vld [vmem:[%s32760_s15 + $0xa68] ss:$12 sps:$4 sm:$0xff]   ;;  %v25654_v16 = vld [vmem:[%s32760_s15 + $0xa80] ss:$12 sps:$4 sm:$0xff]  }
0x189a   : > { %21070 = vmatmul.mubr.msk.bf16.vlgmr.msra.gmra.mrb[184].mxu1 %vm11490_vm12, %v30578_v11 }
0x189b   : > { %22562 = vmatpush3.bf16.msra.mxu1 %v25604_v45  ;;  %v25659_v45 = vld [vmem:[%s32760_s15 + $0xa9c] ss:$12 sps:$4 sm:$0xff]  }
0x189c   : > { %v12639_v49 = vpop.f32.mrb[176].mxu1  ;;  %22563 = vmatprep.subr.bf16.mxu1 %v25608_v53  ;;  %v25657_v53 = vld [vmem:[%s32760_s15 + $0xa98] ss:$12 sps:$4 sm:$0xff]  }
0x189d   : > { %v12641_v56 = vpop.f32.mrb[177].mxu1  ;;  %v12688_v59 = vpack.c.bf16 %v12639_v49, %v12639_v49  ;;  %v25660_v49 = vld [vmem:[%s32760_s15 + $0xab0] ss:$12 sps:$4 sm:$0xff]  }
0x189e   : > { %v12689_v63 = vpack.c.bf16 %v12641_v56, %v12641_v56  ;;  %v12643_v13 = vpop.f32.mrb[178].mxu1  ;;  %v25666_v56 = vld [vmem:[%s32760_s15 + $0xac8] ss:$12 sps:$4 sm:$0xff]  }
0x189f   : > { %22564 = vmatpush3.bf16.msra.mxu1 %v25609_v60  ;;  %v12644_v10 = vpop.f32.mrb[179].mxu1  ;;  %v25662_v60 = vld [vmem:[%s32760_s15 + $0xab4] ss:$12 sps:$4 sm:$0xff]  }
0x18a0   : > { %13488 = vmatprep.mubr.bf16.mxu0 %v12689_v63  ;;  %22565 = vmatprep.subr.bf16.mxu1 %v25611_v2  ;;  %v25668_v2 = vld [vmem:[%s32760_s15 + $0xacc] ss:$12 sps:$4 sm:$0xff]   ;;  %v25677_v13 = vld [vmem:[%s32760_s15 + $0xbd4] ss:$12 sps:$4 sm:$0xff]  }
0x18a1   : > { %13610 = vmatprep.mubr.bf16.mxu1 %v12689_v63  ;;  %13489 = vmatmul.mubr.bf16.vlgmr.msra.gmra.mrb[164].mxu0 %v12688_v59  ;;  %v25674_v63 = vld [vmem:[%s32760_s15 + $0xae4] ss:$12 sps:$4 sm:$0xff]  }
0x18a2   : > { %22540 = vmatpush3.bf16.msra.mxu0 %v25612_v15  ;;  %13570 = vmatprep.mubr.bf16.mxu0 %v12687_v48  ;;  %v25628_v48 = vld [vmem:[%s32760_s15 + $0x728] ss:$12 sps:$4 sm:$0xff]   ;;  %v25672_v15 = vld [vmem:[%s32760_s15 + $0xae0] ss:$12 sps:$4 sm:$0xff]   ;;  %v25678_v10 = vld [vmem:[%s32760_s15 + $0xaf8] ss:$12 sps:$4 sm:$0xff]  }
0x18a3   : > { %22566 = vmatpush3.bf16.msra.mxu1 %v25613_v39  ;;  %22541 = vmatprep.subr.bf16.mxu0 %v25614_v36  ;;  %v25680_v39 = vld [vmem:[%s32760_s15 + $0xafc] ss:$12 sps:$4 sm:$0xff]  }
0x18a4   : > { %22567 = vmatprep.subr.bf16.mxu1 %v25615_v14  ;;  %v25681_v36 = vld [vmem:[%s32760_s15 + $0xbe8] ss:$12 sps:$4 sm:$0xff]   ;;  %v25683_v14 = vld [vmem:[%s32760_s15 + $0xbec] ss:$12 sps:$4 sm:$0xff]  }
0x18a6   : > { %22542 = vmatpush3.bf16.msra.mxu0 %v25616_v18  ;;  %v25686_v18 = vld [vmem:[%s32760_s15 + $0xb14] ss:$12 sps:$4 sm:$0xff]  }
0x18a7   : > { %22568 = vmatpush3.bf16.msra.mxu1 %v25617_v42  ;;  %22543 = vmatprep.subr.bf16.mxu0 %v25618_v51  ;;  %v25689_v42 = vld [vmem:[%s32760_s15 + $0xc04] ss:$12 sps:$4 sm:$0xff]  }
0x18a8   : > { %22569 = vmatprep.subr.bf16.mxu1 %v25619_v25  ;;  %v25684_v51 = vld [vmem:[%s32760_s15 + $0xb10] ss:$12 sps:$4 sm:$0xff]   ;;  %v25687_v25 = vld [vmem:[%s32760_s15 + $0xc00] ss:$12 sps:$4 sm:$0xff]  }
0x18aa   : > { %22544 = vmatpush3.bf16.msra.mxu0 %v25620_v33  ;;  %v25692_v33 = vld [vmem:[%s32760_s15 + $0xb2c] ss:$12 sps:$4 sm:$0xff]  }
0x18ab   : > { %22570 = vmatpush3.bf16.msra.mxu1 %v25621_v62  ;;  %22545 = vmatprep.subr.bf16.mxu0 %v25622_v50  ;;  %v25695_v62 = vld [vmem:[%s32760_s15 + $0xc1c] ss:$12 sps:$4 sm:$0xff]  }
0x18ac   : > { %22571 = vmatprep.subr.bf16.mxu1 %v25623_v17  ;;  %v25690_v50 = vld [vmem:[%s32760_s15 + $0xb28] ss:$12 sps:$4 sm:$0xff]   ;;  %v25693_v17 = vld [vmem:[%s32760_s15 + $0xc18] ss:$12 sps:$4 sm:$0xff]  }
0x18ae   : > { %22546 = vmatpush3.bf16.msra.mxu0 %v25624_v40  ;;  %v25698_v40 = vld [vmem:[%s32760_s15 + $0xb44] ss:$12 sps:$4 sm:$0xff]  }
0x18af   : > { %22572 = vmatpush3.bf16.msra.mxu1 %v25625_v5  ;;  %22547 = vmatprep.subr.bf16.mxu0 %v25626_v38  ;;  %v25701_v5 = vld [vmem:[%s32760_s15 + $0xc34] ss:$12 sps:$4 sm:$0xff]  }
0x18b0   : > { %22573 = vmatprep.subr.bf16.mxu1 %v25627_v21  ;;  %v25696_v38 = vld [vmem:[%s32760_s15 + $0xb40] ss:$12 sps:$4 sm:$0xff]   ;;  %v25699_v21 = vld [vmem:[%s32760_s15 + $0xc30] ss:$12 sps:$4 sm:$0xff]  }
0x18b2   : > { %22548 = vmatpush3.bf16.msra.mxu0 %v25628_v48  ;;  %v25704_v48 = vld [vmem:[%s32760_s15 + $0xb5c] ss:$12 sps:$4 sm:$0xff]  }
0x18b3   : > { %22574 = vmatpush3.bf16.msra.mxu1 %v25629_v55  ;;  %22549 = vmatprep.subr.bf16.mxu0 %v25630_v32  ;;  %v25707_v55 = vld [vmem:[%s32760_s15 + $0xc4c] ss:$12 sps:$4 sm:$0xff]  }
0x18b4   : > { %22575 = vmatprep.subr.bf16.mxu1 %v25631_v58  ;;  %v25702_v32 = vld [vmem:[%s32760_s15 + $0xb58] ss:$12 sps:$4 sm:$0xff]   ;;  %v25705_v58 = vld [vmem:[%s32760_s15 + $0xc48] ss:$12 sps:$4 sm:$0xff]  }
0x18b6   : > { %22550 = vmatpush3.bf16.msra.mxu0 %v25632_v12  ;;  %v25710_v12 = vld [vmem:[%s32760_s15 + $0xb74] ss:$12 sps:$4 sm:$0xff]  }
0x18b7   : > { %22576 = vmatpush3.bf16.msra.mxu1 %v25633_v19  ;;  %22551 = vmatprep.subr.bf16.mxu0 %v25634_v34  ;;  %v25713_v19 = vld [vmem:[%s32760_s15 + $0xc64] ss:$12 sps:$4 sm:$0xff]  }
0x18b8   : > { %21072 = vmatprep.subr.msk.bf16.mxu1 %vm1124_vm3, %v29570_v20  ;;  %v13662_v20 = vld [vmem:[#allocation17 + $0x3] sm:$0x1]  ;;  %v25708_v34 = vld [vmem:[%s32760_s15 + $0xb70] ss:$12 sps:$4 sm:$0xff]  }
0x18ba   : > { %13611 = vmatmul.mubr.bf16.vlgmr.msra.gmra.mrb[188].mxu1 %v12688_v59  ;;  %22552 = vmatpush3.bf16.msra.mxu0 %v25635_v35  ;;  %v25675_v59 = vld [vmem:[%s32760_s15 + $0xbd0] ss:$12 sps:$4 sm:$0xff]   ;;  %v25711_v35 = vld [vmem:[%s32760_s15 + $0xc60] ss:$12 sps:$4 sm:$0xff]  }
0x18bb   : > { %13667 = vmatpush1.bf16.msra.mxu1 %v29577_v57  ;;  %22553 = vmatprep.subr.bf16.mxu0 %v25636_v1  ;;  %v25639_v57 = vld [vmem:[%s32760_s15 + $0x9e0] ss:$12 sps:$4 sm:$0xff]  }
0x18bc   : > { %13698 = vmatprep.mubr.bf16.mxu1 %v32791_v37  ;;  %23293 = vmatprep.subr.bf16.mxu1 %v27397_v0  ;;  %v25716_v1 = vld [vmem:[%s32760_s15 + $0xb8c] ss:$12 sps:$4 sm:$0xff]  }
0x18be   : > { %22554 = vmatpush3.bf16.msra.mxu0 %v25637_v9  ;;  %v25719_v9 = vld [vmem:[%s32760_s15 + $0xc7c] ss:$12 sps:$4 sm:$0xff]  }
0x18bf   : > { %23281 = vmatprep.subr.bf16.mxu0 %v27397_v0 }
0x18c1   : > { %13571 = vmatmul.mubr.bf16.vlgmr.msra.gmra.mrb[168].mxu0 %v30548_v31  ;;  %v25640_v31 = vld [vmem:[%s32760_s15 + $0x9f8] ss:$12 sps:$4 sm:$0xff]  }
0x18c2   : > { %21073 = vmatmul.mubr.msk.bf16.vlgmr.msra.gmra.mrb[192].mxu1 %vm10347_vm1, %v13662_v20  ;;  %23282 = vmatpush3.bf16.msra.mxu0 %v25638_v22  ;;  %v25714_v22 = vld [vmem:[%s32760_s15 + $0xb88] ss:$12 sps:$4 sm:$0xff]  }
0x18c3   : > { %23283 = vmatprep.subr.bf16.mxu0 %v27397_v0  ;;  %23289 = vmatprep.mubr.msk.bf16.mxu0 %vm26394_vm0, %v27397_v0 }
0x18c4   : > { %23294 = vmatpush3.bf16.msra.mxu1 %v29597_v4  ;;  %23295 = vmatprep.mubr.msk.bf16.mxu1 %vm26394_vm0, %v27397_v0  ;;  %v25644_v4 = vld [vmem:[%s32760_s15 + $0xa24] ss:$12 sps:$4 sm:$0xff]  }
0x18c5   : > { %14558 = vmatprep.subr.bf16.mxu1 %v25665_v8  ;;  %v25751_v8 = vld [vmem:[%s32760_s15 + $0xd0c] ss:$12 sps:$4 sm:$0xff]  }
0x18c6   : > { %23284 = vmatpush3.bf16.msra.mxu0 %v25639_v57  ;;  %v25722_v57 = vld [vmem:[%s32760_s15 + $0xc94] ss:$12 sps:$4 sm:$0xff]  }
0x18c7   : > { %23285 = vmatprep.subr.bf16.mxu0 %v27397_v0 }
0x18ca   : > { %23286 = vmatpush3.bf16.msra.mxu0 %v25640_v31  ;;  %23296 = vmatmul.mubr.msk.bf16.vlgmr.msra.gmra.mrb[196].mxu1 %vm10347_vm1, %v13662_v20  ;;  %v25725_v31 = vld [vmem:[%s32760_s15 + $0xd24] ss:$12 sps:$4 sm:$0xff]  }
0x18cb   : > { %23287 = vmatprep.subr.bf16.mxu0 %v27397_v0  ;;  %14559 = vmatpush1.bf16.msra.mxu1 %v25663_v26  ;;  %v25746_v26 = vld [vmem:[%s32760_s15 + $0xcf4] ss:$12 sps:$4 sm:$0xff]  }
0x18cc   : > { %14560 = vmatprep.subr.bf16.mxu1 %v25671_v47  ;;  %v25754_v47 = vld [vmem:[%s32760_s15 + $0xae8] ss:$12 sps:$4 sm:$0xff]  }
0x18ce   : > { %23288 = vmatpush3.bf16.msra.mxu0 %v25641_v3  ;;  %v25720_v3 = vld [vmem:[%s32760_s15 + $0xc90] ss:$12 sps:$4 sm:$0xff]  }
0x18cf   : > { %21074 = vmatprep.subr.msk.bf16.mxu0 %vm1124_vm3, %v29579_v54  ;;  %v25647_v54 = vld [vmem:[%s32760_s15 + $0xa3c] ss:$12 sps:$4 sm:$0xff]  }
0x18d1   : > { %23290 = vmatmul.mubr.msk.bf16.vlgmr.msra.gmra.mrb[172].mxu0 %vm11490_vm12, %v30578_v11  ;;  %v25669_v11 = vld [vmem:[%s32760_s15 + $0xbb8] ss:$12 sps:$4 sm:$0xff]  }
0x18d2   : > { %13708 = vmatpush1.bf16.msra.mxu0 %v29587_v24  ;;  %13739 = vmatprep.mubr.bf16.mxu0 %v32791_v37  ;;  %v25650_v24 = vld [vmem:[%s32760_s15 + $0xa54] ss:$12 sps:$4 sm:$0xff]  }
0x18d3   : > { %14517 = vmatprep.subr.bf16.mxu0 %v25644_v4  ;;  %14561 = vmatpush1.bf16.msra.mxu1 %v25669_v11  ;;  %v25726_v4 = vld [vmem:[%s32760_s15 + $0xca8] ss:$12 sps:$4 sm:$0xff]  }
0x18d4   : > { %14562 = vmatprep.subr.bf16.mxu1 %v25677_v13 }
0x18d7   : > { %14563 = vmatpush1.bf16.msra.mxu1 %v25675_v59 }
0x18d8   : > { %14564 = vmatprep.subr.bf16.mxu1 %v25683_v14 }
0x18d9   : > { %21075 = vmatmul.mubr.msk.bf16.vlgmr.msra.gmra.mrb[176].mxu0 %vm10347_vm1, %v13662_v20  ;;  %v25717_v20 = vld [vmem:[%s32760_s15 + $0xc78] ss:$12 sps:$4 sm:$0xff]  }
0x18da   : > { %14518 = vmatpush1.bf16.msra.mxu0 %v25642_v44  ;;  %v25728_v44 = vld [vmem:[%s32760_s15 + $0xcac] ss:$12 sps:$4 sm:$0xff]  }
0x18db   : > { %14519 = vmatprep.subr.bf16.mxu0 %v25647_v54  ;;  %14565 = vmatpush1.bf16.msra.mxu1 %v25681_v36  ;;  %v25732_v54 = vld [vmem:[%s32760_s15 + $0xcc0] ss:$12 sps:$4 sm:$0xff]  }
0x18dc   : > { %14566 = vmatprep.subr.bf16.mxu1 %v25689_v42 }
0x18de   : > { %14520 = vmatpush1.bf16.msra.mxu0 %v25645_v6  ;;  %v25734_v6 = vld [vmem:[%s32760_s15 + $0xcc4] ss:$12 sps:$4 sm:$0xff]  }
0x18df   : > { %14521 = vmatprep.subr.bf16.mxu0 %v25650_v24  ;;  %14567 = vmatpush1.bf16.msra.mxu1 %v25687_v25  ;;  %v25740_v24 = vld [vmem:[%s32760_s15 + $0xcdc] ss:$12 sps:$4 sm:$0xff]  }
0x18e0   : > { %14568 = vmatprep.subr.bf16.mxu1 %v25695_v62 }
0x18e2   : > { %14522 = vmatpush1.bf16.msra.mxu0 %v25648_v41  ;;  %v25738_v41 = vld [vmem:[%s32760_s15 + $0xcd8] ss:$12 sps:$4 sm:$0xff]  }
0x18e3   : > { %14523 = vmatprep.subr.bf16.mxu0 %v25653_v46  ;;  %14569 = vmatpush1.bf16.msra.mxu1 %v25693_v17  ;;  %v25744_v46 = vld [vmem:[%s32760_s15 + $0xcf0] ss:$12 sps:$4 sm:$0xff]  }
0x18e4   : > { %14570 = vmatprep.subr.bf16.mxu1 %v25701_v5 }
0x18e6   : > { %14524 = vmatpush1.bf16.msra.mxu0 %v25651_v61  ;;  %v25749_v61 = vld [vmem:[%s32760_s15 + $0xd08] ss:$12 sps:$4 sm:$0xff]  }
0x18e7   : > { %14525 = vmatprep.subr.bf16.mxu0 %v25656_v52  ;;  %14571 = vmatpush1.bf16.msra.mxu1 %v25699_v21 }
0x18e8   : > { %14572 = vmatprep.subr.bf16.mxu1 %v25707_v55 }
0x18ea   : > { %14526 = vmatpush1.bf16.msra.mxu0 %v25654_v16 }
0x18eb   : > { %14527 = vmatprep.subr.bf16.mxu0 %v25659_v45  ;;  %14573 = vmatpush1.bf16.msra.mxu1 %v25705_v58  ;;  %v25731_v58 = vld [vmem:[%s32760_s15 + $0xd3c] ss:$12 sps:$4 sm:$0xff]  }
0x18ec   : > { %14574 = vmatprep.subr.bf16.mxu1 %v25713_v19 }
0x18ee   : > { %14528 = vmatpush1.bf16.msra.mxu0 %v25657_v53 }
0x18ef   : > { %14529 = vmatprep.subr.bf16.mxu0 %v25662_v60  ;;  %14575 = vmatpush1.bf16.msra.mxu1 %v25711_v35  ;;  %v25737_v35 = vld [vmem:[%s32760_s15 + $0xd54] ss:$12 sps:$4 sm:$0xff]  }
0x18f0   : > { %14576 = vmatprep.subr.bf16.mxu1 %v25719_v9 }
0x18f2   : > { %14530 = vmatpush1.bf16.msra.mxu0 %v25660_v49 }
0x18f3   : > { %14531 = vmatprep.subr.bf16.mxu0 %v25668_v2  ;;  %14577 = vmatpush1.bf16.msra.mxu1 %v25717_v20 }
0x18f4   : > { %14578 = vmatprep.subr.bf16.mxu1 %v25722_v57  ;;  %v25743_v57 = vld [vmem:[%s32760_s15 + $0xd6c] ss:$12 sps:$4 sm:$0xff]  }
0x18f6   : > { %14532 = vmatpush1.bf16.msra.mxu0 %v25666_v56 }
0x18f7   : > { %14533 = vmatprep.subr.bf16.mxu0 %v25674_v63  ;;  %14579 = vmatpush1.bf16.msra.mxu1 %v25720_v3  ;;  %v25741_v3 = vld [vmem:[%s32760_s15 + $0xd68] ss:$12 sps:$4 sm:$0xff]  }
0x18f8   : > { %14580 = vmatprep.subr.bf16.mxu1 %v25728_v44  ;;  %v25747_v44 = vld [vmem:[%s32760_s15 + $0xc68] ss:$12 sps:$4 sm:$0xff]  }
0x18fa   : > { %14534 = vmatpush1.bf16.msra.mxu0 %v25672_v15 }
0x18fb   : > { %14535 = vmatprep.subr.bf16.mxu0 %v25680_v39  ;;  %14581 = vmatpush1.bf16.msra.mxu1 %v25726_v4 }
0x18fc   : > { %14582 = vmatprep.subr.bf16.mxu1 %v25734_v6 }
0x18fe   : > { %14536 = vmatpush1.bf16.msra.mxu0 %v25678_v10 }
0x18ff   : > { %14537 = vmatprep.subr.bf16.mxu0 %v25686_v18  ;;  %14583 = vmatpush1.bf16.msra.mxu1 %v25732_v54 }
0x1900   : > { %14584 = vmatprep.subr.bf16.mxu1 %v25740_v24 }
0x1902   : > { %14538 = vmatpush1.bf16.msra.mxu0 %v25684_v51 }
0x1903   : > { %14539 = vmatprep.subr.bf16.mxu0 %v25692_v33  ;;  %14585 = vmatpush1.bf16.msra.mxu1 %v25738_v41 }
0x1904   : > { %14586 = vmatprep.subr.bf16.mxu1 %v25746_v26 }
0x1906   : > { %14540 = vmatpush1.bf16.msra.mxu0 %v25690_v50 }
0x1907   : > { %14541 = vmatprep.subr.bf16.mxu0 %v25698_v40  ;;  %14587 = vmatpush1.bf16.msra.mxu1 %v25744_v46 }
0x1908   : > { %14588 = vmatprep.subr.bf16.mxu1 %v25751_v8  ;;  %v25748_v8 = vld [vmem:[%s32760_s15 + $0xba8] ss:$12 sps:$4 sm:$0xff]  }
0x190a   : > { %14542 = vmatpush1.bf16.msra.mxu0 %v25696_v38 }
0x190b   : > { %14543 = vmatprep.subr.bf16.mxu0 %v25704_v48  ;;  %14589 = vmatpush1.bf16.msra.mxu1 %v25749_v61  ;;  %v25752_v61 = vld [vmem:[%s32760_s15 + $0xc80] ss:$12 sps:$4 sm:$0xff]  }
0x190c   : > { %22590 = vmatprep.subr.bf16.mxu1 %v25754_v47 }
0x190e   : > { %14544 = vmatpush1.bf16.msra.mxu0 %v25702_v32 }
0x190f   : > { %14545 = vmatprep.subr.bf16.mxu0 %v25710_v12 }
0x1912   : > { %14546 = vmatpush1.bf16.msra.mxu0 %v25708_v34  ;;  %v25729_v34 = vld [vmem:[%s32760_s15 + $0xd38] ss:$12 sps:$4 sm:$0xff]  }
0x1913   : > { %14547 = vmatprep.subr.bf16.mxu0 %v25716_v1 }
0x1916   : > { %14548 = vmatpush1.bf16.msra.mxu0 %v25714_v22  ;;  %v25735_v22 = vld [vmem:[%s32760_s15 + $0xd50] ss:$12 sps:$4 sm:$0xff]  }
0x1917   : > { %14599 = vmatprep.subr.bf16.mxu0 %v25725_v31 }
0x195d   : > { %v13449_v52 = vpop.f32.mrb[180].mxu1 }
0x195e   : > { %v13451_v11 = vpop.f32.mrb[181].mxu1 }
0x195f   : > { %v13453_v16 = vpop.f32.mrb[182].mxu1 }
0x1960   : > { %v13454_v45 = vpop.f32.mrb[183].mxu1 }
0x196d   : > { %v13531_v53 = vpop.f32.mrb[184].mxu1 }
0x196e   : > { %v13533_v60 = vpop.f32.mrb[185].mxu1 }
0x196f   : > { %v13535_v49 = vpop.f32.mrb[186].mxu1 }
0x1970   : > { %v13536_v2 = vpop.f32.mrb[187].mxu1 }
0x1971   : > { %v25757_v2 = vld [vmem:[%s32760_s15 + $0xbd8] ss:$12 sps:$4 sm:$0xff]  }
0x1974   : > { %v13490_v56 = vpop.f32.mrb[164].mxu0 }
0x1975   : > { %v13491_v63 = vadd.f32 %v13490_v56, %v13449_v52  ;;  %v13492_v13 = vpop.f32.mrb[165].mxu0  ;;  %v25755_v52 = vld [vmem:[%s32760_s15 + $0xc98] ss:$12 sps:$4 sm:$0xff]   ;;  %v25758_v56 = vld [vmem:[%s32760_s15 + $0xb00] ss:$12 sps:$4 sm:$0xff]  }
0x1976   : > { %v13493_v15 = vadd.f32 %v13492_v13, %v13451_v11  ;;  %v13494_v59 = vpop.f32.mrb[166].mxu0  ;;  %v25760_v13 = vld [vmem:[%s32760_s15 + $0xa40] ss:$12 sps:$4 sm:$0xff]  }
0x1977   : > { %v13532_v10 = vadd.f32 %v13531_v53, %v13491_v63  ;;  %v13495_v39 = vpop.f32.mrb[167].mxu0  ;;  %v25756_v53 = vld [vmem:[%s32760_s15 + $0xa28] ss:$12 sps:$4 sm:$0xff]   ;;  %v25759_v63 = vld [vmem:[%s32760_s15 + $0xcb0] ss:$12 sps:$4 sm:$0xff]  }
0x1978   : > { %v13534_v36 = vadd.f32 %v13533_v60, %v13493_v15  ;;  %v25761_v15 = vld [vmem:[%s32760_s15 + $0xbf0] ss:$12 sps:$4 sm:$0xff]   ;;  %v25762_v59 = vld [vmem:[%s32760_s15 + $0xb18] ss:$12 sps:$4 sm:$0xff]  }
0x1979   : > { %v30907_v14 = vadd.f32 %v13532_v10, %v30544_v23  ;;  %v25723_v23 = vld [vmem:[%s32760_s15 + $0xd20] ss:$12 sps:$4 sm:$0xff]   ;;  %v25763_v10 = vld [vmem:[%s32760_s15 + $0xcc8] ss:$12 sps:$4 sm:$0xff]   ;;  %v25764_v39 = vld [vmem:[%s32760_s15 + $0xa58] ss:$12 sps:$4 sm:$0xff]  }
0x197a   : > { %v30910_v18 = vadd.f32 %v13534_v36, %v30546_v28  ;;  %v25765_v36 = vld [vmem:[%s32760_s15 + $0xc08] ss:$12 sps:$4 sm:$0xff]  }
0x198d   : > { %v22577_v42 = vpop.f32.mrb[188].mxu1 }
0x198e   : > { %v22578_v51 = vpop.f32.mrb[189].mxu1 }
0x198f   : > { %v22579_v25 = vadd.f32 %v22578_v51, %v22577_v42  ;;  %v22580_v33 = vpop.f32.mrb[190].mxu1  ;;  %v25766_v42 = vld [vmem:[%s32760_s15 + $0xb30] ss:$12 sps:$4 sm:$0xff]   ;;  %v25767_v51 = vld [vmem:[%s32760_s15 + $0xce0] ss:$12 sps:$4 sm:$0xff]  }
0x1990   : > { %v22581_v62 = vpop.f32.mrb[191].mxu1  ;;  %v25769_v33 = vld [vmem:[%s32760_s15 + $0xc20] ss:$12 sps:$4 sm:$0xff]  }
0x1991   : > { %v25770_v62 = vld [vmem:[%s32760_s15 + $0xb48] ss:$12 sps:$4 sm:$0xff]  }
0x1994   : > { %v22555_v50 = vpop.f32.mrb[168].mxu0 }
0x1995   : > { %v13700_v17 = vpop.f32.mrb[192].mxu1  ;;  %v22556_v40 = vpop.f32.mrb[169].mxu0 }
0x1996   : > { %v30912_v5 = vpack.c.bf16 %v13700_v17, %v13700_v17  ;;  %v22557_v38 = vadd.f32 %v22556_v40, %v22555_v50  ;;  %v13702_v21 = vpop.f32.mrb[193].mxu1  ;;  %v22558_v48 = vpop.f32.mrb[170].mxu0  ;;  %v25771_v50 = vld [vmem:[%s32760_s15 + $0xcf8] ss:$12 sps:$4 sm:$0xff]   ;;  %v25772_v17 = vld [vmem:[%s32760_s15 + $0xa88] ss:$12 sps:$4 sm:$0xff]  }
0x1997   : > { %v13789_v55 = vpack.c.bf16 %v13702_v21, %v13702_v21  ;;  %v22559_v32 = vpop.f32.mrb[171].mxu0  ;;  %v13704_v28 = vpop.f32.mrb[194].mxu1  ;;  %v25773_v40 = vld [vmem:[%s32760_s15 + $0xc38] ss:$12 sps:$4 sm:$0xff]   ;;  %v25775_v21 = vld [vmem:[%s32760_s15 + $0xd10] ss:$12 sps:$4 sm:$0xff]  }
0x1998   : > { %v13613_v12 = vadd.f32 %v22579_v25, %v22557_v38  ;;  %v13705_v19 = vpop.f32.mrb[195].mxu1  ;;  %v25768_v25 = vld [vmem:[%s32760_s15 + $0xa70] ss:$12 sps:$4 sm:$0xff]   ;;  %v25774_v38 = vld [vmem:[%s32760_s15 + $0xb60] ss:$12 sps:$4 sm:$0xff]  }
0x1999   : > { %14549 = vmatprep.mubr.bf16.mxu0 %v13789_v55  ;;  %v14806_v48 = vld [vmem:[%s32865_s17 + $0x8] sm:$0xff]  ;;  %v25778_v28 = vld [vmem:[%s32760_s15 + $0xb78] ss:$12 sps:$4 sm:$0xff]   ;;  %v14807_v19 = vld [vmem:[%s32865_s17 + $0x10] sm:$0xff] }
0x199a   : > { %14550 = vmatmul.mubr.bf16.vlgmr.msra.gmra.mrb[180].mxu0 %v30912_v5  ;;  %v25776_v32 = vld [vmem:[%s32760_s15 + $0xaa0] ss:$12 sps:$4 sm:$0xff]  }
0x199b   : > { %14600 = vmatpush1.bf16.msra.mxu0 %v25723_v23  ;;  %14631 = vmatprep.mubr.bf16.mxu0 %v32791_v37  ;;  %v25777_v23 = vld [vmem:[%s32760_s15 + $0xc50] ss:$12 sps:$4 sm:$0xff]  }
0x199c   : > { %14601 = vmatprep.subr.bf16.mxu0 %v25731_v58  ;;  %v15085_v37 = vld [vmem:[#allocation20 + $0x138] sm:$0xff] }
0x199d   : > { %v13782_v1 = vpop.f32.mrb[196].mxu1 }
0x199e   : > { %v23297_v9 = vpop.f32.mrb[197].mxu1  ;;  %v30940_v41 = vpack.c.bf16 %v13782_v1, %v13782_v1  ;;  %v25779_v1 = vld [vmem:[%s32760_s15 + $0xab8] ss:$12 sps:$4 sm:$0xff]  }
0x199f   : > { %14602 = vmatpush1.bf16.msra.mxu0 %v25729_v34  ;;  %v13785_v20 = vpop.f32.mrb[198].mxu1  ;;  %v14810_v34 = vld [vmem:[%s32865_s17 + $0x28] sm:$0xff]  ;;  %v25780_v9 = vld [vmem:[%s32760_s15 + $0xb90] ss:$12 sps:$4 sm:$0xff]  }
0x19a0   : > { %14603 = vmatprep.subr.bf16.mxu0 %v25737_v35  ;;  %v23298_v31 = vpop.f32.mrb[199].mxu1  ;;  %v14812_v35 = vld [vmem:[%s32865_s17 + $0x38] sm:$0xff] }
0x19a1   : > { %v31060_v20 = vpack.c.bf16 %v14812_v35, %v14810_v34  ;;  %v14811_v31 = vld [vmem:[%s32865_s17 + $0x30] sm:$0xff]  ;;  %v14842_v35 = vld [vmem:[%s32865_s17 + $0x128] sm:$0xff] }
0x19a2   : > { %v14839_v34 = vld [vmem:[%s32865_s17 + $0x110] sm:$0xff] }
0x19a3   : > { %14604 = vmatpush1.bf16.msra.mxu0 %v25735_v22 }
0x19a4   : > { %v13652_v4 = vpop.f32.mrb[172].mxu0  ;;  %14605 = vmatprep.subr.bf16.mxu0 %v25743_v57  ;;  %v14809_v57 = vld [vmem:[%s32865_s17 + $0x20] sm:$0xff] }
0x19a5   : > { %v13653_v54 = vadd.f32 %v13652_v4, %v13613_v12  ;;  %v23291_v6 = vpop.f32.mrb[173].mxu0  ;;  %v14805_v12 = vld [vmem:[%s32865_s17] sm:$0xff]  ;;  %v14816_v4 = vld [vmem:[%s32865_s17 + $0x58] sm:$0xff] }
0x19a6   : > { %v13655_v24 = vpop.f32.mrb[174].mxu0  ;;  %v31057_v22 = vpack.c.bf16 %v14807_v19, %v14805_v12  ;;  %v14840_v12 = vld [vmem:[%s32865_s17 + $0x118] sm:$0xff] }
0x19a7   : > { %v30943_v46 = vadd.f32 %v13653_v54, %v30576_v43  ;;  %14606 = vmatpush1.bf16.msra.mxu0 %v25741_v3  ;;  %v23292_v26 = vpop.f32.mrb[175].mxu0  ;;  %v25753_v43 = vld [vmem:[%s32760_s15 + $0xbc0] ss:$12 sps:$4 sm:$0xff]   ;;  %v31079_v54 = vpack.c.bf16 %v14811_v31, %v14809_v57  ;;  %v14843_v31 = vld [vmem:[%s32865_s17 + $0x130] sm:$0xff] }
0x19a8   : > { %22612 = vmatprep.subr.bf16.mxu0 %v25747_v44  ;;  %v14814_v3 = vld [vmem:[%s32865_s17 + $0x48] sm:$0xff]  ;;  %v25781_v44 = vld [vmem:[%s32760_s15 + $0xad0] ss:$12 sps:$4 sm:$0xff]   ;;  %v14813_v24 = vld [vmem:[%s32865_s17 + $0x40] sm:$0xff] }
0x19a9   : > { %v31082_v6 = vpack.c.bf16 %v14816_v4, %v14814_v3  ;;  %v14815_v26 = vld [vmem:[%s32865_s17 + $0x50] sm:$0xff]  ;;  %v14841_v57 = vld [vmem:[%s32865_s17 + $0x120] sm:$0xff] }
0x19aa   : > { %21329 = vmatmul.mubr.msk.bf16.vlgmr.msra.gmra.mrb[184].mxu0 %vm11490_vm12, %v30940_v41  ;;  %v31238_v4 = vpack.c.bf16 %v14843_v31, %v14841_v57  ;;  %v14865_v57 = vld [vmem:[%s32865_s17 + $0x1e0] sm:$0xff]  ;;  %v14867_v31 = vld [vmem:[%s32865_s17 + $0x1f0] sm:$0xff] }
0x19ab   : > { %22613 = vmatpush3.bf16.msra.mxu0 %v25748_v8  ;;  %v14818_v8 = vld [vmem:[%s32865_s17 + $0x68] sm:$0xff] }
0x19ac   : > { %v13741_v47 = vpop.f32.mrb[176].mxu0  ;;  %22614 = vmatprep.subr.bf16.mxu0 %v25752_v61  ;;  %v14820_v61 = vld [vmem:[%s32865_s17 + $0x78] sm:$0xff] }
0x19ad   : > { %v13743_v11 = vpop.f32.mrb[177].mxu0  ;;  %v30962_v60 = vpack.c.bf16 %v13741_v47, %v13741_v47  ;;  %v31101_v47 = vpack.c.bf16 %v14815_v26, %v14813_v24  ;;  %v14848_v24 = vld [vmem:[%s32865_s17 + $0x158] sm:$0xff] }
0x19ae   : > { %v13791_v16 = vpack.c.bf16 %v13743_v11, %v13743_v11  ;;  %v13745_v45 = vpop.f32.mrb[178].mxu0  ;;  %v14817_v11 = vld [vmem:[%s32865_s17 + $0x60] sm:$0xff] }
0x19af   : > { %22615 = vmatpush3.bf16.msra.mxu0 %v25753_v43  ;;  %v13746_v49 = vpop.f32.mrb[179].mxu0  ;;  %v25782_v43 = vld [vmem:[%s32760_s15 + $0xd28] ss:$12 sps:$4 sm:$0xff]  }
0x19b0   : > { %14590 = vmatprep.mubr.bf16.mxu1 %v13791_v16  ;;  %22616 = vmatprep.subr.bf16.mxu0 %v25755_v52  ;;  %v31104_v52 = vpack.c.bf16 %v14820_v61, %v14818_v8  ;;  %v14822_v45 = vld [vmem:[%s32865_s17 + $0x88] sm:$0xff]  ;;  %v14845_v8 = vld [vmem:[%s32865_s17 + $0x140] sm:$0xff]  ;;  %v14847_v61 = vld [vmem:[%s32865_s17 + $0x150] sm:$0xff] }
0x19b1   : > { %14712 = vmatprep.mubr.bf16.mxu0 %v13791_v16  ;;  %14591 = vmatmul.mubr.bf16.vlgmr.msra.gmra.mrb[200].mxu1 %v30962_v60  ;;  %v14819_v16 = vld [vmem:[%s32865_s17 + $0x70] sm:$0xff] }
0x19b2   : > { %22591 = vmatpush3.bf16.msra.mxu1 %v25756_v53  ;;  %14672 = vmatprep.mubr.bf16.mxu1 %v13789_v55  ;;  %v14808_v55 = vld [vmem:[%s32865_s17 + $0x18] sm:$0xff] }
0x19b3   : > { %22617 = vmatpush3.bf16.msra.mxu0 %v25757_v2  ;;  %22592 = vmatprep.subr.bf16.mxu1 %v25758_v56  ;;  %v31037_v58 = vpack.c.bf16 %v14808_v55, %v14806_v48  ;;  %v14824_v53 = vld [vmem:[%s32865_s17 + $0x98] sm:$0xff]  ;;  %v14821_v2 = vld [vmem:[%s32865_s17 + $0x80] sm:$0xff]  ;;  %v14823_v56 = vld [vmem:[%s32865_s17 + $0x90] sm:$0xff] }
0x19b4   : > { %22618 = vmatprep.subr.bf16.mxu0 %v25759_v63  ;;  %v31129_v49 = vpack.c.bf16 %v14824_v53, %v14822_v45  ;;  %v14826_v63 = vld [vmem:[%s32865_s17 + $0xa8] sm:$0xff]  ;;  %v14833_v55 = vld [vmem:[%s32865_s17 + $0xe0] sm:$0xff] }
0x19b5   : > { %v14849_v53 = vld [vmem:[%s32865_s17 + $0x160] sm:$0xff] }
0x19b6   : > { %22593 = vmatpush3.bf16.msra.mxu1 %v25760_v13  ;;  %v14828_v13 = vld [vmem:[%s32865_s17 + $0xb8] sm:$0xff] }
0x19b7   : > { %22619 = vmatpush3.bf16.msra.mxu0 %v25761_v15  ;;  %22594 = vmatprep.subr.bf16.mxu1 %v25762_v59  ;;  %v25784_v15 = vld [vmem:[%s32760_s15 + $0xd58] ss:$12 sps:$4 sm:$0xff]   ;;  %v31148_v59 = vpack.c.bf16 %v14823_v56, %v14821_v2  ;;  %v14854_v56 = vld [vmem:[%s32865_s17 + $0x188] sm:$0xff] }
0x19b8   : > { %22620 = vmatprep.subr.bf16.mxu0 %v25763_v10  ;;  %v31151_v10 = vpack.c.bf16 %v14828_v13, %v14826_v63  ;;  %v14856_v63 = vld [vmem:[%s32865_s17 + $0x198] sm:$0xff] }
0x19b9   : > { %v31284_v13 = vpack.c.bf16 %v14856_v63, %v14854_v56  ;;  %v15049_v56 = vld [vmem:[#allocation20 + $0x18] sm:$0xff] }
0x19ba   : > { %22595 = vmatpush3.bf16.msra.mxu1 %v25764_v39  ;;  %v14825_v39 = vld [vmem:[%s32865_s17 + $0xa0] sm:$0xff]  ;;  %v15053_v63 = vld [vmem:[#allocation20 + $0x38] sm:$0xff] }
0x19bb   : > { %22621 = vmatpush3.bf16.msra.mxu0 %v25765_v36  ;;  %22596 = vmatprep.subr.bf16.mxu1 %v25766_v42  ;;  %v14827_v36 = vld [vmem:[%s32865_s17 + $0xb0] sm:$0xff]  ;;  %v14830_v42 = vld [vmem:[%s32865_s17 + $0xc8] sm:$0xff] }
0x19bc   : > { %22622 = vmatprep.subr.bf16.mxu0 %v25767_v51  ;;  %v14832_v51 = vld [vmem:[%s32865_s17 + $0xd8] sm:$0xff] }
0x19be   : > { %22597 = vmatpush3.bf16.msra.mxu1 %v25768_v25  ;;  %v25785_v25 = vld [vmem:[%s32760_s15 + $0xd70] ss:$12 sps:$4 sm:$0xff]  }
0x19bf   : > { %22623 = vmatpush3.bf16.msra.mxu0 %v25769_v33  ;;  %22598 = vmatprep.subr.bf16.mxu1 %v25770_v62  ;;  %v31170_v33 = vpack.c.bf16 %v14827_v36, %v14825_v39  ;;  %v31173_v62 = vpack.c.bf16 %v14832_v51, %v14830_v42  ;;  %v14855_v39 = vld [vmem:[%s32865_s17 + $0x190] sm:$0xff]  ;;  %v14858_v42 = vld [vmem:[%s32865_s17 + $0x1a8] sm:$0xff]  ;;  %v14860_v51 = vld [vmem:[%s32865_s17 + $0x1b8] sm:$0xff] }
0x19c0   : > { %22624 = vmatprep.subr.bf16.mxu0 %v25771_v50  ;;  %v14829_v50 = vld [vmem:[%s32865_s17 + $0xc0] sm:$0xff] }
0x19c2   : > { %22599 = vmatpush3.bf16.msra.mxu1 %v25772_v17  ;;  %v14831_v17 = vld [vmem:[%s32865_s17 + $0xd0] sm:$0xff] }
0x19c3   : > { %22625 = vmatpush3.bf16.msra.mxu0 %v25773_v40  ;;  %22600 = vmatprep.subr.bf16.mxu1 %v25774_v38  ;;  %v14834_v40 = vld [vmem:[%s32865_s17 + $0xe8] sm:$0xff]  ;;  %v14836_v38 = vld [vmem:[%s32865_s17 + $0xf8] sm:$0xff] }
0x19c4   : > { %22626 = vmatprep.subr.bf16.mxu0 %v25775_v21  ;;  %v31188_v21 = vpack.c.bf16 %v14831_v17, %v14829_v50  ;;  %v31191_v48 = vpack.c.bf16 %v14836_v38, %v14834_v40  ;;  %v14857_v50 = vld [vmem:[%s32865_s17 + $0x1a0] sm:$0xff]  ;;  %v14859_v17 = vld [vmem:[%s32865_s17 + $0x1b0] sm:$0xff]  ;;  %v14862_v38 = vld [vmem:[%s32865_s17 + $0x1c8] sm:$0xff] }
0x19c5   : > { %v31310_v40 = vpack.c.bf16 %v14859_v17, %v14857_v50  ;;  %v15055_v50 = vld [vmem:[#allocation20 + $0x48] sm:$0xff] }
0x19c6   : > { %22601 = vmatpush3.bf16.msra.mxu1 %v25776_v32  ;;  %v14835_v32 = vld [vmem:[%s32865_s17 + $0xf0] sm:$0xff]  ;;  %v15059_v17 = vld [vmem:[#allocation20 + $0x68] sm:$0xff] }
0x19c7   : > { %22627 = vmatpush3.bf16.msra.mxu0 %v25777_v23  ;;  %22602 = vmatprep.subr.bf16.mxu1 %v25778_v28  ;;  %v31202_v23 = vpack.c.bf16 %v14835_v32, %v14833_v55  ;;  %v14838_v28 = vld [vmem:[%s32865_s17 + $0x108] sm:$0xff]  ;;  %v14864_v55 = vld [vmem:[%s32865_s17 + $0x1d8] sm:$0xff]  ;;  %v14861_v32 = vld [vmem:[%s32865_s17 + $0x1c0] sm:$0xff] }
0x19c8   : > { %23662 = vmatprep.subr.bf16.mxu0 %v31037_v58  ;;  %v31212_v19 = vpack.c.bf16 %v14840_v12, %v14838_v28  ;;  %v31323_v28 = vpack.c.bf16 %v14864_v55, %v14862_v38  ;;  %v14863_v12 = vld [vmem:[%s32865_s17 + $0x1d0] sm:$0xff] }
0x19c9   : > { %v15062_v38 = vld [vmem:[#allocation20 + $0x80] sm:$0xff] }
0x19ca   : > { %14713 = vmatmul.mubr.bf16.vlgmr.msra.gmra.mrb[188].mxu0 %v30962_v60  ;;  %22603 = vmatpush3.bf16.msra.mxu1 %v25779_v1  ;;  %v25783_v60 = vld [vmem:[%s32760_s15 + $0xd40] ss:$12 sps:$4 sm:$0xff]  }
0x19cb   : > { %22604 = vmatprep.subr.bf16.mxu1 %v25780_v9  ;;  %23664 = vmatpush1.bf16.msra.mxu0 %v31057_v22  ;;  %v14844_v9 = vld [vmem:[%s32865_s17 + $0x138] sm:$0xff] }
0x19cc   : > { %23666 = vmatprep.subr.bf16.mxu0 %v31060_v20  ;;  %v31235_v3 = vpack.c.bf16 %v14844_v9, %v14842_v35  ;;  %v31334_v35 = vpack.c.bf16 %v14863_v12, %v14861_v32  ;;  %v31370_v32 = vpack.c.bf16 %v15062_v38, %v15059_v17  ;;  %v15058_v12 = vld [vmem:[#allocation20 + $0x60] sm:$0xff]  ;;  %v15080_v17 = vld [vmem:[#allocation20 + $0x110] sm:$0xff] }
0x19ce   : > { %22605 = vmatpush3.bf16.msra.mxu1 %v25781_v44  ;;  %v14846_v44 = vld [vmem:[%s32865_s17 + $0x148] sm:$0xff] }
0x19cf   : > { %23299 = vmatprep.subr.bf16.mxu1 %v27397_v0  ;;  %23668 = vmatpush1.bf16.msra.mxu0 %v31079_v54  ;;  %v31248_v26 = vpack.c.bf16 %v14848_v24, %v14846_v44  ;;  %v31346_v44 = vpack.c.bf16 %v14867_v31, %v14865_v57  ;;  %v14870_v24 = vld [vmem:[%s32865_s17 + $0x208] sm:$0xff] }
0x19d0   : > { %23670 = vmatprep.subr.bf16.mxu0 %v31082_v6  ;;  %v15068_v57 = vld [vmem:[#allocation20 + $0xb0] sm:$0xff] }
0x19d1   : > { %14673 = vmatmul.mubr.bf16.vlgmr.msra.gmra.mrb[204].mxu1 %v30912_v5  ;;  %v31126_v5 = vpack.c.bf16 %v14819_v16, %v14817_v11  ;;  %v14850_v11 = vld [vmem:[%s32865_s17 + $0x168] sm:$0xff]  ;;  %v14852_v16 = vld [vmem:[%s32865_s17 + $0x178] sm:$0xff] }
0x19d2   : > { %23300 = vmatpush3.bf16.msra.mxu1 %v25782_v43  ;;  %23307 = vmatprep.mubr.msk.bf16.mxu1 %vm26394_vm0, %v27397_v0  ;;  %v31256_v43 = vpack.c.bf16 %v14847_v61, %v14845_v8  ;;  %v31266_v45 = vpack.c.bf16 %v14852_v16, %v14850_v11  ;;  %v14872_v8 = vld [vmem:[%s32865_s17 + $0x218] sm:$0xff]  ;;  %vm14783_vm0 = vcmask 1041408  }
0x19d3   : > { %23301 = vmatprep.subr.bf16.mxu1 %v27397_v0  ;;  %23672 = vmatpush1.bf16.msra.mxu0 %v31101_v47  ;;  %v31356_v61 = vpack.c.bf16 %v14872_v8, %v14870_v24  ;;  %v15047_v11 = vld [vmem:[#allocation20 + $0x8] sm:$0xff]  ;;  %v15050_v16 = vld [vmem:[#allocation20 + $0x20] sm:$0xff]  ;;  %v15064_v8 = vld [vmem:[#allocation20 + $0x90] sm:$0xff] }
0x19d4   : > { %23674 = vmatprep.subr.bf16.mxu0 %v31104_v52 }
0x19d6   : > { %23302 = vmatpush3.bf16.msra.mxu1 %v25783_v60  ;;  %v14851_v60 = vld [vmem:[%s32865_s17 + $0x170] sm:$0xff] }
0x19d7   : > { %23303 = vmatprep.subr.bf16.mxu1 %v27397_v0  ;;  %23676 = vmatpush1.bf16.msra.mxu0 %v31126_v5  ;;  %v31274_v2 = vpack.c.bf16 %v14851_v60, %v14849_v53  ;;  %v15046_v53 = vld [vmem:[#allocation20] sm:$0xff]  ;;  %v31359_v60 = vpack.c.bf16 %v15050_v16, %v15047_v11  ;;  %v15067_v11 = vld [vmem:[#allocation20 + $0xa8] sm:$0xff] }
0x19d8   : > { %23678 = vmatprep.subr.bf16.mxu0 %v31129_v49  ;;  %v15071_v16 = vld [vmem:[#allocation20 + $0xc8] sm:$0xff] }
0x19da   : > { %23304 = vmatpush3.bf16.msra.mxu1 %v25784_v15  ;;  %v14853_v15 = vld [vmem:[%s32865_s17 + $0x180] sm:$0xff] }
0x19db   : > { %23305 = vmatprep.subr.bf16.mxu1 %v27397_v0  ;;  %23680 = vmatpush1.bf16.msra.mxu0 %v31148_v59  ;;  %v31292_v36 = vpack.c.bf16 %v14855_v39, %v14853_v15  ;;  %v15056_v15 = vld [vmem:[#allocation20 + $0x50] sm:$0xff]  ;;  %v31361_v39 = vpack.c.bf16 %v15049_v56, %v15046_v53  ;;  %v15074_v53 = vld [vmem:[#allocation20 + $0xe0] sm:$0xff]  ;;  %v31379_v56 = vpack.c.bf16 %v15067_v11, %v15064_v8 }
0x19dc   : > { %23682 = vmatprep.subr.bf16.mxu0 %v31151_v10  ;;  %v15086_v8 = vld [vmem:[#allocation20 + $0x140] sm:$0xff] }
0x19dd   : > { %32867 = vst [vmem:[#allocation37_spill] sm:$0xff] %v31379_v56 }
0x19de   : > { %23306 = vmatpush3.bf16.msra.mxu1 %v25785_v25  ;;  %v31302_v25 = vpack.c.bf16 %v14860_v51, %v14858_v42  ;;  %v31363_v42 = vpack.c.bf16 %v15056_v15, %v15053_v63  ;;  %v15052_v51 = vld [vmem:[#allocation20 + $0x30] sm:$0xff]  ;;  %v31382_v63 = vpack.c.bf16 %v15074_v53, %v15071_v16  ;;  %v15070_v15 = vld [vmem:[#allocation20 + $0xc0] sm:$0xff] }
0x19df   : > { %23684 = vmatpush1.bf16.msra.mxu0 %v31170_v33  ;;  %23758 = vmatprep.subr.bf16.mxu1 %v31359_v60  ;;  %v31367_v55 = vpack.c.bf16 %v15055_v50, %v15052_v51  ;;  %v15073_v51 = vld [vmem:[#allocation20 + $0xd8] sm:$0xff]  ;;  %v15082_v53 = vld [vmem:[#allocation20 + $0x120] sm:$0xff] }
0x19e0   : > { %23686 = vmatprep.subr.bf16.mxu0 %v31173_v62  ;;  %32868 = vst [vmem:[#allocation38_spill] sm:$0xff] %v31382_v63  ;;  %v15077_v50 = vld [vmem:[#allocation20 + $0xf8] sm:$0xff]  ;;  %v31385_v38 = vpack.c.bf16 %v15073_v51, %v15070_v15  ;;  %v15092_v51 = vld [vmem:[#allocation20 + $0x170] sm:$0xff] }
0x19e1   : > { %23308 = vmatmul.mubr.msk.bf16.vlgmr.msra.gmra.mrb[208].mxu1 %vm11490_vm12, %v30940_v41  ;;  %v14837_v41 = vld [vmem:[%s32865_s17 + $0x100] sm:$0xff]  ;;  %v15089_v15 = vld [vmem:[#allocation20 + $0x158] sm:$0xff] }
0x19e2   : > { %v31223_v1 = vpack.c.bf16 %v14839_v34, %v14837_v41  ;;  %v14866_v41 = vld [vmem:[%s32865_s17 + $0x1e8] sm:$0xff]  ;;  %v14868_v34 = vld [vmem:[%s32865_s17 + $0x1f8] sm:$0xff]  ;;  %23760 = vmatpush1.bf16.msra.mxu1 %v31361_v39  ;;  %32869 = vst [vmem:[#allocation39_spill] sm:$0xff] %v31385_v38 }
0x19e3   : > { %23688 = vmatpush1.bf16.msra.mxu0 %v31188_v21  ;;  %v31336_v9 = vpack.c.bf16 %v14868_v34, %v14866_v41  ;;  %23762 = vmatprep.subr.bf16.mxu1 %v31363_v42  ;;  %v15061_v41 = vld [vmem:[#allocation20 + $0x78] sm:$0xff] }
0x19e4   : > { %23690 = vmatprep.subr.bf16.mxu0 %v31191_v48  ;;  %v15065_v34 = vld [vmem:[#allocation20 + $0x98] sm:$0xff]  ;;  %v31373_v31 = vpack.c.bf16 %v15061_v41, %v15058_v12  ;;  %v31388_v12 = vpack.c.bf16 %v15080_v17, %v15077_v50  ;;  %v15076_v41 = vld [vmem:[#allocation20 + $0xf0] sm:$0xff]  ;;  %v31397_v50 = vpack.c.bf16 %v15085_v37, %v15082_v53  ;;  %v31400_v17 = vpack.c.bf16 %v15092_v51, %v15089_v15 }
0x19e5   : > { %v31376_v24 = vpack.c.bf16 %v15068_v57, %v15065_v34  ;;  %v15079_v34 = vld [vmem:[#allocation20 + $0x108] sm:$0xff]  ;;  %v15101_v37 = vld [vmem:[#allocation20 + $0x1b8] sm:$0xff]  ;;  %v15104_v53 = vld [vmem:[#allocation20 + $0x1d0] sm:$0xff] }
0x19e6   : > { %23764 = vmatpush1.bf16.msra.mxu1 %v31367_v55  ;;  %32870 = vst [vmem:[#allocation40_spill] sm:$0xff] %v31388_v12  ;;  %v15083_v57 = vld [vmem:[#allocation20 + $0x128] sm:$0xff]  ;;  %v31391_v11 = vpack.c.bf16 %v15079_v34, %v15076_v41  ;;  %32873 = vst [vmem:[#allocation43_spill] sm:$0xff] %v31397_v50  ;;  %v15098_v34 = vld [vmem:[#allocation20 + $0x1a0] sm:$0xff]  ;;  %v31412_v51 = vpack.c.bf16 %v15104_v53, %v15101_v37 }
0x19e7   : > { %23692 = vmatpush1.bf16.msra.mxu0 %v31202_v23  ;;  %23766 = vmatprep.subr.bf16.mxu1 %v31370_v32  ;;  %32866 = vst [vmem:[#allocation36_spill] sm:$0xff] %v31376_v24  ;;  %v31394_v16 = vpack.c.bf16 %v15086_v8, %v15083_v57  ;;  %32874 = vst [vmem:[#allocation44_spill] sm:$0xff] %v31400_v17  ;;  %v15095_v41 = vld [vmem:[#allocation20 + $0x188] sm:$0xff] }
0x19e8   : > { %23694 = vmatprep.subr.bf16.mxu0 %v31212_v19  ;;  %32871 = vst [vmem:[#allocation41_spill] sm:$0xff] %v31391_v11  ;;  %v31406_v8 = vpack.c.bf16 %v15098_v34, %v15095_v41  ;;  %32878 = vst [vmem:[#allocation48_spill] sm:$0xff] %v31412_v51 }
0x19e9   : > { %32872 = vst [vmem:[#allocation42_spill] sm:$0xff] %v31394_v16 }
0x19ea   : > { %23768 = vmatpush1.bf16.msra.mxu1 %v31373_v31  ;;  %32876 = vst [vmem:[#allocation46_spill] sm:$0xff] %v31406_v8 }
0x19eb   : > { %23696 = vmatpush1.bf16.msra.mxu0 %v31223_v1  ;;  %23770 = vmatprep.subr.bf16.mxu1 %v31376_v24 }
0x19ec   : > { %23698 = vmatprep.subr.bf16.mxu0 %v31235_v3 }
0x19ee   : > { %23772 = vmatpush1.bf16.msra.mxu1 %v31379_v56 }
0x19ef   : > { %23700 = vmatpush1.bf16.msra.mxu0 %v31238_v4  ;;  %23774 = vmatprep.subr.bf16.mxu1 %v31382_v63 }
0x19f0   : > { %23702 = vmatprep.subr.bf16.mxu0 %v31248_v26 }
0x19f2   : > { %23776 = vmatpush1.bf16.msra.mxu1 %v31385_v38  ;;  %v15091_v38 = vld [vmem:[#allocation20 + $0x168] sm:$0xff] }
0x19f3   : > { %23704 = vmatpush1.bf16.msra.mxu0 %v31256_v43  ;;  %23778 = vmatprep.subr.bf16.mxu1 %v31388_v12  ;;  %v31403_v57 = vpack.c.bf16 %v15091_v38, %v15088_v7  ;;  %v15094_v12 = vld [vmem:[#allocation20 + $0x180] sm:$0xff]  ;;  %v15107_v7 = vld [vmem:[#allocation20 + $0x1e8] sm:$0xff] }
0x19f4   : > { %23706 = vmatprep.subr.bf16.mxu0 %v31266_v45  ;;  %v15110_v38 = vld [vmem:[#allocation20 + $0x200] sm:$0xff] }
0x19f5   : > { %32875 = vst [vmem:[#allocation45_spill] sm:$0xff] %v31403_v57 }
0x19f6   : > { %23780 = vmatpush1.bf16.msra.mxu1 %v31391_v11  ;;  %v15097_v11 = vld [vmem:[#allocation20 + $0x198] sm:$0xff] }
0x19f7   : > { %23708 = vmatpush1.bf16.msra.mxu0 %v31274_v2  ;;  %23782 = vmatprep.subr.bf16.mxu1 %v31394_v16  ;;  %v31409_v15 = vpack.c.bf16 %v15097_v11, %v15094_v12  ;;  %v15100_v16 = vld [vmem:[#allocation20 + $0x1b0] sm:$0xff]  ;;  %v15109_v12 = vld [vmem:[#allocation20 + $0x1f8] sm:$0xff] }
0x19f8   : > { %23710 = vmatprep.subr.bf16.mxu0 %v31284_v13 }
0x19f9   : > { %32877 = vst [vmem:[#allocation47_spill] sm:$0xff] %v31409_v15 }
0x19fa   : > { %23784 = vmatpush1.bf16.msra.mxu1 %v31397_v50  ;;  %v15103_v50 = vld [vmem:[#allocation20 + $0x1c8] sm:$0xff] }
0x19fb   : > { %23712 = vmatpush1.bf16.msra.mxu0 %v31292_v36  ;;  %23786 = vmatprep.subr.bf16.mxu1 %v31400_v17  ;;  %v31415_v41 = vpack.c.bf16 %v15103_v50, %v15100_v16  ;;  %v31418_v17 = vpack.c.bf16 %v15110_v38, %v15107_v7  ;;  %v31425_v7 = vld [vmem:[#allocation18] sm:$0x7] }
0x19fc   : > { %23714 = vmatprep.subr.bf16.mxu0 %v31302_v25 }
0x19fd   : > { %32879 = vst [vmem:[#allocation49_spill] sm:$0xff] %v31415_v41  ;;  %32880 = vst [vmem:[#allocation50_spill] sm:$0xff] %v31418_v17 }
0x19fe   : > { %23788 = vmatpush1.bf16.msra.mxu1 %v31403_v57  ;;  %v15106_v57 = vld [vmem:[#allocation20 + $0x1e0] sm:$0xff] }
0x19ff   : > { %23716 = vmatpush1.bf16.msra.mxu0 %v31310_v40  ;;  %23790 = vmatprep.subr.bf16.mxu1 %v31406_v8  ;;  %v31421_v37 = vpack.c.bf16 %v15109_v12, %v15106_v57  ;;  %v14768_v57 = vrot.slane %v31425_v7, %v27171_v27 }
0x1a00   : > { %23718 = vmatprep.subr.bf16.mxu0 %v31323_v28 }
0x1a01   : > { %32881 = vst [vmem:[#allocation51_spill] sm:$0xff] %v31421_v37 }
0x1a02   : > { %23792 = vmatpush1.bf16.msra.mxu1 %v31409_v15 }
0x1a03   : > { %23720 = vmatpush1.bf16.msra.mxu0 %v31334_v35  ;;  %23794 = vmatprep.subr.bf16.mxu1 %v31412_v51 }
0x1a04   : > { %23722 = vmatprep.subr.bf16.mxu0 %v31336_v9 }
0x1a06   : > { %23796 = vmatpush1.bf16.msra.mxu1 %v31415_v41 }
0x1a07   : > { %23724 = vmatpush1.bf16.msra.mxu0 %v31346_v44  ;;  %23798 = vmatprep.subr.bf16.mxu1 %v31418_v17 }
0x1a08   : > { %23726 = vmatprep.subr.bf16.mxu0 %v31356_v61 }
0x1a0a   : > { %23800 = vmatpush1.bf16.msra.mxu1 %v31421_v37  ;;  %v14772_v37 = vrot.slane %v31425_v7, %v27173_v29 }
0x1a6d   : > { %v14551_v34 = vpop.f32.mrb[180].mxu0 }
0x1a6e   : > { %v14553_v11 = vpop.f32.mrb[181].mxu0 }
0x1a6f   : > { %v14555_v63 = vpop.f32.mrb[182].mxu0 }
0x1a70   : > { %v14556_v8 = vpop.f32.mrb[183].mxu0 }
0x1a7d   : > { %v14633_v16 = vpop.f32.mrb[184].mxu0 }
0x1a7e   : > { %v14635_v50 = vpop.f32.mrb[185].mxu0 }
0x1a7f   : > { %v14637_v53 = vpop.f32.mrb[186].mxu0 }
0x1a80   : > { %v14638_v15 = vpop.f32.mrb[187].mxu0 }
0x1a84   : > { %v14592_v51 = vpop.f32.mrb[200].mxu1 }
0x1a85   : > { %v14593_v38 = vadd.f32 %v14592_v51, %v14551_v34  ;;  %v14594_v56 = vpop.f32.mrb[201].mxu1 }
0x1a86   : > { %v14595_v24 = vadd.f32 %v14594_v56, %v14553_v11  ;;  %v14596_v63 = vpop.f32.mrb[202].mxu1 }
0x1a87   : > { %v14634_v8 = vadd.f32 %v14633_v16, %v14593_v38  ;;  %v14597_v12 = vpop.f32.mrb[203].mxu1 }
0x1a88   : > { %v14636_v41 = vadd.f32 %v14635_v50, %v14595_v24 }
0x1a89   : > { %v14760_v17 = vadd.f32 %v14634_v8, %v30907_v14 }
0x1a8a   : > { %v14761_v15 = vadd.f32 %v14636_v41, %v30910_v18  ;;  %v14869_v18 = vld [vmem:[%s32865_s17 + $0x200] sm:$0xff] }
0x1a8b   : > { %v31433_v53 = vadd.f32 %v14768_v57, %v14760_v17  ;;  %v14871_v17 = vld [vmem:[%s32865_s17 + $0x210] sm:$0xff]  ;;  %v14876_v57 = vld [vmem:[%s32865_s17 + $0x238] sm:$0xff] }
0x1a8c   : > { %v31435_v51 = vadd.f32 %v14772_v37, %v14761_v15  ;;  %v14874_v37 = vld [vmem:[%s32865_s17 + $0x228] sm:$0xff]  ;;  %v31453_v15 = vpack.c.bf16 %v14871_v17, %v14869_v18  ;;  %v14879_v18 = vld [vmem:[%s32865_s17 + $0x250] sm:$0xff] }
0x1a8d   : > { %v14784_v56 = vsel %vm14783_vm0, %v31433_v53, 0.0 }
0x1a8e   : > { %v14785_v34 = vrot.slane %v14784_v56, 4  ;;  %v14791_v11 = vsel %vm14783_vm0, %v31435_v51, 0.0 }
0x1a8f   : > { %v14792_v24 = vrot.slane %v14791_v11, 4 }
0x1a90   : > { %v14786_v16 = vadd.f32 %v14785_v34, %v14784_v56  ;;  %v31455_v34 = vpack.c.bf16 %v14876_v57, %v14874_v37  ;;  %v14882_v37 = vld [vmem:[%s32865_s17 + $0x268] sm:$0xff]  ;;  %v14884_v57 = vld [vmem:[%s32865_s17 + $0x278] sm:$0xff] }
0x1a91   : > { %v14793_v50 = vadd.f32 %v14792_v24, %v14791_v11  ;;  %v14873_v11 = vld [vmem:[%s32865_s17 + $0x220] sm:$0xff]  ;;  %v14875_v24 = vld [vmem:[%s32865_s17 + $0x230] sm:$0xff] }
0x1a92   : > { %v14787_v29 = vrot.slane %v14786_v16, 2 }
0x1a93   : > { %v14794_v38 = vrot.slane %v14793_v50, 2 }
0x1a94   : > { %v14788_v14 = vadd.f32 %v14787_v29, %v14786_v16  ;;  %v14878_v16 = vld [vmem:[%s32865_s17 + $0x248] sm:$0xff] }
0x1a95   : > { %v14795_v63 = vadd.f32 %v14794_v38, %v14793_v50  ;;  %v14880_v50 = vld [vmem:[%s32865_s17 + $0x258] sm:$0xff]  ;;  %v31470_v38 = vpack.c.bf16 %v14875_v24, %v14873_v11  ;;  %v31492_v11 = vpack.c.bf16 %v14884_v57, %v14882_v37  ;;  %v14881_v24 = vld [vmem:[%s32865_s17 + $0x260] sm:$0xff] }
0x1a96   : > { %v14789_v8 = vrot.slane %v14788_v14, 1 }
0x1a97   : > { %v14796_v41 = vrot.slane %v14795_v63, 1  ;;  %32882 = vst [vmem:[#allocation52_spill] sm:$0xff] %v31470_v38 }
0x1a98   : > { %v14790_v56 = vadd.f32 %v14789_v8, %v14788_v14  ;;  %v14877_v8 = vld [vmem:[%s32865_s17 + $0x240] sm:$0xff] }
0x1a99   : > { %v14797_v12 = vadd.f32 %v14796_v41, %v14795_v63  ;;  %v31474_v63 = vpack.c.bf16 %v14880_v50, %v14878_v16  ;;  %v14883_v16 = vld [vmem:[%s32865_s17 + $0x270] sm:$0xff]  ;;  %v14886_v50 = vld [vmem:[%s32865_s17 + $0x288] sm:$0xff] }
0x1a9b   : > { %14965 = vmatprep.mubr.f32.mxu0 %v14797_v12  ;;  %32883 = vst [vmem:[#allocation53_spill] sm:$0xff] %v31474_v63 }
0x1a9c   : > { %14966 = vmatmul.mubr.f32.vlgmr.msra.gmra.mrb[192].mxu0 %v14790_v56  ;;  %v31489_v56 = vpack.c.bf16 %v14879_v18, %v14877_v8  ;;  %v31507_v18 = vpack.c.bf16 %v14883_v16, %v14881_v24  ;;  %v14890_v24 = vld [vmem:[%s32865_s17 + $0x2a8] sm:$0xff]  ;;  %v14892_v16 = vld [vmem:[%s32865_s17 + $0x2b8] sm:$0xff] }
0x1a9d   : > { %v22628_v29 = vpop.f32.mrb[188].mxu0  ;;  %23728 = vmatpush1.bf16.msra.mxu0 %v31453_v15  ;;  %15036 = vmatprep.mubr.f32.mxu0 %v27397_v0 }
0x1a9e   : > { %v22629_v14 = vpop.f32.mrb[189].mxu0  ;;  %23730 = vmatprep.subr.bf16.mxu0 %v31455_v34  ;;  %32884 = vst [vmem:[#allocation54_spill] sm:$0xff] %v31507_v18 }
0x1a9f   : > { %v22630_v17 = vadd.f32 %v22629_v14, %v22628_v29  ;;  %v22631_v41 = vpop.f32.mrb[190].mxu0  ;;  %v14888_v29 = vld [vmem:[%s32865_s17 + $0x298] sm:$0xff] }
0x1aa0   : > { %v22632_v12 = vpop.f32.mrb[191].mxu0  ;;  %v31510_v57 = vpack.c.bf16 %v14888_v29, %v14886_v50  ;;  %v31528_v29 = vpack.c.bf16 %v14892_v16, %v14890_v24  ;;  %v14895_v24 = vld [vmem:[%s32865_s17 + $0x2d0] sm:$0xff]  ;;  %v14898_v16 = vld [vmem:[%s32865_s17 + $0x2e8] sm:$0xff] }
0x1aa1   : > { %23732 = vmatpush1.bf16.msra.mxu0 %v31470_v38  ;;  %v14885_v12 = vld [vmem:[%s32865_s17 + $0x280] sm:$0xff] }
0x1aa2   : > { %23734 = vmatprep.subr.bf16.mxu0 %v31474_v63  ;;  %32885 = vst [vmem:[#allocation55_spill] sm:$0xff] %v31510_v57  ;;  %v14887_v63 = vld [vmem:[%s32865_s17 + $0x290] sm:$0xff]  ;;  %32887 = vst [vmem:[#allocation57_spill] sm:$0xff] %v31528_v29 }
0x1aa3   : > { %v31525_v50 = vpack.c.bf16 %v14887_v63, %v14885_v12  ;;  %v14896_v63 = vld [vmem:[%s32865_s17 + $0x2d8] sm:$0xff]  ;;  %v14893_v12 = vld [vmem:[%s32865_s17 + $0x2c0] sm:$0xff] }
0x1aa4   : > { %v22606_v14 = vpop.f32.mrb[204].mxu1 }
0x1aa5   : > { %v22607_v8 = vpop.f32.mrb[205].mxu1  ;;  %23736 = vmatpush1.bf16.msra.mxu0 %v31489_v56  ;;  %32886 = vst [vmem:[#allocation56_spill] sm:$0xff] %v31525_v50 }
0x1aa6   : > { %v22608_v41 = vadd.f32 %v22607_v8, %v22606_v14  ;;  %v22609_v37 = vpop.f32.mrb[206].mxu1  ;;  %23738 = vmatprep.subr.bf16.mxu0 %v31492_v11  ;;  %v14891_v8 = vld [vmem:[%s32865_s17 + $0x2b0] sm:$0xff] }
0x1aa7   : > { %v22610_v38 = vpop.f32.mrb[207].mxu1 }
0x1aa8   : > { %v14715_v14 = vadd.f32 %v22630_v17, %v22608_v41  ;;  %v14889_v38 = vld [vmem:[%s32865_s17 + $0x2a0] sm:$0xff]  ;;  %v14894_v17 = vld [vmem:[%s32865_s17 + $0x2c8] sm:$0xff] }
0x1aa9   : > { %23740 = vmatpush1.bf16.msra.mxu0 %v31507_v18  ;;  %v31543_v41 = vpack.c.bf16 %v14891_v8, %v14889_v38  ;;  %v31546_v37 = vpack.c.bf16 %v14896_v63, %v14894_v17  ;;  %v14900_v38 = vld [vmem:[%s32865_s17 + $0x2f8] sm:$0xff]  ;;  %v31561_v8 = vpack.c.bf16 %v14895_v24, %v14893_v12  ;;  %v14897_v63 = vld [vmem:[%s32865_s17 + $0x2e0] sm:$0xff]  ;;  %v14776_v18 = vrot.slane %v31425_v7, %v27175_v30 }
0x1aaa   : > { %23742 = vmatprep.subr.bf16.mxu0 %v31510_v57  ;;  %v31564_v17 = vpack.c.bf16 %v14900_v38, %v14898_v16 }
0x1aab   : > { %32888 = vst [vmem:[#allocation58_spill] sm:$0xff] %v31543_v41  ;;  %32889 = vst [vmem:[#allocation59_spill] sm:$0xff] %v31546_v37 }
0x1aad   : > { %23744 = vmatpush1.bf16.msra.mxu0 %v31525_v50 }
0x1aae   : > { %23746 = vmatprep.subr.bf16.mxu0 %v31528_v29  ;;  %v14899_v29 = vld [vmem:[%s32865_s17 + $0x2f0] sm:$0xff] }
0x1aaf   : > { %v31575_v12 = vpack.c.bf16 %v14899_v29, %v14897_v63 }
0x1ab1   : > { %23748 = vmatpush1.bf16.msra.mxu0 %v31543_v41 }
0x1ab2   : > { %23750 = vmatprep.subr.bf16.mxu0 %v31546_v37 }
0x1ab4   : > { %v14754_v50 = vpop.f32.mrb[208].mxu1 }
0x1ab5   : > { %v14755_v57 = vadd.f32 %v14754_v50, %v14715_v14  ;;  %v23309_v41 = vpop.f32.mrb[209].mxu1  ;;  %23752 = vmatpush1.bf16.msra.mxu0 %v31561_v8 }
0x1ab6   : > { %v14757_v24 = vpop.f32.mrb[210].mxu1  ;;  %23754 = vmatprep.subr.bf16.mxu0 %v31564_v17 }
0x1ab7   : > { %v14762_v16 = vadd.f32 %v14755_v57, %v30943_v46  ;;  %v23310_v38 = vpop.f32.mrb[211].mxu1  ;;  %v15113_v46 = vld [vmem:[#allocation20 + $0x218] sm:$0xff]  ;;  %v15096_v57 = vld [vmem:[#allocation20 + $0x190] sm:$0xff]  ;;  %v15099_v24 = vld [vmem:[#allocation20 + $0x1a8] sm:$0xff] }
0x1ab8   : > { %v15102_v38 = vld [vmem:[#allocation20 + $0x1c0] sm:$0xff] }
0x1ab9   : > { %v31579_v37 = vadd.f32 %v14776_v18, %v14762_v16  ;;  %23756 = vmatpush1.bf16.msra.mxu0 %v31575_v12  ;;  %v31657_v16 = vpack.c.bf16 %v15099_v24, %v15096_v57 }
0x1aba   : > { %23842 = vmatprep.subr.bf16.mxu0 %v31037_v58  ;;  %v15116_v58 = vld [vmem:[#allocation20 + $0x230] sm:$0xff] }
0x1abb   : > { %v14798_v30 = vsel %vm14783_vm0, %v31579_v37, 0.0 }
0x1abc   : > { %v14799_v7 = vrot.slane %v14798_v30, 4 }
0x1abe   : > { %v14800_v14 = vadd.f32 %v14799_v7, %v14798_v30  ;;  %v15105_v30 = vld [vmem:[#allocation20 + $0x1d8] sm:$0xff] }
0x1abf   : > { %v31661_v7 = vpack.c.bf16 %v15105_v30, %v15102_v38 }
0x1ac0   : > { %v14801_v50 = vrot.slane %v14800_v14, 2 }
0x1ac2   : > { %v14802_v29 = vadd.f32 %v14801_v50, %v14800_v14  ;;  %v15108_v14 = vld [vmem:[#allocation20 + $0x1f0] sm:$0xff]  ;;  %v15111_v50 = vld [vmem:[#allocation20 + $0x208] sm:$0xff] }
0x1ac4   : > { %v14803_v41 = vrot.slane %v14802_v29, 1 }
0x1ac6   : > { %v14804_v63 = vadd.f32 %v14803_v41, %v14802_v29  ;;  %v31665_v29 = vpack.c.bf16 %v15111_v50, %v15108_v14  ;;  %v15114_v41 = vld [vmem:[#allocation20 + $0x220] sm:$0xff] }
0x1ac7   : > { %v32907_v50 = vld [vmem:[#allocation52_spill] sm:$0xff] }
0x1ac8   : > { %15037 = vmatmul.mubr.f32.vlgmr.msra.gmra.mrb[192].mxu0 %v14804_v63  ;;  %v15117_v63 = vld [vmem:[#allocation20 + $0x238] sm:$0xff] }
0x1ac9   : > { %23844 = vmatpush1.bf16.msra.mxu0 %v31057_v22  ;;  %v31617_v22 = vpack.c.bf16 %v15116_v58, %v15113_v46  ;;  %v31669_v46 = vpack.c.bf16 %v15117_v63, %v15114_v41  ;;  %v32891_v58 = vld [vmem:[#allocation36_spill] sm:$0xff]  ;;  %v32908_v41 = vld [vmem:[#allocation53_spill] sm:$0xff]  ;;  %v32909_v63 = vld [vmem:[#allocation54_spill] sm:$0xff] }
0x1aca   : > { %23846 = vmatprep.subr.bf16.mxu0 %v31060_v20  ;;  %v15112_v20 = vld [vmem:[#allocation20 + $0x210] sm:$0xff] }
0x1acb   : > { %23802 = vmatprep.subr.bf16.mxu1 %v31617_v22 }
0x1acd   : > { %23848 = vmatpush1.bf16.msra.mxu0 %v31079_v54  ;;  %v15115_v54 = vld [vmem:[#allocation20 + $0x228] sm:$0xff] }
0x1ace   : > { %23850 = vmatprep.subr.bf16.mxu0 %v31082_v6  ;;  %v31619_v6 = vpack.c.bf16 %v15115_v54, %v15112_v20  ;;  %v32892_v20 = vld [vmem:[#allocation37_spill] sm:$0xff]  ;;  %v32893_v54 = vld [vmem:[#allocation38_spill] sm:$0xff] }
0x1ad0   : > { %23804 = vmatpush1.bf16.msra.mxu1 %v31619_v6 }
0x1ad1   : > { %23852 = vmatpush1.bf16.msra.mxu0 %v31101_v47  ;;  %v32890_v47 = vmov 0.0|0.0  }
0x1ad2   : > { %23854 = vmatprep.subr.bf16.mxu0 %v31104_v52  ;;  %23805 = vmatprep.subr.bf16.mxu1 %v32890_v47  ;;  %v15048_v52 = vld [vmem:[#allocation20 + $0x10] sm:$0xff] }
0x1ad5   : > { %23856 = vmatpush1.bf16.msra.mxu0 %v31126_v5  ;;  %v15051_v5 = vld [vmem:[#allocation20 + $0x28] sm:$0xff] }
0x1ad6   : > { %23858 = vmatprep.subr.bf16.mxu0 %v31129_v49 }
0x1ad9   : > { %23860 = vmatpush1.bf16.msra.mxu0 %v31148_v59 }
0x1ada   : > { %23862 = vmatprep.subr.bf16.mxu0 %v31151_v10 }
0x1add   : > { %23864 = vmatpush1.bf16.msra.mxu0 %v31170_v33  ;;  %v31624_v33 = vpack.c.bf16 %v15051_v5, %v15048_v52  ;;  %v32894_v52 = vld [vmem:[#allocation39_spill] sm:$0xff]  ;;  %v32896_v5 = vld [vmem:[#allocation41_spill] sm:$0xff] }
0x1ade   : > { %23866 = vmatprep.subr.bf16.mxu0 %v31173_v62 }
0x1ae1   : > { %23868 = vmatpush1.bf16.msra.mxu0 %v31188_v21  ;;  %v15054_v21 = vld [vmem:[#allocation20 + $0x40] sm:$0xff] }
0x1ae2   : > { %23870 = vmatprep.subr.bf16.mxu0 %v31191_v48  ;;  %v15057_v48 = vld [vmem:[#allocation20 + $0x58] sm:$0xff] }
0x1ae5   : > { %23872 = vmatpush1.bf16.msra.mxu0 %v31202_v23  ;;  %v31629_v23 = vpack.c.bf16 %v15057_v48, %v15054_v21  ;;  %v32906_v21 = vld [vmem:[#allocation51_spill] sm:$0xff] }
0x1ae6   : > { %23874 = vmatprep.subr.bf16.mxu0 %v31212_v19  ;;  %v15060_v19 = vld [vmem:[#allocation20 + $0x70] sm:$0xff] }
0x1ae9   : > { %23876 = vmatpush1.bf16.msra.mxu0 %v31223_v1  ;;  %v15063_v1 = vld [vmem:[#allocation20 + $0x88] sm:$0xff] }
0x1aea   : > { %23878 = vmatprep.subr.bf16.mxu0 %v31235_v3  ;;  %v31633_v3 = vpack.c.bf16 %v15063_v1, %v15060_v19 }
0x1aed   : > { %23880 = vmatpush1.bf16.msra.mxu0 %v31238_v4  ;;  %v15066_v4 = vld [vmem:[#allocation20 + $0xa0] sm:$0xff] }
0x1aee   : > { %23882 = vmatprep.subr.bf16.mxu0 %v31248_v26  ;;  %v15069_v26 = vld [vmem:[#allocation20 + $0xb8] sm:$0xff] }
0x1af1   : > { %23884 = vmatpush1.bf16.msra.mxu0 %v31256_v43  ;;  %v31637_v43 = vpack.c.bf16 %v15069_v26, %v15066_v4 }
0x1af2   : > { %23886 = vmatprep.subr.bf16.mxu0 %v31266_v45  ;;  %v15072_v45 = vld [vmem:[#allocation20 + $0xd0] sm:$0xff] }
0x1af5   : > { %23888 = vmatpush1.bf16.msra.mxu0 %v31274_v2  ;;  %v15075_v2 = vld [vmem:[#allocation20 + $0xe8] sm:$0xff] }
0x1af6   : > { %23890 = vmatprep.subr.bf16.mxu0 %v31284_v13  ;;  %v31641_v13 = vpack.c.bf16 %v15075_v2, %v15072_v45 }
0x1af9   : > { %23892 = vmatpush1.bf16.msra.mxu0 %v31292_v36  ;;  %v15078_v36 = vld [vmem:[#allocation20 + $0x100] sm:$0xff] }
0x1afa   : > { %23894 = vmatprep.subr.bf16.mxu0 %v31302_v25  ;;  %v15081_v25 = vld [vmem:[#allocation20 + $0x118] sm:$0xff] }
0x1afd   : > { %23896 = vmatpush1.bf16.msra.mxu0 %v31310_v40  ;;  %v31645_v40 = vpack.c.bf16 %v15081_v25, %v15078_v36 }
0x1afe   : > { %23898 = vmatprep.subr.bf16.mxu0 %v31323_v28  ;;  %v15084_v28 = vld [vmem:[#allocation20 + $0x130] sm:$0xff] }
0x1b01   : > { %23900 = vmatpush1.bf16.msra.mxu0 %v31334_v35  ;;  %v15087_v35 = vld [vmem:[#allocation20 + $0x148] sm:$0xff] }
0x1b02   : > { %23902 = vmatprep.subr.bf16.mxu0 %v31336_v9  ;;  %v31649_v9 = vpack.c.bf16 %v15087_v35, %v15084_v28 }
0x1b05   : > { %23904 = vmatpush1.bf16.msra.mxu0 %v31346_v44  ;;  %v15090_v44 = vld [vmem:[#allocation20 + $0x160] sm:$0xff] }
0x1b06   : > { %23906 = vmatprep.subr.bf16.mxu0 %v31356_v61  ;;  %v15093_v61 = vld [vmem:[#allocation20 + $0x178] sm:$0xff] }
0x1b07   : > { %v31653_v18 = vpack.c.bf16 %v15093_v61, %v15090_v44 }
0x1b9b   : > { %v15038_v49 = vpop.f32.mrb[192].mxu0 }
0x1b9c   : > { %v15040_v59 = vpop.f32.mrb[193].mxu0  ;;  %v15044_v62 = vmul.f32 0.25, %v15038_v49  ;;  %v32902_v49 = vld [vmem:[#allocation47_spill] sm:$0xff] }
0x1b9d   : > { %v15045_v10 = vmul.f32 0.25, %v15040_v59  ;;  %v32903_v59 = vld [vmem:[#allocation48_spill] sm:$0xff] }
0x1b9f   : > { %21331 = vmatprep.mubr.msk.f32.mxu1 %vm11490_vm12, %v15045_v10 }
0x1ba0   : > { %15186 = vmatmul.mubr.f32.vlgmr.msra.gmra.mrb[212].mxu1 %v15044_v62 }
0x1ba1   : > { %23807 = vmatpush1.bf16.msra.mxu1 %v31624_v33  ;;  %21332 = vmatprep.mubr.msk.f32.mxu1 %vm11490_vm12, %v15045_v10  ;;  %v32904_v10 = vld [vmem:[#allocation49_spill] sm:$0xff] }
0x1ba2   : > { %23808 = vmatprep.subr.bf16.mxu1 %v32890_v47 }
0x1ba5   : > { %23810 = vmatpush1.bf16.msra.mxu1 %v31629_v23 }
0x1ba6   : > { %23811 = vmatprep.subr.bf16.mxu1 %v32890_v47 }
0x1ba9   : > { %23813 = vmatpush1.bf16.msra.mxu1 %v31633_v3 }
0x1baa   : > { %23814 = vmatprep.subr.bf16.mxu1 %v32890_v47 }
0x1bad   : > { %23816 = vmatpush1.bf16.msra.mxu1 %v31637_v43 }
0x1bae   : > { %23817 = vmatprep.subr.bf16.mxu1 %v32890_v47 }
0x1bb1   : > { %23819 = vmatpush1.bf16.msra.mxu1 %v31641_v13 }
0x1bb2   : > { %23820 = vmatprep.subr.bf16.mxu1 %v32890_v47 }
0x1bb5   : > { %23822 = vmatpush1.bf16.msra.mxu1 %v31645_v40 }
0x1bb6   : > { %23823 = vmatprep.subr.bf16.mxu1 %v32890_v47 }
0x1bb9   : > { %23825 = vmatpush1.bf16.msra.mxu1 %v31649_v9 }
0x1bba   : > { %23826 = vmatprep.subr.bf16.mxu1 %v32890_v47 }
0x1bbd   : > { %23828 = vmatpush1.bf16.msra.mxu1 %v31653_v18 }
0x1bbe   : > { %23829 = vmatprep.subr.bf16.mxu1 %v32890_v47 }
0x1bc1   : > { %23831 = vmatpush1.bf16.msra.mxu1 %v31657_v16 }
0x1bc2   : > { %23832 = vmatprep.subr.bf16.mxu1 %v32890_v47 }
0x1bc5   : > { %23834 = vmatpush1.bf16.msra.mxu1 %v31661_v7 }
0x1bc6   : > { %23835 = vmatprep.subr.bf16.mxu1 %v32890_v47 }
0x1bc9   : > { %23837 = vmatpush1.bf16.msra.mxu1 %v31665_v29 }
0x1bca   : > { %23838 = vmatprep.subr.bf16.mxu1 %v32890_v47 }
0x1bcd   : > { %23840 = vmatpush1.bf16.msra.mxu1 %v31669_v46 }
0x1bce   : > { %23938 = vmatprep.subr.bf16.mxu1 %v31359_v60  ;;  %v32895_v60 = vld [vmem:[#allocation40_spill] sm:$0xff] }
0x1bd0   : > { %15257 = vmatmul.mubr.f32.vlgmr.msra.gmra.mrb[214].mxu1 %v15044_v62  ;;  %v32905_v62 = vld [vmem:[#allocation50_spill] sm:$0xff] }
0x1bd1   : > { %23940 = vmatpush1.bf16.msra.mxu1 %v31361_v39  ;;  %v32897_v39 = vld [vmem:[#allocation42_spill] sm:$0xff] }
0x1bd2   : > { %23942 = vmatprep.subr.bf16.mxu1 %v31363_v42  ;;  %v32898_v42 = vld [vmem:[#allocation43_spill] sm:$0xff] }
0x1bd5   : > { %23944 = vmatpush1.bf16.msra.mxu1 %v31367_v55  ;;  %v32899_v55 = vld [vmem:[#allocation44_spill] sm:$0xff] }
0x1bd6   : > { %23946 = vmatprep.subr.bf16.mxu1 %v31370_v32  ;;  %v32900_v32 = vld [vmem:[#allocation45_spill] sm:$0xff] }
0x1bd9   : > { %23948 = vmatpush1.bf16.msra.mxu1 %v31373_v31  ;;  %v32901_v31 = vld [vmem:[#allocation46_spill] sm:$0xff] }
0x1bda   : > { %23950 = vmatprep.subr.bf16.mxu1 %v32891_v58  ;;  %v32910_v58 = vld [vmem:[#allocation55_spill] sm:$0xff] }
0x1bdd   : > { %23952 = vmatpush1.bf16.msra.mxu1 %v32892_v20  ;;  %v32911_v20 = vld [vmem:[#allocation56_spill] sm:$0xff] }
0x1bde   : > { %23954 = vmatprep.subr.bf16.mxu1 %v32893_v54  ;;  %v32912_v54 = vld [vmem:[#allocation57_spill] sm:$0xff] }
0x1be1   : > { %23956 = vmatpush1.bf16.msra.mxu1 %v32894_v52  ;;  %v32914_v52 = vld [vmem:[#allocation59_spill] sm:$0xff] }
0x1be2   : > { %23958 = vmatprep.subr.bf16.mxu1 %v32895_v60 }
0x1be5   : > { %23960 = vmatpush1.bf16.msra.mxu1 %v32896_v5 }
0x1be6   : > { %23962 = vmatprep.subr.bf16.mxu1 %v32897_v39 }
0x1be9   : > { %23964 = vmatpush1.bf16.msra.mxu1 %v32898_v42 }
0x1bea   : > { %23966 = vmatprep.subr.bf16.mxu1 %v32899_v55 }
0x1bed   : > { %23968 = vmatpush1.bf16.msra.mxu1 %v32900_v32 }
0x1bee   : > { %23970 = vmatprep.subr.bf16.mxu1 %v32901_v31 }
0x1bf1   : > { %23972 = vmatpush1.bf16.msra.mxu1 %v32902_v49 }
0x1bf2   : > { %23974 = vmatprep.subr.bf16.mxu1 %v32903_v59 }
0x1bf5   : > { %23976 = vmatpush1.bf16.msra.mxu1 %v32904_v10 }
0x1bf6   : > { %23978 = vmatprep.subr.bf16.mxu1 %v32905_v62 }
0x1bf9   : > { %23980 = vmatpush1.bf16.msra.mxu1 %v32906_v21 }
0x1bfa   : > { %23982 = vmatprep.subr.bf16.mxu1 %v31617_v22 }
0x1bfd   : > { %23984 = vmatpush1.bf16.msra.mxu1 %v31619_v6 }
0x1bfe   : > { %23985 = vmatprep.subr.bf16.mxu1 %v32890_v47 }
0x1c73   : > { %v15187_v48 = vpop.f32.mrb[212].mxu1 }
0x1c74   : > { %v15265_v19 = vrot.slane %v15187_v48, %v27171_v27  ;;  %v15189_v1 = vpop.f32.mrb[213].mxu1 }
0x1c75   : > { %v15269_v4 = vrot.slane %v15189_v1, %v27171_v27 }
0x1c76   : > { %v31701_v26 = vsub.f32 %v31433_v53, %v15265_v19 }
0x1c77   : > { %v31704_v45 = vsub.f32 %v31435_v51, %v15269_v4 }
0x1c78   : > { %v15277_v2 = vmul.f32 %v31701_v26, %v31701_v26 }
0x1c79   : > { %v15278_v22 = vmul.f32 %v31704_v45, %v31704_v45 }
0x1c7a   : > { %v15280_v6 = vsel %vm14783_vm0, %v15277_v2, 0.0 }
0x1c7b   : > { %v15281_v36 = vrot.slane %v15280_v6, 4  ;;  %v15287_v25 = vsel %vm14783_vm0, %v15278_v22, 0.0 }
0x1c7c   : > { %v15288_v28 = vrot.slane %v15287_v25, 4 }
0x1c7d   : > { %v15282_v35 = vadd.f32 %v15281_v36, %v15280_v6 }
0x1c7e   : > { %v15289_v44 = vadd.f32 %v15288_v28, %v15287_v25 }
0x1c7f   : > { %v15283_v61 = vrot.slane %v15282_v35, 2 }
0x1c80   : > { %v15290_v53 = vrot.slane %v15289_v44, 2 }
0x1c81   : > { %v15284_v57 = vadd.f32 %v15283_v61, %v15282_v35  ;;  %v15631_v35 = vld [vmem:[#allocation5 + $0x10] sm:$0x1f] }
0x1c82   : > { %v15291_v24 = vadd.f32 %v15290_v53, %v15289_v44  ;;  %v15636_v44 = vld [vmem:[#allocation5 + $0x38] sm:$0x1f]  ;;  %v15639_v61 = vpack.c.bf16 %v15631_v35, %v15631_v35  ;;  %v25823_v35 = vld [vmem:[%s32917_s27 + $0x218] sm:$0xff]  }
0x1c83   : > { %v15285_v51 = vrot.slane %v15284_v57, 1  ;;  %v15644_v53 = vpack.c.bf16 %v15636_v44, %v15636_v44  ;;  %v25825_v44 = vld [vmem:[%s32917_s27 + $0x320] sm:$0xff]  }
0x1c84   : > { %v15292_v38 = vrot.slane %v15291_v24, 1 }
0x1c85   : > { %v15286_v14 = vadd.f32 %v15285_v51, %v15284_v57  ;;  %v15635_v57 = vld [vmem:[#allocation5 + $0x30] sm:$0x1f] }
0x1c86   : > { %v15293_v30 = vadd.f32 %v15292_v38, %v15291_v24 }
0x1c88   : > { %15365 = vmatprep.mubr.f32.mxu0 %v15293_v30 }
0x1c89   : > { %15366 = vmatmul.mubr.f32.vlgmr.msra.gmra.mrb[194].mxu0 %v15286_v14 }
0x1c8a   : > { %23908 = vmatpush1.bf16.msra.mxu0 %v31453_v15  ;;  %15436 = vmatprep.mubr.f32.mxu0 %v27397_v0  ;;  %v32913_v15 = vld [vmem:[#allocation58_spill] sm:$0xff]  ;;  %v31778_v0 = vld [vmem:[%s32916_s5] sm:$0x1] }
0x1c8b   : > { %23910 = vmatprep.subr.bf16.mxu0 %v31455_v34 }
0x1c8e   : > { %23912 = vmatpush1.bf16.msra.mxu0 %v32907_v50  ;;  %v21339_v50 = vld [vmem:[%s32916_s5 + $0x1] sm:$0x1] }
0x1c8f   : > { %23914 = vmatprep.subr.bf16.mxu0 %v32908_v41  ;;  %v25786_v41 = vld [vmem:[%s32917_s27 + $0x2a0] sm:$0xff]  }
0x1c92   : > { %23916 = vmatpush1.bf16.msra.mxu0 %v31489_v56 }
0x1c93   : > { %23918 = vmatprep.subr.bf16.mxu0 %v31492_v11 }
0x1c96   : > { %23920 = vmatpush1.bf16.msra.mxu0 %v32909_v63  ;;  %v25787_v63 = vld [vmem:[%s32917_s27 + $0x260] sm:$0xff]  }
0x1c97   : > { %23922 = vmatprep.subr.bf16.mxu0 %v32910_v58 }
0x1c9a   : > { %23924 = vmatpush1.bf16.msra.mxu0 %v32911_v20  ;;  %v25788_v20 = vld [vmem:[%s32917_s27 + $0x2a8] sm:$0xff]  }
0x1c9b   : > { %23926 = vmatprep.subr.bf16.mxu0 %v32912_v54 }
0x1c9e   : > { %23928 = vmatpush1.bf16.msra.mxu0 %v32913_v15 }
0x1c9f   : > { %23930 = vmatprep.subr.bf16.mxu0 %v32914_v52 }
0x1ca2   : > { %23932 = vmatpush1.bf16.msra.mxu0 %v31561_v8 }
0x1ca3   : > { %v15258_v34 = vpop.f32.mrb[214].mxu1  ;;  %23934 = vmatprep.subr.bf16.mxu0 %v31564_v17  ;;  %v32915_v17 = vmov 0  }
0x1ca4   : > { %v15273_v56 = vrot.slane %v15258_v34, %v27171_v27  ;;  %v15260_v11 = vpop.f32.mrb[215].mxu1  ;;  %v25789_v34 = vld [vmem:[%s32917_s27 + $0x268] sm:$0xff]  }
0x1ca6   : > { %v31729_v60 = vsub.f32 %v31579_v37, %v15273_v56  ;;  %23936 = vmatpush1.bf16.msra.mxu0 %v31575_v12  ;;  %v25790_v56 = vld [vmem:[%s32917_s27 + $0x2b0] sm:$0xff]  }
0x1ca8   : > { %v15279_v5 = vmul.f32 %v31729_v60, %v31729_v60 }
0x1caa   : > { %v15294_v39 = vsel %vm14783_vm0, %v15279_v5, 0.0 }
0x1cab   : > { %v15295_v42 = vrot.slane %v15294_v39, 4 }
0x1cad   : > { %v15296_v55 = vadd.f32 %v15295_v42, %v15294_v39  ;;  %v25793_v42 = vld [vmem:[%s32917_s27 + $0x278] sm:$0xff]  }
0x1caf   : > { %v15297_v32 = vrot.slane %v15296_v55, 2 }
0x1cb1   : > { %v15298_v8 = vadd.f32 %v15297_v32, %v15296_v55  ;;  %v25794_v55 = vld [vmem:[%s32917_s27 + $0x2c0] sm:$0xff]  }
0x1cb3   : > { %v15299_v31 = vrot.slane %v15298_v8, 1 }
0x1cb5   : > { %v15300_v49 = vadd.f32 %v15299_v31, %v15298_v8  ;;  %v25795_v8 = vld [vmem:[%s32917_s27 + $0x280] sm:$0xff]  }
0x1cb7   : > { %15437 = vmatmul.mubr.f32.vlgmr.msra.gmra.mrb[194].mxu0 %v15300_v49 }
0x1cb8   : > { %15708 = vmatprep.mubr.bf16.mxu0 %v32915_v17 }
0x1d8a   : > { %v15438_v59 = vpop.f32.mrb[194].mxu0 }
0x1d8b   : > { %v15443_v10 = vmul.f32 0.25, %v15438_v59  ;;  %v15440_v37 = vpop.f32.mrb[195].mxu0 }
0x1d8c   : > { %v15444_v62 = vmul.f32 0.25, %v15440_v37 }
0x1d8d   : > { %v15445_v21 = vadd.f32 1e-05, %v15443_v10 }
0x1d8e   : > { %v15446_v12 = vadd.f32 1e-05, %v15444_v62  ;;  %v25796_v62 = vld [vmem:[%s32917_s27 + $0x2c8] sm:$0xff]  }
0x1d90   : > { %26030 = vrsqrt.f32 %v15446_v12  ;;  %v25798_v12 = vld [vmem:[%s32917_s27 + $0x2d0] sm:$0xff]  }
0x1d91   : > { %26032 = vrsqrt.f32 %v15445_v21  ;;  %v25797_v21 = vld [vmem:[%s32917_s27 + $0x288] sm:$0xff]  }
0x1d9a   : > { %v26031_v48 = vpop.eup %26030 }
0x1d9b   : > { %v26033_v19 = vpop.eup %26032  ;;  %21333 = vmatprep.mubr.msk.f32.mxu1 %vm11490_vm12, %v26031_v48 }
0x1d9c   : > { %15517 = vmatmul.mubr.f32.vlgmr.msra.gmra.mrb[216].mxu1 %v26033_v19 }
0x1d9d   : > { %23987 = vmatpush1.bf16.msra.mxu1 %v31624_v33  ;;  %21334 = vmatprep.mubr.msk.f32.mxu1 %vm11490_vm12, %v26031_v48  ;;  %v26400_v33 = vmov 65535   ;;  %v25799_v48 = vld [vmem:[%s32917_s27 + $0x290] sm:$0xff]  }
0x1d9e   : > { %23988 = vmatprep.subr.bf16.mxu1 %v32890_v47 }
0x1da1   : > { %23990 = vmatpush1.bf16.msra.mxu1 %v31629_v23  ;;  %v15650_v23 = vsel %vm14783_vm0, 4294967295, %v26400_v33  ;;  %v25801_v33 = vld [vmem:[%s32917_s27 + $0x1e0] sm:$0xff]  }
0x1da2   : > { %23991 = vmatprep.subr.bf16.mxu1 %v32890_v47 }
0x1da5   : > { %23993 = vmatpush1.bf16.msra.mxu1 %v31633_v3  ;;  %v15630_v3 = vld [vmem:[#allocation5 + $0x8] sm:$0x1f] }
0x1da6   : > { %23994 = vmatprep.subr.bf16.mxu1 %v32890_v47 }
0x1da9   : > { %23996 = vmatpush1.bf16.msra.mxu1 %v31637_v43  ;;  %v15638_v43 = vpack.c.bf16 %v15630_v3, %v15630_v3  ;;  %v25803_v3 = vld [vmem:[%s32917_s27 + $0x298] sm:$0xff]  }
0x1daa   : > { %23997 = vmatprep.subr.bf16.mxu1 %v32890_v47 }
0x1dad   : > { %23999 = vmatpush1.bf16.msra.mxu1 %v31641_v13  ;;  %v15629_v13 = vld [vmem:[#allocation5] sm:$0x1f] }
0x1dae   : > { %24000 = vmatprep.subr.bf16.mxu1 %v32890_v47 }
0x1db1   : > { %24002 = vmatpush1.bf16.msra.mxu1 %v31645_v40  ;;  %v31765_v40 = vsel %vm1124_vm3, %v15650_v23, 0  ;;  %v25802_v23 = vld [vmem:[%s32917_s27 + $0x2d8] sm:$0xff]  }
0x1db2   : > { %24003 = vmatprep.subr.bf16.mxu1 %v32890_v47  ;;  %v31794_v30 = vand.u32 %v31765_v40, %v15644_v53 }
0x1db5   : > { %24005 = vmatpush1.bf16.msra.mxu1 %v31649_v9  ;;  %v15637_v9 = vpack.c.bf16 %v15629_v13, %v15629_v13  ;;  %v25805_v13 = vld [vmem:[%s32917_s27 + $0x1e8] sm:$0xff]  }
0x1db6   : > { %24006 = vmatprep.subr.bf16.mxu1 %v32890_v47 }
0x1db9   : > { %24008 = vmatpush1.bf16.msra.mxu1 %v31653_v18  ;;  %v31771_v18 = vand.u32 %v31765_v40, %v15637_v9  ;;  %v25808_v9 = vld [vmem:[%s32917_s27 + $0x1f0] sm:$0xff]  }
0x1dba   : > { %24009 = vmatprep.subr.bf16.mxu1 %v32890_v47 }
0x1dbd   : > { %24011 = vmatpush1.bf16.msra.mxu1 %v31657_v16 }
0x1dbe   : > { %24012 = vmatprep.subr.bf16.mxu1 %v32890_v47 }
0x1dc1   : > { %24014 = vmatpush1.bf16.msra.mxu1 %v31661_v7 }
0x1dc2   : > { %24015 = vmatprep.subr.bf16.mxu1 %v32890_v47 }
0x1dc5   : > { %24017 = vmatpush1.bf16.msra.mxu1 %v31665_v29 }
0x1dc6   : > { %24018 = vmatprep.subr.bf16.mxu1 %v32890_v47  ;;  %v31768_v47 = vand.u32 %v31765_v40, %v15638_v43  ;;  %v25804_v43 = vld [vmem:[%s32917_s27 + $0x228] sm:$0xff]  }
0x1dc8   : > { %15676 = vmatprep.subr.bf16.mxu0 %v31768_v47 }
0x1dc9   : > { %24020 = vmatpush1.bf16.msra.mxu1 %v31669_v46  ;;  %15677 = vmatpush1.bf16.msra.mxu0 %v31771_v18 }
0x1dcc   : > { %15588 = vmatmul.mubr.f32.vlgmr.msra.gmra.mrb[218].mxu1 %v26033_v19  ;;  %21335 = vmatmul.mubr.msk.bf16.vlgmr.msra.gmra.mrb[196].mxu0 %vm15646_vm14, %v31778_v0  ;;  %v25800_v19 = vld [vmem:[%s32917_s27 + $0x220] sm:$0xff]  }
0x1dcd   : > { %15749 = vmatprep.mubr.bf16.mxu1 %v32915_v17  ;;  %15790 = vmatprep.mubr.bf16.mxu0 %v32915_v17 }
0x1e6f   : > { %v15518_v16 = vpop.f32.mrb[216].mxu1 }
0x1e70   : > { %v15596_v7 = vrot.slane %v15518_v16, %v27171_v27  ;;  %v15520_v29 = vpop.f32.mrb[217].mxu1  ;;  %v25811_v16 = vld [vmem:[%s32917_s27 + $0x1f8] sm:$0xff]  }
0x1e71   : > { %v15600_v46 = vrot.slane %v15520_v29, %v27171_v27  ;;  %v25814_v29 = vld [vmem:[%s32917_s27 + $0x200] sm:$0xff]  }
0x1e72   : > { %v15605_v1 = vmul.f32 %v15596_v7, %v31701_v26  ;;  %v31788_v26 = vand.u32 %v31765_v40, %v15639_v61  ;;  %v25813_v7 = vld [vmem:[%s32917_s27 + $0x240] sm:$0xff]  }
0x1e73   : > { %v15606_v4 = vmul.f32 %v15600_v46, %v31704_v45  ;;  %v15643_v45 = vpack.c.bf16 %v15635_v57, %v15635_v57  ;;  %v25816_v46 = vld [vmem:[%s32917_s27 + $0x248] sm:$0xff]  }
0x1e74   : > { %vm15608_vm3 = vcmp.ge.f32.partialorder %v15605_v1, 0.0  ;;  %v15611_v2 = vmul.f32 0.2, %v15605_v1 }
0x1e75   : > { %vm15609_vm15 = vcmp.ge.f32.partialorder %v15606_v4, 0.0  ;;  %v15612_v22 = vmul.f32 0.2, %v15606_v4  ;;  %v31799_v14 = vand.u32 %v31765_v40, %v15643_v45 }
0x1e76   : > { %v15614_v6 = vsel %vm15608_vm3, %v15605_v1, %v15611_v2 }
0x1e77   : > { %v15620_v36 = vrot.slane %v15614_v6, 6  ;;  %v15615_v25 = vsel %vm15609_vm15, %v15606_v4, %v15612_v22  ;;  %v25817_v6 = vld [vmem:[%s32917_s27 + $0x208] sm:$0xff]  }
0x1e78   : > { %v15621_v28 = vrot.slane %v15615_v25, 6  ;;  %v25820_v25 = vld [vmem:[%s32917_s27 + $0x210] sm:$0xff]  }
0x1e79   : > { %15626 = vst [vmem:[#allocation5 + $0x18] sm:$0xc] %v15620_v36  ;;  %v25819_v36 = vld [vmem:[%s32917_s27 + $0x250] sm:$0xff]  }
0x1e7a   : > { %15627 = vst [vmem:[#allocation5 + $0x20] sm:$0xc] %v15621_v28  ;;  %v25822_v28 = vld [vmem:[%s32917_s27 + $0x258] sm:$0xff]  }
0x1e80   : > { %v15632_v24 = vld [vmem:[#allocation5 + $0x18] sm:$0x1f] }
0x1e81   : > { %v15640_v51 = vpack.c.bf16 %v15632_v24, %v15632_v24  ;;  %v15633_v32 = vld [vmem:[#allocation5 + $0x20] sm:$0x1f] }
0x1e82   : > { %v15641_v49 = vpack.c.bf16 %v15633_v32, %v15633_v32  ;;  %v25818_v32 = vld [vmem:[%s32917_s27 + $0x380] sm:$0xff]  }
0x1e83   : > { %v31791_v38 = vand.u32 %v31765_v40, %v15640_v51 }
0x1e84   : > { %v31855_v37 = vand.u32 %v31765_v40, %v15641_v49  ;;  %v25827_v49 = vld [vmem:[%s32917_s27 + $0x398] sm:$0xff]  }
0x1e85   : > { %15717 = vmatprep.subr.bf16.mxu1 %v31791_v38 }
0x1e86   : > { %15718 = vmatpush1.bf16.msra.mxu1 %v31788_v26 }
0x1e87   : > { %15799 = vmatprep.subr.bf16.mxu1 %v31794_v30 }
0x1e89   : > { %21336 = vmatmul.mubr.msk.bf16.vlgmr.msra.gmra.mrb[220].mxu1 %vm15646_vm14, %v31778_v0 }
0x1e8a   : > { %15800 = vmatpush1.bf16.msra.mxu1 %v31799_v14  ;;  %15831 = vmatprep.mubr.bf16.mxu1 %v32915_v17 }
0x1e8b   : > { %16014 = vmatprep.subr.bf16.mxu1 %v31791_v38 }
0x1e91   : > { %21338 = vmatmul.mubr.msk.bf16.vlgmr.msra.gmra.mrb[224].mxu1 %vm15646_vm14, %v31778_v0 }
0x1e92   : > { %16015 = vmatpush1.bf16.msra.mxu1 %v31788_v26  ;;  %16046 = vmatprep.mubr.bf16.mxu1 %v32915_v17 }
0x1e93   : > { %16096 = vmatprep.subr.bf16.mxu1 %v31794_v30 }
0x1e99   : > { %21341 = vmatmul.mubr.msk.bf16.vlgmr.msra.gmra.mrb[228].mxu1 %vm15646_vm14, %v21339_v50 }
0x1e9a   : > { %16097 = vmatpush1.bf16.msra.mxu1 %v31799_v14  ;;  %16128 = vmatprep.mubr.bf16.mxu1 %v32915_v17 }
0x1e9b   : > { %22661 = vmatprep.subr.bf16.mxu1 %v25786_v41 }
0x1e9f   : > { %v15589_v58 = vpop.f32.mrb[218].mxu1  ;;  %v31921_v1 = vpop.f32.mrb[196].mxu0 }
0x1ea0   : > { %v15604_v54 = vrot.slane %v15589_v58, %v27171_v27  ;;  %v15591_v15 = vpop.f32.mrb[219].mxu1  ;;  %v25791_v27 = vld [vmem:[%s32917_s27 + $0x270] sm:$0xff]   ;;  %v31923_v4 = vpop.f32.mrb[197].mxu0 }
0x1ea1   : > { %21343 = vmatmul.mubr.msk.bf16.vlgmr.msra.gmra.mrb[232].mxu1 %vm15646_vm14, %v21339_v50  ;;  %v15714_v2 = vpop.f32.mrb[198].mxu0  ;;  %v25806_v15 = vld [vmem:[%s32917_s27 + $0x360] sm:$0xff]  }
0x1ea2   : > { %v15607_v52 = vmul.f32 %v15604_v54, %v31729_v60  ;;  %22662 = vmatpush3.bf16.msra.mxu1 %v25787_v63  ;;  %v25792_v60 = vld [vmem:[%s32917_s27 + $0x2b8] sm:$0xff]   ;;  %v15715_v22 = vpop.f32.mrb[199].mxu0  ;;  %v25842_v2 = vld [vmem:[%s32917_s27 + $0xc0] sm:$0xff]  }
0x1ea3   : > { %22663 = vmatprep.subr.bf16.mxu1 %v25788_v20 }
0x1ea4   : > { %vm15610_vm2 = vcmp.ge.f32.partialorder %v15607_v52, 0.0  ;;  %v15613_v11 = vmul.f32 0.2, %v15607_v52 }
0x1ea6   : > { %v15616_v5 = vsel %vm15610_vm2, %v15607_v52, %v15613_v11  ;;  %22664 = vmatpush3.bf16.msra.mxu1 %v25789_v34 }
0x1ea7   : > { %v15622_v39 = vrot.slane %v15616_v5, 6  ;;  %22665 = vmatprep.subr.bf16.mxu1 %v25790_v56  ;;  %v25809_v56 = vld [vmem:[%s32917_s27 + $0x368] sm:$0xff]  }
0x1ea9   : > { %15628 = vst [vmem:[#allocation5 + $0x28] sm:$0xc] %v15622_v39 }
0x1eaa   : > { %22666 = vmatpush3.bf16.msra.mxu1 %v25791_v27  ;;  %v25812_v27 = vld [vmem:[%s32917_s27 + $0x370] sm:$0xff]  }
0x1eab   : > { %22667 = vmatprep.subr.bf16.mxu1 %v25792_v60 }
0x1eae   : > { %22668 = vmatpush3.bf16.msra.mxu1 %v25793_v42 }
0x1eaf   : > { %22669 = vmatprep.subr.bf16.mxu1 %v25794_v55  ;;  %v25815_v55 = vld [vmem:[%s32917_s27 + $0x378] sm:$0xff]  }
0x1eb0   : > { %v15634_v31 = vld [vmem:[#allocation5 + $0x28] sm:$0x1f] }
0x1eb1   : > { %v15642_v59 = vpack.c.bf16 %v15634_v31, %v15634_v31  ;;  %v25824_v31 = vld [vmem:[%s32917_s27 + $0x390] sm:$0xff]  }
0x1eb2   : > { %22670 = vmatpush3.bf16.msra.mxu1 %v25795_v8  ;;  %v25821_v8 = vld [vmem:[%s32917_s27 + $0x388] sm:$0xff]  }
0x1eb3   : > { %v31852_v10 = vand.u32 %v31765_v40, %v15642_v59  ;;  %22671 = vmatprep.subr.bf16.mxu1 %v25796_v62  ;;  %v25807_v40 = vld [vmem:[%s32917_s27 + $0x230] sm:$0xff]  }
0x1eb5   : > { %15758 = vmatprep.subr.bf16.mxu0 %v31852_v10 }
0x1eb6   : > { %15759 = vmatpush1.bf16.msra.mxu0 %v31855_v37  ;;  %22672 = vmatpush3.bf16.msra.mxu1 %v25797_v21 }
0x1eb7   : > { %15973 = vmatprep.subr.bf16.mxu0 %v31768_v47  ;;  %22673 = vmatprep.subr.bf16.mxu1 %v25798_v12  ;;  %v25830_v12 = vld [vmem:[%s32917_s27 + $0x3a0] sm:$0xff]  }
0x1eb9   : > { %21337 = vmatmul.mubr.msk.bf16.vlgmr.msra.gmra.mrb[200].mxu0 %vm15646_vm14, %v31778_v0  ;;  %v25810_v0 = vld [vmem:[%s32917_s27 + $0x238] sm:$0xff]  }
0x1eba   : > { %15974 = vmatpush1.bf16.msra.mxu0 %v31771_v18  ;;  %16005 = vmatprep.mubr.bf16.mxu0 %v32915_v17 }
0x1ebb   : > { %16055 = vmatprep.subr.bf16.mxu0 %v31852_v10  ;;  %22674 = vmatpush3.bf16.msra.mxu1 %v25799_v48 }
0x1ebc   : > { %22675 = vmatprep.subr.bf16.mxu1 %v25802_v23 }
0x1ebf   : > { %22676 = vmatpush3.bf16.msra.mxu1 %v25803_v3 }
0x1ec0   : > { %16749 = vmatprep.subr.bf16.mxu1 %v32915_v17 }
0x1ec1   : > { %21340 = vmatmul.mubr.msk.bf16.vlgmr.msra.gmra.mrb[204].mxu0 %vm15646_vm14, %v21339_v50 }
0x1ec2   : > { %16056 = vmatpush1.bf16.msra.mxu0 %v31855_v37  ;;  %16087 = vmatprep.mubr.bf16.mxu0 %v32915_v17 }
0x1ec3   : > { %22639 = vmatprep.subr.bf16.mxu0 %v25800_v19  ;;  %v25833_v19 = vld [vmem:[%s32917_s27 + $0x3a8] sm:$0xff]  }
0x1ec9   : > { %21342 = vmatmul.mubr.msk.bf16.vlgmr.msra.gmra.mrb[208].mxu0 %vm15646_vm14, %v21339_v50 }
0x1eca   : > { %22640 = vmatpush3.bf16.msra.mxu0 %v25801_v33 }
0x1ecb   : > { %22641 = vmatprep.subr.bf16.mxu0 %v25804_v43 }
0x1ece   : > { %22642 = vmatpush3.bf16.msra.mxu0 %v25805_v13  ;;  %v25826_v13 = vld [vmem:[%s32917_s27 + $0x2e0] sm:$0xff]  }
0x1ecf   : > { %22643 = vmatprep.subr.bf16.mxu0 %v25807_v40  ;;  %v25836_v40 = vld [vmem:[%s32917_s27 + $0x3b0] sm:$0xff]  }
0x1ed2   : > { %22644 = vmatpush3.bf16.msra.mxu0 %v25808_v9 }
0x1ed3   : > { %22645 = vmatprep.subr.bf16.mxu0 %v25810_v0 }
0x1ed6   : > { %22646 = vmatpush3.bf16.msra.mxu0 %v25811_v16  ;;  %v25828_v16 = vld [vmem:[%s32917_s27 + $0x328] sm:$0xff]  }
0x1ed7   : > { %22647 = vmatprep.subr.bf16.mxu0 %v25813_v7  ;;  %v25829_v7 = vld [vmem:[%s32917_s27 + $0x2e8] sm:$0xff]  }
0x1eda   : > { %22648 = vmatpush3.bf16.msra.mxu0 %v25814_v29  ;;  %v25839_v29 = vld [vmem:[%s32917_s27 + $0x3b8] sm:$0xff]  }
0x1edb   : > { %22649 = vmatprep.subr.bf16.mxu0 %v25816_v46  ;;  %v25831_v46 = vld [vmem:[%s32917_s27 + $0x330] sm:$0xff]  }
0x1ede   : > { %22650 = vmatpush3.bf16.msra.mxu0 %v25817_v6 }
0x1edf   : > { %22651 = vmatprep.subr.bf16.mxu0 %v25819_v36 }
0x1ee2   : > { %22652 = vmatpush3.bf16.msra.mxu0 %v25820_v25  ;;  %v25832_v25 = vld [vmem:[%s32917_s27 + $0x2f0] sm:$0xff]  }
0x1ee3   : > { %22653 = vmatprep.subr.bf16.mxu0 %v25822_v28  ;;  %v25843_v28 = vld [vmem:[%s32917_s27 + $0x80] sm:$0xff]  }
0x1ee6   : > { %22654 = vmatpush3.bf16.msra.mxu0 %v25823_v35 }
0x1ee7   : > { %22683 = vmatprep.subr.bf16.mxu0 %v25825_v44 }
0x1f5c   : > { %v31943_v61 = vpop.f32.mrb[220].mxu1 }
0x1f5d   : > { %v31945_v53 = vpop.f32.mrb[221].mxu1 }
0x1f5e   : > { %v15755_v57 = vpop.f32.mrb[222].mxu1 }
0x1f5f   : > { %v15756_v24 = vpop.f32.mrb[223].mxu1  ;;  %v25834_v57 = vld [vmem:[%s32917_s27 + $0x338] sm:$0xff]  }
0x1f60   : > { %v25846_v24 = vld [vmem:[%s32917_s27 + $0xc8] sm:$0xff]  }
0x1f64   : > { %v31947_v51 = vpop.f32.mrb[224].mxu1 }
0x1f65   : > { %v31949_v45 = vpop.f32.mrb[225].mxu1 }
0x1f66   : > { %v15837_v50 = vpop.f32.mrb[226].mxu1 }
0x1f67   : > { %v15838_v41 = vpop.f32.mrb[227].mxu1 }
0x1f68   : > { %v15843_v41 = vpack.c.bf16 %v31945_v53, %v31945_v53  ;;  %v25850_v53 = vld [vmem:[%s32917_s27 + $0xd0] sm:$0xff]  }
0x1f6c   : > { %v16048_v63 = vpop.f32.mrb[228].mxu1 }
0x1f6d   : > { %v16139_v58 = vpack.c.bf16 %v16048_v63, %v16048_v63  ;;  %v16050_v20 = vpop.f32.mrb[229].mxu1  ;;  %v25835_v63 = vld [vmem:[%s32917_s27 + $0x2f8] sm:$0xff]  }
0x1f6e   : > { %v16140_v54 = vpack.c.bf16 %v16050_v20, %v16050_v20  ;;  %v16052_v52 = vpop.f32.mrb[230].mxu1  ;;  %v25837_v20 = vld [vmem:[%s32917_s27 + $0x340] sm:$0xff]  }
0x1f6f   : > { %v16053_v34 = vpop.f32.mrb[231].mxu1  ;;  %v25840_v52 = vld [vmem:[%s32917_s27 + $0x348] sm:$0xff]  }
0x1f70   : > { %16701 = vmatprep.mubr.bf16.mxu1 %v16140_v54  ;;  %v25838_v54 = vld [vmem:[%s32917_s27 + $0x300] sm:$0xff]   ;;  %v25854_v34 = vld [vmem:[%s32917_s27 + $0xd8] sm:$0xff]  }
0x1f71   : > { %16702 = vmatmul.mubr.bf16.vlgmr.msra.gmra.mrb[236].mxu1 %v16139_v58  ;;  %v25847_v58 = vld [vmem:[%s32917_s27 + $0x88] sm:$0xff]  }
0x1f72   : > { %16750 = vmatpush1.bf16.msra.mxu1 %v25806_v15  ;;  %v25851_v15 = vld [vmem:[%s32917_s27 + $0x90] sm:$0xff]  }
0x1f73   : > { %16751 = vmatprep.subr.bf16.mxu1 %v32915_v17 }
0x1f74   : > { %v31958_v11 = vpop.f32.mrb[232].mxu1 }
0x1f75   : > { %v16132_v5 = vpop.f32.mrb[233].mxu1  ;;  %v16143_v6 = vpack.c.bf16 %v31958_v11, %v31958_v11  ;;  %v25855_v11 = vld [vmem:[%s32917_s27 + $0x98] sm:$0xff]  }
0x1f76   : > { %16752 = vmatpush1.bf16.msra.mxu1 %v25809_v56  ;;  %v16144_v39 = vpack.c.bf16 %v16132_v5, %v16132_v5  ;;  %v16134_v60 = vpop.f32.mrb[234].mxu1  ;;  %v25841_v56 = vld [vmem:[%s32917_s27 + $0x308] sm:$0xff]   ;;  %v25844_v5 = vld [vmem:[%s32917_s27 + $0x350] sm:$0xff]  }
0x1f77   : > { %16753 = vmatprep.subr.bf16.mxu1 %v32915_v17  ;;  %v16135_v42 = vpop.f32.mrb[235].mxu1  ;;  %v25859_v60 = vld [vmem:[%s32917_s27 + $0xa0] sm:$0xff]  }
0x1f78   : > { %21524 = vmatprep.mubr.msk.bf16.mxu1 %vm11490_vm12, %v16144_v39  ;;  %v25845_v39 = vld [vmem:[%s32917_s27 + $0x310] sm:$0xff]   ;;  %v25848_v42 = vld [vmem:[%s32917_s27 + $0x358] sm:$0xff]  }
0x1f7a   : > { %16754 = vmatpush1.bf16.msra.mxu1 %v25812_v27  ;;  %v25858_v27 = vld [vmem:[%s32917_s27 + $0xe0] sm:$0xff]  }
0x1f7b   : > { %16755 = vmatprep.subr.bf16.mxu1 %v32915_v17 }
0x1f7e   : > { %16756 = vmatpush1.bf16.msra.mxu1 %v25815_v55  ;;  %v25862_v55 = vld [vmem:[%s32917_s27 + $0xe8] sm:$0xff]  }
0x1f7f   : > { %16757 = vmatprep.subr.bf16.mxu1 %v32915_v17 }
0x1f82   : > { %16758 = vmatpush1.bf16.msra.mxu1 %v25818_v32  ;;  %v25849_v32 = vld [vmem:[%s32917_s27 + $0x318] sm:$0xff]  }
0x1f83   : > { %16759 = vmatprep.subr.bf16.mxu1 %v32915_v17 }
0x1f86   : > { %16760 = vmatpush1.bf16.msra.mxu1 %v25821_v8  ;;  %v25863_v8 = vld [vmem:[%s32917_s27 + $0xa8] sm:$0xff]  }
0x1f87   : > { %16761 = vmatprep.subr.bf16.mxu1 %v32915_v17 }
0x1f8a   : > { %16762 = vmatpush1.bf16.msra.mxu1 %v25824_v31  ;;  %v25852_v31 = vld [vmem:[%s32917_s27 + $0x40] sm:$0xff]  }
0x1f8b   : > { %16763 = vmatprep.subr.bf16.mxu1 %v32915_v17 }
0x1f8c   : > { %v31985_v59 = vpop.f32.mrb[200].mxu0 }
0x1f8d   : > { %v31987_v62 = vpop.f32.mrb[201].mxu0 }
0x1f8e   : > { %v15796_v21 = vpop.f32.mrb[202].mxu0  ;;  %16764 = vmatpush1.bf16.msra.mxu1 %v25827_v49  ;;  %v25866_v49 = vld [vmem:[%s32917_s27 + $0xf0] sm:$0xff]  }
0x1f8f   : > { %v15797_v48 = vpop.f32.mrb[203].mxu0  ;;  %16765 = vmatprep.subr.bf16.mxu1 %v32915_v17 }
0x1f90   : > { %v25856_v48 = vld [vmem:[%s32917_s27 + $0x48] sm:$0xff]  }
0x1f92   : > { %16766 = vmatpush1.bf16.msra.mxu1 %v25830_v12  ;;  %v25853_v12 = vld [vmem:[%s32917_s27] sm:$0xff]  }
0x1f93   : > { %16767 = vmatprep.subr.bf16.mxu1 %v32915_v17 }
0x1f94   : > { %v16007_v33 = vpop.f32.mrb[204].mxu0 }
0x1f95   : > { %v16009_v23 = vpop.f32.mrb[205].mxu0  ;;  %v16137_v9 = vpack.c.bf16 %v16007_v33, %v16007_v33  ;;  %v15841_v33 = vpack.c.bf16 %v31923_v4, %v31923_v4  ;;  %v25871_v4 = vld [vmem:[%s32917_s27 + $0xb8] sm:$0xff]  }
0x1f96   : > { %v16138_v3 = vpack.c.bf16 %v16009_v23, %v16009_v23  ;;  %v16011_v43 = vpop.f32.mrb[206].mxu0  ;;  %16768 = vmatpush1.bf16.msra.mxu1 %v25833_v19  ;;  %v25867_v19 = vld [vmem:[%s32917_s27 + $0xb0] sm:$0xff]   ;;  %v25870_v23 = vld [vmem:[%s32917_s27 + $0xf8] sm:$0xff]  }
0x1f97   : > { %v16012_v0 = vpop.f32.mrb[207].mxu0  ;;  %16769 = vmatprep.subr.bf16.mxu1 %v32915_v17  ;;  %v25860_v43 = vld [vmem:[%s32917_s27 + $0x50] sm:$0xff]  }
0x1f98   : > { %16661 = vmatprep.mubr.bf16.mxu0 %v16138_v3  ;;  %v25857_v3 = vld [vmem:[%s32917_s27 + $0x8] sm:$0xff]   ;;  %v25874_v0 = vld [vmem:[%s32917_s27 + $0x180] sm:$0xff]  }
0x1f99   : > { %16662 = vmatmul.mubr.bf16.vlgmr.msra.gmra.mrb[212].mxu0 %v16137_v9  ;;  %v25864_v9 = vld [vmem:[%s32917_s27 + $0x58] sm:$0xff]  }
0x1f9a   : > { %22684 = vmatpush3.bf16.msra.mxu0 %v25826_v13  ;;  %16770 = vmatpush1.bf16.msra.mxu1 %v25836_v40  ;;  %v15842_v13 = vpack.c.bf16 %v31943_v61, %v31943_v61  ;;  %v25861_v40 = vld [vmem:[%s32917_s27 + $0x10] sm:$0xff]   ;;  %v25865_v61 = vld [vmem:[%s32917_s27 + $0x18] sm:$0xff]  }
0x1f9b   : > { %22685 = vmatprep.subr.bf16.mxu0 %v25828_v16  ;;  %16771 = vmatprep.subr.bf16.mxu1 %v32915_v17  ;;  %v15847_v16 = vpack.c.bf16 %v31949_v45, %v31949_v45  ;;  %v25869_v45 = vld [vmem:[%s32917_s27 + $0x20] sm:$0xff]  }
0x1f9c   : > { %v32020_v22 = vpop.f32.mrb[208].mxu0 }
0x1f9d   : > { %v16091_v36 = vpop.f32.mrb[209].mxu0  ;;  %v16141_v21 = vpack.c.bf16 %v32020_v22, %v32020_v22  ;;  %v25873_v22 = vld [vmem:[%s32917_s27 + $0x28] sm:$0xff]  }
0x1f9e   : > { %22686 = vmatpush3.bf16.msra.mxu0 %v25829_v7  ;;  %16772 = vmatpush1.bf16.msra.mxu1 %v25839_v29  ;;  %v16142_v35 = vpack.c.bf16 %v16091_v36, %v16091_v36  ;;  %v16093_v44 = vpop.f32.mrb[210].mxu0  ;;  %v25868_v7 = vld [vmem:[%s32917_s27 + $0x60] sm:$0xff]   ;;  %v25877_v29 = vld [vmem:[%s32917_s27 + $0x188] sm:$0xff]   ;;  %v25883_v36 = vld [vmem:[%s32917_s27 + $0x198] sm:$0xff]  }
0x1f9f   : > { %22687 = vmatprep.subr.bf16.mxu0 %v25831_v46  ;;  %22727 = vmatprep.subr.bf16.mxu1 %v25842_v2  ;;  %v16094_v50 = vpop.f32.mrb[211].mxu0  ;;  %v25872_v46 = vld [vmem:[%s32917_s27 + $0x68] sm:$0xff]   ;;  %v25880_v2 = vld [vmem:[%s32917_s27 + $0x190] sm:$0xff]   ;;  %v25879_v44 = vld [vmem:[%s32917_s27 + $0x38] sm:$0xff]  }
0x1fa0   : > { %16741 = vmatprep.mubr.bf16.mxu0 %v16142_v35  ;;  %v25886_v35 = vld [vmem:[%s32917_s27 + $0x1a0] sm:$0xff]  }
0x1fa1   : > { %16782 = vmatmul.mubr.bf16.vlgmr.msra.gmra.mrb[240].mxu1 %v16143_v6  ;;  %v25875_v6 = vld [vmem:[%s32917_s27 + $0x70] sm:$0xff]   ;;  %v25882_v50 = vld [vmem:[%s32917_s27 + $0x100] sm:$0xff]  }
0x1fa2   : > { %22688 = vmatpush3.bf16.msra.mxu0 %v25832_v25  ;;  %22728 = vmatpush3.bf16.msra.mxu1 %v25843_v28  ;;  %v25876_v25 = vld [vmem:[%s32917_s27 + $0x30] sm:$0xff]   ;;  %v25878_v28 = vld [vmem:[%s32917_s27 + $0x78] sm:$0xff]  }
0x1fa3   : > { %22689 = vmatprep.subr.bf16.mxu0 %v25834_v57  ;;  %22729 = vmatprep.subr.bf16.mxu1 %v25846_v24  ;;  %v25881_v57 = vld [vmem:[%s32917_s27 + $0x140] sm:$0xff]   ;;  %v25889_v24 = vld [vmem:[%s32917_s27 + $0x1a8] sm:$0xff]  }
0x1fa4   : > { %17224 = vmatprep.mubr.bf16.mxu1 %v15843_v41  ;;  %v15840_v41 = vpack.c.bf16 %v31921_v1, %v31921_v1  ;;  %v25885_v1 = vld [vmem:[%s32917_s27 + $0x108] sm:$0xff]  }
0x1fa6   : > { %22690 = vmatpush3.bf16.msra.mxu0 %v25835_v63  ;;  %22730 = vmatpush3.bf16.msra.mxu1 %v25847_v58  ;;  %v25884_v63 = vld [vmem:[%s32917_s27 + $0x148] sm:$0xff]   ;;  %v25892_v58 = vld [vmem:[%s32917_s27 + $0x1b0] sm:$0xff]  }
0x1fa7   : > { %22691 = vmatprep.subr.bf16.mxu0 %v25837_v20  ;;  %22731 = vmatprep.subr.bf16.mxu1 %v25850_v53  ;;  %v15845_v20 = vpack.c.bf16 %v31987_v62, %v31987_v62  ;;  %v25887_v53 = vld [vmem:[%s32917_s27 + $0x150] sm:$0xff]  }
0x1fa8   : > { %v25888_v62 = vld [vmem:[%s32917_s27 + $0x110] sm:$0xff]  }
0x1faa   : > { %22692 = vmatpush3.bf16.msra.mxu0 %v25838_v54  ;;  %22732 = vmatpush3.bf16.msra.mxu1 %v25851_v15  ;;  %v25895_v54 = vld [vmem:[%s32917_s27 + $0x1b8] sm:$0xff]  }
0x1fab   : > { %22693 = vmatprep.subr.bf16.mxu0 %v25840_v52  ;;  %22733 = vmatprep.subr.bf16.mxu1 %v25854_v34  ;;  %v25890_v15 = vld [vmem:[%s32917_s27 + $0x158] sm:$0xff]   ;;  %v25898_v52 = vld [vmem:[%s32917_s27 + $0x1c0] sm:$0xff]  }
0x1fac   : > { %v25891_v34 = vld [vmem:[%s32917_s27 + $0x118] sm:$0xff]  }
0x1fae   : > { %22694 = vmatpush3.bf16.msra.mxu0 %v25841_v56  ;;  %22734 = vmatpush3.bf16.msra.mxu1 %v25855_v11  ;;  %v25893_v56 = vld [vmem:[%s32917_s27 + $0x160] sm:$0xff]   ;;  %v25901_v11 = vld [vmem:[%s32917_s27 + $0x1c8] sm:$0xff]  }
0x1faf   : > { %22695 = vmatprep.subr.bf16.mxu0 %v25844_v5  ;;  %22735 = vmatprep.subr.bf16.mxu1 %v25858_v27  ;;  %v25894_v5 = vld [vmem:[%s32917_s27 + $0x120] sm:$0xff]   ;;  %v25896_v27 = vld [vmem:[%s32917_s27 + $0x168] sm:$0xff]  }
0x1fb2   : > { %22696 = vmatpush3.bf16.msra.mxu0 %v25845_v39  ;;  %22736 = vmatpush3.bf16.msra.mxu1 %v25859_v60  ;;  %v25904_v39 = vld [vmem:[%s32917_s27 + $0x1d0] sm:$0xff]   ;;  %v25897_v60 = vld [vmem:[%s32917_s27 + $0x128] sm:$0xff]  }
0x1fb3   : > { %22697 = vmatprep.subr.bf16.mxu0 %v25848_v42  ;;  %22737 = vmatprep.subr.bf16.mxu1 %v25862_v55  ;;  %v25899_v42 = vld [vmem:[%s32917_s27 + $0x170] sm:$0xff]   ;;  %v25905_v55 = vld [vmem:[%s32917_s27 + $0x1d8] sm:$0xff]  }
0x1fb6   : > { %22698 = vmatpush3.bf16.msra.mxu0 %v25849_v32  ;;  %22738 = vmatpush3.bf16.msra.mxu1 %v25863_v8  ;;  %v15846_v32 = vpack.c.bf16 %v31947_v51, %v31947_v51  ;;  %v25900_v8 = vld [vmem:[%s32917_s27 + $0x130] sm:$0xff]   ;;  %v15844_v51 = vpack.c.bf16 %v31985_v59, %v31985_v59  ;;  %v25906_v59 = vld [vmem:[%s32917_s27 + $0x400] sm:$0xff]  }
0x1fb7   : > { %22705 = vmatprep.subr.bf16.mxu0 %v25852_v31  ;;  %22739 = vmatprep.subr.bf16.mxu1 %v25866_v49  ;;  %v25902_v31 = vld [vmem:[%s32917_s27 + $0x178] sm:$0xff]  }
0x1fb8   : > { %v25903_v49 = vld [vmem:[%s32917_s27 + $0x138] sm:$0xff]  }
0x1fb9   : > { %16742 = vmatmul.mubr.bf16.vlgmr.msra.gmra.mrb[216].mxu0 %v16141_v21  ;;  %v21586_v21 = vld [vmem:[%s32916_s5 + $0x2] sm:$0x1] }
0x1fba   : > { %22706 = vmatpush3.bf16.msra.mxu0 %v25853_v12  ;;  %17184 = vmatprep.mubr.bf16.mxu0 %v15841_v33  ;;  %v25907_v12 = vld [vmem:[%s32917_s27 + $0x3c0] sm:$0xff]  }
0x1fbb   : > { %22707 = vmatprep.subr.bf16.mxu0 %v25856_v48  ;;  %22740 = vmatpush3.bf16.msra.mxu1 %v25867_v19  ;;  %v25908_v48 = vld [vmem:[%s32917_s27 + $0x408] sm:$0xff]   ;;  %v25911_v19 = vld [vmem:[%s32917_s27 + $0x480] sm:$0xff]  }
0x1fbc   : > { %22741 = vmatprep.subr.bf16.mxu1 %v25870_v23  ;;  %v25913_v33 = vld [vmem:[%s32917_s27 + $0x440] sm:$0xff]   ;;  %v25909_v23 = vld [vmem:[%s32917_s27 + $0x3c8] sm:$0xff]  }
0x1fbe   : > { %22708 = vmatpush3.bf16.msra.mxu0 %v25857_v3  ;;  %v25915_v3 = vld [vmem:[%s32917_s27 + $0x488] sm:$0xff]  }
0x1fbf   : > { %22709 = vmatprep.subr.bf16.mxu0 %v25860_v43  ;;  %22742 = vmatpush3.bf16.msra.mxu1 %v25871_v4  ;;  %v25910_v43 = vld [vmem:[%s32917_s27 + $0x410] sm:$0xff]   ;;  %v25917_v4 = vld [vmem:[%s32917_s27 + $0x448] sm:$0xff]  }
0x1fc0   : > { %17272 = vmatprep.subr.bf16.mxu1 %v32915_v17 }
0x1fc2   : > { %22710 = vmatpush3.bf16.msra.mxu0 %v25861_v40  ;;  %17225 = vmatmul.mubr.bf16.vlgmr.msra.gmra.mrb[244].mxu1 %v15842_v13  ;;  %v25919_v13 = vld [vmem:[%s32917_s27 + $0x490] sm:$0xff]  }
0x1fc3   : > { %22711 = vmatprep.subr.bf16.mxu0 %v25864_v9  ;;  %17273 = vmatpush1.bf16.msra.mxu1 %v25874_v0  ;;  %v25912_v40 = vld [vmem:[%s32917_s27 + $0x3d0] sm:$0xff]   ;;  %v25914_v9 = vld [vmem:[%s32917_s27 + $0x418] sm:$0xff]  }
0x1fc4   : > { %17274 = vmatprep.subr.bf16.mxu1 %v32915_v17  ;;  %21585 = vmatprep.mubr.msk.bf16.mxu1 %vm11490_vm12, %v15847_v16  ;;  %v25921_v0 = vld [vmem:[%s32917_s27 + $0x450] sm:$0xff]   ;;  %v25916_v16 = vld [vmem:[%s32917_s27 + $0x3d8] sm:$0xff]  }
0x1fc6   : > { %22712 = vmatpush3.bf16.msra.mxu0 %v25865_v61  ;;  %v25918_v61 = vld [vmem:[%s32917_s27 + $0x420] sm:$0xff]  }
0x1fc7   : > { %22713 = vmatprep.subr.bf16.mxu0 %v25868_v7  ;;  %17275 = vmatpush1.bf16.msra.mxu1 %v25877_v29  ;;  %v25920_v7 = vld [vmem:[%s32917_s27 + $0x3e0] sm:$0xff]  }
0x1fc8   : > { %17276 = vmatprep.subr.bf16.mxu1 %v32915_v17 }
0x1fca   : > { %22714 = vmatpush3.bf16.msra.mxu0 %v25869_v45 }
0x1fcb   : > { %22715 = vmatprep.subr.bf16.mxu0 %v25872_v46  ;;  %17277 = vmatpush1.bf16.msra.mxu1 %v25880_v2 }
0x1fcc   : > { %17278 = vmatprep.subr.bf16.mxu1 %v32915_v17 }
0x1fce   : > { %22716 = vmatpush3.bf16.msra.mxu0 %v25873_v22 }
0x1fcf   : > { %22717 = vmatprep.subr.bf16.mxu0 %v25875_v6  ;;  %17279 = vmatpush1.bf16.msra.mxu1 %v25883_v36  ;;  %v25922_v6 = vld [vmem:[%s32917_s27 + $0x428] sm:$0xff]   ;;  %v25923_v36 = vld [vmem:[%s32917_s27 + $0x498] sm:$0xff]  }
0x1fd0   : > { %17280 = vmatprep.subr.bf16.mxu1 %v32915_v17 }
0x1fd2   : > { %22718 = vmatpush3.bf16.msra.mxu0 %v25876_v25  ;;  %v25924_v25 = vld [vmem:[%s32917_s27 + $0x3e8] sm:$0xff]  }
0x1fd3   : > { %22719 = vmatprep.subr.bf16.mxu0 %v25878_v28  ;;  %17281 = vmatpush1.bf16.msra.mxu1 %v25886_v35  ;;  %v25925_v28 = vld [vmem:[%s32917_s27 + $0x458] sm:$0xff]   ;;  %v25926_v35 = vld [vmem:[%s32917_s27 + $0x430] sm:$0xff]  }
0x1fd4   : > { %17282 = vmatprep.subr.bf16.mxu1 %v32915_v17 }
0x1fd6   : > { %22720 = vmatpush3.bf16.msra.mxu0 %v25879_v44  ;;  %v25927_v44 = vld [vmem:[%s32917_s27 + $0x4a0] sm:$0xff]  }
0x1fd7   : > { %22749 = vmatprep.subr.bf16.mxu0 %v25881_v57  ;;  %17283 = vmatpush1.bf16.msra.mxu1 %v25889_v24  ;;  %v25928_v57 = vld [vmem:[%s32917_s27 + $0x3f0] sm:$0xff]   ;;  %v25929_v24 = vld [vmem:[%s32917_s27 + $0x460] sm:$0xff]  }
0x1fd8   : > { %17284 = vmatprep.subr.bf16.mxu1 %v32915_v17 }
0x1fd9   : > { %17185 = vmatmul.mubr.bf16.vlgmr.msra.gmra.mrb[220].mxu0 %v15840_v41  ;;  %v25931_v41 = vld [vmem:[%s32917_s27 + $0x4a8] sm:$0xff]  }
0x1fda   : > { %22750 = vmatpush3.bf16.msra.mxu0 %v25882_v50  ;;  %17264 = vmatprep.mubr.bf16.mxu0 %v15845_v20  ;;  %v25930_v50 = vld [vmem:[%s32917_s27 + $0x438] sm:$0xff]   ;;  %v25934_v20 = vld [vmem:[%s32917_s27 + $0x4b0] sm:$0xff]  }
0x1fdb   : > { %22751 = vmatprep.subr.bf16.mxu0 %v25884_v63  ;;  %17285 = vmatpush1.bf16.msra.mxu1 %v25892_v58  ;;  %v25932_v63 = vld [vmem:[%s32917_s27 + $0x3f8] sm:$0xff]   ;;  %v25933_v58 = vld [vmem:[%s32917_s27 + $0x468] sm:$0xff]  }
0x1fdc   : > { %17286 = vmatprep.subr.bf16.mxu1 %v32915_v17 }
0x1fde   : > { %22752 = vmatpush3.bf16.msra.mxu0 %v25885_v1  ;;  %v25935_v1 = vld [vmem:[%s32917_s27 + $0x500] sm:$0xff]  }
0x1fdf   : > { %22753 = vmatprep.subr.bf16.mxu0 %v25887_v53  ;;  %17287 = vmatpush1.bf16.msra.mxu1 %v25895_v54  ;;  %v25936_v53 = vld [vmem:[%s32917_s27 + $0x470] sm:$0xff]   ;;  %v25938_v54 = vld [vmem:[%s32917_s27 + $0x4b8] sm:$0xff]  }
0x1fe0   : > { %17288 = vmatprep.subr.bf16.mxu1 %v32915_v17 }
0x1fe2   : > { %22754 = vmatpush3.bf16.msra.mxu0 %v25888_v62  ;;  %v25940_v62 = vld [vmem:[%s32917_s27 + $0x478] sm:$0xff]  }
0x1fe3   : > { %22755 = vmatprep.subr.bf16.mxu0 %v25890_v15  ;;  %17289 = vmatpush1.bf16.msra.mxu1 %v25898_v52 }
0x1fe4   : > { %17290 = vmatprep.subr.bf16.mxu1 %v32915_v17 }
0x1fe6   : > { %22756 = vmatpush3.bf16.msra.mxu0 %v25891_v34 }
0x1fe7   : > { %22757 = vmatprep.subr.bf16.mxu0 %v25893_v56  ;;  %17291 = vmatpush1.bf16.msra.mxu1 %v25901_v11 }
0x1fe8   : > { %17292 = vmatprep.subr.bf16.mxu1 %v32915_v17 }
0x1fea   : > { %22758 = vmatpush3.bf16.msra.mxu0 %v25894_v5 }
0x1feb   : > { %22759 = vmatprep.subr.bf16.mxu0 %v25896_v27  ;;  %17293 = vmatpush1.bf16.msra.mxu1 %v25904_v39 }
0x1fec   : > { %17294 = vmatprep.subr.bf16.mxu1 %v32915_v17 }
0x1fee   : > { %22760 = vmatpush3.bf16.msra.mxu0 %v25897_v60 }
0x1fef   : > { %22761 = vmatprep.subr.bf16.mxu0 %v25899_v42  ;;  %17295 = vmatpush1.bf16.msra.mxu1 %v25905_v55 }
0x1ff0   : > { %22793 = vmatprep.subr.bf16.mxu1 %v25911_v19 }
0x1ff2   : > { %22762 = vmatpush3.bf16.msra.mxu0 %v25900_v8  ;;  %17305 = vmatmul.mubr.bf16.vlgmr.msra.gmra.mrb[248].mxu1 %v15846_v32 }
0x1ff3   : > { %22763 = vmatprep.subr.bf16.mxu0 %v25902_v31  ;;  %22794 = vmatpush3.bf16.msra.mxu1 %v25913_v33 }
0x1ff4   : > { %22795 = vmatprep.subr.bf16.mxu1 %v25915_v3 }
0x1ff6   : > { %22764 = vmatpush3.bf16.msra.mxu0 %v25903_v49 }
0x1ff7   : > { %17317 = vmatprep.subr.bf16.mxu0 %v31768_v47  ;;  %22796 = vmatpush3.bf16.msra.mxu1 %v25917_v4 }
0x1ff8   : > { %22797 = vmatprep.subr.bf16.mxu1 %v25919_v13 }
0x1ff9   : > { %17265 = vmatmul.mubr.bf16.vlgmr.msra.gmra.mrb[224].mxu0 %v15844_v51 }
0x1ffa   : > { %17318 = vmatpush1.bf16.msra.mxu0 %v31771_v18  ;;  %17349 = vmatprep.mubr.bf16.mxu0 %v32915_v17 }
0x1ffb   : > { %17358 = vmatprep.subr.bf16.mxu0 %v31791_v38  ;;  %22798 = vmatpush3.bf16.msra.mxu1 %v25921_v0 }
0x1ffc   : > { %22799 = vmatprep.subr.bf16.mxu1 %v25923_v36 }
0x1fff   : > { %22800 = vmatpush3.bf16.msra.mxu1 %v25925_v28 }
0x2000   : > { %22801 = vmatprep.subr.bf16.mxu1 %v25927_v44 }
0x2001   : > { %21587 = vmatmul.mubr.msk.bf16.vlgmr.msra.gmra.mrb[228].mxu0 %vm15646_vm14, %v21586_v21 }
0x2002   : > { %17359 = vmatpush1.bf16.msra.mxu0 %v31788_v26  ;;  %17390 = vmatprep.mubr.bf16.mxu0 %v32915_v17 }
0x2003   : > { %17399 = vmatprep.subr.bf16.mxu0 %v31852_v10  ;;  %22802 = vmatpush3.bf16.msra.mxu1 %v25929_v24 }
0x2004   : > { %22803 = vmatprep.subr.bf16.mxu1 %v25931_v41  ;;  %v25939_v41 = vld [vmem:[%s32917_s27 + $0x508] sm:$0xff]  }
0x2007   : > { %22804 = vmatpush3.bf16.msra.mxu1 %v25933_v58  ;;  %v25942_v58 = vld [vmem:[%s32917_s27 + $0x510] sm:$0xff]  }
0x2008   : > { %22805 = vmatprep.subr.bf16.mxu1 %v25934_v20 }
0x2009   : > { %21588 = vmatmul.mubr.msk.bf16.vlgmr.msra.gmra.mrb[232].mxu0 %vm15646_vm14, %v21586_v21 }
0x200a   : > { %17400 = vmatpush1.bf16.msra.mxu0 %v31855_v37  ;;  %17431 = vmatprep.mubr.bf16.mxu0 %v32915_v17 }
0x200b   : > { %17440 = vmatprep.subr.bf16.mxu0 %v31794_v30  ;;  %22806 = vmatpush3.bf16.msra.mxu1 %v25936_v53 }
0x200c   : > { %22807 = vmatprep.subr.bf16.mxu1 %v25938_v54 }
0x200f   : > { %22808 = vmatpush3.bf16.msra.mxu1 %v25940_v62  ;;  %v25943_v62 = vld [vmem:[%s32917_s27 + $0x4d0] sm:$0xff]  }
0x2010   : > { %18093 = vmatprep.subr.bf16.mxu1 %v32915_v17 }
0x2011   : > { %21589 = vmatmul.mubr.msk.bf16.vlgmr.msra.gmra.mrb[236].mxu0 %vm15646_vm14, %v21586_v21 }
0x2012   : > { %17441 = vmatpush1.bf16.msra.mxu0 %v31799_v14  ;;  %17472 = vmatprep.mubr.bf16.mxu0 %v32915_v17 }
0x2013   : > { %22771 = vmatprep.subr.bf16.mxu0 %v25906_v59 }
0x2019   : > { %21590 = vmatmul.mubr.msk.bf16.vlgmr.msra.gmra.mrb[240].mxu0 %vm15646_vm14, %v21586_v21 }
0x201a   : > { %22772 = vmatpush3.bf16.msra.mxu0 %v25907_v12 }
0x201b   : > { %22773 = vmatprep.subr.bf16.mxu0 %v25908_v48 }
0x201e   : > { %22774 = vmatpush3.bf16.msra.mxu0 %v25909_v23 }
0x201f   : > { %22775 = vmatprep.subr.bf16.mxu0 %v25910_v43 }
0x2022   : > { %22776 = vmatpush3.bf16.msra.mxu0 %v25912_v40 }
0x2023   : > { %22777 = vmatprep.subr.bf16.mxu0 %v25914_v9 }
0x2026   : > { %22778 = vmatpush3.bf16.msra.mxu0 %v25916_v16 }
0x2027   : > { %22779 = vmatprep.subr.bf16.mxu0 %v25918_v61 }
0x202a   : > { %22780 = vmatpush3.bf16.msra.mxu0 %v25920_v7 }
0x202b   : > { %22781 = vmatprep.subr.bf16.mxu0 %v25922_v6 }
0x202e   : > { %22782 = vmatpush3.bf16.msra.mxu0 %v25924_v25 }
0x202f   : > { %22783 = vmatprep.subr.bf16.mxu0 %v25926_v35 }
0x2032   : > { %22784 = vmatpush3.bf16.msra.mxu0 %v25928_v57  ;;  %v25937_v57 = vld [vmem:[%s32917_s27 + $0x4c0] sm:$0xff]  }
0x2033   : > { %22785 = vmatprep.subr.bf16.mxu0 %v25930_v50 }
0x2036   : > { %22786 = vmatpush3.bf16.msra.mxu0 %v25932_v63  ;;  %v25941_v63 = vld [vmem:[%s32917_s27 + $0x4c8] sm:$0xff]  }
0x2037   : > { %22815 = vmatprep.subr.bf16.mxu0 %v25935_v1 }
0x2044   : > { %v22677_v29 = vpop.f32.mrb[236].mxu1 }
0x2045   : > { %v22678_v45 = vpop.f32.mrb[237].mxu1 }
0x2046   : > { %v22679_v46 = vadd.f32 %v22678_v45, %v22677_v29  ;;  %v22680_v2 = vpop.f32.mrb[238].mxu1 }
0x2047   : > { %v22681_v22 = vpop.f32.mrb[239].mxu1 }
0x206c   : > { %v22655_v15 = vpop.f32.mrb[212].mxu0 }
0x206d   : > { %v22656_v52 = vpop.f32.mrb[213].mxu0 }
0x206e   : > { %v22657_v34 = vadd.f32 %v22656_v52, %v22655_v15  ;;  %v22658_v56 = vpop.f32.mrb[214].mxu0  ;;  %v25944_v15 = vld [vmem:[%s32917_s27 + $0x540] sm:$0xff]  }
0x206f   : > { %v22659_v11 = vpop.f32.mrb[215].mxu0 }
0x2070   : > { %v16704_v5 = vadd.f32 %v22679_v46, %v22657_v34  ;;  %v25945_v34 = vld [vmem:[%s32917_s27 + $0x518] sm:$0xff]  }
0x2071   : > { %v25946_v11 = vld [vmem:[%s32917_s27 + $0x4d8] sm:$0xff]  }
0x2074   : > { %v16783_v27 = vpop.f32.mrb[240].mxu1 }
0x2075   : > { %v16785_v39 = vpop.f32.mrb[241].mxu1 }
0x2076   : > { %v16786_v60 = vpop.f32.mrb[242].mxu1 }
0x2077   : > { %v16787_v42 = vpop.f32.mrb[243].mxu1 }
0x2078   : > { %v25949_v42 = vld [vmem:[%s32917_s27 + $0x4e0] sm:$0xff]  }
0x208c   : > { %v22699_v55 = vpop.f32.mrb[216].mxu0 }
0x208d   : > { %v22700_v32 = vpop.f32.mrb[217].mxu0 }
0x208e   : > { %v22701_v8 = vadd.f32 %v22700_v32, %v22699_v55  ;;  %v22702_v31 = vpop.f32.mrb[218].mxu0  ;;  %v25950_v55 = vld [vmem:[%s32917_s27 + $0x550] sm:$0xff]  }
0x208f   : > { %v22703_v49 = vpop.f32.mrb[219].mxu0  ;;  %v25951_v31 = vld [vmem:[%s32917_s27 + $0x528] sm:$0xff]  }
0x2090   : > { %v16744_v51 = vadd.f32 %v22701_v8, %v16704_v5  ;;  %v25947_v5 = vld [vmem:[%s32917_s27 + $0x548] sm:$0xff]  }
0x2092   : > { %v16784_v21 = vadd.f32 %v16783_v27, %v16744_v51  ;;  %v25948_v27 = vld [vmem:[%s32917_s27 + $0x520] sm:$0xff]   ;;  %v25952_v51 = vld [vmem:[%s32917_s27 + $0x4e8] sm:$0xff]  }
0x2095   : > { %v22743_v59 = vpop.f32.mrb[244].mxu1 }
0x2096   : > { %v22744_v12 = vpop.f32.mrb[245].mxu1 }
0x2097   : > { %v22745_v48 = vadd.f32 %v22744_v12, %v22743_v59  ;;  %v22746_v19 = vpop.f32.mrb[246].mxu1  ;;  %v25954_v59 = vld [vmem:[%s32917_s27 + $0x530] sm:$0xff]  }
0x2098   : > { %v22747_v33 = vpop.f32.mrb[247].mxu1  ;;  %v25955_v19 = vld [vmem:[%s32917_s27 + $0x4f0] sm:$0xff]  }
0x2099   : > { %v25956_v33 = vld [vmem:[%s32917_s27 + $0x560] sm:$0xff]  }
0x20ac   : > { %v22721_v23 = vpop.f32.mrb[220].mxu0 }
0x20ad   : > { %v22722_v3 = vpop.f32.mrb[221].mxu0 }
0x20ae   : > { %v22723_v43 = vadd.f32 %v22722_v3, %v22721_v23  ;;  %v22724_v4 = vpop.f32.mrb[222].mxu0 }
0x20af   : > { %v22725_v13 = vpop.f32.mrb[223].mxu0 }
0x20b0   : > { %v17187_v40 = vadd.f32 %v22723_v43, %v16784_v21  ;;  %v25953_v21 = vld [vmem:[%s32917_s27 + $0x558] sm:$0xff]  }
0x20b1   : > { %v25957_v43 = vld [vmem:[%s32917_s27 + $0x538] sm:$0xff]  }
0x20b2   : > { %v17227_v9 = vadd.f32 %v22745_v48, %v17187_v40  ;;  %v25958_v13 = vld [vmem:[%s32917_s27 + $0x4f8] sm:$0xff]   ;;  %v25959_v40 = vld [vmem:[%s32917_s27 + $0x568] sm:$0xff]  }
0x20c5   : > { %v17306_v0 = vpop.f32.mrb[248].mxu1 }
0x20c6   : > { %v17308_v16 = vpop.f32.mrb[249].mxu1 }
0x20c7   : > { %v17309_v61 = vpop.f32.mrb[250].mxu1  ;;  %v25961_v16 = vld [vmem:[%s32917_s27 + $0x578] sm:$0xff]  }
0x20c8   : > { %v17310_v7 = vpop.f32.mrb[251].mxu1  ;;  %v21772_v61 = vld [vmem:[%s32916_s5 + $0x3] sm:$0x1] }
0x20c9   : > { %v25967_v7 = vld [vmem:[%s32917_s27 + $0x5a0] sm:$0xff]  }
0x20cc   : > { %v22765_v29 = vpop.f32.mrb[224].mxu0 }
0x20cd   : > { %v22766_v45 = vpop.f32.mrb[225].mxu0 }
0x20ce   : > { %v22767_v46 = vadd.f32 %v22766_v45, %v22765_v29  ;;  %v22768_v2 = vpop.f32.mrb[226].mxu0  ;;  %v25969_v29 = vld [vmem:[%s32917_s27 + $0x5a8] sm:$0xff]   ;;  %v25973_v45 = vld [vmem:[%s32917_s27 + $0x620] sm:$0xff]  }
0x20cf   : > { %v22769_v22 = vpop.f32.mrb[227].mxu0  ;;  %v25970_v2 = vld [vmem:[%s32917_s27 + $0x5f0] sm:$0xff]  }
0x20d0   : > { %v17267_v6 = vadd.f32 %v22767_v46, %v17227_v9  ;;  %v25960_v9 = vld [vmem:[%s32917_s27 + $0x570] sm:$0xff]   ;;  %v25975_v46 = vld [vmem:[%s32917_s27 + $0x668] sm:$0xff]  }
0x20d1   : > { %v25977_v22 = vld [vmem:[%s32917_s27 + $0x628] sm:$0xff]  }
0x20d2   : > { %v32384_v36 = vadd.f32 %v17306_v0, %v17267_v6  ;;  %v25979_v6 = vld [vmem:[%s32917_s27 + $0x670] sm:$0xff]  }
0x20d4   : > { %v17351_v25 = vpop.f32.mrb[228].mxu0 }
0x20d5   : > { %v17353_v28 = vpop.f32.mrb[229].mxu0  ;;  %v17481_v24 = vpack.c.bf16 %v17351_v25, %v17351_v25  ;;  %v25972_v25 = vld [vmem:[%s32917_s27 + $0x5b0] sm:$0xff]  }
0x20d6   : > { %v17482_v35 = vpack.c.bf16 %v17353_v28, %v17353_v28  ;;  %v17355_v44 = vpop.f32.mrb[230].mxu0  ;;  %v25974_v28 = vld [vmem:[%s32917_s27 + $0x5f8] sm:$0xff]  }
0x20d7   : > { %v17356_v50 = vpop.f32.mrb[231].mxu0  ;;  %v25976_v44 = vld [vmem:[%s32917_s27 + $0x5b8] sm:$0xff]  }
0x20d8   : > { %18005 = vmatprep.mubr.bf16.mxu0 %v17482_v35  ;;  %v25981_v35 = vld [vmem:[%s32917_s27 + $0x630] sm:$0xff]   ;;  %v25982_v50 = vld [vmem:[%s32917_s27 + $0x608] sm:$0xff]  }
0x20d9   : > { %18006 = vmatmul.mubr.bf16.vlgmr.msra.gmra.mrb[244].mxu0 %v17481_v24  ;;  %v25980_v24 = vld [vmem:[%s32917_s27 + $0x5c0] sm:$0xff]  }
0x20da   : > { %22816 = vmatpush3.bf16.msra.mxu0 %v25937_v57  ;;  %v25978_v57 = vld [vmem:[%s32917_s27 + $0x600] sm:$0xff]  }
0x20db   : > { %22817 = vmatprep.subr.bf16.mxu0 %v25939_v41  ;;  %v25983_v41 = vld [vmem:[%s32917_s27 + $0x678] sm:$0xff]  }
0x20dc   : > { %v17392_v20 = vpop.f32.mrb[232].mxu0 }
0x20dd   : > { %v17483_v1 = vpack.c.bf16 %v17392_v20, %v17392_v20  ;;  %v17394_v53 = vpop.f32.mrb[233].mxu0  ;;  %v25986_v20 = vld [vmem:[%s32917_s27 + $0x610] sm:$0xff]  }
0x20de   : > { %v17484_v54 = vpack.c.bf16 %v17394_v53, %v17394_v53  ;;  %22818 = vmatpush3.bf16.msra.mxu0 %v25941_v63  ;;  %v17396_v52 = vpop.f32.mrb[234].mxu0  ;;  %v25984_v63 = vld [vmem:[%s32917_s27 + $0x5c8] sm:$0xff]   ;;  %v25988_v53 = vld [vmem:[%s32917_s27 + $0x5d0] sm:$0xff]  }
0x20df   : > { %22819 = vmatprep.subr.bf16.mxu0 %v25942_v58  ;;  %v17397_v56 = vpop.f32.mrb[235].mxu0  ;;  %v25985_v58 = vld [vmem:[%s32917_s27 + $0x638] sm:$0xff]  }
0x20e0   : > { %18045 = vmatprep.mubr.bf16.mxu1 %v17484_v54  ;;  %v25989_v54 = vld [vmem:[%s32917_s27 + $0x640] sm:$0xff]   ;;  %v25992_v52 = vld [vmem:[%s32917_s27 + $0x5d8] sm:$0xff]   ;;  %v25994_v56 = vld [vmem:[%s32917_s27 + $0x690] sm:$0xff]  }
0x20e1   : > { %18046 = vmatmul.mubr.bf16.vlgmr.msra.gmra.mrb[252].mxu1 %v17483_v1  ;;  %v25987_v1 = vld [vmem:[%s32917_s27 + $0x680] sm:$0xff]  }
0x20e2   : > { %22820 = vmatpush3.bf16.msra.mxu0 %v25943_v62  ;;  %18094 = vmatpush1.bf16.msra.mxu1 %v25944_v15  ;;  %v25990_v62 = vld [vmem:[%s32917_s27 + $0x618] sm:$0xff]   ;;  %v25991_v15 = vld [vmem:[%s32917_s27 + $0x688] sm:$0xff]  }
0x20e3   : > { %22821 = vmatprep.subr.bf16.mxu0 %v25945_v34  ;;  %18095 = vmatprep.subr.bf16.mxu1 %v32915_v17  ;;  %v25993_v34 = vld [vmem:[%s32917_s27 + $0x648] sm:$0xff]  }
0x20e4   : > { %v17433_v39 = vpop.f32.mrb[236].mxu0 }
0x20e5   : > { %v17435_v60 = vpop.f32.mrb[237].mxu0  ;;  %v17485_v0 = vpack.c.bf16 %v17433_v39, %v17433_v39  ;;  %v26000_v39 = vld [vmem:[%s32917_s27 + $0x658] sm:$0xff]  }
0x20e6   : > { %22822 = vmatpush3.bf16.msra.mxu0 %v25946_v11  ;;  %18096 = vmatpush1.bf16.msra.mxu1 %v25947_v5  ;;  %v17486_v32 = vpack.c.bf16 %v17435_v60, %v17435_v60  ;;  %v17437_v8 = vpop.f32.mrb[238].mxu0  ;;  %v25995_v11 = vld [vmem:[%s32917_s27 + $0x6e0] sm:$0xff]   ;;  %v25996_v5 = vld [vmem:[%s32917_s27 + $0x650] sm:$0xff]  }
0x20e7   : > { %22823 = vmatprep.subr.bf16.mxu0 %v25948_v27  ;;  %18097 = vmatprep.subr.bf16.mxu1 %v32915_v17  ;;  %v17438_v49 = vpop.f32.mrb[239].mxu0  ;;  %v25998_v27 = vld [vmem:[%s32917_s27 + $0x698] sm:$0xff]  }
0x20e8   : > { %18085 = vmatprep.mubr.bf16.mxu0 %v17486_v32 }
0x20ea   : > { %22824 = vmatpush3.bf16.msra.mxu0 %v25949_v42  ;;  %18098 = vmatpush1.bf16.msra.mxu1 %v25950_v55 }
0x20eb   : > { %22825 = vmatprep.subr.bf16.mxu0 %v25951_v31  ;;  %18099 = vmatprep.subr.bf16.mxu1 %v32915_v17 }
0x20ec   : > { %v17474_v12 = vpop.f32.mrb[240].mxu0 }
0x20ed   : > { %v17476_v48 = vpop.f32.mrb[241].mxu0 }
0x20ee   : > { %22826 = vmatpush3.bf16.msra.mxu0 %v25952_v51  ;;  %18100 = vmatpush1.bf16.msra.mxu1 %v25953_v21  ;;  %v17488_v23 = vpack.c.bf16 %v17476_v48, %v17476_v48  ;;  %v17478_v3 = vpop.f32.mrb[242].mxu0 }
0x20ef   : > { %22827 = vmatprep.subr.bf16.mxu0 %v25954_v59  ;;  %18101 = vmatprep.subr.bf16.mxu1 %v32915_v17  ;;  %v17479_v4 = vpop.f32.mrb[243].mxu0 }
0x20f0   : > { %21771 = vmatprep.mubr.msk.bf16.mxu1 %vm11490_vm12, %v17488_v23 }
0x20f2   : > { %22828 = vmatpush3.bf16.msra.mxu0 %v25955_v19  ;;  %18102 = vmatpush1.bf16.msra.mxu1 %v25956_v33 }
0x20f3   : > { %22829 = vmatprep.subr.bf16.mxu0 %v25957_v43  ;;  %18103 = vmatprep.subr.bf16.mxu1 %v32915_v17 }
0x20f6   : > { %22830 = vmatpush3.bf16.msra.mxu0 %v25958_v13  ;;  %18104 = vmatpush1.bf16.msra.mxu1 %v25959_v40 }
0x20f7   : > { %18105 = vmatprep.subr.bf16.mxu1 %v32915_v17  ;;  %18139 = vmatprep.subr.bf16.mxu0 %v31768_v47  ;;  %v25962_v47 = vld [vmem:[%s32917_s27 + $0x580] sm:$0xff]  }
0x20f9   : > { %18086 = vmatmul.mubr.bf16.vlgmr.msra.gmra.mrb[248].mxu0 %v17485_v0  ;;  %v25997_v0 = vld [vmem:[%s32917_s27 + $0x6a0] sm:$0xff]  }
0x20fa   : > { %18106 = vmatpush1.bf16.msra.mxu1 %v25960_v9  ;;  %18140 = vmatpush1.bf16.msra.mxu0 %v31771_v18  ;;  %v25963_v18 = vld [vmem:[%s32917_s27 + $0x588] sm:$0xff]  }
0x20fb   : > { %18180 = vmatprep.subr.bf16.mxu0 %v31791_v38  ;;  %18107 = vmatprep.subr.bf16.mxu1 %v32915_v17  ;;  %v25964_v38 = vld [vmem:[%s32917_s27 + $0x590] sm:$0xff]  }
0x20fc   : > { %18171 = vmatprep.mubr.bf16.mxu0 %v32915_v17 }
0x20fe   : > { %18108 = vmatpush1.bf16.msra.mxu1 %v25961_v16 }
0x20ff   : > { %18109 = vmatprep.subr.bf16.mxu1 %v32915_v17 }
0x2101   : > { %21773 = vmatmul.mubr.msk.bf16.vlgmr.msra.gmra.mrb[252].mxu0 %vm15646_vm14, %v21772_v61 }
0x2102   : > { %18181 = vmatpush1.bf16.msra.mxu0 %v31788_v26  ;;  %18110 = vmatpush1.bf16.msra.mxu1 %v25962_v47  ;;  %v25965_v26 = vld [vmem:[%s32917_s27 + $0x598] sm:$0xff]   ;;  %v25999_v47 = vld [vmem:[%s32917_s27 + $0x6e8] sm:$0xff]  }
0x2103   : > { %18221 = vmatprep.subr.bf16.mxu0 %v31852_v10  ;;  %18111 = vmatprep.subr.bf16.mxu1 %v32915_v17  ;;  %v17487_v10 = vpack.c.bf16 %v17474_v12, %v17474_v12 }
0x2104   : > { %18212 = vmatprep.mubr.bf16.mxu0 %v32915_v17 }
0x2106   : > { %18112 = vmatpush1.bf16.msra.mxu1 %v25963_v18  ;;  %v26001_v18 = vld [vmem:[%s32917_s27 + $0x6a8] sm:$0xff]  }
0x2107   : > { %18113 = vmatprep.subr.bf16.mxu1 %v32915_v17 }
0x2109   : > { %21774 = vmatmul.mubr.msk.bf16.vlgmr.msra.gmra.mrb[0].mxu0 %vm15646_vm14, %v21772_v61 }
0x210a   : > { %18222 = vmatpush1.bf16.msra.mxu0 %v31855_v37  ;;  %18114 = vmatpush1.bf16.msra.mxu1 %v25964_v38  ;;  %v25966_v37 = vld [vmem:[%s32917_s27 + $0x5e0] sm:$0xff]   ;;  %v26002_v38 = vld [vmem:[%s32917_s27 + $0x6f0] sm:$0xff]  }
0x210b   : > { %18115 = vmatprep.subr.bf16.mxu1 %v32915_v17  ;;  %18253 = vmatprep.mubr.bf16.mxu0 %v32915_v17 }
0x210c   : > { %22837 = vmatprep.subr.bf16.mxu0 %v25966_v37 }
0x210e   : > { %18116 = vmatpush1.bf16.msra.mxu1 %v25965_v26 }
0x210f   : > { %18262 = vmatprep.subr.bf16.mxu1 %v31794_v30  ;;  %v25968_v30 = vld [vmem:[%s32917_s27 + $0x5e8] sm:$0xff]  }
0x2111   : > { %18126 = vmatmul.mubr.bf16.vlgmr.msra.gmra.mrb[0].mxu1 %v17487_v10  ;;  %21775 = vmatmul.mubr.msk.bf16.vlgmr.msra.gmra.mrb[8].mxu0 %vm15646_vm14, %v21772_v61 }
0x2112   : > { %18263 = vmatpush1.bf16.msra.mxu1 %v31799_v14  ;;  %18294 = vmatprep.mubr.bf16.mxu1 %v32915_v17  ;;  %v25971_v14 = vld [vmem:[%s32917_s27 + $0x660] sm:$0xff]  }
0x2113   : > { %22838 = vmatpush3.bf16.msra.mxu0 %v25967_v7  ;;  %22859 = vmatprep.subr.bf16.mxu1 %v25971_v14  ;;  %v26004_v14 = vld [vmem:[%s32917_s27 + $0x720] sm:$0xff]  }
0x2114   : > { %22839 = vmatprep.subr.bf16.mxu0 %v25968_v30  ;;  %v26003_v30 = vld [vmem:[%s32917_s27 + $0x6b0] sm:$0xff]  }
0x2117   : > { %22840 = vmatpush3.bf16.msra.mxu0 %v25969_v29 }
0x2118   : > { %22841 = vmatprep.subr.bf16.mxu0 %v25970_v2  ;;  %v26006_v2 = vld [vmem:[%s32917_s27 + $0x6b8] sm:$0xff]  }
0x2119   : > { %21776 = vmatmul.mubr.msk.bf16.vlgmr.msra.gmra.mrb[4].mxu1 %vm15646_vm14, %v21772_v61 }
0x211a   : > { %22860 = vmatpush3.bf16.msra.mxu1 %v25973_v45 }
0x211b   : > { %22861 = vmatprep.subr.bf16.mxu1 %v25975_v46  ;;  %22842 = vmatpush3.bf16.msra.mxu0 %v25972_v25  ;;  %v26005_v46 = vld [vmem:[%s32917_s27 + $0x6f8] sm:$0xff]  }
0x211c   : > { %22843 = vmatprep.subr.bf16.mxu0 %v25974_v28 }
0x211e   : > { %22862 = vmatpush3.bf16.msra.mxu1 %v25977_v22  ;;  %v26007_v22 = vld [vmem:[%s32917_s27 + $0x728] sm:$0xff]  }
0x211f   : > { %22863 = vmatprep.subr.bf16.mxu1 %v25979_v6  ;;  %22844 = vmatpush3.bf16.msra.mxu0 %v25976_v44  ;;  %v26008_v6 = vld [vmem:[%s32917_s27 + $0x700] sm:$0xff]  }
0x2120   : > { %22845 = vmatprep.subr.bf16.mxu0 %v25978_v57 }
0x2122   : > { %22864 = vmatpush3.bf16.msra.mxu1 %v25981_v35 }
0x2123   : > { %22846 = vmatpush3.bf16.msra.mxu0 %v25980_v24  ;;  %22865 = vmatprep.subr.bf16.mxu1 %v25983_v41  ;;  %v26009_v24 = vld [vmem:[%s32917_s27 + $0x6c0] sm:$0xff]  }
0x2124   : > { %22847 = vmatprep.subr.bf16.mxu0 %v25982_v50  ;;  %v26010_v50 = vld [vmem:[%s32917_s27 + $0x730] sm:$0xff]  }
0x2126   : > { %22866 = vmatpush3.bf16.msra.mxu1 %v25985_v58 }
0x2127   : > { %22848 = vmatpush3.bf16.msra.mxu0 %v25984_v63  ;;  %22867 = vmatprep.subr.bf16.mxu1 %v25987_v1  ;;  %v26011_v1 = vld [vmem:[%s32917_s27 + $0x708] sm:$0xff]  }
0x2128   : > { %22849 = vmatprep.subr.bf16.mxu0 %v25986_v20 }
0x212a   : > { %22868 = vmatpush3.bf16.msra.mxu1 %v25989_v54 }
0x212b   : > { %22850 = vmatpush3.bf16.msra.mxu0 %v25988_v53  ;;  %22869 = vmatprep.subr.bf16.mxu1 %v25991_v15  ;;  %v26014_v15 = vld [vmem:[%s32917_s27 + $0x710] sm:$0xff]  }
0x212c   : > { %22851 = vmatprep.subr.bf16.mxu0 %v25990_v62  ;;  %v26012_v62 = vld [vmem:[%s32917_s27 + $0x6c8] sm:$0xff]  }
0x212e   : > { %22870 = vmatpush3.bf16.msra.mxu1 %v25993_v34 }
0x212f   : > { %22852 = vmatpush3.bf16.msra.mxu0 %v25992_v52  ;;  %22871 = vmatprep.subr.bf16.mxu1 %v25994_v56  ;;  %v26015_v56 = vld [vmem:[%s32917_s27 + $0x6d0] sm:$0xff]  }
0x2130   : > { %22881 = vmatprep.subr.bf16.mxu0 %v25995_v11  ;;  %v26016_v11 = vld [vmem:[%s32917_s27 + $0x740] sm:$0xff]  }
0x2132   : > { %22872 = vmatpush3.bf16.msra.mxu1 %v25996_v5 }
0x2133   : > { %22873 = vmatprep.subr.bf16.mxu1 %v25998_v27 }
0x2136   : > { %22874 = vmatpush3.bf16.msra.mxu1 %v26000_v39  ;;  %v26017_v39 = vld [vmem:[%s32917_s27 + $0x718] sm:$0xff]  }
0x2137   : > { %18915 = vmatprep.subr.bf16.mxu1 %v32915_v17 }
0x21ac   : > { %v22787_v60 = vpop.f32.mrb[244].mxu0 }
0x21ad   : > { %v22788_v42 = vpop.f32.mrb[245].mxu0 }
0x21ae   : > { %v22789_v55 = vadd.f32 %v22788_v42, %v22787_v60  ;;  %v22790_v32 = vpop.f32.mrb[246].mxu0  ;;  %v26018_v42 = vld [vmem:[%s32917_s27 + $0x6d8] sm:$0xff]  }
0x21af   : > { %v22791_v8 = vpop.f32.mrb[247].mxu0 }
0x21b0   : > { %v26020_v8 = vld [vmem:[%s32917_s27 + $0x750] sm:$0xff]  }
0x21b4   : > { %v22809_v31 = vpop.f32.mrb[252].mxu1 }
0x21b5   : > { %v22810_v49 = vpop.f32.mrb[253].mxu1 }
0x21b6   : > { %v22811_v51 = vadd.f32 %v22810_v49, %v22809_v31  ;;  %v22812_v21 = vpop.f32.mrb[254].mxu1  ;;  %v26021_v31 = vld [vmem:[%s32917_s27 + $0x758] sm:$0xff]   ;;  %v26022_v49 = vld [vmem:[%s32917_s27 + $0x760] sm:$0xff]  }
0x21b7   : > { %v22813_v59 = vpop.f32.mrb[255].mxu1  ;;  %v26024_v21 = vld [vmem:[%s32917_s27 + $0x770] sm:$0xff]  }
0x21b8   : > { %v18048_v12 = vadd.f32 %v22811_v51, %v22789_v55  ;;  %v26019_v55 = vld [vmem:[%s32917_s27 + $0x748] sm:$0xff]   ;;  %v26025_v59 = vld [vmem:[%s32917_s27 + $0x778] sm:$0xff]  }
0x21b9   : > { %v26023_v51 = vld [vmem:[%s32917_s27 + $0x768] sm:$0xff]  }
0x21cc   : > { %v22831_v48 = vpop.f32.mrb[248].mxu0 }
0x21cd   : > { %v22832_v19 = vpop.f32.mrb[249].mxu0 }
0x21ce   : > { %v22833_v33 = vadd.f32 %v22832_v19, %v22831_v48  ;;  %v22834_v23 = vpop.f32.mrb[250].mxu0 }
0x21cf   : > { %v22835_v3 = vpop.f32.mrb[251].mxu0 }
0x21d0   : > { %v18088_v43 = vadd.f32 %v22833_v33, %v18048_v12 }
0x21d4   : > { %v18173_v4 = vpop.f32.mrb[252].mxu0 }
0x21d5   : > { %v18175_v13 = vpop.f32.mrb[253].mxu0  ;;  %v18303_v16 = vpack.c.bf16 %v18173_v4, %v18173_v4 }
0x21d6   : > { %v18304_v40 = vpack.c.bf16 %v18175_v13, %v18175_v13  ;;  %v18177_v9 = vpop.f32.mrb[254].mxu0 }
0x21d7   : > { %v18178_v61 = vpop.f32.mrb[255].mxu0 }
0x21d8   : > { %18827 = vmatprep.mubr.bf16.mxu0 %v18304_v40 }
0x21d9   : > { %18828 = vmatmul.mubr.bf16.vlgmr.msra.gmra.mrb[4].mxu0 %v18303_v16 }
0x21da   : > { %22882 = vmatpush3.bf16.msra.mxu0 %v25997_v0 }
0x21db   : > { %22883 = vmatprep.subr.bf16.mxu0 %v25999_v47 }
0x21dc   : > { %v18214_v26 = vpop.f32.mrb[0].mxu0 }
0x21dd   : > { %v18216_v10 = vpop.f32.mrb[1].mxu0  ;;  %v18305_v29 = vpack.c.bf16 %v18214_v26, %v18214_v26 }
0x21de   : > { %v18306_v37 = vpack.c.bf16 %v18216_v10, %v18216_v10  ;;  %22884 = vmatpush3.bf16.msra.mxu0 %v26001_v18  ;;  %v18218_v7 = vpop.f32.mrb[2].mxu0 }
0x21df   : > { %22885 = vmatprep.subr.bf16.mxu0 %v26002_v38  ;;  %v18219_v45 = vpop.f32.mrb[3].mxu0  ;;  %v21958_v7 = vld [vmem:[%s32919_s22] ss:$0 sm:$0xff]  ;;  %s26296_s22 = scalar_lea.vmem %s26295_s25, 64 }
0x21e0   : > { %18867 = vmatprep.mubr.bf16.mxu1 %v18306_v37  ;;  %p26298_p2 = scmp.lt.s32.totalorder %s26296_s22, %s26290_s4 }
0x21e1   : > { %18868 = vmatmul.mubr.bf16.vlgmr.msra.gmra.mrb[8].mxu1 %v18305_v29 }
0x21e2   : > { %22886 = vmatpush3.bf16.msra.mxu0 %v26003_v30  ;;  %18916 = vmatpush1.bf16.msra.mxu1 %v26004_v14  ;;  %p26299_p3 = por %p26298_p2, %p26297_p0 }
0x21e3   : > { %22887 = vmatprep.subr.bf16.mxu0 %v26005_v46  ;;  %18917 = vmatprep.subr.bf16.mxu1 %v32915_v17 }
0x21e4   : > { %v18127_v25 = vpop.f32.mrb[0].mxu1  ;;  %v18255_v28 = vpop.f32.mrb[8].mxu0  ;;  %p26300_p4 = pnand %p26299_p3, %p26293_p10 }
0x21e5   : > { %v18128_v35 = vadd.f32 %v18127_v25, %v18088_v43  ;;  %v18257_v44 = vpop.f32.mrb[9].mxu0  ;;  %v18129_v57 = vpop.f32.mrb[1].mxu1  ;;  %v18307_v32 = vpack.c.bf16 %v18255_v28, %v18255_v28 }
0x21e6   : > { %22888 = vmatpush3.bf16.msra.mxu0 %v26006_v2  ;;  %18918 = vmatpush1.bf16.msra.mxu1 %v26007_v22  ;;  %v18308_v41 = vpack.c.bf16 %v18257_v44, %v18257_v44  ;;  %v18130_v63 = vpop.f32.mrb[2].mxu1  ;;  %v18259_v58 = vpop.f32.mrb[10].mxu0 }
0x21e7   : > { %v32636_v20 = vadd.f32 %v18128_v35, %v32384_v36  ;;  %22889 = vmatprep.subr.bf16.mxu0 %v26008_v6  ;;  %18919 = vmatprep.subr.bf16.mxu1 %v32915_v17  ;;  %v18131_v53 = vpop.f32.mrb[3].mxu1  ;;  %v18260_v54 = vpop.f32.mrb[11].mxu0  ;;  %v26013_v36 = vld [vmem:[%s32917_s27 + $0x738] sm:$0xff]  }
0x21e8   : > { %18907 = vmatprep.mubr.bf16.mxu0 %v18308_v41 }
0x21ea   : > { %22890 = vmatpush3.bf16.msra.mxu0 %v26009_v24  ;;  %18920 = vmatpush1.bf16.msra.mxu1 %v26010_v50 }
0x21eb   : > { %22891 = vmatprep.subr.bf16.mxu0 %v26011_v1  ;;  %18921 = vmatprep.subr.bf16.mxu1 %v32915_v17 }
0x21ec   : > { %v18296_v52 = vpop.f32.mrb[4].mxu1 }
0x21ed   : > { %v18298_v34 = vpop.f32.mrb[5].mxu1  ;;  %v18309_v12 = vpack.c.bf16 %v18296_v52, %v18296_v52 }
0x21ee   : > { %22892 = vmatpush3.bf16.msra.mxu0 %v26012_v62  ;;  %18922 = vmatpush1.bf16.msra.mxu1 %v26013_v36  ;;  %v18310_v5 = vpack.c.bf16 %v18298_v34, %v18298_v34  ;;  %v18300_v27 = vpop.f32.mrb[6].mxu1 }
0x21ef   : > { %22893 = vmatprep.subr.bf16.mxu0 %v26014_v15  ;;  %18923 = vmatprep.subr.bf16.mxu1 %v32915_v17  ;;  %v18301_v60 = vpop.f32.mrb[7].mxu1 }
0x21f0   : > { %21957 = vmatprep.mubr.msk.bf16.mxu1 %vm11490_vm12, %v18310_v5 }
0x21f2   : > { %22894 = vmatpush3.bf16.msra.mxu0 %v26015_v56  ;;  %18924 = vmatpush1.bf16.msra.mxu1 %v26016_v11 }
0x21f3   : > { %22895 = vmatprep.subr.bf16.mxu0 %v26017_v39  ;;  %18925 = vmatprep.subr.bf16.mxu1 %v32915_v17 }
0x21f6   : > { %22896 = vmatpush3.bf16.msra.mxu0 %v26018_v42  ;;  %18926 = vmatpush1.bf16.msra.mxu1 %v26019_v55 }
0x21f7   : > { %18927 = vmatprep.subr.bf16.mxu1 %v32915_v17 }
0x21f9   : > { %18908 = vmatmul.mubr.bf16.vlgmr.msra.gmra.mrb[12].mxu0 %v18307_v32 }
0x21fa   : > { %18928 = vmatpush1.bf16.msra.mxu1 %v26020_v8 }
0x21fb   : > { %18929 = vmatprep.subr.bf16.mxu1 %v32915_v17 }
0x21fe   : > { %18930 = vmatpush1.bf16.msra.mxu1 %v26021_v31 }
0x21ff   : > { %18931 = vmatprep.subr.bf16.mxu1 %v32915_v17 }
0x2202   : > { %18932 = vmatpush1.bf16.msra.mxu1 %v26022_v49 }
0x2203   : > { %18933 = vmatprep.subr.bf16.mxu1 %v32915_v17 }
0x2206   : > { %18934 = vmatpush1.bf16.msra.mxu1 %v26023_v51 }
0x2207   : > { %18935 = vmatprep.subr.bf16.mxu1 %v32915_v17 }
0x220a   : > { %18936 = vmatpush1.bf16.msra.mxu1 %v26024_v21 }
0x220b   : > { %18937 = vmatprep.subr.bf16.mxu1 %v32915_v17 }
0x220e   : > { %18938 = vmatpush1.bf16.msra.mxu1 %v26025_v59 }
0x2211   : > { %18948 = vmatmul.mubr.bf16.vlgmr.msra.gmra.mrb[12].mxu1 %v18309_v12 }
0x22ac   : > { %v22853_v48 = vpop.f32.mrb[4].mxu0 }
0x22ad   : > { %v22854_v19 = vpop.f32.mrb[5].mxu0 }
0x22ae   : > { %v22855_v33 = vadd.f32 %v22854_v19, %v22853_v48  ;;  %v22856_v23 = vpop.f32.mrb[6].mxu0 }
0x22af   : > { %v22857_v3 = vpop.f32.mrb[7].mxu0 }
0x22b4   : > { %v22875_v43 = vpop.f32.mrb[8].mxu1 }
0x22b5   : > { %v22876_v4 = vpop.f32.mrb[9].mxu1 }
0x22b6   : > { %v22877_v13 = vadd.f32 %v22876_v4, %v22875_v43  ;;  %v22878_v40 = vpop.f32.mrb[10].mxu1 }
0x22b7   : > { %v22879_v9 = vpop.f32.mrb[11].mxu1 }
0x22b8   : > { %v18870_v0 = vadd.f32 %v22877_v13, %v22855_v33 }
0x22cc   : > { %v22897_v16 = vpop.f32.mrb[12].mxu0 }
0x22cd   : > { %v22898_v61 = vpop.f32.mrb[13].mxu0 }
0x22ce   : > { %v22899_v47 = vadd.f32 %v22898_v61, %v22897_v16  ;;  %v22900_v17 = vpop.f32.mrb[14].mxu0 }
0x22cf   : > { %v22901_v18 = vpop.f32.mrb[15].mxu0 }
0x22d0   : > { %v18910_v38 = vadd.f32 %v22899_v47, %v18870_v0 }
0x22e4   : > { %v18949_v26 = vpop.f32.mrb[12].mxu1 }
0x22e5   : > { %v18950_v10 = vadd.f32 %v18949_v26, %v18910_v38  ;;  %v18951_v37 = vpop.f32.mrb[13].mxu1 }
0x22e6   : > { %v18952_v30 = vpop.f32.mrb[14].mxu1 }
0x22e7   : > { %v18955_v14 = vadd.f32 %v18950_v10, %v32636_v20  ;;  %v18953_v29 = vpop.f32.mrb[15].mxu1 }
0x22e9   : > { %v18963_v45 = vadd.f32 %v21958_v7, %v18955_v14 }
0x22eb   : > { %18965 = vst.msk [vmem:[%s799_s28] sm:$0x3] %vm18964_vm5, %v18963_v45 }
0x22ec   : > { %26303 = shalt.err (!%p26300_p4)
}
0x22ed   : > { %s26304_s6 = scalar_lea.hbm %s32703_s1, 32  ;;  %s26308_s19 = scalar_lea.hbm %s32921_s2, 64 }
0x22ee   : > { %p26305_p12 = scmp.ne.s32.totalorder %s32703_s1, %s26304_s6  ;;  %p26309_p11 = scmp.lt.u32.totalorder %s32703_s1, %s32921_s2 }
0x22ef   : > { %p26310_p13 = scmp.lt.u32.totalorder %s26308_s19, %s26304_s6  ;;  %p26312_p6 = scmp.lt.u32.totalorder %s26304_s6, %s32703_s1 }
0x22f0   : > { %p26306_p7 = pnand %p26305_p12, %p32922_p9 }
0x22f1   : > { %p26311_p1 = por %p26310_p13, %p26309_p11 }
0x22f2   : > { %p26307_p8 = pneg %p26306_p7 }
0x22f3   : > { %p26313_p5 = por %p26312_p6, %p26311_p1 }
0x22f5   : > { %p26314_p10 = pnand %p26313_p5, %p26307_p8 }
0x22f7   : > { %26317 = shalt.err (!%p26314_p10)
}
0x22f8   : > { %24074 = dma.vmem_to_hbm [thread:$0]  (%p32922_p9), %s32705_s3, 32, %s32703_s1, %s18967_s0  }
0x22f9 PF: > { %s32923_s4 = sld [smem:[#allocation31_spill]]  ;;  %s32924_s25 = sld [smem:[#allocation28_spill]] }
0x22fa   : > { %s32925_s22 = sld [smem:[#allocation35_spill]] }
0x22ff   : > { %p24126_p0 = scmp.ge.s32.totalorder %s32923_s4, 2  ;;  %s18992_s30 = sand.u32 1, %s32924_s25  }
0x2300   : > { %p32926_p2 = scmp.ne.s32.totalorder %s32925_s22, 0  ;;  %s18993_s28 = scalar_lea.sflag [#allocation8], %s18992_s30 }
0x2302   : > { %p24105_p3 = pnand %p24126_p0, %p32926_p2 }
0x2304   : > { %26355 = dma.done.wait (!%p24105_p3), %s18993_s28, 32  }
0x2305   : > { %26357 = vsyncadd (!%p24105_p3), %s18993_s28, 4294967264  ;;  %s32927_s30 = sld [smem:[#allocation32_spill]]  ;;  %s32928_s3 = sld [smem:[#allocation29_spill]] }
0x2306   : > { %s32929_s28 = sld [smem:[#allocation30_spill]]  ;;  %s32930_s29 = sld [smem:[#allocation33_spill]] }
0x230b   : > { %p37_p4 = scmp.ge.s32.totalorder %s32927_s30, 4  }
0x230d   :  { %39 = sbr.rel (!%p37_p4) target bundleno = 22 (0x16), region = 210 }
0x2314   :  { %18998 = vsyncpa [#allocation7], 1 }
0x2315   :  { %19000 = vsyncpa [#allocation7 + $0x1], 1 }
0x2316   :  { %19001 = vsyncpa [#allocation10], 1 }
0x2317   :  { %19002 = vsyncpa [#allocation13], 1 }
0x2318   :  { %19003 = vsyncpa [#allocation16], 1 }
0x2319   :  { %19004 = vsyncpa [#allocation19], 1 }
0x231a   :  { %19005 = vsyncpa [#allocation8], 1 }
0x231b   :  { %19007 = vsyncpa [#allocation8 + $0x1], 1 }

</bundles_post_ra>
